<compile_context>
chip_gen: v6e
topology: v6e:2x2x1
jax: 0.10.0
libtpu: 0.0.40
codegen_flags: <defaults>
</compile_context>

<pallas_src>
import functools

import jax
import jax.numpy as jnp
from jax.experimental import pallas as pl
from jax.experimental.pallas import tpu as pltpu


def _round_up(x, m):
    return (x + m - 1) // m * m


# ---------------------------------------------------------------------------
# Single-K-step fused  out = relu(A @ B + bias)  kernel (used by both convs).
# K and N are full-extent blocks, grid runs over M tiles only.
# ---------------------------------------------------------------------------
def _mm_bias_kernel_1k(a_ref, b_ref, bias_ref, o_ref, *, apply_relu):
    r = jnp.dot(a_ref[...], b_ref[...], preferred_element_type=jnp.float32)
    r = r + bias_ref[...]
    if apply_relu:
        r = jnp.maximum(r, 0.0)
    o_ref[...] = r.astype(o_ref.dtype)


def _matmul_bias_relu_singlek(a, b, bias2d, *, tm, apply_relu=True):
    """a:(M,K) @ b:(K,N) + bias:(1,N); K/N taken full-extent, grid over M tiles."""
    M, K = a.shape
    _, N = b.shape
    Mp = _round_up(M, tm)
    if Mp != M:                      # cheap: only conv1's 277 KB A matrix hits this
        a = jnp.zeros((Mp, K), a.dtype).at[:M].set(a)
    out = pl.pallas_call(
        functools.partial(_mm_bias_kernel_1k, apply_relu=apply_relu),
        out_shape=jax.ShapeDtypeStruct((Mp, N), jnp.float32),
        grid=(Mp // tm,),
        in_specs=[
            pl.BlockSpec((tm, K), lambda i: (i, 0)),
            pl.BlockSpec((K, N), lambda i: (0, 0)),
            pl.BlockSpec((1, N), lambda i: (0, 0)),
        ],
        out_specs=pl.BlockSpec((tm, N), lambda i: (i, 0)),
        compiler_params=pltpu.CompilerParams(dimension_semantics=("parallel",)),
    )(a, b, bias2d)
    return out[:M]


# ---------------------------------------------------------------------------
# Fused fc1 + ReLU + fc2 head.
#   acc += x_blk @ W1_blk   over K in tk-sized steps (reduction axis),
#   last step:  out = relu(acc + b1) @ W2 + b2
# W1 block (6400,128) f32 = 3.1 MiB (x2 buffers = 6.25 MiB) -> fits every
# generation's default scoped VMEM.
# ---------------------------------------------------------------------------
def _fc_fused_kernel(x_ref, w1_ref, b1_ref, w2_ref, b2_ref, o_ref, acc_ref):
    k = pl.program_id(0)

    @pl.when(k == 0)
    def _():
        acc_ref[...] = jnp.zeros_like(acc_ref)

    acc_ref[...] += jnp.dot(x_ref[...], w1_ref[...],
                            preferred_element_type=jnp.float32)

    @pl.when(k == pl.num_programs(0) - 1)
    def _():
        h = jnp.maximum(acc_ref[...] + b1_ref[...], 0.0)            # fc1 + ReLU
        o_ref[...] = (jnp.dot(h, w2_ref[...],
                              preferred_element_type=jnp.float32)
                      + b2_ref[...]).astype(o_ref.dtype)            # fc2


def fc_head(x_flat, wf1, bf1_2d, wf2, bf2_2d, *, tk=6400):
    Bp, K = x_flat.shape                 # Bp is a multiple of 8
    _, H = wf1.shape                     # H = 128
    _, O = wf2.shape                     # O = 1
    assert K % tk == 0
    return pl.pallas_call(
        _fc_fused_kernel,
        out_shape=jax.ShapeDtypeStruct((Bp, O), jnp.float32),
        grid_spec=pltpu.PrefetchScalarGridSpec(
            num_scalar_prefetch=0,
            grid=(K // tk,),
            in_specs=[
                pl.BlockSpec((Bp, tk), lambda k: (0, k)),
                pl.BlockSpec((tk, H), lambda k: (k, 0)),
                pl.BlockSpec((1, H), lambda k: (0, 0)),
                pl.BlockSpec((H, O), lambda k: (0, 0)),
                pl.BlockSpec((1, O), lambda k: (0, 0)),
            ],
            out_specs=pl.BlockSpec((Bp, O), lambda k: (0, 0)),
            scratch_shapes=[pltpu.VMEM((Bp, H), jnp.float32)],
        ),
        compiler_params=pltpu.CompilerParams(
            dimension_semantics=("arbitrary",)),
    )(x_flat, wf1, bf1_2d, wf2, bf2_2d)


# ---------------------------------------------------------------------------
# 2x2 max-pool (stride 2).  Input is pre-reshaped so both pooled pairs land on
# a leading dim (H pair) and on the lane dim (W pair).
# ---------------------------------------------------------------------------
def _maxpool2_kernel(x_ref, o_ref):
    v = x_ref[0]                          # (Ho, 2, Wo, 2*C)
    m = jnp.maximum(v[:, 0], v[:, 1])     # pool over H pair -> (Ho, Wo, 2*C)
    c = o_ref.shape[-1]
    o_ref[0] = jnp.maximum(m[..., :c], m[..., c:])   # pool over W pair


def max_pool_2x2(x):
    """x: (B, H, W, C) NHWC with even H, W -> (B, H//2, W//2, C)."""
    B, H, W, C = x.shape
    Ho, Wo = H // 2, W // 2
    xr = x.reshape(B, Ho, 2, Wo, 2 * C)
    return pl.pallas_call(
        _maxpool2_kernel,
        out_shape=jax.ShapeDtypeStruct((B, Ho, Wo, C), x.dtype),
        grid=(B,),
        in_specs=[pl.BlockSpec((1, Ho, 2, Wo, 2 * C),
                               lambda b: (b, 0, 0, 0, 0))],
        out_specs=pl.BlockSpec((1, Ho, Wo, C), lambda b: (b, 0, 0, 0)),
        compiler_params=pltpu.CompilerParams(dimension_semantics=("parallel",)),
    )(xr)


# ---------------------------------------------------------------------------
# Valid 3x3 conv (stride 1) + bias + ReLU = im2col (XLA glue) + Pallas matmul.
# TODO(synk): conv2's im2col patch tensor (~8.3 MB) is still materialized by XLA;
#             a shifted-window accumulation kernel would remove ~16 MB HBM traffic.
# ---------------------------------------------------------------------------
def conv3x3_relu(x, wk, bias2d, *, tm):
    """x: (B,H,W,Cin) NHWC; wk: (9*Cin, Cout) in (kh,kw,ci) row order."""
    B, H, W, Cin = x.shape
    Ho, Wo = H - 2, W - 2
    Cout = wk.shape[1]
    patches = jnp.concatenate(
        [x[:, kh:kh + Ho, kw:kw + Wo, :] for kh in range(3) for kw in range(3)],
        axis=-1)                                          # (B, Ho, Wo, 9*Cin)
    a = patches.reshape(B * Ho * Wo, 9 * Cin)
    y = _matmul_bias_relu_singlek(a, wk, bias2d, tm=tm, apply_relu=True)
    return y.reshape(B, Ho, Wo, Cout)


# ---------------------------------------------------------------------------
# Full forward pass (eval-mode semantics)
# ---------------------------------------------------------------------------
def net_forward(x_nchw, p):
    B = x_nchw.shape[0]
    x = jnp.transpose(x_nchw, (0, 2, 3, 1))                    # NCHW -> NHWC (B,64,64,1)
    x = conv3x3_relu(x, p["w1k"], p["b1k"], tm=1024)           # (B, 62, 62, 32)
    x = conv3x3_relu(x, p["w2k"], p["b2k"], tm=1440)           # (B, 60, 60, 64)
    x = max_pool_2x2(x)                                        # (B, 30, 30, 64)
    # dropout1 / dropout2: identity at inference (eval mode)
    # TODO(synk): training-mode dropout (random masking) intentionally omitted.
    xf = x.reshape(B, -1)                                      # NHWC flatten (wf1 rows pre-permuted)
    Bp = _round_up(B, 8)
    if Bp != B:
        xf = jnp.zeros((Bp, xf.shape[1]), xf.dtype).at[:B].set(xf)
    out = fc_head(xf, p["wf1k"], p["bf1k"], p["wf2k"], p["bf2k"], tk=6400)  # (Bp, 1)
    return out[:B]


# ---------------------------------------------------------------------------
# Parameters
# ---------------------------------------------------------------------------
def init_params(key):
    """Random params. Conv weights HWIO; fc weights (in, out); wf1 rows follow
    PyTorch's NCHW flatten order (c, h, w) — i.e. fc1.weight.T."""
    ks = jax.random.split(key, 8)

    def u(k, shape, fan_in):
        bound = 1.0 / float(fan_in) ** 0.5
        return jax.random.uniform(k, shape, jnp.float32, -bound, bound)

    return dict(
        w1=u(ks[0], (3, 3, 1, 32), 9),        b1=u(ks[1], (32,), 9),
        w2=u(ks[2], (3, 3, 32, 64), 288),     b2=u(ks[3], (64,), 288),
        wf1=u(ks[4], (57600, 128), 57600),    bf1=u(ks[5], (128,), 57600),
        wf2=u(ks[6], (128, 1), 128),          bf2=u(ks[7], (1,), 128),
    )


def prepare_params(p):
    """One-time weight prep (outside the forward pass): reshape conv weights to
    matmul form and permute fc1 rows from NCHW to NHWC flatten order so the
    forward needs no runtime transpose or padding copies."""
    wf1_nhwc = (p["wf1"].reshape(64, 30, 30, 128)   # rows indexed (c, h, w)
                        .transpose(1, 2, 0, 3)       # -> (h, w, c)
                        .reshape(57600, 128))
    return dict(
        w1k=p["w1"].reshape(9, 32),    b1k=p["b1"].reshape(1, 32),
        w2k=p["w2"].reshape(288, 64),  b2k=p["b2"].reshape(1, 64),
        wf1k=wf1_nhwc,                 bf1k=p["bf1"].reshape(1, 128),
        wf2k=p["wf2"],                 bf2k=p["bf2"].reshape(1, 1),
    )


if __name__ == "__main__":
    key = jax.random.PRNGKey(0)
    kx, kp = jax.random.split(key)
    # batch=2, single-channel 64x64 images (required by fc1: 57600 = 64*30*30)
    x = jax.random.normal(kx, (2, 1, 64, 64), dtype=jnp.float32)
    params = prepare_params(init_params(kp))   # one-time prep, outside the jitted forward

    out = jax.jit(net_forward)(x, params)
    out = jax.block_until_ready(out)
    assert out.shape == (2, 1) and out.dtype == jnp.float32
    print("KERNEL_OK")
</pallas_src>

<mosaic_0001>
module attributes {stable_mosaic.version = 11 : i64} {
  func.func @_mm_bias_kernel_1k(%arg0: i32, %arg1: memref<1024x9xf32, #tpu.memory_space<vmem>>, %arg2: memref<9x32xf32, #tpu.memory_space<vmem>>, %arg3: memref<1x32xf32, #tpu.memory_space<vmem>>, %arg4: memref<1024x32xf32, #tpu.memory_space<vmem>>) attributes {dimension_semantics = [#tpu.dimension_semantics<parallel>], iteration_bounds = array<i64: 8>, scalar_prefetch = 0 : i64, scratch_operands = 0 : i64, tpu.core_type = #tpu.core_type<tc>, window_params = [{transform_indices = @transform_0, window_bounds = array<i64: 1024, 9>}, {pipeline_mode = #tpu.pipeline_mode<synchronous>, transform_indices = @transform_1, window_bounds = array<i64: 9, 32>}, {pipeline_mode = #tpu.pipeline_mode<synchronous>, transform_indices = @transform_2, window_bounds = array<i64: 1, 32>}, {transform_indices = @transform_3, window_bounds = array<i64: 1024, 32>}]} {
    %c0 = arith.constant 0 : index
    %c0_0 = arith.constant 0 : index
    %0 = vector.load %arg1[%c0, %c0_0] : memref<1024x9xf32, #tpu.memory_space<vmem>>, vector<1024x9xf32>
    %c0_1 = arith.constant 0 : index
    %c0_2 = arith.constant 0 : index
    %1 = vector.load %arg2[%c0_1, %c0_2] : memref<9x32xf32, #tpu.memory_space<vmem>>, vector<9x32xf32>
    %cst = arith.constant dense<0.000000e+00> : vector<1024x32xf32>
    %2 = tpu.matmul %0, %1, %cst {dimension_numbers = #tpu.dot_dimension_numbers<[1], [0], [0], [1], [0, 0, 1, 1], [], []>} : vector<1024x9xf32>, vector<9x32xf32>, vector<1024x32xf32> -> vector<1024x32xf32>
    %c0_3 = arith.constant 0 : index
    %c0_4 = arith.constant 0 : index
    %3 = vector.load %arg3[%c0_3, %c0_4] : memref<1x32xf32, #tpu.memory_space<vmem>>, vector<1x32xf32>
    %4 = vector.broadcast %3 : vector<1x32xf32> to vector<1024x32xf32>
    %5 = arith.addf %2, %4 : vector<1024x32xf32>
    %cst_5 = arith.constant 0.000000e+00 : f32
    %6 = vector.broadcast %cst_5 : f32 to vector<1024x32xf32>
    %7 = arith.maximumf %5, %6 : vector<1024x32xf32>
    %c0_6 = arith.constant 0 : index
    %c0_7 = arith.constant 0 : index
    %8 = vector.load %arg4[%c0_6, %c0_7] : memref<1024x32xf32, #tpu.memory_space<vmem>>, vector<1024x32xf32>
    tpu.vector_store %arg4[%c0_6, %c0_7], %7 {strides = array<i32>} : memref<1024x32xf32, #tpu.memory_space<vmem>>, vector<1024x32xf32>,
    return
  }
  func.func @transform_0(%arg0: i32) -> (i32, i32) {
    %c0_i32 = arith.constant 0 : i32
    %c0_i32_0 = arith.constant 0 : i32
    return %arg0, %c0_i32 : i32, i32
  }
  func.func @transform_1(%arg0: i32) -> (i32, i32) {
    %c0_i32 = arith.constant 0 : i32
    %c0_i32_0 = arith.constant 0 : i32
    %c0_i32_1 = arith.constant 0 : i32
    return %c0_i32, %c0_i32_0 : i32, i32
  }
  func.func @transform_2(%arg0: i32) -> (i32, i32) {
    %c0_i32 = arith.constant 0 : i32
    %c0_i32_0 = arith.constant 0 : i32
    %c0_i32_1 = arith.constant 0 : i32
    return %c0_i32, %c0_i32_0 : i32, i32
  }
  func.func @transform_3(%arg0: i32) -> (i32, i32) {
    %c0_i32 = arith.constant 0 : i32
    %c0_i32_0 = arith.constant 0 : i32
    return %arg0, %c0_i32 : i32, i32
  }
}

module attributes {stable_mosaic.version = 11 : i64} {
  func.func @_mm_bias_kernel_1k(%arg0: i32, %arg1: memref<1440x288xf32, #tpu.memory_space<vmem>>, %arg2: memref<288x64xf32, #tpu.memory_space<vmem>>, %arg3: memref<1x64xf32, #tpu.memory_space<vmem>>, %arg4: memref<1440x64xf32, #tpu.memory_space<vmem>>) attributes {dimension_semantics = [#tpu.dimension_semantics<parallel>], iteration_bounds = array<i64: 5>, scalar_prefetch = 0 : i64, scratch_operands = 0 : i64, tpu.core_type = #tpu.core_type<tc>, window_params = [{transform_indices = @transform_0, window_bounds = array<i64: 1440, 288>}, {pipeline_mode = #tpu.pipeline_mode<synchronous>, transform_indices = @transform_1, window_bounds = array<i64: 288, 64>}, {pipeline_mode = #tpu.pipeline_mode<synchronous>, transform_indices = @transform_2, window_bounds = array<i64: 1, 64>}, {transform_indices = @transform_3, window_bounds = array<i64: 1440, 64>}]} {
    %c0 = arith.constant 0 : index
    %c0_0 = arith.constant 0 : index
    %0 = vector.load %arg1[%c0, %c0_0] : memref<1440x288xf32, #tpu.memory_space<vmem>>, vector<1440x288xf32>
    %c0_1 = arith.constant 0 : index
    %c0_2 = arith.constant 0 : index
    %1 = vector.load %arg2[%c0_1, %c0_2] : memref<288x64xf32, #tpu.memory_space<vmem>>, vector<288x64xf32>
    %cst = arith.constant dense<0.000000e+00> : vector<1440x64xf32>
    %2 = tpu.matmul %0, %1, %cst {dimension_numbers = #tpu.dot_dimension_numbers<[1], [0], [0], [1], [0, 0, 1, 1], [], []>} : vector<1440x288xf32>, vector<288x64xf32>, vector<1440x64xf32> -> vector<1440x64xf32>
    %c0_3 = arith.constant 0 : index
    %c0_4 = arith.constant 0 : index
    %3 = vector.load %arg3[%c0_3, %c0_4] : memref<1x64xf32, #tpu.memory_space<vmem>>, vector<1x64xf32>
    %4 = vector.broadcast %3 : vector<1x64xf32> to vector<1440x64xf32>
    %5 = arith.addf %2, %4 : vector<1440x64xf32>
    %cst_5 = arith.constant 0.000000e+00 : f32
    %6 = vector.broadcast %cst_5 : f32 to vector<1440x64xf32>
    %7 = arith.maximumf %5, %6 : vector<1440x64xf32>
    %c0_6 = arith.constant 0 : index
    %c0_7 = arith.constant 0 : index
    %8 = vector.load %arg4[%c0_6, %c0_7] : memref<1440x64xf32, #tpu.memory_space<vmem>>, vector<1440x64xf32>
    tpu.vector_store %arg4[%c0_6, %c0_7], %7 {strides = array<i32>} : memref<1440x64xf32, #tpu.memory_space<vmem>>, vector<1440x64xf32>,
    return
  }
  func.func @transform_0(%arg0: i32) -> (i32, i32) {
    %c0_i32 = arith.constant 0 : i32
    %c0_i32_0 = arith.constant 0 : i32
    return %arg0, %c0_i32 : i32, i32
  }
  func.func @transform_1(%arg0: i32) -> (i32, i32) {
    %c0_i32 = arith.constant 0 : i32
    %c0_i32_0 = arith.constant 0 : i32
    %c0_i32_1 = arith.constant 0 : i32
    return %c0_i32, %c0_i32_0 : i32, i32
  }
  func.func @transform_2(%arg0: i32) -> (i32, i32) {
    %c0_i32 = arith.constant 0 : i32
    %c0_i32_0 = arith.constant 0 : i32
    %c0_i32_1 = arith.constant 0 : i32
    return %c0_i32, %c0_i32_0 : i32, i32
  }
  func.func @transform_3(%arg0: i32) -> (i32, i32) {
    %c0_i32 = arith.constant 0 : i32
    %c0_i32_0 = arith.constant 0 : i32
    return %arg0, %c0_i32 : i32, i32
  }
}

module attributes {stable_mosaic.version = 11 : i64} {
  func.func @_maxpool2_kernel(%arg0: i32, %arg1: memref<1x30x2x30x128xf32, #tpu.memory_space<vmem>>, %arg2: memref<1x30x30x64xf32, #tpu.memory_space<vmem>>) attributes {dimension_semantics = [#tpu.dimension_semantics<parallel>], iteration_bounds = array<i64: 2>, scalar_prefetch = 0 : i64, scratch_operands = 0 : i64, tpu.core_type = #tpu.core_type<tc>, window_params = [{transform_indices = @transform_0, window_bounds = array<i64: 1, 30, 2, 30, 128>}, {transform_indices = @transform_1, window_bounds = array<i64: 1, 30, 30, 64>}]} {
    %c0 = arith.constant 0 : index
    %c0_0 = arith.constant 0 : index
    %c0_1 = arith.constant 0 : index
    %c0_2 = arith.constant 0 : index
    %c0_3 = arith.constant 0 : index
    %0 = vector.load %arg1[%c0, %c0_0, %c0_1, %c0_2, %c0_3] : memref<1x30x2x30x128xf32, #tpu.memory_space<vmem>>, vector<1x30x2x30x128xf32>
    %1 = vector.shape_cast %0 : vector<1x30x2x30x128xf32> to vector<30x2x30x128xf32>
    %2 = vector.extract_strided_slice %1 {offsets = [0, 0, 0, 0], sizes = [30, 1, 30, 128], strides = [1, 1, 1, 1]} : vector<30x2x30x128xf32> to vector<30x1x30x128xf32>
    %3 = vector.shape_cast %2 : vector<30x1x30x128xf32> to vector<30x30x128xf32>
    %4 = vector.extract_strided_slice %1 {offsets = [0, 1, 0, 0], sizes = [30, 1, 30, 128], strides = [1, 1, 1, 1]} : vector<30x2x30x128xf32> to vector<30x1x30x128xf32>
    %5 = vector.shape_cast %4 : vector<30x1x30x128xf32> to vector<30x30x128xf32>
    %6 = arith.maximumf %3, %5 : vector<30x30x128xf32>
    %7 = vector.extract_strided_slice %6 {offsets = [0, 0, 0], sizes = [30, 30, 64], strides = [1, 1, 1]} : vector<30x30x128xf32> to vector<30x30x64xf32>
    %8 = vector.extract_strided_slice %6 {offsets = [0, 0, 64], sizes = [30, 30, 64], strides = [1, 1, 1]} : vector<30x30x128xf32> to vector<30x30x64xf32>
    %9 = arith.maximumf %7, %8 : vector<30x30x64xf32>
    %c0_4 = arith.constant 0 : index
    %c0_5 = arith.constant 0 : index
    %c0_6 = arith.constant 0 : index
    %c0_7 = arith.constant 0 : index
    %10 = vector.load %arg2[%c0_4, %c0_5, %c0_6, %c0_7] : memref<1x30x30x64xf32, #tpu.memory_space<vmem>>, vector<1x30x30x64xf32>
    %11 = vector.shape_cast %10 : vector<1x30x30x64xf32> to vector<30x30x64xf32>
    %12 = vector.shape_cast %9 : vector<30x30x64xf32> to vector<1x30x30x64xf32>
    tpu.vector_store %arg2[%c0_4, %c0_5, %c0_6, %c0_7], %12 {strides = array<i32>} : memref<1x30x30x64xf32, #tpu.memory_space<vmem>>, vector<1x30x30x64xf32>,
    return
  }
  func.func @transform_0(%arg0: i32) -> (i32, i32, i32, i32, i32) {
    %c0_i32 = arith.constant 0 : i32
    %c0_i32_0 = arith.constant 0 : i32
    %c0_i32_1 = arith.constant 0 : i32
    %c0_i32_2 = arith.constant 0 : i32
    %c0_i32_3 = arith.constant 0 : i32
    return %arg0, %c0_i32, %c0_i32_0, %c0_i32_1, %c0_i32_2 : i32, i32, i32, i32, i32
  }
  func.func @transform_1(%arg0: i32) -> (i32, i32, i32, i32) {
    %c0_i32 = arith.constant 0 : i32
    %c0_i32_0 = arith.constant 0 : i32
    %c0_i32_1 = arith.constant 0 : i32
    %c0_i32_2 = arith.constant 0 : i32
    return %arg0, %c0_i32, %c0_i32_0, %c0_i32_1 : i32, i32, i32, i32
  }
}

module attributes {stable_mosaic.version = 11 : i64} {
  func.func @_fc_fused_kernel(%arg0: i32, %arg1: memref<8x6400xf32, #tpu.memory_space<vmem>>, %arg2: memref<6400x128xf32, #tpu.memory_space<vmem>>, %arg3: memref<1x128xf32, #tpu.memory_space<vmem>>, %arg4: memref<128x1xf32, #tpu.memory_space<vmem>>, %arg5: memref<1x1xf32, #tpu.memory_space<vmem>>, %arg6: memref<8x1xf32, #tpu.memory_space<vmem>>, %arg7: memref<8x128xf32, #tpu.memory_space<vmem>>) attributes {dimension_semantics = [#tpu.dimension_semantics<arbitrary>], iteration_bounds = array<i64: 9>, scalar_prefetch = 0 : i64, scratch_operands = 1 : i64, tpu.core_type = #tpu.core_type<tc>, window_params = [{transform_indices = @transform_0, window_bounds = array<i64: 8, 6400>}, {transform_indices = @transform_1, window_bounds = array<i64: 6400, 128>}, {pipeline_mode = #tpu.pipeline_mode<synchronous>, transform_indices = @transform_2, window_bounds = array<i64: 1, 128>}, {pipeline_mode = #tpu.pipeline_mode<synchronous>, transform_indices = @transform_3, window_bounds = array<i64: 128, 1>}, {pipeline_mode = #tpu.pipeline_mode<synchronous>, transform_indices = @transform_4, window_bounds = array<i64: 1, 1>}, {pipeline_mode = #tpu.pipeline_mode<synchronous>, transform_indices = @transform_5, window_bounds = array<i64: 8, 1>}]} {
    %c0_i32 = arith.constant 0 : i32
    %0 = arith.cmpi eq, %arg0, %c0_i32 : i32
    %1 = arith.extui %0 : i1 to i32
    %c0_i32_0 = arith.constant 0 : i32
    %2 = arith.cmpi ne, %1, %c0_i32_0 : i32
    scf.if %2 {
      %cst_9 = arith.constant 0.000000e+00 : f32
      %12 = vector.broadcast %cst_9 : f32 to vector<8x128xf32>
      %c0_10 = arith.constant 0 : index
      %c0_11 = arith.constant 0 : index
      %13 = vector.load %arg7[%c0_10, %c0_11] : memref<8x128xf32, #tpu.memory_space<vmem>>, vector<8x128xf32>
      tpu.vector_store %arg7[%c0_10, %c0_11], %12 {strides = array<i32>} : memref<8x128xf32, #tpu.memory_space<vmem>>, vector<8x128xf32>,
    } else {
    }
    %c0 = arith.constant 0 : index
    %c0_1 = arith.constant 0 : index
    %3 = vector.load %arg7[%c0, %c0_1] : memref<8x128xf32, #tpu.memory_space<vmem>>, vector<8x128xf32>
    %c0_2 = arith.constant 0 : index
    %c0_3 = arith.constant 0 : index
    %4 = vector.load %arg1[%c0_2, %c0_3] : memref<8x6400xf32, #tpu.memory_space<vmem>>, vector<8x6400xf32>
    %c0_4 = arith.constant 0 : index
    %c0_5 = arith.constant 0 : index
    %5 = vector.load %arg2[%c0_4, %c0_5] : memref<6400x128xf32, #tpu.memory_space<vmem>>, vector<6400x128xf32>
    %cst = arith.constant dense<0.000000e+00> : vector<8x128xf32>
    %6 = tpu.matmul %4, %5, %cst {dimension_numbers = #tpu.dot_dimension_numbers<[1], [0], [0], [1], [0, 0, 1, 1], [], []>} : vector<8x6400xf32>, vector<6400x128xf32>, vector<8x128xf32> -> vector<8x128xf32>
    %7 = arith.addf %3, %6 : vector<8x128xf32>
    %c0_6 = arith.constant 0 : index
    %c0_7 = arith.constant 0 : index
    %8 = vector.load %arg7[%c0_6, %c0_7] : memref<8x128xf32, #tpu.memory_space<vmem>>, vector<8x128xf32>
    tpu.vector_store %arg7[%c0_6, %c0_7], %7 {strides = array<i32>} : memref<8x128xf32, #tpu.memory_space<vmem>>, vector<8x128xf32>,
    %c8_i32 = arith.constant 8 : i32
    %9 = arith.cmpi eq, %arg0, %c8_i32 : i32
    %10 = arith.extui %9 : i1 to i32
    %c0_i32_8 = arith.constant 0 : i32
    %11 = arith.cmpi ne, %10, %c0_i32_8 : i32
    scf.if %11 {
      %c0_9 = arith.constant 0 : index
      %c0_10 = arith.constant 0 : index
      %12 = vector.load %arg7[%c0_9, %c0_10] : memref<8x128xf32, #tpu.memory_space<vmem>>, vector<8x128xf32>
      %c0_11 = arith.constant 0 : index
      %c0_12 = arith.constant 0 : index
      %13 = vector.load %arg3[%c0_11, %c0_12] : memref<1x128xf32, #tpu.memory_space<vmem>>, vector<1x128xf32>
      %14 = vector.broadcast %13 : vector<1x128xf32> to vector<8x128xf32>
      %15 = arith.addf %12, %14 : vector<8x128xf32>
      %cst_13 = arith.constant 0.000000e+00 : f32
      %16 = vector.broadcast %cst_13 : f32 to vector<8x128xf32>
      %17 = arith.maximumf %15, %16 : vector<8x128xf32>
      %c0_14 = arith.constant 0 : index
      %c0_15 = arith.constant 0 : index
      %18 = vector.load %arg4[%c0_14, %c0_15] : memref<128x1xf32, #tpu.memory_space<vmem>>, vector<128x1xf32>
      %cst_16 = arith.constant dense<0.000000e+00> : vector<8x1xf32>
      %19 = tpu.matmul %17, %18, %cst_16 {dimension_numbers = #tpu.dot_dimension_numbers<[1], [0], [0], [1], [0, 0, 1, 1], [], []>} : vector<8x128xf32>, vector<128x1xf32>, vector<8x1xf32> -> vector<8x1xf32>
      %c0_17 = arith.constant 0 : index
      %c0_18 = arith.constant 0 : index
      %20 = vector.load %arg5[%c0_17, %c0_18] : memref<1x1xf32, #tpu.memory_space<vmem>>, vector<1x1xf32>
      %21 = vector.broadcast %20 : vector<1x1xf32> to vector<8x1xf32>
      %22 = arith.addf %19, %21 : vector<8x1xf32>
      %c0_19 = arith.constant 0 : index
      %c0_20 = arith.constant 0 : index
      %23 = vector.load %arg6[%c0_19, %c0_20] : memref<8x1xf32, #tpu.memory_space<vmem>>, vector<8x1xf32>
      tpu.vector_store %arg6[%c0_19, %c0_20], %22 {strides = array<i32>} : memref<8x1xf32, #tpu.memory_space<vmem>>, vector<8x1xf32>,
    } else {
    }
    return
  }
  func.func @transform_0(%arg0: i32) -> (i32, i32) {
    %c0_i32 = arith.constant 0 : i32
    %c0_i32_0 = arith.constant 0 : i32
    return %c0_i32, %arg0 : i32, i32
  }
  func.func @transform_1(%arg0: i32) -> (i32, i32) {
    %c0_i32 = arith.constant 0 : i32
    %c0_i32_0 = arith.constant 0 : i32
    return %arg0, %c0_i32 : i32, i32
  }
  func.func @transform_2(%arg0: i32) -> (i32, i32) {
    %c0_i32 = arith.constant 0 : i32
    %c0_i32_0 = arith.constant 0 : i32
    %c0_i32_1 = arith.constant 0 : i32
    return %c0_i32, %c0_i32_0 : i32, i32
  }
  func.func @transform_3(%arg0: i32) -> (i32, i32) {
    %c0_i32 = arith.constant 0 : i32
    %c0_i32_0 = arith.constant 0 : i32
    %c0_i32_1 = arith.constant 0 : i32
    return %c0_i32, %c0_i32_0 : i32, i32
  }
  func.func @transform_4(%arg0: i32) -> (i32, i32) {
    %c0_i32 = arith.constant 0 : i32
    %c0_i32_0 = arith.constant 0 : i32
    %c0_i32_1 = arith.constant 0 : i32
    return %c0_i32, %c0_i32_0 : i32, i32
  }
  func.func @transform_5(%arg0: i32) -> (i32, i32) {
    %c0_i32 = arith.constant 0 : i32
    %c0_i32_0 = arith.constant 0 : i32
    %c0_i32_1 = arith.constant 0 : i32
    return %c0_i32, %c0_i32_0 : i32, i32
  }
}

</mosaic_0001>

<bundles_post_ra>
// kernel: net_forward.4
= control target key start
LH: loop header
LB: loop body
LE: loop exit
PB: predicated region body
PF: predicated region fallthrough
CT: control target
= control target key end

     0   :  { %8 = vsyncpa [#allocation3], 0  ;;  %s3084_s0 = inlined_call_operand.vmem [shape: f32[8192,9], index: 0, kind: input, shape index: {}]   ;;  %s3085_s1 = inlined_call_operand.hbm [shape: f32[9,32], index: 1, kind: input, shape index: {}]   ;;  %s3086_s2 = inlined_call_operand.hbm [shape: f32[1,32], index: 2, kind: input, shape index: {}]   ;;  %s3087_s3 = inlined_call_operand.vmem [shape: f32[8192,32], index: 3, kind: output, shape index: {}]  }
   0x1   :  { %9 = vsyncpa [#allocation5], 0  ;;  %s2366_s12 = smov 0  }
   0x2 LB: > { %s1768_s13 = sadd.s32 4294967295, %s2340_s12   ;;  %p1770_p0 = scmp.ge.s32.totalorder %s2340_s12, 1  ;;  %s2340_s12 = sphi %s2366_s12, %s15_s12  }
   0x3   : > { %p114_p1 = scmp.lt.s32.totalorder %s2340_s12, 9  ;;  %s2342_s14 = smov [#allocation2]  }
   0x4   : > { %s126_s15 = sshll.u32 %s2342_s14, 4  ;;  %p2380_p3 = scmp.eq.s32.totalorder %s1768_s13, 0  ;;  %s127_s15 = int_to_ptr.vmem [resolvable:$true] %s126_s15 }
   0x5   : > { %p2374_p2 = pnand %p1770_p0, %p114_p1  ;;  %s2343_s18 = smov [#allocation4]  }
   0x6   : > { %s140_s19 = sshll.u32 %s2343_s18, 4  ;;  %s2285_s21 = scalar_lea.vmem %s127_s15, 256  ;;  %s141_s19 = int_to_ptr.vmem [resolvable:$true] %s140_s19 }
   0x7   : > { %p2251_p4 = pneg %p2374_p2  ;;  %p2286_p7 = scmp.ne.s32.totalorder %s127_s15, %s2285_s21 }
   0x8   : > { %p2293_p10 = scmp.lt.s32.totalorder %s127_s15, %s127_s15  ;;  %p2294_p11 = scmp.lt.s32.totalorder %s2285_s21, %s2285_s21 }
   0x9   : > { %p2388_p5 = pnand %p2380_p3, %p2251_p4 }
   0xa   : > { %p2295_p12 = por %p2294_p11, %p2293_p10 }
   0xb   : > { %p2276_p6 = pneg %p2388_p5 }
   0xd   : > { %p2288_p8 = pnand %p2286_p7, %p2276_p6 }
   0xf   : > { %p2289_p9 = pneg %p2288_p8 }
  0x11   : > { %p2296_p13 = pnand %p2295_p12, %p2289_p9 }
  0x13   : > { %2299 = shalt.err (!%p2296_p13)
}
  0x14   : > { %s2344_s22 = smov 128   ;;  %s2345_s23 = smov 8  }
  0x15   : > { %2254 = dma.hbm_to_vmem [thread:$0]  (!%p2388_p5), %s3085_s1, 256, %s127_s15, [#allocation3], %s2344_s22, %s2344_s22, %s2345_s23  }
  0x16   : > { %s2311_s26 = scalar_lea.vmem %s141_s19, 16  ;;  %s2318_s27 = scalar_lea.vmem %s141_s19, 32 }
  0x17   : > { %p2312_p0 = scmp.ne.s32.totalorder %s141_s19, %s2311_s26  ;;  %p2319_p7 = scmp.lt.s32.totalorder %s141_s19, %s141_s19 }
  0x18   : > { %p2320_p8 = scmp.lt.s32.totalorder %s2318_s27, %s2311_s26 }
  0x19   : > { %p2314_p1 = pnand %p2312_p0, %p2276_p6 }
  0x1a   : > { %p2321_p9 = por %p2320_p8, %p2319_p7 }
  0x1b   : > { %p2315_p4 = pneg %p2314_p1 }
  0x1d   : > { %p2322_p10 = pnand %p2321_p9, %p2315_p4 }
  0x1f   : > { %2325 = shalt.err (!%p2322_p10)
}
  0x20   : > { %2257 = dma.hbm_to_vmem [thread:$0]  (!%p2388_p5), %s3086_s2, 16, %s141_s19, [#allocation5]  }
  0x21   : > { %162 = sbr.rel (%p2374_p2) target bundleno = 374 (0x176), region = 32 }
  0x26   : > { %2331 = dma.done.wait (%p2380_p3), [#allocation3], 256  }
  0x27   : > { %2333 = vsyncadd (%p2380_p3), [#allocation3], 4294967040 }
  0x28   : > { %2335 = dma.done.wait (%p2380_p3), [#allocation5], 16  }
  0x29   : > { %2337 = vsyncadd (%p2380_p3), [#allocation5], 4294967280  ;;  %s1777_s30 = sshll.u32 %s1768_s13, 7  ;;  %vm724_vm0 = vcmask 1040384   ;;  %v331_v0 = vld [vmem:[#allocation2 + $0x8] sm:$0x1] }
  0x2a   : > { %p191_p6 = scmp.lt.s32.totalorder %s1777_s30, 1023  ;;  %v330_v1 = vld [vmem:[#allocation2] sm:$0xff]  ;;  %2043 = vmatprep.subr.msk.mxu0 %vm724_vm0, %v331_v0  ;;  %2239 = vmatprep.subr.msk.mxu1 %vm724_vm0, %v331_v0  ;;  %vm339_vm1 = vcmask 72704   ;;  %vm1561_vm2 = vcmask 261120  }
  0x2b   : > { %2044 = vmatpush3.msk.msra.mxu0 %vm724_vm0, %v331_v0  ;;  %2241 = vmatpush3.msk.msra.mxu1 %vm724_vm0, %v331_v0 }
  0x2c   : > { %s3092_s30 = smov (!%p191_p6, %s1777_s30), 1023  ;;  %2045 = vmatprep.subr.mxu0 %v330_v1  ;;  %2240 = vmatprep.subr.mxu1 %v330_v1 }
  0x2d   : > { %s1778_s4 = sshll.u32 %s3092_s30, 3  ;;  %2046 = vmatpush3.msra.mxu0 %v330_v1  ;;  %2242 = vmatpush3.msra.mxu1 %v330_v1 }
  0x2e   : > { %s2430_s7 = scalar_lea.vmem %s3084_s0, %s1778_s4  ;;  %s2697_s10 = scalar_lea.vmem %s3087_s3, %s1778_s4 }
  0x2f   : > { %v202_v2 = vld [vmem:[%s2430_s7] sm:$0xff]  ;;  %v203_v4 = vld [vmem:[%s2430_s7 + $0x8] sm:$0xff]  ;;  %v204_v6 = vld [vmem:[%s2430_s7 + $0x10] sm:$0xff] }
  0x30   : > { %v266_v3 = vld [vmem:[%s2430_s7 + $0x200] sm:$0xff]  ;;  %v267_v5 = vld [vmem:[%s2430_s7 + $0x208] sm:$0xff]  ;;  %v268_v7 = vld [vmem:[%s2430_s7 + $0x210] sm:$0xff]  ;;  %2047 = vmatprep.mubr.msk.f32.mxu0 %vm339_vm1, %v202_v2 }
  0x31   : > { %2143 = vmatprep.mubr.msk.f32.mxu1 %vm339_vm1, %v266_v3  ;;  %2048 = vmatmul.mubr.msk.f32.vlgmr.msra.gmra.mxu0 %vm339_vm1, %v203_v4  ;;  %v205_v8 = vld [vmem:[%s2430_s7 + $0x18] sm:$0xff]  ;;  %v206_v10 = vld [vmem:[%s2430_s7 + $0x20] sm:$0xff]  ;;  %v207_v12 = vld [vmem:[%s2430_s7 + $0x28] sm:$0xff] }
  0x32   : > { %2144 = vmatmul.mubr.msk.f32.vlgmr.msra.gmra.mxu1 %vm339_vm1, %v267_v5  ;;  %2050 = vmatprep.mubr.msk.f32.mxu0 %vm339_vm1, %v204_v6  ;;  %v269_v9 = vld [vmem:[%s2430_s7 + $0x218] sm:$0xff]  ;;  %v270_v11 = vld [vmem:[%s2430_s7 + $0x220] sm:$0xff]  ;;  %v271_v13 = vld [vmem:[%s2430_s7 + $0x228] sm:$0xff] }
  0x33   : > { %2146 = vmatprep.mubr.msk.f32.mxu1 %vm339_vm1, %v268_v7  ;;  %v208_v14 = vld [vmem:[%s2430_s7 + $0x30] sm:$0xff]  ;;  %v209_v16 = vld [vmem:[%s2430_s7 + $0x38] sm:$0xff]  ;;  %v210_v18 = vld [vmem:[%s2430_s7 + $0x40] sm:$0xff] }
  0x34   : > { %v272_v15 = vld [vmem:[%s2430_s7 + $0x230] sm:$0xff]  ;;  %v273_v17 = vld [vmem:[%s2430_s7 + $0x238] sm:$0xff]  ;;  %v274_v19 = vld [vmem:[%s2430_s7 + $0x240] sm:$0xff] }
  0x35   : > { %2051 = vmatmul.mubr.msk.f32.gmra.mxu0 %vm339_vm1, %v205_v8  ;;  %v211_v20 = vld [vmem:[%s2430_s7 + $0x48] sm:$0xff]  ;;  %v212_v22 = vld [vmem:[%s2430_s7 + $0x50] sm:$0xff]  ;;  %v213_v24 = vld [vmem:[%s2430_s7 + $0x58] sm:$0xff] }
  0x36   : > { %2147 = vmatmul.mubr.msk.f32.gmra.mxu1 %vm339_vm1, %v269_v9  ;;  %2053 = vmatprep.mubr.msk.f32.mxu0 %vm339_vm1, %v206_v10  ;;  %v275_v21 = vld [vmem:[%s2430_s7 + $0x248] sm:$0xff]  ;;  %v276_v23 = vld [vmem:[%s2430_s7 + $0x250] sm:$0xff]  ;;  %v277_v25 = vld [vmem:[%s2430_s7 + $0x258] sm:$0xff] }
  0x37   : > { %2149 = vmatprep.mubr.msk.f32.mxu1 %vm339_vm1, %v270_v11  ;;  %v214_v26 = vld [vmem:[%s2430_s7 + $0x60] sm:$0xff]  ;;  %v215_v28 = vld [vmem:[%s2430_s7 + $0x68] sm:$0xff]  ;;  %v216_v30 = vld [vmem:[%s2430_s7 + $0x70] sm:$0xff] }
  0x38   : > { %v278_v27 = vld [vmem:[%s2430_s7 + $0x260] sm:$0xff]  ;;  %v279_v29 = vld [vmem:[%s2430_s7 + $0x268] sm:$0xff]  ;;  %v280_v31 = vld [vmem:[%s2430_s7 + $0x270] sm:$0xff] }
  0x39   : > { %2054 = vmatmul.mubr.msk.f32.gmra.mxu0 %vm339_vm1, %v207_v12  ;;  %v217_v32 = vld [vmem:[%s2430_s7 + $0x78] sm:$0xff]  ;;  %v218_v34 = vld [vmem:[%s2430_s7 + $0x80] sm:$0xff]  ;;  %v219_v36 = vld [vmem:[%s2430_s7 + $0x88] sm:$0xff] }
  0x3a   : > { %2150 = vmatmul.mubr.msk.f32.gmra.mxu1 %vm339_vm1, %v271_v13  ;;  %2056 = vmatprep.mubr.msk.f32.mxu0 %vm339_vm1, %v208_v14  ;;  %v281_v33 = vld [vmem:[%s2430_s7 + $0x278] sm:$0xff]  ;;  %v282_v35 = vld [vmem:[%s2430_s7 + $0x280] sm:$0xff]  ;;  %v283_v37 = vld [vmem:[%s2430_s7 + $0x288] sm:$0xff] }
  0x3b   : > { %2152 = vmatprep.mubr.msk.f32.mxu1 %vm339_vm1, %v272_v15  ;;  %v220_v38 = vld [vmem:[%s2430_s7 + $0x90] sm:$0xff]  ;;  %v221_v40 = vld [vmem:[%s2430_s7 + $0x98] sm:$0xff]  ;;  %v222_v42 = vld [vmem:[%s2430_s7 + $0xa0] sm:$0xff] }
  0x3c   : > { %v284_v39 = vld [vmem:[%s2430_s7 + $0x290] sm:$0xff]  ;;  %v285_v41 = vld [vmem:[%s2430_s7 + $0x298] sm:$0xff]  ;;  %v286_v43 = vld [vmem:[%s2430_s7 + $0x2a0] sm:$0xff] }
  0x3d   : > { %2057 = vmatmul.mubr.msk.f32.gmra.mxu0 %vm339_vm1, %v209_v16  ;;  %v223_v44 = vld [vmem:[%s2430_s7 + $0xa8] sm:$0xff]  ;;  %v224_v46 = vld [vmem:[%s2430_s7 + $0xb0] sm:$0xff]  ;;  %v225_v48 = vld [vmem:[%s2430_s7 + $0xb8] sm:$0xff] }
  0x3e   : > { %2153 = vmatmul.mubr.msk.f32.gmra.mxu1 %vm339_vm1, %v273_v17  ;;  %2059 = vmatprep.mubr.msk.f32.mxu0 %vm339_vm1, %v210_v18  ;;  %v287_v45 = vld [vmem:[%s2430_s7 + $0x2a8] sm:$0xff]  ;;  %v288_v47 = vld [vmem:[%s2430_s7 + $0x2b0] sm:$0xff]  ;;  %v289_v49 = vld [vmem:[%s2430_s7 + $0x2b8] sm:$0xff] }
  0x3f   : > { %2155 = vmatprep.mubr.msk.f32.mxu1 %vm339_vm1, %v274_v19  ;;  %v226_v50 = vld [vmem:[%s2430_s7 + $0xc0] sm:$0xff]  ;;  %v227_v52 = vld [vmem:[%s2430_s7 + $0xc8] sm:$0xff]  ;;  %v228_v54 = vld [vmem:[%s2430_s7 + $0xd0] sm:$0xff] }
  0x40   : > { %v290_v51 = vld [vmem:[%s2430_s7 + $0x2c0] sm:$0xff]  ;;  %v291_v53 = vld [vmem:[%s2430_s7 + $0x2c8] sm:$0xff]  ;;  %v292_v55 = vld [vmem:[%s2430_s7 + $0x2d0] sm:$0xff] }
  0x41   : > { %2060 = vmatmul.mubr.msk.f32.gmra.mxu0 %vm339_vm1, %v211_v20  ;;  %v229_v56 = vld [vmem:[%s2430_s7 + $0xd8] sm:$0xff]  ;;  %v230_v58 = vld [vmem:[%s2430_s7 + $0xe0] sm:$0xff]  ;;  %v231_v60 = vld [vmem:[%s2430_s7 + $0xe8] sm:$0xff] }
  0x42   : > { %2156 = vmatmul.mubr.msk.f32.gmra.mxu1 %vm339_vm1, %v275_v21  ;;  %2062 = vmatprep.mubr.msk.f32.mxu0 %vm339_vm1, %v212_v22  ;;  %v293_v57 = vld [vmem:[%s2430_s7 + $0x2d8] sm:$0xff]  ;;  %v294_v59 = vld [vmem:[%s2430_s7 + $0x2e0] sm:$0xff]  ;;  %v295_v61 = vld [vmem:[%s2430_s7 + $0x2e8] sm:$0xff] }
  0x43   : > { %2158 = vmatprep.mubr.msk.f32.mxu1 %vm339_vm1, %v276_v23  ;;  %v232_v62 = vld [vmem:[%s2430_s7 + $0xf0] sm:$0xff]  ;;  %v233_v0 = vld [vmem:[%s2430_s7 + $0xf8] sm:$0xff]  ;;  %v234_v2 = vld [vmem:[%s2430_s7 + $0x100] sm:$0xff] }
  0x44   : > { %v296_v63 = vld [vmem:[%s2430_s7 + $0x2f0] sm:$0xff]  ;;  %v297_v1 = vld [vmem:[%s2430_s7 + $0x2f8] sm:$0xff]  ;;  %v298_v3 = vld [vmem:[%s2430_s7 + $0x300] sm:$0xff] }
  0x45   : > { %2063 = vmatmul.mubr.msk.f32.gmra.mxu0 %vm339_vm1, %v213_v24  ;;  %v235_v4 = vld [vmem:[%s2430_s7 + $0x108] sm:$0xff]  ;;  %v236_v6 = vld [vmem:[%s2430_s7 + $0x110] sm:$0xff]  ;;  %v237_v8 = vld [vmem:[%s2430_s7 + $0x118] sm:$0xff] }
  0x46   : > { %2159 = vmatmul.mubr.msk.f32.gmra.mxu1 %vm339_vm1, %v277_v25  ;;  %2065 = vmatprep.mubr.msk.f32.mxu0 %vm339_vm1, %v214_v26  ;;  %v299_v5 = vld [vmem:[%s2430_s7 + $0x308] sm:$0xff]  ;;  %v300_v7 = vld [vmem:[%s2430_s7 + $0x310] sm:$0xff]  ;;  %v301_v9 = vld [vmem:[%s2430_s7 + $0x318] sm:$0xff] }
  0x47   : > { %2161 = vmatprep.mubr.msk.f32.mxu1 %vm339_vm1, %v278_v27  ;;  %v238_v10 = vld [vmem:[%s2430_s7 + $0x120] sm:$0xff]  ;;  %v239_v12 = vld [vmem:[%s2430_s7 + $0x128] sm:$0xff]  ;;  %v240_v14 = vld [vmem:[%s2430_s7 + $0x130] sm:$0xff] }
  0x48   : > { %v302_v11 = vld [vmem:[%s2430_s7 + $0x320] sm:$0xff]  ;;  %v303_v13 = vld [vmem:[%s2430_s7 + $0x328] sm:$0xff]  ;;  %v304_v15 = vld [vmem:[%s2430_s7 + $0x330] sm:$0xff] }
  0x49   : > { %2066 = vmatmul.mubr.msk.f32.gmra.mxu0 %vm339_vm1, %v215_v28  ;;  %v241_v16 = vld [vmem:[%s2430_s7 + $0x138] sm:$0xff]  ;;  %v242_v18 = vld [vmem:[%s2430_s7 + $0x140] sm:$0xff]  ;;  %v243_v20 = vld [vmem:[%s2430_s7 + $0x148] sm:$0xff] }
  0x4a   : > { %2162 = vmatmul.mubr.msk.f32.gmra.mxu1 %vm339_vm1, %v279_v29  ;;  %2068 = vmatprep.mubr.msk.f32.mxu0 %vm339_vm1, %v216_v30  ;;  %v305_v17 = vld [vmem:[%s2430_s7 + $0x338] sm:$0xff]  ;;  %v306_v19 = vld [vmem:[%s2430_s7 + $0x340] sm:$0xff]  ;;  %v307_v21 = vld [vmem:[%s2430_s7 + $0x348] sm:$0xff] }
  0x4b   : > { %2164 = vmatprep.mubr.msk.f32.mxu1 %vm339_vm1, %v280_v31  ;;  %v244_v22 = vld [vmem:[%s2430_s7 + $0x150] sm:$0xff]  ;;  %v245_v24 = vld [vmem:[%s2430_s7 + $0x158] sm:$0xff]  ;;  %v246_v26 = vld [vmem:[%s2430_s7 + $0x160] sm:$0xff] }
  0x4c   : > { %v308_v23 = vld [vmem:[%s2430_s7 + $0x350] sm:$0xff]  ;;  %v309_v25 = vld [vmem:[%s2430_s7 + $0x358] sm:$0xff]  ;;  %v310_v27 = vld [vmem:[%s2430_s7 + $0x360] sm:$0xff] }
  0x4d   : > { %2069 = vmatmul.mubr.msk.f32.gmra.mxu0 %vm339_vm1, %v217_v32  ;;  %v247_v28 = vld [vmem:[%s2430_s7 + $0x168] sm:$0xff]  ;;  %v248_v30 = vld [vmem:[%s2430_s7 + $0x170] sm:$0xff]  ;;  %v249_v32 = vld [vmem:[%s2430_s7 + $0x178] sm:$0xff] }
  0x4e   : > { %2165 = vmatmul.mubr.msk.f32.gmra.mxu1 %vm339_vm1, %v281_v33  ;;  %2071 = vmatprep.mubr.msk.f32.mxu0 %vm339_vm1, %v218_v34  ;;  %v311_v29 = vld [vmem:[%s2430_s7 + $0x368] sm:$0xff]  ;;  %v312_v31 = vld [vmem:[%s2430_s7 + $0x370] sm:$0xff]  ;;  %v313_v33 = vld [vmem:[%s2430_s7 + $0x378] sm:$0xff] }
  0x4f   : > { %2167 = vmatprep.mubr.msk.f32.mxu1 %vm339_vm1, %v282_v35  ;;  %v250_v34 = vld [vmem:[%s2430_s7 + $0x180] sm:$0xff] }
  0x50   : > { %v314_v35 = vld [vmem:[%s2430_s7 + $0x380] sm:$0xff] }
  0x51   : > { %2072 = vmatmul.mubr.msk.f32.gmra.mxu0 %vm339_vm1, %v219_v36  ;;  %v251_v36 = vld [vmem:[%s2430_s7 + $0x188] sm:$0xff] }
  0x52   : > { %2168 = vmatmul.mubr.msk.f32.gmra.mxu1 %vm339_vm1, %v283_v37  ;;  %2074 = vmatprep.mubr.msk.f32.mxu0 %vm339_vm1, %v220_v38  ;;  %v315_v37 = vld [vmem:[%s2430_s7 + $0x388] sm:$0xff]  ;;  %v252_v38 = vld [vmem:[%s2430_s7 + $0x190] sm:$0xff] }
  0x53   : > { %2170 = vmatprep.mubr.msk.f32.mxu1 %vm339_vm1, %v284_v39  ;;  %v316_v39 = vld [vmem:[%s2430_s7 + $0x390] sm:$0xff] }
  0x55   : > { %2075 = vmatmul.mubr.msk.f32.gmra.mxu0 %vm339_vm1, %v221_v40  ;;  %v253_v40 = vld [vmem:[%s2430_s7 + $0x198] sm:$0xff] }
  0x56   : > { %2171 = vmatmul.mubr.msk.f32.gmra.mxu1 %vm339_vm1, %v285_v41  ;;  %2077 = vmatprep.mubr.msk.f32.mxu0 %vm339_vm1, %v222_v42  ;;  %v317_v41 = vld [vmem:[%s2430_s7 + $0x398] sm:$0xff]  ;;  %v254_v42 = vld [vmem:[%s2430_s7 + $0x1a0] sm:$0xff] }
  0x57   : > { %2173 = vmatprep.mubr.msk.f32.mxu1 %vm339_vm1, %v286_v43  ;;  %v318_v43 = vld [vmem:[%s2430_s7 + $0x3a0] sm:$0xff] }
  0x59   : > { %2078 = vmatmul.mubr.msk.f32.gmra.mxu0 %vm339_vm1, %v223_v44  ;;  %v255_v44 = vld [vmem:[%s2430_s7 + $0x1a8] sm:$0xff] }
  0x5a   : > { %2174 = vmatmul.mubr.msk.f32.gmra.mxu1 %vm339_vm1, %v287_v45  ;;  %2080 = vmatprep.mubr.msk.f32.mxu0 %vm339_vm1, %v224_v46  ;;  %v319_v45 = vld [vmem:[%s2430_s7 + $0x3a8] sm:$0xff]  ;;  %v256_v46 = vld [vmem:[%s2430_s7 + $0x1b0] sm:$0xff] }
  0x5b   : > { %2176 = vmatprep.mubr.msk.f32.mxu1 %vm339_vm1, %v288_v47  ;;  %v320_v47 = vld [vmem:[%s2430_s7 + $0x3b0] sm:$0xff] }
  0x5d   : > { %2081 = vmatmul.mubr.msk.f32.gmra.mxu0 %vm339_vm1, %v225_v48  ;;  %v257_v48 = vld [vmem:[%s2430_s7 + $0x1b8] sm:$0xff] }
  0x5e   : > { %2177 = vmatmul.mubr.msk.f32.gmra.mxu1 %vm339_vm1, %v289_v49  ;;  %2083 = vmatprep.mubr.msk.f32.mxu0 %vm339_vm1, %v226_v50  ;;  %v321_v49 = vld [vmem:[%s2430_s7 + $0x3b8] sm:$0xff]  ;;  %v258_v50 = vld [vmem:[%s2430_s7 + $0x1c0] sm:$0xff] }
  0x5f   : > { %2179 = vmatprep.mubr.msk.f32.mxu1 %vm339_vm1, %v290_v51  ;;  %v322_v51 = vld [vmem:[%s2430_s7 + $0x3c0] sm:$0xff] }
  0x61   : > { %2084 = vmatmul.mubr.msk.f32.gmra.mxu0 %vm339_vm1, %v227_v52  ;;  %v259_v52 = vld [vmem:[%s2430_s7 + $0x1c8] sm:$0xff] }
  0x62   : > { %2180 = vmatmul.mubr.msk.f32.gmra.mxu1 %vm339_vm1, %v291_v53  ;;  %2086 = vmatprep.mubr.msk.f32.mxu0 %vm339_vm1, %v228_v54  ;;  %v323_v53 = vld [vmem:[%s2430_s7 + $0x3c8] sm:$0xff]  ;;  %v260_v54 = vld [vmem:[%s2430_s7 + $0x1d0] sm:$0xff] }
  0x63   : > { %2182 = vmatprep.mubr.msk.f32.mxu1 %vm339_vm1, %v292_v55  ;;  %v324_v55 = vld [vmem:[%s2430_s7 + $0x3d0] sm:$0xff] }
  0x65   : > { %2087 = vmatmul.mubr.msk.f32.gmra.mxu0 %vm339_vm1, %v229_v56  ;;  %v261_v56 = vld [vmem:[%s2430_s7 + $0x1d8] sm:$0xff] }
  0x66   : > { %2183 = vmatmul.mubr.msk.f32.gmra.mxu1 %vm339_vm1, %v293_v57  ;;  %2089 = vmatprep.mubr.msk.f32.mxu0 %vm339_vm1, %v230_v58  ;;  %v325_v57 = vld [vmem:[%s2430_s7 + $0x3d8] sm:$0xff]  ;;  %v262_v58 = vld [vmem:[%s2430_s7 + $0x1e0] sm:$0xff] }
  0x67   : > { %2185 = vmatprep.mubr.msk.f32.mxu1 %vm339_vm1, %v294_v59  ;;  %v326_v59 = vld [vmem:[%s2430_s7 + $0x3e0] sm:$0xff] }
  0x69   : > { %2090 = vmatmul.mubr.msk.f32.gmra.mxu0 %vm339_vm1, %v231_v60  ;;  %v263_v60 = vld [vmem:[%s2430_s7 + $0x1e8] sm:$0xff] }
  0x6a   : > { %2186 = vmatmul.mubr.msk.f32.gmra.mxu1 %vm339_vm1, %v295_v61  ;;  %2092 = vmatprep.mubr.msk.f32.mxu0 %vm339_vm1, %v232_v62  ;;  %v327_v61 = vld [vmem:[%s2430_s7 + $0x3e8] sm:$0xff]  ;;  %v264_v62 = vld [vmem:[%s2430_s7 + $0x1f0] sm:$0xff] }
  0x6b   : > { %2188 = vmatprep.mubr.msk.f32.mxu1 %vm339_vm1, %v296_v63  ;;  %v328_v63 = vld [vmem:[%s2430_s7 + $0x3f0] sm:$0xff] }
  0x6d   : > { %2093 = vmatmul.mubr.msk.f32.gmra.mxu0 %vm339_vm1, %v233_v0  ;;  %v265_v0 = vld [vmem:[%s2430_s7 + $0x1f8] sm:$0xff] }
  0x6e   : > { %2189 = vmatmul.mubr.msk.f32.gmra.mxu1 %vm339_vm1, %v297_v1  ;;  %2095 = vmatprep.mubr.msk.f32.mxu0 %vm339_vm1, %v234_v2  ;;  %v329_v1 = vld [vmem:[%s2430_s7 + $0x3f8] sm:$0xff]  ;;  %v2688_v2 = vld [vmem:[#allocation4] ss:$0 sm:$0xff] }
  0x6f   : > { %2191 = vmatprep.mubr.msk.f32.mxu1 %vm339_vm1, %v298_v3 }
  0x71   : > { %2096 = vmatmul.mubr.msk.f32.gmra.mxu0 %vm339_vm1, %v235_v4 }
  0x72   : > { %2192 = vmatmul.mubr.msk.f32.gmra.mxu1 %vm339_vm1, %v299_v5  ;;  %2098 = vmatprep.mubr.msk.f32.mxu0 %vm339_vm1, %v236_v6 }
  0x73   : > { %2194 = vmatprep.mubr.msk.f32.mxu1 %vm339_vm1, %v300_v7 }
  0x75   : > { %2099 = vmatmul.mubr.msk.f32.gmra.mxu0 %vm339_vm1, %v237_v8 }
  0x76   : > { %2195 = vmatmul.mubr.msk.f32.gmra.mxu1 %vm339_vm1, %v301_v9  ;;  %2101 = vmatprep.mubr.msk.f32.mxu0 %vm339_vm1, %v238_v10 }
  0x77   : > { %2197 = vmatprep.mubr.msk.f32.mxu1 %vm339_vm1, %v302_v11 }
  0x79   : > { %2102 = vmatmul.mubr.msk.f32.gmra.mxu0 %vm339_vm1, %v239_v12 }
  0x7a   : > { %2198 = vmatmul.mubr.msk.f32.gmra.mxu1 %vm339_vm1, %v303_v13  ;;  %2104 = vmatprep.mubr.msk.f32.mxu0 %vm339_vm1, %v240_v14 }
  0x7b   : > { %2200 = vmatprep.mubr.msk.f32.mxu1 %vm339_vm1, %v304_v15 }
  0x7d   : > { %2105 = vmatmul.mubr.msk.f32.gmra.mxu0 %vm339_vm1, %v241_v16 }
  0x7e   : > { %2201 = vmatmul.mubr.msk.f32.gmra.mxu1 %vm339_vm1, %v305_v17  ;;  %2107 = vmatprep.mubr.msk.f32.mxu0 %vm339_vm1, %v242_v18 }
  0x7f   : > { %2203 = vmatprep.mubr.msk.f32.mxu1 %vm339_vm1, %v306_v19 }
  0x81   : > { %2108 = vmatmul.mubr.msk.f32.gmra.mxu0 %vm339_vm1, %v243_v20 }
  0x82   : > { %2204 = vmatmul.mubr.msk.f32.gmra.mxu1 %vm339_vm1, %v307_v21  ;;  %2110 = vmatprep.mubr.msk.f32.mxu0 %vm339_vm1, %v244_v22 }
  0x83   : > { %2206 = vmatprep.mubr.msk.f32.mxu1 %vm339_vm1, %v308_v23 }
  0x85   : > { %2111 = vmatmul.mubr.msk.f32.gmra.mxu0 %vm339_vm1, %v245_v24 }
  0x86   : > { %2207 = vmatmul.mubr.msk.f32.gmra.mxu1 %vm339_vm1, %v309_v25  ;;  %2113 = vmatprep.mubr.msk.f32.mxu0 %vm339_vm1, %v246_v26 }
  0x87   : > { %2209 = vmatprep.mubr.msk.f32.mxu1 %vm339_vm1, %v310_v27 }
  0x89   : > { %2114 = vmatmul.mubr.msk.f32.gmra.mxu0 %vm339_vm1, %v247_v28 }
  0x8a   : > { %2210 = vmatmul.mubr.msk.f32.gmra.mxu1 %vm339_vm1, %v311_v29  ;;  %2116 = vmatprep.mubr.msk.f32.mxu0 %vm339_vm1, %v248_v30 }
  0x8b   : > { %2212 = vmatprep.mubr.msk.f32.mxu1 %vm339_vm1, %v312_v31 }
  0x8d   : > { %2117 = vmatmul.mubr.msk.f32.gmra.mxu0 %vm339_vm1, %v249_v32 }
  0x8e   : > { %2213 = vmatmul.mubr.msk.f32.gmra.mxu1 %vm339_vm1, %v313_v33  ;;  %2119 = vmatprep.mubr.msk.f32.mxu0 %vm339_vm1, %v250_v34 }
  0x8f   : > { %2215 = vmatprep.mubr.msk.f32.mxu1 %vm339_vm1, %v314_v35 }
  0x91   : > { %2120 = vmatmul.mubr.msk.f32.gmra.mxu0 %vm339_vm1, %v251_v36 }
  0x92   : > { %2216 = vmatmul.mubr.msk.f32.gmra.mxu1 %vm339_vm1, %v315_v37  ;;  %2122 = vmatprep.mubr.msk.f32.mxu0 %vm339_vm1, %v252_v38 }
  0x93   : > { %2218 = vmatprep.mubr.msk.f32.mxu1 %vm339_vm1, %v316_v39 }
  0x95   : > { %2123 = vmatmul.mubr.msk.f32.gmra.mxu0 %vm339_vm1, %v253_v40 }
  0x96   : > { %2219 = vmatmul.mubr.msk.f32.gmra.mxu1 %vm339_vm1, %v317_v41  ;;  %2125 = vmatprep.mubr.msk.f32.mxu0 %vm339_vm1, %v254_v42 }
  0x97   : > { %2221 = vmatprep.mubr.msk.f32.mxu1 %vm339_vm1, %v318_v43 }
  0x99   : > { %2126 = vmatmul.mubr.msk.f32.gmra.mxu0 %vm339_vm1, %v255_v44 }
  0x9a   : > { %2222 = vmatmul.mubr.msk.f32.gmra.mxu1 %vm339_vm1, %v319_v45  ;;  %2128 = vmatprep.mubr.msk.f32.mxu0 %vm339_vm1, %v256_v46 }
  0x9b   : > { %2224 = vmatprep.mubr.msk.f32.mxu1 %vm339_vm1, %v320_v47 }
  0x9d   : > { %2129 = vmatmul.mubr.msk.f32.gmra.mxu0 %vm339_vm1, %v257_v48 }
  0x9e   : > { %2225 = vmatmul.mubr.msk.f32.gmra.mxu1 %vm339_vm1, %v321_v49  ;;  %2131 = vmatprep.mubr.msk.f32.mxu0 %vm339_vm1, %v258_v50 }
  0x9f   : > { %2227 = vmatprep.mubr.msk.f32.mxu1 %vm339_vm1, %v322_v51 }
  0xa1   : > { %2132 = vmatmul.mubr.msk.f32.gmra.mxu0 %vm339_vm1, %v259_v52 }
  0xa2   : > { %2228 = vmatmul.mubr.msk.f32.gmra.mxu1 %vm339_vm1, %v323_v53  ;;  %2134 = vmatprep.mubr.msk.f32.mxu0 %vm339_vm1, %v260_v54 }
  0xa3   : > { %2230 = vmatprep.mubr.msk.f32.mxu1 %vm339_vm1, %v324_v55 }
  0xa5   : > { %2135 = vmatmul.mubr.msk.f32.gmra.mxu0 %vm339_vm1, %v261_v56 }
  0xa6   : > { %2231 = vmatmul.mubr.msk.f32.gmra.mxu1 %vm339_vm1, %v325_v57  ;;  %2137 = vmatprep.mubr.msk.f32.mxu0 %vm339_vm1, %v262_v58 }
  0xa7   : > { %2233 = vmatprep.mubr.msk.f32.mxu1 %vm339_vm1, %v326_v59 }
  0xa9   : > { %2138 = vmatmul.mubr.msk.f32.gmra.mxu0 %vm339_vm1, %v263_v60 }
  0xaa   : > { %2234 = vmatmul.mubr.msk.f32.gmra.mxu1 %vm339_vm1, %v327_v61  ;;  %2140 = vmatprep.mubr.msk.f32.mxu0 %vm339_vm1, %v264_v62 }
  0xab   : > { %2236 = vmatprep.mubr.msk.f32.mxu1 %vm339_vm1, %v328_v63 }
  0xad   : > { %2141 = vmatmul.mubr.msk.f32.gmra.mxu0 %vm339_vm1, %v265_v0 }
  0xae   : > { %2237 = vmatmul.mubr.msk.f32.gmra.mxu1 %vm339_vm1, %v329_v1 }
  0xf1   : > { %v2049_v3 = vpop.f32.mrf.mxu0 }
  0xf2   : > { %v2145_v4 = vpop.f32.mrf.mxu1  ;;  %v800_v5 = vadd.f32 %v2049_v3, %v2688_v2 }
  0xf3   : > { %v1120_v6 = vadd.f32 %v2145_v4, %v2688_v2  ;;  %v794_v7 = vpop.f32.mrf.mxu0 }
  0xf4   : > { %v1114_v8 = vpop.f32.mrf.mxu1  ;;  %v1434_v9 = vmax.f32 %v800_v5, 0.0  ;;  %v795_v11 = vadd.f32 %v2688_v2, %v794_v7 }
  0xf5   : > { %v1498_v10 = vmax.f32 %v1120_v6, 0.0  ;;  %v1115_v12 = vadd.f32 %v2688_v2, %v1114_v8  ;;  %v2052_v13 = vpop.f32.mrf.mxu0 }
  0xf6   : > { %v2148_v14 = vpop.f32.mrf.mxu1  ;;  %1563 = vst.msk [vmem:[%s2697_s10 + $0x8] sm:$0xff] %vm1561_vm2, %v1434_v9  ;;  %v1433_v15 = vmax.f32 %v795_v11, 0.0  ;;  %v810_v17 = vadd.f32 %v2052_v13, %v2688_v2 }
  0xf7   : > { %1627 = vst.msk [vmem:[%s2697_s10 + $0x208] sm:$0xff] %vm1561_vm2, %v1498_v10  ;;  %v1497_v16 = vmax.f32 %v1115_v12, 0.0  ;;  %v1130_v18 = vadd.f32 %v2148_v14, %v2688_v2  ;;  %v804_v19 = vpop.f32.mrf.mxu0 }
  0xf8   : > { %v1124_v20 = vpop.f32.mrf.mxu1  ;;  %1562 = vst.msk [vmem:[%s2697_s10] sm:$0xff] %vm1561_vm2, %v1433_v15  ;;  %v1436_v21 = vmax.f32 %v810_v17, 0.0  ;;  %v805_v23 = vadd.f32 %v2688_v2, %v804_v19 }
  0xf9   : > { %1626 = vst.msk [vmem:[%s2697_s10 + $0x200] sm:$0xff] %vm1561_vm2, %v1497_v16  ;;  %v1500_v22 = vmax.f32 %v1130_v18, 0.0  ;;  %v1125_v24 = vadd.f32 %v2688_v2, %v1124_v20  ;;  %v2055_v25 = vpop.f32.mrf.mxu0 }
  0xfa   : > { %v2151_v26 = vpop.f32.mrf.mxu1  ;;  %1565 = vst.msk [vmem:[%s2697_s10 + $0x18] sm:$0xff] %vm1561_vm2, %v1436_v21  ;;  %v1435_v27 = vmax.f32 %v805_v23, 0.0  ;;  %v820_v29 = vadd.f32 %v2055_v25, %v2688_v2 }
  0xfb   : > { %1629 = vst.msk [vmem:[%s2697_s10 + $0x218] sm:$0xff] %vm1561_vm2, %v1500_v22  ;;  %v1499_v28 = vmax.f32 %v1125_v24, 0.0  ;;  %v1140_v30 = vadd.f32 %v2151_v26, %v2688_v2  ;;  %v814_v31 = vpop.f32.mrf.mxu0 }
  0xfc   : > { %v1134_v32 = vpop.f32.mrf.mxu1  ;;  %1564 = vst.msk [vmem:[%s2697_s10 + $0x10] sm:$0xff] %vm1561_vm2, %v1435_v27  ;;  %v1438_v33 = vmax.f32 %v820_v29, 0.0  ;;  %v815_v35 = vadd.f32 %v2688_v2, %v814_v31 }
  0xfd   : > { %1628 = vst.msk [vmem:[%s2697_s10 + $0x210] sm:$0xff] %vm1561_vm2, %v1499_v28  ;;  %v1502_v34 = vmax.f32 %v1140_v30, 0.0  ;;  %v1135_v36 = vadd.f32 %v2688_v2, %v1134_v32  ;;  %v2058_v37 = vpop.f32.mrf.mxu0 }
  0xfe   : > { %v2154_v38 = vpop.f32.mrf.mxu1  ;;  %1567 = vst.msk [vmem:[%s2697_s10 + $0x28] sm:$0xff] %vm1561_vm2, %v1438_v33  ;;  %v1437_v39 = vmax.f32 %v815_v35, 0.0  ;;  %v830_v41 = vadd.f32 %v2058_v37, %v2688_v2 }
  0xff   : > { %1631 = vst.msk [vmem:[%s2697_s10 + $0x228] sm:$0xff] %vm1561_vm2, %v1502_v34  ;;  %v1501_v40 = vmax.f32 %v1135_v36, 0.0  ;;  %v1150_v42 = vadd.f32 %v2154_v38, %v2688_v2  ;;  %v824_v43 = vpop.f32.mrf.mxu0 }
 0x100   : > { %v1144_v44 = vpop.f32.mrf.mxu1  ;;  %1566 = vst.msk [vmem:[%s2697_s10 + $0x20] sm:$0xff] %vm1561_vm2, %v1437_v39  ;;  %v1440_v45 = vmax.f32 %v830_v41, 0.0  ;;  %v825_v47 = vadd.f32 %v2688_v2, %v824_v43 }
 0x101   : > { %1630 = vst.msk [vmem:[%s2697_s10 + $0x220] sm:$0xff] %vm1561_vm2, %v1501_v40  ;;  %v1504_v46 = vmax.f32 %v1150_v42, 0.0  ;;  %v1145_v48 = vadd.f32 %v2688_v2, %v1144_v44  ;;  %v2061_v49 = vpop.f32.mrf.mxu0 }
 0x102   : > { %v2157_v50 = vpop.f32.mrf.mxu1  ;;  %1569 = vst.msk [vmem:[%s2697_s10 + $0x38] sm:$0xff] %vm1561_vm2, %v1440_v45  ;;  %v1439_v51 = vmax.f32 %v825_v47, 0.0  ;;  %v840_v53 = vadd.f32 %v2061_v49, %v2688_v2 }
 0x103   : > { %1633 = vst.msk [vmem:[%s2697_s10 + $0x238] sm:$0xff] %vm1561_vm2, %v1504_v46  ;;  %v1503_v52 = vmax.f32 %v1145_v48, 0.0  ;;  %v1160_v54 = vadd.f32 %v2157_v50, %v2688_v2  ;;  %v834_v55 = vpop.f32.mrf.mxu0 }
 0x104   : > { %v1154_v56 = vpop.f32.mrf.mxu1  ;;  %1568 = vst.msk [vmem:[%s2697_s10 + $0x30] sm:$0xff] %vm1561_vm2, %v1439_v51  ;;  %v1442_v57 = vmax.f32 %v840_v53, 0.0  ;;  %v835_v59 = vadd.f32 %v2688_v2, %v834_v55 }
 0x105   : > { %1632 = vst.msk [vmem:[%s2697_s10 + $0x230] sm:$0xff] %vm1561_vm2, %v1503_v52  ;;  %v1506_v58 = vmax.f32 %v1160_v54, 0.0  ;;  %v1155_v60 = vadd.f32 %v2688_v2, %v1154_v56  ;;  %v2064_v61 = vpop.f32.mrf.mxu0 }
 0x106   : > { %v2160_v62 = vpop.f32.mrf.mxu1  ;;  %1571 = vst.msk [vmem:[%s2697_s10 + $0x48] sm:$0xff] %vm1561_vm2, %v1442_v57  ;;  %v1441_v63 = vmax.f32 %v835_v59, 0.0  ;;  %v850_v1 = vadd.f32 %v2064_v61, %v2688_v2 }
 0x107   : > { %1635 = vst.msk [vmem:[%s2697_s10 + $0x248] sm:$0xff] %vm1561_vm2, %v1506_v58  ;;  %v1505_v0 = vmax.f32 %v1155_v60, 0.0  ;;  %v1170_v3 = vadd.f32 %v2160_v62, %v2688_v2  ;;  %v844_v4 = vpop.f32.mrf.mxu0 }
 0x108   : > { %v1164_v5 = vpop.f32.mrf.mxu1  ;;  %1570 = vst.msk [vmem:[%s2697_s10 + $0x40] sm:$0xff] %vm1561_vm2, %v1441_v63  ;;  %v1444_v6 = vmax.f32 %v850_v1, 0.0  ;;  %v845_v8 = vadd.f32 %v2688_v2, %v844_v4 }
 0x109   : > { %1634 = vst.msk [vmem:[%s2697_s10 + $0x240] sm:$0xff] %vm1561_vm2, %v1505_v0  ;;  %v1508_v7 = vmax.f32 %v1170_v3, 0.0  ;;  %v1165_v9 = vadd.f32 %v2688_v2, %v1164_v5  ;;  %v2067_v10 = vpop.f32.mrf.mxu0 }
 0x10a   : > { %v2163_v11 = vpop.f32.mrf.mxu1  ;;  %1573 = vst.msk [vmem:[%s2697_s10 + $0x58] sm:$0xff] %vm1561_vm2, %v1444_v6  ;;  %v1443_v12 = vmax.f32 %v845_v8, 0.0  ;;  %v860_v14 = vadd.f32 %v2067_v10, %v2688_v2 }
 0x10b   : > { %1637 = vst.msk [vmem:[%s2697_s10 + $0x258] sm:$0xff] %vm1561_vm2, %v1508_v7  ;;  %v1507_v13 = vmax.f32 %v1165_v9, 0.0  ;;  %v1180_v15 = vadd.f32 %v2163_v11, %v2688_v2  ;;  %v854_v16 = vpop.f32.mrf.mxu0 }
 0x10c   : > { %v1174_v17 = vpop.f32.mrf.mxu1  ;;  %1572 = vst.msk [vmem:[%s2697_s10 + $0x50] sm:$0xff] %vm1561_vm2, %v1443_v12  ;;  %v1446_v18 = vmax.f32 %v860_v14, 0.0  ;;  %v855_v20 = vadd.f32 %v2688_v2, %v854_v16 }
 0x10d   : > { %1636 = vst.msk [vmem:[%s2697_s10 + $0x250] sm:$0xff] %vm1561_vm2, %v1507_v13  ;;  %v1510_v19 = vmax.f32 %v1180_v15, 0.0  ;;  %v1175_v21 = vadd.f32 %v2688_v2, %v1174_v17  ;;  %v2070_v22 = vpop.f32.mrf.mxu0 }
 0x10e   : > { %v2166_v23 = vpop.f32.mrf.mxu1  ;;  %1575 = vst.msk [vmem:[%s2697_s10 + $0x68] sm:$0xff] %vm1561_vm2, %v1446_v18  ;;  %v1445_v24 = vmax.f32 %v855_v20, 0.0  ;;  %v870_v26 = vadd.f32 %v2070_v22, %v2688_v2 }
 0x10f   : > { %1639 = vst.msk [vmem:[%s2697_s10 + $0x268] sm:$0xff] %vm1561_vm2, %v1510_v19  ;;  %v1509_v25 = vmax.f32 %v1175_v21, 0.0  ;;  %v1190_v27 = vadd.f32 %v2166_v23, %v2688_v2  ;;  %v864_v28 = vpop.f32.mrf.mxu0 }
 0x110   : > { %v1184_v29 = vpop.f32.mrf.mxu1  ;;  %1574 = vst.msk [vmem:[%s2697_s10 + $0x60] sm:$0xff] %vm1561_vm2, %v1445_v24  ;;  %v1448_v30 = vmax.f32 %v870_v26, 0.0  ;;  %v865_v32 = vadd.f32 %v2688_v2, %v864_v28 }
 0x111   : > { %1638 = vst.msk [vmem:[%s2697_s10 + $0x260] sm:$0xff] %vm1561_vm2, %v1509_v25  ;;  %v1512_v31 = vmax.f32 %v1190_v27, 0.0  ;;  %v1185_v33 = vadd.f32 %v2688_v2, %v1184_v29  ;;  %v2073_v34 = vpop.f32.mrf.mxu0 }
 0x112   : > { %v2169_v35 = vpop.f32.mrf.mxu1  ;;  %1577 = vst.msk [vmem:[%s2697_s10 + $0x78] sm:$0xff] %vm1561_vm2, %v1448_v30  ;;  %v1447_v36 = vmax.f32 %v865_v32, 0.0  ;;  %v880_v38 = vadd.f32 %v2073_v34, %v2688_v2 }
 0x113   : > { %1641 = vst.msk [vmem:[%s2697_s10 + $0x278] sm:$0xff] %vm1561_vm2, %v1512_v31  ;;  %v1511_v37 = vmax.f32 %v1185_v33, 0.0  ;;  %v1200_v39 = vadd.f32 %v2169_v35, %v2688_v2  ;;  %v874_v40 = vpop.f32.mrf.mxu0 }
 0x114   : > { %v1194_v41 = vpop.f32.mrf.mxu1  ;;  %1576 = vst.msk [vmem:[%s2697_s10 + $0x70] sm:$0xff] %vm1561_vm2, %v1447_v36  ;;  %v1450_v42 = vmax.f32 %v880_v38, 0.0  ;;  %v875_v44 = vadd.f32 %v2688_v2, %v874_v40 }
 0x115   : > { %1640 = vst.msk [vmem:[%s2697_s10 + $0x270] sm:$0xff] %vm1561_vm2, %v1511_v37  ;;  %v1514_v43 = vmax.f32 %v1200_v39, 0.0  ;;  %v1195_v45 = vadd.f32 %v2688_v2, %v1194_v41  ;;  %v2076_v46 = vpop.f32.mrf.mxu0 }
 0x116   : > { %v2172_v47 = vpop.f32.mrf.mxu1  ;;  %1579 = vst.msk [vmem:[%s2697_s10 + $0x88] sm:$0xff] %vm1561_vm2, %v1450_v42  ;;  %v1449_v48 = vmax.f32 %v875_v44, 0.0  ;;  %v890_v50 = vadd.f32 %v2076_v46, %v2688_v2 }
 0x117   : > { %1643 = vst.msk [vmem:[%s2697_s10 + $0x288] sm:$0xff] %vm1561_vm2, %v1514_v43  ;;  %v1513_v49 = vmax.f32 %v1195_v45, 0.0  ;;  %v1210_v51 = vadd.f32 %v2172_v47, %v2688_v2  ;;  %v884_v52 = vpop.f32.mrf.mxu0 }
 0x118   : > { %v1204_v53 = vpop.f32.mrf.mxu1  ;;  %1578 = vst.msk [vmem:[%s2697_s10 + $0x80] sm:$0xff] %vm1561_vm2, %v1449_v48  ;;  %v1452_v54 = vmax.f32 %v890_v50, 0.0  ;;  %v885_v56 = vadd.f32 %v2688_v2, %v884_v52 }
 0x119   : > { %1642 = vst.msk [vmem:[%s2697_s10 + $0x280] sm:$0xff] %vm1561_vm2, %v1513_v49  ;;  %v1516_v55 = vmax.f32 %v1210_v51, 0.0  ;;  %v1205_v57 = vadd.f32 %v2688_v2, %v1204_v53  ;;  %v2079_v58 = vpop.f32.mrf.mxu0 }
 0x11a   : > { %v2175_v59 = vpop.f32.mrf.mxu1  ;;  %1581 = vst.msk [vmem:[%s2697_s10 + $0x98] sm:$0xff] %vm1561_vm2, %v1452_v54  ;;  %v1451_v60 = vmax.f32 %v885_v56, 0.0  ;;  %v900_v62 = vadd.f32 %v2079_v58, %v2688_v2 }
 0x11b   : > { %1645 = vst.msk [vmem:[%s2697_s10 + $0x298] sm:$0xff] %vm1561_vm2, %v1516_v55  ;;  %v1515_v61 = vmax.f32 %v1205_v57, 0.0  ;;  %v1220_v63 = vadd.f32 %v2175_v59, %v2688_v2  ;;  %v894_v0 = vpop.f32.mrf.mxu0 }
 0x11c   : > { %v1214_v1 = vpop.f32.mrf.mxu1  ;;  %1580 = vst.msk [vmem:[%s2697_s10 + $0x90] sm:$0xff] %vm1561_vm2, %v1451_v60  ;;  %v1454_v3 = vmax.f32 %v900_v62, 0.0  ;;  %v895_v5 = vadd.f32 %v2688_v2, %v894_v0 }
 0x11d   : > { %1644 = vst.msk [vmem:[%s2697_s10 + $0x290] sm:$0xff] %vm1561_vm2, %v1515_v61  ;;  %v1518_v4 = vmax.f32 %v1220_v63, 0.0  ;;  %v1215_v6 = vadd.f32 %v2688_v2, %v1214_v1  ;;  %v2082_v7 = vpop.f32.mrf.mxu0 }
 0x11e   : > { %v2178_v8 = vpop.f32.mrf.mxu1  ;;  %1583 = vst.msk [vmem:[%s2697_s10 + $0xa8] sm:$0xff] %vm1561_vm2, %v1454_v3  ;;  %v1453_v9 = vmax.f32 %v895_v5, 0.0  ;;  %v910_v11 = vadd.f32 %v2082_v7, %v2688_v2 }
 0x11f   : > { %1647 = vst.msk [vmem:[%s2697_s10 + $0x2a8] sm:$0xff] %vm1561_vm2, %v1518_v4  ;;  %v1517_v10 = vmax.f32 %v1215_v6, 0.0  ;;  %v1230_v12 = vadd.f32 %v2178_v8, %v2688_v2  ;;  %v904_v13 = vpop.f32.mrf.mxu0 }
 0x120   : > { %v1224_v14 = vpop.f32.mrf.mxu1  ;;  %1582 = vst.msk [vmem:[%s2697_s10 + $0xa0] sm:$0xff] %vm1561_vm2, %v1453_v9  ;;  %v1456_v15 = vmax.f32 %v910_v11, 0.0  ;;  %v905_v17 = vadd.f32 %v2688_v2, %v904_v13 }
 0x121   : > { %1646 = vst.msk [vmem:[%s2697_s10 + $0x2a0] sm:$0xff] %vm1561_vm2, %v1517_v10  ;;  %v1520_v16 = vmax.f32 %v1230_v12, 0.0  ;;  %v1225_v18 = vadd.f32 %v2688_v2, %v1224_v14  ;;  %v2085_v19 = vpop.f32.mrf.mxu0 }
 0x122   : > { %v2181_v20 = vpop.f32.mrf.mxu1  ;;  %1585 = vst.msk [vmem:[%s2697_s10 + $0xb8] sm:$0xff] %vm1561_vm2, %v1456_v15  ;;  %v1455_v21 = vmax.f32 %v905_v17, 0.0  ;;  %v920_v23 = vadd.f32 %v2085_v19, %v2688_v2 }
 0x123   : > { %1649 = vst.msk [vmem:[%s2697_s10 + $0x2b8] sm:$0xff] %vm1561_vm2, %v1520_v16  ;;  %v1519_v22 = vmax.f32 %v1225_v18, 0.0  ;;  %v1240_v24 = vadd.f32 %v2181_v20, %v2688_v2  ;;  %v914_v25 = vpop.f32.mrf.mxu0 }
 0x124   : > { %v1234_v26 = vpop.f32.mrf.mxu1  ;;  %1584 = vst.msk [vmem:[%s2697_s10 + $0xb0] sm:$0xff] %vm1561_vm2, %v1455_v21  ;;  %v1458_v27 = vmax.f32 %v920_v23, 0.0  ;;  %v915_v29 = vadd.f32 %v2688_v2, %v914_v25 }
 0x125   : > { %1648 = vst.msk [vmem:[%s2697_s10 + $0x2b0] sm:$0xff] %vm1561_vm2, %v1519_v22  ;;  %v1522_v28 = vmax.f32 %v1240_v24, 0.0  ;;  %v1235_v30 = vadd.f32 %v2688_v2, %v1234_v26  ;;  %v2088_v31 = vpop.f32.mrf.mxu0 }
 0x126   : > { %v2184_v32 = vpop.f32.mrf.mxu1  ;;  %1587 = vst.msk [vmem:[%s2697_s10 + $0xc8] sm:$0xff] %vm1561_vm2, %v1458_v27  ;;  %v1457_v33 = vmax.f32 %v915_v29, 0.0  ;;  %v930_v35 = vadd.f32 %v2088_v31, %v2688_v2 }
 0x127   : > { %1651 = vst.msk [vmem:[%s2697_s10 + $0x2c8] sm:$0xff] %vm1561_vm2, %v1522_v28  ;;  %v1521_v34 = vmax.f32 %v1235_v30, 0.0  ;;  %v1250_v36 = vadd.f32 %v2184_v32, %v2688_v2  ;;  %v924_v37 = vpop.f32.mrf.mxu0 }
 0x128   : > { %v1244_v38 = vpop.f32.mrf.mxu1  ;;  %1586 = vst.msk [vmem:[%s2697_s10 + $0xc0] sm:$0xff] %vm1561_vm2, %v1457_v33  ;;  %v1460_v39 = vmax.f32 %v930_v35, 0.0  ;;  %v925_v41 = vadd.f32 %v2688_v2, %v924_v37 }
 0x129   : > { %1650 = vst.msk [vmem:[%s2697_s10 + $0x2c0] sm:$0xff] %vm1561_vm2, %v1521_v34  ;;  %v1524_v40 = vmax.f32 %v1250_v36, 0.0  ;;  %v1245_v42 = vadd.f32 %v2688_v2, %v1244_v38  ;;  %v2091_v43 = vpop.f32.mrf.mxu0 }
 0x12a   : > { %v2187_v44 = vpop.f32.mrf.mxu1  ;;  %1589 = vst.msk [vmem:[%s2697_s10 + $0xd8] sm:$0xff] %vm1561_vm2, %v1460_v39  ;;  %v1459_v45 = vmax.f32 %v925_v41, 0.0  ;;  %v940_v47 = vadd.f32 %v2091_v43, %v2688_v2 }
 0x12b   : > { %1653 = vst.msk [vmem:[%s2697_s10 + $0x2d8] sm:$0xff] %vm1561_vm2, %v1524_v40  ;;  %v1523_v46 = vmax.f32 %v1245_v42, 0.0  ;;  %v1260_v48 = vadd.f32 %v2187_v44, %v2688_v2  ;;  %v934_v49 = vpop.f32.mrf.mxu0 }
 0x12c   : > { %v1254_v50 = vpop.f32.mrf.mxu1  ;;  %1588 = vst.msk [vmem:[%s2697_s10 + $0xd0] sm:$0xff] %vm1561_vm2, %v1459_v45  ;;  %v1462_v51 = vmax.f32 %v940_v47, 0.0  ;;  %v935_v53 = vadd.f32 %v2688_v2, %v934_v49 }
 0x12d   : > { %1652 = vst.msk [vmem:[%s2697_s10 + $0x2d0] sm:$0xff] %vm1561_vm2, %v1523_v46  ;;  %v1526_v52 = vmax.f32 %v1260_v48, 0.0  ;;  %v1255_v54 = vadd.f32 %v2688_v2, %v1254_v50  ;;  %v2094_v55 = vpop.f32.mrf.mxu0 }
 0x12e   : > { %v2190_v56 = vpop.f32.mrf.mxu1  ;;  %1591 = vst.msk [vmem:[%s2697_s10 + $0xe8] sm:$0xff] %vm1561_vm2, %v1462_v51  ;;  %v1461_v57 = vmax.f32 %v935_v53, 0.0  ;;  %v950_v59 = vadd.f32 %v2094_v55, %v2688_v2 }
 0x12f   : > { %1655 = vst.msk [vmem:[%s2697_s10 + $0x2e8] sm:$0xff] %vm1561_vm2, %v1526_v52  ;;  %v1525_v58 = vmax.f32 %v1255_v54, 0.0  ;;  %v1270_v60 = vadd.f32 %v2190_v56, %v2688_v2  ;;  %v944_v61 = vpop.f32.mrf.mxu0 }
 0x130   : > { %v1264_v62 = vpop.f32.mrf.mxu1  ;;  %1590 = vst.msk [vmem:[%s2697_s10 + $0xe0] sm:$0xff] %vm1561_vm2, %v1461_v57  ;;  %v1464_v63 = vmax.f32 %v950_v59, 0.0  ;;  %v945_v1 = vadd.f32 %v2688_v2, %v944_v61 }
 0x131   : > { %1654 = vst.msk [vmem:[%s2697_s10 + $0x2e0] sm:$0xff] %vm1561_vm2, %v1525_v58  ;;  %v1528_v0 = vmax.f32 %v1270_v60, 0.0  ;;  %v1265_v3 = vadd.f32 %v2688_v2, %v1264_v62  ;;  %v2097_v4 = vpop.f32.mrf.mxu0 }
 0x132   : > { %v2193_v5 = vpop.f32.mrf.mxu1  ;;  %1593 = vst.msk [vmem:[%s2697_s10 + $0xf8] sm:$0xff] %vm1561_vm2, %v1464_v63  ;;  %v1463_v6 = vmax.f32 %v945_v1, 0.0  ;;  %v960_v8 = vadd.f32 %v2097_v4, %v2688_v2 }
 0x133   : > { %1657 = vst.msk [vmem:[%s2697_s10 + $0x2f8] sm:$0xff] %vm1561_vm2, %v1528_v0  ;;  %v1527_v7 = vmax.f32 %v1265_v3, 0.0  ;;  %v1280_v9 = vadd.f32 %v2193_v5, %v2688_v2  ;;  %v954_v10 = vpop.f32.mrf.mxu0 }
 0x134   : > { %v1274_v11 = vpop.f32.mrf.mxu1  ;;  %1592 = vst.msk [vmem:[%s2697_s10 + $0xf0] sm:$0xff] %vm1561_vm2, %v1463_v6  ;;  %v1466_v12 = vmax.f32 %v960_v8, 0.0  ;;  %v955_v14 = vadd.f32 %v2688_v2, %v954_v10 }
 0x135   : > { %1656 = vst.msk [vmem:[%s2697_s10 + $0x2f0] sm:$0xff] %vm1561_vm2, %v1527_v7  ;;  %v1530_v13 = vmax.f32 %v1280_v9, 0.0  ;;  %v1275_v15 = vadd.f32 %v2688_v2, %v1274_v11  ;;  %v2100_v16 = vpop.f32.mrf.mxu0 }
 0x136   : > { %v2196_v17 = vpop.f32.mrf.mxu1  ;;  %1595 = vst.msk [vmem:[%s2697_s10 + $0x108] sm:$0xff] %vm1561_vm2, %v1466_v12  ;;  %v1465_v18 = vmax.f32 %v955_v14, 0.0  ;;  %v970_v20 = vadd.f32 %v2100_v16, %v2688_v2 }
 0x137   : > { %1659 = vst.msk [vmem:[%s2697_s10 + $0x308] sm:$0xff] %vm1561_vm2, %v1530_v13  ;;  %v1529_v19 = vmax.f32 %v1275_v15, 0.0  ;;  %v1290_v21 = vadd.f32 %v2196_v17, %v2688_v2  ;;  %v964_v22 = vpop.f32.mrf.mxu0 }
 0x138   : > { %v1284_v23 = vpop.f32.mrf.mxu1  ;;  %1594 = vst.msk [vmem:[%s2697_s10 + $0x100] sm:$0xff] %vm1561_vm2, %v1465_v18  ;;  %v1468_v24 = vmax.f32 %v970_v20, 0.0  ;;  %v965_v26 = vadd.f32 %v2688_v2, %v964_v22 }
 0x139   : > { %1658 = vst.msk [vmem:[%s2697_s10 + $0x300] sm:$0xff] %vm1561_vm2, %v1529_v19  ;;  %v1532_v25 = vmax.f32 %v1290_v21, 0.0  ;;  %v1285_v27 = vadd.f32 %v2688_v2, %v1284_v23  ;;  %v2103_v28 = vpop.f32.mrf.mxu0 }
 0x13a   : > { %v2199_v29 = vpop.f32.mrf.mxu1  ;;  %1597 = vst.msk [vmem:[%s2697_s10 + $0x118] sm:$0xff] %vm1561_vm2, %v1468_v24  ;;  %v1467_v30 = vmax.f32 %v965_v26, 0.0  ;;  %v980_v32 = vadd.f32 %v2103_v28, %v2688_v2 }
 0x13b   : > { %1661 = vst.msk [vmem:[%s2697_s10 + $0x318] sm:$0xff] %vm1561_vm2, %v1532_v25  ;;  %v1531_v31 = vmax.f32 %v1285_v27, 0.0  ;;  %v1300_v33 = vadd.f32 %v2199_v29, %v2688_v2  ;;  %v974_v34 = vpop.f32.mrf.mxu0 }
 0x13c   : > { %v1294_v35 = vpop.f32.mrf.mxu1  ;;  %1596 = vst.msk [vmem:[%s2697_s10 + $0x110] sm:$0xff] %vm1561_vm2, %v1467_v30  ;;  %v1470_v36 = vmax.f32 %v980_v32, 0.0  ;;  %v975_v38 = vadd.f32 %v2688_v2, %v974_v34 }
 0x13d   : > { %1660 = vst.msk [vmem:[%s2697_s10 + $0x310] sm:$0xff] %vm1561_vm2, %v1531_v31  ;;  %v1534_v37 = vmax.f32 %v1300_v33, 0.0  ;;  %v1295_v39 = vadd.f32 %v2688_v2, %v1294_v35  ;;  %v2106_v40 = vpop.f32.mrf.mxu0 }
 0x13e   : > { %v2202_v41 = vpop.f32.mrf.mxu1  ;;  %1599 = vst.msk [vmem:[%s2697_s10 + $0x128] sm:$0xff] %vm1561_vm2, %v1470_v36  ;;  %v1469_v42 = vmax.f32 %v975_v38, 0.0  ;;  %v990_v44 = vadd.f32 %v2106_v40, %v2688_v2 }
 0x13f   : > { %1663 = vst.msk [vmem:[%s2697_s10 + $0x328] sm:$0xff] %vm1561_vm2, %v1534_v37  ;;  %v1533_v43 = vmax.f32 %v1295_v39, 0.0  ;;  %v1310_v45 = vadd.f32 %v2202_v41, %v2688_v2  ;;  %v984_v46 = vpop.f32.mrf.mxu0 }
 0x140   : > { %v1304_v47 = vpop.f32.mrf.mxu1  ;;  %1598 = vst.msk [vmem:[%s2697_s10 + $0x120] sm:$0xff] %vm1561_vm2, %v1469_v42  ;;  %v1472_v48 = vmax.f32 %v990_v44, 0.0  ;;  %v985_v50 = vadd.f32 %v2688_v2, %v984_v46 }
 0x141   : > { %1662 = vst.msk [vmem:[%s2697_s10 + $0x320] sm:$0xff] %vm1561_vm2, %v1533_v43  ;;  %v1536_v49 = vmax.f32 %v1310_v45, 0.0  ;;  %v1305_v51 = vadd.f32 %v2688_v2, %v1304_v47  ;;  %v2109_v52 = vpop.f32.mrf.mxu0 }
 0x142   : > { %v2205_v53 = vpop.f32.mrf.mxu1  ;;  %1601 = vst.msk [vmem:[%s2697_s10 + $0x138] sm:$0xff] %vm1561_vm2, %v1472_v48  ;;  %v1471_v54 = vmax.f32 %v985_v50, 0.0  ;;  %v1000_v56 = vadd.f32 %v2109_v52, %v2688_v2 }
 0x143   : > { %1665 = vst.msk [vmem:[%s2697_s10 + $0x338] sm:$0xff] %vm1561_vm2, %v1536_v49  ;;  %v1535_v55 = vmax.f32 %v1305_v51, 0.0  ;;  %v1320_v57 = vadd.f32 %v2205_v53, %v2688_v2  ;;  %v994_v58 = vpop.f32.mrf.mxu0 }
 0x144   : > { %v1314_v59 = vpop.f32.mrf.mxu1  ;;  %1600 = vst.msk [vmem:[%s2697_s10 + $0x130] sm:$0xff] %vm1561_vm2, %v1471_v54  ;;  %v1474_v60 = vmax.f32 %v1000_v56, 0.0  ;;  %v995_v62 = vadd.f32 %v2688_v2, %v994_v58 }
 0x145   : > { %1664 = vst.msk [vmem:[%s2697_s10 + $0x330] sm:$0xff] %vm1561_vm2, %v1535_v55  ;;  %v1538_v61 = vmax.f32 %v1320_v57, 0.0  ;;  %v1315_v63 = vadd.f32 %v2688_v2, %v1314_v59  ;;  %v2112_v0 = vpop.f32.mrf.mxu0 }
 0x146   : > { %v2208_v1 = vpop.f32.mrf.mxu1  ;;  %1603 = vst.msk [vmem:[%s2697_s10 + $0x148] sm:$0xff] %vm1561_vm2, %v1474_v60  ;;  %v1473_v3 = vmax.f32 %v995_v62, 0.0  ;;  %v1010_v5 = vadd.f32 %v2112_v0, %v2688_v2 }
 0x147   : > { %1667 = vst.msk [vmem:[%s2697_s10 + $0x348] sm:$0xff] %vm1561_vm2, %v1538_v61  ;;  %v1537_v4 = vmax.f32 %v1315_v63, 0.0  ;;  %v1330_v6 = vadd.f32 %v2208_v1, %v2688_v2  ;;  %v1004_v7 = vpop.f32.mrf.mxu0 }
 0x148   : > { %v1324_v8 = vpop.f32.mrf.mxu1  ;;  %1602 = vst.msk [vmem:[%s2697_s10 + $0x140] sm:$0xff] %vm1561_vm2, %v1473_v3  ;;  %v1476_v9 = vmax.f32 %v1010_v5, 0.0  ;;  %v1005_v11 = vadd.f32 %v2688_v2, %v1004_v7 }
 0x149   : > { %1666 = vst.msk [vmem:[%s2697_s10 + $0x340] sm:$0xff] %vm1561_vm2, %v1537_v4  ;;  %v1540_v10 = vmax.f32 %v1330_v6, 0.0  ;;  %v1325_v12 = vadd.f32 %v2688_v2, %v1324_v8  ;;  %v2115_v13 = vpop.f32.mrf.mxu0 }
 0x14a   : > { %v2211_v14 = vpop.f32.mrf.mxu1  ;;  %1605 = vst.msk [vmem:[%s2697_s10 + $0x158] sm:$0xff] %vm1561_vm2, %v1476_v9  ;;  %v1475_v15 = vmax.f32 %v1005_v11, 0.0  ;;  %v1020_v17 = vadd.f32 %v2115_v13, %v2688_v2 }
 0x14b   : > { %1669 = vst.msk [vmem:[%s2697_s10 + $0x358] sm:$0xff] %vm1561_vm2, %v1540_v10  ;;  %v1539_v16 = vmax.f32 %v1325_v12, 0.0  ;;  %v1340_v18 = vadd.f32 %v2211_v14, %v2688_v2  ;;  %v1014_v19 = vpop.f32.mrf.mxu0 }
 0x14c   : > { %v1334_v20 = vpop.f32.mrf.mxu1  ;;  %1604 = vst.msk [vmem:[%s2697_s10 + $0x150] sm:$0xff] %vm1561_vm2, %v1475_v15  ;;  %v1478_v21 = vmax.f32 %v1020_v17, 0.0  ;;  %v1015_v23 = vadd.f32 %v2688_v2, %v1014_v19 }
 0x14d   : > { %1668 = vst.msk [vmem:[%s2697_s10 + $0x350] sm:$0xff] %vm1561_vm2, %v1539_v16  ;;  %v1542_v22 = vmax.f32 %v1340_v18, 0.0  ;;  %v1335_v24 = vadd.f32 %v2688_v2, %v1334_v20  ;;  %v2118_v25 = vpop.f32.mrf.mxu0 }
 0x14e   : > { %v2214_v26 = vpop.f32.mrf.mxu1  ;;  %1607 = vst.msk [vmem:[%s2697_s10 + $0x168] sm:$0xff] %vm1561_vm2, %v1478_v21  ;;  %v1477_v27 = vmax.f32 %v1015_v23, 0.0  ;;  %v1030_v29 = vadd.f32 %v2118_v25, %v2688_v2 }
 0x14f   : > { %1671 = vst.msk [vmem:[%s2697_s10 + $0x368] sm:$0xff] %vm1561_vm2, %v1542_v22  ;;  %v1541_v28 = vmax.f32 %v1335_v24, 0.0  ;;  %v1350_v30 = vadd.f32 %v2214_v26, %v2688_v2  ;;  %v1024_v31 = vpop.f32.mrf.mxu0 }
 0x150   : > { %v1344_v32 = vpop.f32.mrf.mxu1  ;;  %1606 = vst.msk [vmem:[%s2697_s10 + $0x160] sm:$0xff] %vm1561_vm2, %v1477_v27  ;;  %v1480_v33 = vmax.f32 %v1030_v29, 0.0  ;;  %v1025_v35 = vadd.f32 %v2688_v2, %v1024_v31 }
 0x151   : > { %1670 = vst.msk [vmem:[%s2697_s10 + $0x360] sm:$0xff] %vm1561_vm2, %v1541_v28  ;;  %v1544_v34 = vmax.f32 %v1350_v30, 0.0  ;;  %v1345_v36 = vadd.f32 %v2688_v2, %v1344_v32  ;;  %v2121_v37 = vpop.f32.mrf.mxu0 }
 0x152   : > { %v2217_v38 = vpop.f32.mrf.mxu1  ;;  %1609 = vst.msk [vmem:[%s2697_s10 + $0x178] sm:$0xff] %vm1561_vm2, %v1480_v33  ;;  %v1479_v39 = vmax.f32 %v1025_v35, 0.0  ;;  %v1040_v41 = vadd.f32 %v2121_v37, %v2688_v2 }
 0x153   : > { %1673 = vst.msk [vmem:[%s2697_s10 + $0x378] sm:$0xff] %vm1561_vm2, %v1544_v34  ;;  %v1543_v40 = vmax.f32 %v1345_v36, 0.0  ;;  %v1360_v42 = vadd.f32 %v2217_v38, %v2688_v2  ;;  %v1034_v43 = vpop.f32.mrf.mxu0 }
 0x154   : > { %v1354_v44 = vpop.f32.mrf.mxu1  ;;  %1608 = vst.msk [vmem:[%s2697_s10 + $0x170] sm:$0xff] %vm1561_vm2, %v1479_v39  ;;  %v1482_v45 = vmax.f32 %v1040_v41, 0.0  ;;  %v1035_v47 = vadd.f32 %v2688_v2, %v1034_v43 }
 0x155   : > { %1672 = vst.msk [vmem:[%s2697_s10 + $0x370] sm:$0xff] %vm1561_vm2, %v1543_v40  ;;  %v1546_v46 = vmax.f32 %v1360_v42, 0.0  ;;  %v1355_v48 = vadd.f32 %v2688_v2, %v1354_v44  ;;  %v2124_v49 = vpop.f32.mrf.mxu0 }
 0x156   : > { %v2220_v50 = vpop.f32.mrf.mxu1  ;;  %1611 = vst.msk [vmem:[%s2697_s10 + $0x188] sm:$0xff] %vm1561_vm2, %v1482_v45  ;;  %v1481_v51 = vmax.f32 %v1035_v47, 0.0  ;;  %v1050_v53 = vadd.f32 %v2124_v49, %v2688_v2 }
 0x157   : > { %1675 = vst.msk [vmem:[%s2697_s10 + $0x388] sm:$0xff] %vm1561_vm2, %v1546_v46  ;;  %v1545_v52 = vmax.f32 %v1355_v48, 0.0  ;;  %v1370_v54 = vadd.f32 %v2220_v50, %v2688_v2  ;;  %v1044_v55 = vpop.f32.mrf.mxu0 }
 0x158   : > { %v1364_v56 = vpop.f32.mrf.mxu1  ;;  %1610 = vst.msk [vmem:[%s2697_s10 + $0x180] sm:$0xff] %vm1561_vm2, %v1481_v51  ;;  %v1484_v57 = vmax.f32 %v1050_v53, 0.0  ;;  %v1045_v59 = vadd.f32 %v2688_v2, %v1044_v55 }
 0x159   : > { %1674 = vst.msk [vmem:[%s2697_s10 + $0x380] sm:$0xff] %vm1561_vm2, %v1545_v52  ;;  %v1548_v58 = vmax.f32 %v1370_v54, 0.0  ;;  %v1365_v60 = vadd.f32 %v2688_v2, %v1364_v56  ;;  %v2127_v61 = vpop.f32.mrf.mxu0 }
 0x15a   : > { %v2223_v62 = vpop.f32.mrf.mxu1  ;;  %1613 = vst.msk [vmem:[%s2697_s10 + $0x198] sm:$0xff] %vm1561_vm2, %v1484_v57  ;;  %v1483_v63 = vmax.f32 %v1045_v59, 0.0  ;;  %v1060_v1 = vadd.f32 %v2127_v61, %v2688_v2 }
 0x15b   : > { %1677 = vst.msk [vmem:[%s2697_s10 + $0x398] sm:$0xff] %vm1561_vm2, %v1548_v58  ;;  %v1547_v0 = vmax.f32 %v1365_v60, 0.0  ;;  %v1380_v3 = vadd.f32 %v2223_v62, %v2688_v2  ;;  %v1054_v4 = vpop.f32.mrf.mxu0 }
 0x15c   : > { %v1374_v5 = vpop.f32.mrf.mxu1  ;;  %1612 = vst.msk [vmem:[%s2697_s10 + $0x190] sm:$0xff] %vm1561_vm2, %v1483_v63  ;;  %v1486_v6 = vmax.f32 %v1060_v1, 0.0  ;;  %v1055_v8 = vadd.f32 %v2688_v2, %v1054_v4 }
 0x15d   : > { %1676 = vst.msk [vmem:[%s2697_s10 + $0x390] sm:$0xff] %vm1561_vm2, %v1547_v0  ;;  %v1550_v7 = vmax.f32 %v1380_v3, 0.0  ;;  %v1375_v9 = vadd.f32 %v2688_v2, %v1374_v5  ;;  %v2130_v10 = vpop.f32.mrf.mxu0 }
 0x15e   : > { %v2226_v11 = vpop.f32.mrf.mxu1  ;;  %1615 = vst.msk [vmem:[%s2697_s10 + $0x1a8] sm:$0xff] %vm1561_vm2, %v1486_v6  ;;  %v1485_v12 = vmax.f32 %v1055_v8, 0.0  ;;  %v1070_v14 = vadd.f32 %v2130_v10, %v2688_v2 }
 0x15f   : > { %1679 = vst.msk [vmem:[%s2697_s10 + $0x3a8] sm:$0xff] %vm1561_vm2, %v1550_v7  ;;  %v1549_v13 = vmax.f32 %v1375_v9, 0.0  ;;  %v1390_v15 = vadd.f32 %v2226_v11, %v2688_v2  ;;  %v1064_v16 = vpop.f32.mrf.mxu0 }
 0x160   : > { %v1384_v17 = vpop.f32.mrf.mxu1  ;;  %1614 = vst.msk [vmem:[%s2697_s10 + $0x1a0] sm:$0xff] %vm1561_vm2, %v1485_v12  ;;  %v1488_v18 = vmax.f32 %v1070_v14, 0.0  ;;  %v1065_v20 = vadd.f32 %v2688_v2, %v1064_v16 }
 0x161   : > { %1678 = vst.msk [vmem:[%s2697_s10 + $0x3a0] sm:$0xff] %vm1561_vm2, %v1549_v13  ;;  %v1552_v19 = vmax.f32 %v1390_v15, 0.0  ;;  %v1385_v21 = vadd.f32 %v2688_v2, %v1384_v17  ;;  %v2133_v22 = vpop.f32.mrf.mxu0 }
 0x162   : > { %v2229_v23 = vpop.f32.mrf.mxu1  ;;  %1617 = vst.msk [vmem:[%s2697_s10 + $0x1b8] sm:$0xff] %vm1561_vm2, %v1488_v18  ;;  %v1487_v24 = vmax.f32 %v1065_v20, 0.0  ;;  %v1080_v26 = vadd.f32 %v2133_v22, %v2688_v2 }
 0x163   : > { %1681 = vst.msk [vmem:[%s2697_s10 + $0x3b8] sm:$0xff] %vm1561_vm2, %v1552_v19  ;;  %v1551_v25 = vmax.f32 %v1385_v21, 0.0  ;;  %v1400_v27 = vadd.f32 %v2229_v23, %v2688_v2  ;;  %v1074_v28 = vpop.f32.mrf.mxu0 }
 0x164   : > { %v1394_v29 = vpop.f32.mrf.mxu1  ;;  %1616 = vst.msk [vmem:[%s2697_s10 + $0x1b0] sm:$0xff] %vm1561_vm2, %v1487_v24  ;;  %v1490_v30 = vmax.f32 %v1080_v26, 0.0  ;;  %v1075_v32 = vadd.f32 %v2688_v2, %v1074_v28 }
 0x165   : > { %1680 = vst.msk [vmem:[%s2697_s10 + $0x3b0] sm:$0xff] %vm1561_vm2, %v1551_v25  ;;  %v1554_v31 = vmax.f32 %v1400_v27, 0.0  ;;  %v1395_v33 = vadd.f32 %v2688_v2, %v1394_v29  ;;  %v2136_v34 = vpop.f32.mrf.mxu0 }
 0x166   : > { %v2232_v35 = vpop.f32.mrf.mxu1  ;;  %1619 = vst.msk [vmem:[%s2697_s10 + $0x1c8] sm:$0xff] %vm1561_vm2, %v1490_v30  ;;  %v1489_v36 = vmax.f32 %v1075_v32, 0.0  ;;  %v1090_v38 = vadd.f32 %v2136_v34, %v2688_v2 }
 0x167   : > { %1683 = vst.msk [vmem:[%s2697_s10 + $0x3c8] sm:$0xff] %vm1561_vm2, %v1554_v31  ;;  %v1553_v37 = vmax.f32 %v1395_v33, 0.0  ;;  %v1410_v39 = vadd.f32 %v2232_v35, %v2688_v2  ;;  %v1084_v40 = vpop.f32.mrf.mxu0 }
 0x168   : > { %v1404_v41 = vpop.f32.mrf.mxu1  ;;  %1618 = vst.msk [vmem:[%s2697_s10 + $0x1c0] sm:$0xff] %vm1561_vm2, %v1489_v36  ;;  %v1492_v42 = vmax.f32 %v1090_v38, 0.0  ;;  %v1085_v44 = vadd.f32 %v2688_v2, %v1084_v40 }
 0x169   : > { %1682 = vst.msk [vmem:[%s2697_s10 + $0x3c0] sm:$0xff] %vm1561_vm2, %v1553_v37  ;;  %v1556_v43 = vmax.f32 %v1410_v39, 0.0  ;;  %v1405_v45 = vadd.f32 %v2688_v2, %v1404_v41  ;;  %v2139_v46 = vpop.f32.mrf.mxu0 }
 0x16a   : > { %v2235_v47 = vpop.f32.mrf.mxu1  ;;  %1621 = vst.msk [vmem:[%s2697_s10 + $0x1d8] sm:$0xff] %vm1561_vm2, %v1492_v42  ;;  %v1491_v48 = vmax.f32 %v1085_v44, 0.0  ;;  %v1100_v50 = vadd.f32 %v2139_v46, %v2688_v2 }
 0x16b   : > { %1685 = vst.msk [vmem:[%s2697_s10 + $0x3d8] sm:$0xff] %vm1561_vm2, %v1556_v43  ;;  %v1555_v49 = vmax.f32 %v1405_v45, 0.0  ;;  %v1420_v51 = vadd.f32 %v2235_v47, %v2688_v2  ;;  %v1094_v52 = vpop.f32.mrf.mxu0 }
 0x16c   : > { %v1414_v53 = vpop.f32.mrf.mxu1  ;;  %1620 = vst.msk [vmem:[%s2697_s10 + $0x1d0] sm:$0xff] %vm1561_vm2, %v1491_v48  ;;  %v1494_v54 = vmax.f32 %v1100_v50, 0.0  ;;  %v1095_v56 = vadd.f32 %v2688_v2, %v1094_v52 }
 0x16d   : > { %1684 = vst.msk [vmem:[%s2697_s10 + $0x3d0] sm:$0xff] %vm1561_vm2, %v1555_v49  ;;  %v1558_v55 = vmax.f32 %v1420_v51, 0.0  ;;  %v1415_v57 = vadd.f32 %v2688_v2, %v1414_v53  ;;  %v2142_v58 = vpop.f32.mrf.mxu0 }
 0x16e   : > { %v2238_v59 = vpop.f32.mrf.mxu1  ;;  %1623 = vst.msk [vmem:[%s2697_s10 + $0x1e8] sm:$0xff] %vm1561_vm2, %v1494_v54  ;;  %v1493_v60 = vmax.f32 %v1095_v56, 0.0  ;;  %v1110_v62 = vadd.f32 %v2142_v58, %v2688_v2 }
 0x16f   : > { %1687 = vst.msk [vmem:[%s2697_s10 + $0x3e8] sm:$0xff] %vm1561_vm2, %v1558_v55  ;;  %v1557_v61 = vmax.f32 %v1415_v57, 0.0  ;;  %v1430_v63 = vadd.f32 %v2238_v59, %v2688_v2  ;;  %v1104_v0 = vpop.f32.mrf.mxu0 }
 0x170   : > { %v1424_v1 = vpop.f32.mrf.mxu1  ;;  %1622 = vst.msk [vmem:[%s2697_s10 + $0x1e0] sm:$0xff] %vm1561_vm2, %v1493_v60  ;;  %v1496_v3 = vmax.f32 %v1110_v62, 0.0  ;;  %v1105_v5 = vadd.f32 %v2688_v2, %v1104_v0 }
 0x171   : > { %1686 = vst.msk [vmem:[%s2697_s10 + $0x3e0] sm:$0xff] %vm1561_vm2, %v1557_v61  ;;  %v1560_v4 = vmax.f32 %v1430_v63, 0.0  ;;  %v1425_v6 = vadd.f32 %v2688_v2, %v1424_v1 }
 0x172   : > { %1625 = vst.msk [vmem:[%s2697_s10 + $0x1f8] sm:$0xff] %vm1561_vm2, %v1496_v3  ;;  %v1495_v7 = vmax.f32 %v1105_v5, 0.0 }
 0x173   : > { %1689 = vst.msk [vmem:[%s2697_s10 + $0x3f8] sm:$0xff] %vm1561_vm2, %v1560_v4  ;;  %v1559_v8 = vmax.f32 %v1425_v6, 0.0 }
 0x174   : > { %1624 = vst.msk [vmem:[%s2697_s10 + $0x1f0] sm:$0xff] %vm1561_vm2, %v1495_v7 }
 0x175   : > { %1688 = vst.msk [vmem:[%s2697_s10 + $0x3f0] sm:$0xff] %vm1561_vm2, %v1559_v8 }
 0x176 PF: > { %s15_s12 = sadd.s32 1, %s2340_s12  }
 0x177   : > { %p12_p2 = scmp.ge.s32.totalorder %s15_s12, 10  }
 0x179   :  { %14 = sbr.rel (!%p12_p2) target bundleno = 2 (0x2), region = 71 }
 0x17e   :  { %1712 = vsyncpa [#allocation3], 1 }
 0x17f   :  { %1714 = vsyncpa [#allocation3 + $0x1], 1 }
 0x180   :  { %1715 = vsyncpa [#allocation5], 1 }

// kernel: net_forward.6
= control target key start
LH: loop header
LB: loop body
LE: loop exit
PB: predicated region body
PF: predicated region fallthrough
CT: control target
= control target key end

     0   :  { %s1293_s6 = smov 0   ;;  %s2398_s0 = inlined_call_operand.vmem [shape: f32[2,30,2,30,128], index: 0, kind: input, shape index: {}]   ;;  %s2399_s1 = inlined_call_operand.vmem [shape: f32[2,30,30,64], index: 1, kind: output, shape index: {}]  }
   0x1 LB: > { %s1254_s7 = sadd.s32 4294967295, %s1280_s6   ;;  %p1258_p0 = scmp.ge.s32.totalorder %s1280_s6, 1  ;;  %s1280_s6 = sphi %s1293_s6, %s11_s6  }
   0x2   : > { %p87_p1 = scmp.lt.s32.totalorder %s1280_s6, 3 }
   0x4   : > { %p88_p2 = pnand %p1258_p0, %p87_p1 }
   0x6   : > { %91 = sbr.rel (%p88_p2) target bundleno = 376 (0x178), region = 24 }
   0xb   : > { %p107_p3 = scmp.lt.s32.totalorder %s1254_s7, 1  ;;  %s1282_s12 = smov 64   ;;  %vm1077_vm0 = vcmask 523264   ;;  %vm1081_vm1 = vcmask 521216  }
   0xd   : > { %s2446_s7 = smov (!%p107_p3, %s1254_s7), 1 }
   0xe   : > { %s1263_s8 = smul.u32 1920, %s2446_s7 }
   0xf   : > { %s1264_s13 = smul.u32 960, %s2446_s7 }
  0x10   : > { %s1307_s11 = scalar_lea.vmem %s2398_s0, %s1263_s8 }
  0x11   : > { %v119_v0 = vld [vmem:[%s1307_s11 + $0x10] sm:$0xff]  ;;  %v117_v2 = vld [vmem:[%s1307_s11] sm:$0xff]  ;;  %v120_v5 = vld [vmem:[%s1307_s11 + $0x18] sm:$0x3f]  ;;  %s1671_s16 = scalar_lea.vmem %s2399_s1, %s1264_s13 }
  0x12   : > { %v123_v1 = vld [vmem:[%s1307_s11 + $0x30] sm:$0xff]  ;;  %v121_v4 = vld [vmem:[%s1307_s11 + $0x20] sm:$0xff]  ;;  %v124_v6 = vld [vmem:[%s1307_s11 + $0x38] sm:$0x3f] }
  0x13   : > { %v1312_v3 = vmax.f32 %v119_v0, %v123_v1  ;;  %v1317_v7 = vmax.f32 %v117_v2, %v121_v4  ;;  %v118_v8 = vld [vmem:[%s1307_s11 + $0x8] sm:$0xff]  ;;  %v1323_v10 = vmax.f32 %v120_v5, %v124_v6  ;;  %v125_v14 = vld [vmem:[%s1307_s11 + $0x40] sm:$0xff]  ;;  %v128_v18 = vld [vmem:[%s1307_s11 + $0x58] sm:$0x3f] }
  0x14   : > { %v122_v9 = vld [vmem:[%s1307_s11 + $0x28] sm:$0xff]  ;;  %v129_v15 = vld [vmem:[%s1307_s11 + $0x60] sm:$0xff]  ;;  %v132_v19 = vld [vmem:[%s1307_s11 + $0x78] sm:$0x3f] }
  0x15   : > { %601 = vrot.lane.b32.xlu1 %v1312_v3, %s1282_s12  ;;  %597 = vrot.lane.b32.xlu0 %v1317_v7, %s1282_s12  ;;  %v1327_v11 = vmax.f32 %v118_v8, %v122_v9  ;;  %v126_v12 = vld [vmem:[%s1307_s11 + $0x48] sm:$0xff]  ;;  %v1339_v17 = vmax.f32 %v125_v14, %v129_v15  ;;  %v127_v20 = vld [vmem:[%s1307_s11 + $0x50] sm:$0xff]  ;;  %v1347_v22 = vmax.f32 %v128_v18, %v132_v19 }
  0x16   : > { %v130_v13 = vld [vmem:[%s1307_s11 + $0x68] sm:$0xff]  ;;  %v131_v21 = vld [vmem:[%s1307_s11 + $0x70] sm:$0xff]  ;;  %v133_v26 = vld [vmem:[%s1307_s11 + $0x80] sm:$0xff] }
  0x17   : > { %v1335_v16 = vmax.f32 %v126_v12, %v130_v13  ;;  %v1351_v23 = vmax.f32 %v127_v20, %v131_v21  ;;  %v134_v24 = vld [vmem:[%s1307_s11 + $0x88] sm:$0xff]  ;;  %v137_v27 = vld [vmem:[%s1307_s11 + $0xa0] sm:$0xff]  ;;  %v136_v30 = vld [vmem:[%s1307_s11 + $0x98] sm:$0x3f] }
  0x18   : > { %v138_v25 = vld [vmem:[%s1307_s11 + $0xa8] sm:$0xff]  ;;  %v1363_v29 = vmax.f32 %v133_v26, %v137_v27  ;;  %v140_v31 = vld [vmem:[%s1307_s11 + $0xb8] sm:$0x3f]  ;;  %v135_v32 = vld [vmem:[%s1307_s11 + $0x90] sm:$0xff] }
  0x19   : > { %603 = vrot.lane.b32.xlu1 %v1323_v10, %s1282_s12  ;;  %599 = vrot.lane.b32.xlu0 %v1327_v11, %s1282_s12  ;;  %v1359_v28 = vmax.f32 %v134_v24, %v138_v25  ;;  %v139_v33 = vld [vmem:[%s1307_s11 + $0xb0] sm:$0xff]  ;;  %v1371_v34 = vmax.f32 %v136_v30, %v140_v31  ;;  %v142_v36 = vld [vmem:[%s1307_s11 + $0xc8] sm:$0xff] }
  0x1a   : > { %v1375_v35 = vmax.f32 %v135_v32, %v139_v33  ;;  %v146_v37 = vld [vmem:[%s1307_s11 + $0xe8] sm:$0xff]  ;;  %v141_v38 = vld [vmem:[%s1307_s11 + $0xc0] sm:$0xff]  ;;  %v144_v42 = vld [vmem:[%s1307_s11 + $0xd8] sm:$0x3f] }
  0x1b   : > { %v145_v39 = vld [vmem:[%s1307_s11 + $0xe0] sm:$0xff]  ;;  %v1383_v40 = vmax.f32 %v142_v36, %v146_v37  ;;  %v148_v43 = vld [vmem:[%s1307_s11 + $0xf8] sm:$0x3f]  ;;  %v143_v44 = vld [vmem:[%s1307_s11 + $0xd0] sm:$0xff] }
  0x1c   : > { %v1387_v41 = vmax.f32 %v141_v38, %v145_v39  ;;  %v147_v45 = vld [vmem:[%s1307_s11 + $0xf0] sm:$0xff]  ;;  %v1395_v46 = vmax.f32 %v144_v42, %v148_v43  ;;  %v150_v48 = vld [vmem:[%s1307_s11 + $0x108] sm:$0xff]  ;;  %v149_v50 = vld [vmem:[%s1307_s11 + $0x100] sm:$0xff] }
  0x1d   : > { %607 = vrot.lane.b32.xlu1 %v1335_v16, %s1282_s12  ;;  %605 = vrot.lane.b32.xlu0 %v1339_v17, %s1282_s12  ;;  %v1399_v47 = vmax.f32 %v143_v44, %v147_v45  ;;  %v154_v49 = vld [vmem:[%s1307_s11 + $0x128] sm:$0xff]  ;;  %v153_v51 = vld [vmem:[%s1307_s11 + $0x120] sm:$0xff] }
  0x1e   : > { %v1407_v52 = vmax.f32 %v150_v48, %v154_v49  ;;  %v1411_v53 = vmax.f32 %v149_v50, %v153_v51  ;;  %v152_v54 = vld [vmem:[%s1307_s11 + $0x118] sm:$0x3f]  ;;  %v151_v56 = vld [vmem:[%s1307_s11 + $0x110] sm:$0xff]  ;;  %v158_v60 = vld [vmem:[%s1307_s11 + $0x148] sm:$0xff] }
  0x1f   : > { %v156_v55 = vld [vmem:[%s1307_s11 + $0x138] sm:$0x3f]  ;;  %v155_v57 = vld [vmem:[%s1307_s11 + $0x130] sm:$0xff]  ;;  %v162_v61 = vld [vmem:[%s1307_s11 + $0x168] sm:$0xff] }
  0x20   : > { %v1419_v58 = vmax.f32 %v152_v54, %v156_v55  ;;  %v1423_v59 = vmax.f32 %v151_v56, %v155_v57  ;;  %v157_v62 = vld [vmem:[%s1307_s11 + $0x140] sm:$0xff]  ;;  %v1431_v0 = vmax.f32 %v158_v60, %v162_v61  ;;  %v160_v2 = vld [vmem:[%s1307_s11 + $0x158] sm:$0x3f]  ;;  %v159_v5 = vld [vmem:[%s1307_s11 + $0x150] sm:$0xff] }
  0x21   : > { %611 = vrot.lane.b32.xlu1 %v1347_v22, %s1282_s12  ;;  %609 = vrot.lane.b32.xlu0 %v1351_v23, %s1282_s12  ;;  %v161_v63 = vld [vmem:[%s1307_s11 + $0x160] sm:$0xff]  ;;  %v164_v4 = vld [vmem:[%s1307_s11 + $0x178] sm:$0x3f] }
  0x22   : > { %v1435_v1 = vmax.f32 %v157_v62, %v161_v63  ;;  %v163_v6 = vld [vmem:[%s1307_s11 + $0x170] sm:$0xff]  ;;  %v1443_v8 = vmax.f32 %v160_v2, %v164_v4  ;;  %v166_v12 = vld [vmem:[%s1307_s11 + $0x188] sm:$0xff]  ;;  %v165_v14 = vld [vmem:[%s1307_s11 + $0x180] sm:$0xff] }
  0x23   : > { %v1447_v9 = vmax.f32 %v159_v5, %v163_v6  ;;  %v170_v13 = vld [vmem:[%s1307_s11 + $0x1a8] sm:$0xff]  ;;  %v169_v15 = vld [vmem:[%s1307_s11 + $0x1a0] sm:$0xff]  ;;  %v168_v20 = vld [vmem:[%s1307_s11 + $0x198] sm:$0x3f] }
  0x24   : > { %v1455_v18 = vmax.f32 %v166_v12, %v170_v13  ;;  %v1459_v19 = vmax.f32 %v165_v14, %v169_v15  ;;  %v172_v21 = vld [vmem:[%s1307_s11 + $0x1b8] sm:$0x3f]  ;;  %v167_v24 = vld [vmem:[%s1307_s11 + $0x190] sm:$0xff]  ;;  %v174_v30 = vld [vmem:[%s1307_s11 + $0x1c8] sm:$0xff] }
  0x25   : > { %615 = vrot.lane.b32.xlu1 %v1359_v28, %s1282_s12  ;;  %613 = vrot.lane.b32.xlu0 %v1363_v29, %s1282_s12  ;;  %v171_v25 = vld [vmem:[%s1307_s11 + $0x1b0] sm:$0xff]  ;;  %v1467_v26 = vmax.f32 %v168_v20, %v172_v21  ;;  %v178_v31 = vld [vmem:[%s1307_s11 + $0x1e8] sm:$0xff] }
  0x26   : > { %v1471_v27 = vmax.f32 %v167_v24, %v171_v25  ;;  %v173_v32 = vld [vmem:[%s1307_s11 + $0x1c0] sm:$0xff]  ;;  %v1479_v36 = vmax.f32 %v174_v30, %v178_v31  ;;  %v176_v38 = vld [vmem:[%s1307_s11 + $0x1d8] sm:$0x3f]  ;;  %v175_v42 = vld [vmem:[%s1307_s11 + $0x1d0] sm:$0xff] }
  0x27   : > { %v177_v33 = vld [vmem:[%s1307_s11 + $0x1e0] sm:$0xff]  ;;  %v180_v39 = vld [vmem:[%s1307_s11 + $0x1f8] sm:$0x3f]  ;;  %v179_v43 = vld [vmem:[%s1307_s11 + $0x1f0] sm:$0xff] }
  0x28   : > { %v1483_v37 = vmax.f32 %v173_v32, %v177_v33  ;;  %v1491_v44 = vmax.f32 %v176_v38, %v180_v39  ;;  %v1495_v45 = vmax.f32 %v175_v42, %v179_v43  ;;  %v182_v48 = vld [vmem:[%s1307_s11 + $0x208] sm:$0xff]  ;;  %v181_v50 = vld [vmem:[%s1307_s11 + $0x200] sm:$0xff]  ;;  %v184_v56 = vld [vmem:[%s1307_s11 + $0x218] sm:$0x3f] }
  0x29   : > { %619 = vrot.lane.b32.xlu1 %v1371_v34, %s1282_s12  ;;  %617 = vrot.lane.b32.xlu0 %v1375_v35, %s1282_s12  ;;  %v186_v49 = vld [vmem:[%s1307_s11 + $0x228] sm:$0xff]  ;;  %v185_v51 = vld [vmem:[%s1307_s11 + $0x220] sm:$0xff] }
  0x2a   : > { %v1503_v54 = vmax.f32 %v182_v48, %v186_v49  ;;  %v1507_v55 = vmax.f32 %v181_v50, %v185_v51  ;;  %v188_v57 = vld [vmem:[%s1307_s11 + $0x238] sm:$0x3f]  ;;  %v183_v60 = vld [vmem:[%s1307_s11 + $0x210] sm:$0xff]  ;;  %v190_v2 = vld [vmem:[%s1307_s11 + $0x248] sm:$0xff] }
  0x2b   : > { %v187_v61 = vld [vmem:[%s1307_s11 + $0x230] sm:$0xff]  ;;  %v1515_v62 = vmax.f32 %v184_v56, %v188_v57  ;;  %v194_v4 = vld [vmem:[%s1307_s11 + $0x268] sm:$0xff]  ;;  %v189_v5 = vld [vmem:[%s1307_s11 + $0x240] sm:$0xff] }
  0x2c   : > { %v1519_v63 = vmax.f32 %v183_v60, %v187_v61  ;;  %v193_v6 = vld [vmem:[%s1307_s11 + $0x260] sm:$0xff]  ;;  %v1527_v12 = vmax.f32 %v190_v2, %v194_v4  ;;  %v192_v14 = vld [vmem:[%s1307_s11 + $0x258] sm:$0x3f]  ;;  %v191_v20 = vld [vmem:[%s1307_s11 + $0x250] sm:$0xff] }
  0x2d   : > { %623 = vrot.lane.b32.xlu1 %v1383_v40, %s1282_s12  ;;  %621 = vrot.lane.b32.xlu0 %v1387_v41, %s1282_s12  ;;  %v1531_v13 = vmax.f32 %v189_v5, %v193_v6  ;;  %v196_v15 = vld [vmem:[%s1307_s11 + $0x278] sm:$0x3f]  ;;  %v195_v21 = vld [vmem:[%s1307_s11 + $0x270] sm:$0xff] }
  0x2e   : > { %v1539_v24 = vmax.f32 %v192_v14, %v196_v15  ;;  %v1543_v25 = vmax.f32 %v191_v20, %v195_v21  ;;  %v198_v30 = vld [vmem:[%s1307_s11 + $0x288] sm:$0xff]  ;;  %v197_v32 = vld [vmem:[%s1307_s11 + $0x280] sm:$0xff]  ;;  %v200_v42 = vld [vmem:[%s1307_s11 + $0x298] sm:$0x3f] }
  0x2f   : > { %v202_v31 = vld [vmem:[%s1307_s11 + $0x2a8] sm:$0xff]  ;;  %v201_v33 = vld [vmem:[%s1307_s11 + $0x2a0] sm:$0xff]  ;;  %v204_v43 = vld [vmem:[%s1307_s11 + $0x2b8] sm:$0x3f] }
  0x30   : > { %v1551_v38 = vmax.f32 %v198_v30, %v202_v31  ;;  %v1555_v39 = vmax.f32 %v197_v32, %v201_v33  ;;  %v199_v48 = vld [vmem:[%s1307_s11 + $0x290] sm:$0xff]  ;;  %v1563_v50 = vmax.f32 %v200_v42, %v204_v43  ;;  %v206_v56 = vld [vmem:[%s1307_s11 + $0x2c8] sm:$0xff]  ;;  %v205_v60 = vld [vmem:[%s1307_s11 + $0x2c0] sm:$0xff] }
  0x31   : > { %627 = vrot.lane.b32.xlu1 %v1395_v46, %s1282_s12  ;;  %625 = vrot.lane.b32.xlu0 %v1399_v47, %s1282_s12  ;;  %v203_v49 = vld [vmem:[%s1307_s11 + $0x2b0] sm:$0xff]  ;;  %v210_v57 = vld [vmem:[%s1307_s11 + $0x2e8] sm:$0xff] }
  0x32   : > { %v1567_v51 = vmax.f32 %v199_v48, %v203_v49  ;;  %v209_v61 = vld [vmem:[%s1307_s11 + $0x2e0] sm:$0xff]  ;;  %v1575_v2 = vmax.f32 %v206_v56, %v210_v57  ;;  %v208_v5 = vld [vmem:[%s1307_s11 + $0x2d8] sm:$0x3f]  ;;  %v207_v14 = vld [vmem:[%s1307_s11 + $0x2d0] sm:$0xff] }
  0x33   : > { %v1579_v4 = vmax.f32 %v205_v60, %v209_v61  ;;  %v212_v6 = vld [vmem:[%s1307_s11 + $0x2f8] sm:$0x3f]  ;;  %v211_v15 = vld [vmem:[%s1307_s11 + $0x2f0] sm:$0xff]  ;;  %v214_v30 = vld [vmem:[%s1307_s11 + $0x308] sm:$0xff] }
  0x34   : > { %v1587_v20 = vmax.f32 %v208_v5, %v212_v6  ;;  %v1591_v21 = vmax.f32 %v207_v14, %v211_v15  ;;  %v218_v31 = vld [vmem:[%s1307_s11 + $0x328] sm:$0xff]  ;;  %v213_v32 = vld [vmem:[%s1307_s11 + $0x300] sm:$0xff]  ;;  %v216_v48 = vld [vmem:[%s1307_s11 + $0x318] sm:$0x3f] }
  0x35   : > { %631 = vrot.lane.b32.xlu1 %v1407_v52, %s1282_s12  ;;  %629 = vrot.lane.b32.xlu0 %v1411_v53, %s1282_s12  ;;  %v217_v33 = vld [vmem:[%s1307_s11 + $0x320] sm:$0xff]  ;;  %v1599_v42 = vmax.f32 %v214_v30, %v218_v31  ;;  %v220_v49 = vld [vmem:[%s1307_s11 + $0x338] sm:$0x3f] }
  0x36   : > { %v1603_v43 = vmax.f32 %v213_v32, %v217_v33  ;;  %v215_v56 = vld [vmem:[%s1307_s11 + $0x310] sm:$0xff]  ;;  %v1611_v60 = vmax.f32 %v216_v48, %v220_v49  ;;  %v222_v5 = vld [vmem:[%s1307_s11 + $0x348] sm:$0xff]  ;;  %v221_v14 = vld [vmem:[%s1307_s11 + $0x340] sm:$0xff] }
  0x37   : > { %v219_v57 = vld [vmem:[%s1307_s11 + $0x330] sm:$0xff]  ;;  %v226_v6 = vld [vmem:[%s1307_s11 + $0x368] sm:$0xff]  ;;  %v225_v15 = vld [vmem:[%s1307_s11 + $0x360] sm:$0xff] }
  0x38   : > { %v1615_v61 = vmax.f32 %v215_v56, %v219_v57  ;;  %v1623_v30 = vmax.f32 %v222_v5, %v226_v6  ;;  %v1627_v31 = vmax.f32 %v221_v14, %v225_v15  ;;  %v224_v32 = vld [vmem:[%s1307_s11 + $0x358] sm:$0x3f]  ;;  %v223_v48 = vld [vmem:[%s1307_s11 + $0x350] sm:$0xff]  ;;  %v230_v5 = vld [vmem:[%s1307_s11 + $0x388] sm:$0xff] }
  0x39   : > { %635 = vrot.lane.b32.xlu1 %v1419_v58, %s1282_s12  ;;  %633 = vrot.lane.b32.xlu0 %v1423_v59, %s1282_s12  ;;  %v228_v33 = vld [vmem:[%s1307_s11 + $0x378] sm:$0x3f]  ;;  %v227_v49 = vld [vmem:[%s1307_s11 + $0x370] sm:$0xff] }
  0x3a   : > { %2415 = vst [vmem:[#allocation2_spill] sm:$0xff] %v1615_v61  ;;  %2416 = vst [vmem:[#allocation3_spill] sm:$0xff] %v1623_v30  ;;  %v1635_v56 = vmax.f32 %v224_v32, %v228_v33  ;;  %v1639_v57 = vmax.f32 %v223_v48, %v227_v49  ;;  %v234_v6 = vld [vmem:[%s1307_s11 + $0x3a8] sm:$0xff]  ;;  %v229_v14 = vld [vmem:[%s1307_s11 + $0x380] sm:$0xff] }
  0x3b   : > { %2417 = vst [vmem:[#allocation4_spill] sm:$0xff] %v1627_v31  ;;  %v233_v15 = vld [vmem:[%s1307_s11 + $0x3a0] sm:$0xff]  ;;  %v232_v33 = vld [vmem:[%s1307_s11 + $0x398] sm:$0x3f]  ;;  %v231_v49 = vld [vmem:[%s1307_s11 + $0x390] sm:$0xff] }
  0x3c   : > { %2418 = vst [vmem:[#allocation5_spill] sm:$0xff] %v1635_v56  ;;  %2419 = vst [vmem:[#allocation6_spill] sm:$0xff] %v1639_v57  ;;  %v1651_v32 = vmax.f32 %v229_v14, %v233_v15  ;;  %v236_v48 = vld [vmem:[%s1307_s11 + $0x3b8] sm:$0x3f]  ;;  %v242_v14 = vld [vmem:[%s1307_s11 + $0x3e8] sm:$0xff] }
  0x3d   : > { %639 = vrot.lane.b32.xlu1 %v1431_v0, %s1282_s12  ;;  %637 = vrot.lane.b32.xlu0 %v1435_v1, %s1282_s12 }
  0x3e   : > { %2421 = vst [vmem:[#allocation8_spill] sm:$0xff] %v1651_v32 }
  0x41   : > { %643 = vrot.lane.b32.xlu1 %v1443_v8, %s1282_s12  ;;  %641 = vrot.lane.b32.xlu0 %v1447_v9, %s1282_s12 }
  0x45   : > { %647 = vrot.lane.b32.xlu1 %v1455_v18, %s1282_s12  ;;  %645 = vrot.lane.b32.xlu0 %v1459_v19, %s1282_s12 }
  0x49   : > { %651 = vrot.lane.b32.xlu1 %v1467_v26, %s1282_s12  ;;  %649 = vrot.lane.b32.xlu0 %v1471_v27, %s1282_s12 }
  0x4d   : > { %655 = vrot.lane.b32.xlu1 %v1479_v36, %s1282_s12  ;;  %653 = vrot.lane.b32.xlu0 %v1483_v37, %s1282_s12 }
  0x51   : > { %659 = vrot.lane.b32.xlu1 %v1491_v44, %s1282_s12  ;;  %657 = vrot.lane.b32.xlu0 %v1495_v45, %s1282_s12 }
  0x55   : > { %663 = vrot.lane.b32.xlu1 %v1503_v54, %s1282_s12  ;;  %661 = vrot.lane.b32.xlu0 %v1507_v55, %s1282_s12 }
  0x59   : > { %667 = vrot.lane.b32.xlu1 %v1515_v62, %s1282_s12  ;;  %665 = vrot.lane.b32.xlu0 %v1519_v63, %s1282_s12 }
  0x5d   : > { %671 = vrot.lane.b32.xlu1 %v1527_v12, %s1282_s12  ;;  %669 = vrot.lane.b32.xlu0 %v1531_v13, %s1282_s12 }
  0x61   : > { %675 = vrot.lane.b32.xlu1 %v1539_v24, %s1282_s12  ;;  %673 = vrot.lane.b32.xlu0 %v1543_v25, %s1282_s12 }
  0x65   : > { %679 = vrot.lane.b32.xlu1 %v1551_v38, %s1282_s12  ;;  %677 = vrot.lane.b32.xlu0 %v1555_v39, %s1282_s12 }
  0x69   : > { %683 = vrot.lane.b32.xlu1 %v1563_v50, %s1282_s12  ;;  %681 = vrot.lane.b32.xlu0 %v1567_v51, %s1282_s12 }
  0x6d   : > { %687 = vrot.lane.b32.xlu1 %v1575_v2, %s1282_s12  ;;  %685 = vrot.lane.b32.xlu0 %v1579_v4, %s1282_s12 }
  0x71   : > { %691 = vrot.lane.b32.xlu1 %v1587_v20, %s1282_s12  ;;  %689 = vrot.lane.b32.xlu0 %v1591_v21, %s1282_s12 }
  0x75   : > { %695 = vrot.lane.b32.xlu1 %v1599_v42, %s1282_s12  ;;  %693 = vrot.lane.b32.xlu0 %v1603_v43, %s1282_s12 }
  0x79   : > { %699 = vrot.lane.b32.xlu1 %v1611_v60, %s1282_s12  ;;  %697 = vrot.lane.b32.xlu0 %v1615_v61, %s1282_s12  ;;  %v1647_v61 = vmax.f32 %v230_v5, %v234_v6  ;;  %v238_v6 = vld [vmem:[%s1307_s11 + $0x3c8] sm:$0xff] }
  0x7b   : > { %2420 = vst [vmem:[#allocation7_spill] sm:$0xff] %v1647_v61 }
  0x7d   : > { %703 = vrot.lane.b32.xlu1 %v1623_v30, %s1282_s12  ;;  %701 = vrot.lane.b32.xlu0 %v1627_v31, %s1282_s12  ;;  %v235_v31 = vld [vmem:[%s1307_s11 + $0x3b0] sm:$0xff]  ;;  %v1660_v30 = vmax.f32 %v232_v33, %v236_v48  ;;  %v237_v33 = vld [vmem:[%s1307_s11 + $0x3c0] sm:$0xff] }
  0x7e   : > { %v1664_v5 = vmax.f32 %v231_v49, %v235_v31  ;;  %v241_v48 = vld [vmem:[%s1307_s11 + $0x3e0] sm:$0xff] }
  0x81   : > { %707 = vrot.lane.b32.xlu1 %v1635_v56, %s1282_s12  ;;  %705 = vrot.lane.b32.xlu0 %v1639_v57, %s1282_s12  ;;  %v1685_v57 = vmax.f32 %v237_v33, %v241_v48  ;;  %v240_v56 = vld [vmem:[%s1307_s11 + $0x3d8] sm:$0x3f]  ;;  %v246_v48 = vld [vmem:[%s1307_s11 + $0x408] sm:$0xff] }
  0x85   : > { %711 = vrot.lane.b32.xlu1 %v1647_v61, %s1282_s12  ;;  %709 = vrot.lane.b32.xlu0 %v1651_v32, %s1282_s12  ;;  %v1679_v61 = vmax.f32 %v238_v6, %v242_v14  ;;  %v239_v6 = vld [vmem:[%s1307_s11 + $0x3d0] sm:$0xff] }
  0x86   : > { %v243_v14 = vld [vmem:[%s1307_s11 + $0x3f0] sm:$0xff] }
  0x87   : > { %v602_v15 = vpop.permute.xlu1 %601  ;;  %v598_v49 = vpop.permute.xlu0 %597 }
  0x88   : > { %v959_v31 = vmax.f32 %v1312_v3, %v602_v15  ;;  %v957_v32 = vmax.f32 %v1317_v7, %v598_v49  ;;  %v244_v3 = vld [vmem:[%s1307_s11 + $0x3f8] sm:$0x3f] }
  0x89   : > { %715 = vrot.lane.b32.xlu1 %v1660_v30, %s1282_s12  ;;  %713 = vrot.lane.b32.xlu0 %v1664_v5, %s1282_s12  ;;  %v1697_v33 = vmax.f32 %v240_v56, %v244_v3  ;;  %v249_v56 = vld [vmem:[%s1307_s11 + $0x420] sm:$0xff] }
  0x8a   : > { %1080 = vst.msk [vmem:[%s1671_s16 + $0x10] sm:$0xff] %vm1077_vm0, %v959_v31  ;;  %1078 = vst.msk [vmem:[%s1671_s16] sm:$0xff] %vm1077_vm0, %v957_v32  ;;  %v1703_v32 = vmax.f32 %v239_v6, %v243_v14 }
  0x8b   : > { %v604_v7 = vpop.permute.xlu1 %603  ;;  %v600_v31 = vpop.permute.xlu0 %599 }
  0x8c   : > { %v960_v15 = vmax.f32 %v1323_v10, %v604_v7  ;;  %v958_v49 = vmax.f32 %v1327_v11, %v600_v31  ;;  %v250_v10 = vld [vmem:[%s1307_s11 + $0x428] sm:$0xff]  ;;  %v245_v7 = vld [vmem:[%s1307_s11 + $0x400] sm:$0xff] }
  0x8d   : > { %719 = vrot.lane.b32.xlu1 %v1679_v61, %s1282_s12  ;;  %717 = vrot.lane.b32.xlu0 %v1685_v57, %s1282_s12  ;;  %v1715_v6 = vmax.f32 %v246_v48, %v250_v10  ;;  %v1721_v14 = vmax.f32 %v245_v7, %v249_v56  ;;  %v251_v48 = vld [vmem:[%s1307_s11 + $0x430] sm:$0xff] }
  0x8e   : > { %1082 = vst.msk [vmem:[%s1671_s16 + $0x18] sm:$0x3f] %vm1081_vm1, %v960_v15 }
  0x8f   : > { %1079 = vst.msk [vmem:[%s1671_s16 + $0x8] sm:$0xff] %vm1077_vm0, %v958_v49  ;;  %v608_v11 = vpop.permute.xlu1 %607  ;;  %v606_v15 = vpop.permute.xlu0 %605  ;;  %v248_v49 = vld [vmem:[%s1307_s11 + $0x418] sm:$0x3f] }
  0x90   : > { %v962_v3 = vmax.f32 %v1335_v16, %v608_v11  ;;  %v961_v31 = vmax.f32 %v1339_v17, %v606_v15  ;;  %v252_v16 = vld [vmem:[%s1307_s11 + $0x438] sm:$0x3f]  ;;  %v247_v11 = vld [vmem:[%s1307_s11 + $0x410] sm:$0xff] }
  0x91   : > { %723 = vrot.lane.b32.xlu1 %v1697_v33, %s1282_s12  ;;  %721 = vrot.lane.b32.xlu0 %v1703_v32, %s1282_s12  ;;  %v1733_v7 = vmax.f32 %v248_v49, %v252_v16  ;;  %v1739_v56 = vmax.f32 %v247_v11, %v251_v48  ;;  %v257_v49 = vld [vmem:[%s1307_s11 + $0x460] sm:$0xff] }
  0x92   : > { %1084 = vst.msk [vmem:[%s1671_s16 + $0x28] sm:$0xff] %vm1077_vm0, %v962_v3  ;;  %1083 = vst.msk [vmem:[%s1671_s16 + $0x20] sm:$0xff] %vm1077_vm0, %v961_v31  ;;  %v254_v31 = vld [vmem:[%s1307_s11 + $0x448] sm:$0xff] }
  0x93   : > { %v612_v17 = vpop.permute.xlu1 %611  ;;  %v610_v3 = vpop.permute.xlu0 %609 }
  0x94   : > { %v964_v10 = vmax.f32 %v1347_v22, %v612_v17  ;;  %v963_v15 = vmax.f32 %v1351_v23, %v610_v3  ;;  %v258_v22 = vld [vmem:[%s1307_s11 + $0x468] sm:$0xff]  ;;  %v253_v17 = vld [vmem:[%s1307_s11 + $0x440] sm:$0xff] }
  0x95   : > { %727 = vrot.lane.b32.xlu1 %v1715_v6, %s1282_s12  ;;  %725 = vrot.lane.b32.xlu0 %v1721_v14, %s1282_s12  ;;  %v1751_v11 = vmax.f32 %v254_v31, %v258_v22  ;;  %v1757_v48 = vmax.f32 %v253_v17, %v257_v49  ;;  %v259_v31 = vld [vmem:[%s1307_s11 + $0x470] sm:$0xff] }
  0x96   : > { %1086 = vst.msk [vmem:[%s1671_s16 + $0x38] sm:$0x3f] %vm1081_vm1, %v964_v10 }
  0x97   : > { %1085 = vst.msk [vmem:[%s1671_s16 + $0x30] sm:$0xff] %vm1077_vm0, %v963_v15  ;;  %v616_v23 = vpop.permute.xlu1 %615  ;;  %v614_v10 = vpop.permute.xlu0 %613  ;;  %v256_v15 = vld [vmem:[%s1307_s11 + $0x458] sm:$0x3f] }
  0x98   : > { %v966_v16 = vmax.f32 %v1359_v28, %v616_v23  ;;  %v965_v3 = vmax.f32 %v1363_v29, %v614_v10  ;;  %v260_v28 = vld [vmem:[%s1307_s11 + $0x478] sm:$0x3f]  ;;  %v255_v23 = vld [vmem:[%s1307_s11 + $0x450] sm:$0xff] }
  0x99   : > { %731 = vrot.lane.b32.xlu1 %v1733_v7, %s1282_s12  ;;  %729 = vrot.lane.b32.xlu0 %v1739_v56, %s1282_s12  ;;  %v1769_v17 = vmax.f32 %v256_v15, %v260_v28  ;;  %v1775_v49 = vmax.f32 %v255_v23, %v259_v31  ;;  %v265_v15 = vld [vmem:[%s1307_s11 + $0x4a0] sm:$0xff] }
  0x9a   : > { %1088 = vst.msk [vmem:[%s1671_s16 + $0x48] sm:$0xff] %vm1077_vm0, %v966_v16  ;;  %1087 = vst.msk [vmem:[%s1671_s16 + $0x40] sm:$0xff] %vm1077_vm0, %v965_v3  ;;  %v262_v3 = vld [vmem:[%s1307_s11 + $0x488] sm:$0xff] }
  0x9b   : > { %v620_v29 = vpop.permute.xlu1 %619  ;;  %v618_v16 = vpop.permute.xlu0 %617 }
  0x9c   : > { %v968_v22 = vmax.f32 %v1371_v34, %v620_v29  ;;  %v967_v10 = vmax.f32 %v1375_v35, %v618_v16  ;;  %v266_v34 = vld [vmem:[%s1307_s11 + $0x4a8] sm:$0xff]  ;;  %v261_v29 = vld [vmem:[%s1307_s11 + $0x480] sm:$0xff] }
  0x9d   : > { %735 = vrot.lane.b32.xlu1 %v1751_v11, %s1282_s12  ;;  %733 = vrot.lane.b32.xlu0 %v1757_v48, %s1282_s12  ;;  %v1787_v23 = vmax.f32 %v262_v3, %v266_v34  ;;  %v1793_v31 = vmax.f32 %v261_v29, %v265_v15  ;;  %v267_v3 = vld [vmem:[%s1307_s11 + $0x4b0] sm:$0xff] }
  0x9e   : > { %1090 = vst.msk [vmem:[%s1671_s16 + $0x58] sm:$0x3f] %vm1081_vm1, %v968_v22 }
  0x9f   : > { %1089 = vst.msk [vmem:[%s1671_s16 + $0x50] sm:$0xff] %vm1077_vm0, %v967_v10  ;;  %v624_v35 = vpop.permute.xlu1 %623  ;;  %v622_v22 = vpop.permute.xlu0 %621  ;;  %v264_v10 = vld [vmem:[%s1307_s11 + $0x498] sm:$0x3f] }
  0xa0   : > { %v970_v28 = vmax.f32 %v1383_v40, %v624_v35  ;;  %v969_v16 = vmax.f32 %v1387_v41, %v622_v22  ;;  %v268_v40 = vld [vmem:[%s1307_s11 + $0x4b8] sm:$0x3f]  ;;  %v263_v35 = vld [vmem:[%s1307_s11 + $0x490] sm:$0xff] }
  0xa1   : > { %739 = vrot.lane.b32.xlu1 %v1769_v17, %s1282_s12  ;;  %737 = vrot.lane.b32.xlu0 %v1775_v49, %s1282_s12  ;;  %v1805_v29 = vmax.f32 %v264_v10, %v268_v40  ;;  %v1811_v15 = vmax.f32 %v263_v35, %v267_v3  ;;  %v273_v10 = vld [vmem:[%s1307_s11 + $0x4e0] sm:$0xff] }
  0xa2   : > { %1092 = vst.msk [vmem:[%s1671_s16 + $0x68] sm:$0xff] %vm1077_vm0, %v970_v28  ;;  %1091 = vst.msk [vmem:[%s1671_s16 + $0x60] sm:$0xff] %vm1077_vm0, %v969_v16  ;;  %v270_v16 = vld [vmem:[%s1307_s11 + $0x4c8] sm:$0xff] }
  0xa3   : > { %v628_v41 = vpop.permute.xlu1 %627  ;;  %v626_v28 = vpop.permute.xlu0 %625 }
  0xa4   : > { %v972_v34 = vmax.f32 %v1395_v46, %v628_v41  ;;  %v971_v22 = vmax.f32 %v1399_v47, %v626_v28  ;;  %v274_v46 = vld [vmem:[%s1307_s11 + $0x4e8] sm:$0xff]  ;;  %v269_v41 = vld [vmem:[%s1307_s11 + $0x4c0] sm:$0xff] }
  0xa5   : > { %743 = vrot.lane.b32.xlu1 %v1787_v23, %s1282_s12  ;;  %741 = vrot.lane.b32.xlu0 %v1793_v31, %s1282_s12  ;;  %v1823_v35 = vmax.f32 %v270_v16, %v274_v46  ;;  %v1829_v3 = vmax.f32 %v269_v41, %v273_v10  ;;  %v275_v16 = vld [vmem:[%s1307_s11 + $0x4f0] sm:$0xff] }
  0xa6   : > { %1094 = vst.msk [vmem:[%s1671_s16 + $0x78] sm:$0x3f] %vm1081_vm1, %v972_v34 }
  0xa7   : > { %1093 = vst.msk [vmem:[%s1671_s16 + $0x70] sm:$0xff] %vm1077_vm0, %v971_v22  ;;  %v632_v47 = vpop.permute.xlu1 %631  ;;  %v630_v34 = vpop.permute.xlu0 %629  ;;  %v272_v22 = vld [vmem:[%s1307_s11 + $0x4d8] sm:$0x3f] }
  0xa8   : > { %v974_v40 = vmax.f32 %v1407_v52, %v632_v47  ;;  %v973_v28 = vmax.f32 %v1411_v53, %v630_v34  ;;  %v276_v52 = vld [vmem:[%s1307_s11 + $0x4f8] sm:$0x3f]  ;;  %v271_v47 = vld [vmem:[%s1307_s11 + $0x4d0] sm:$0xff] }
  0xa9   : > { %747 = vrot.lane.b32.xlu1 %v1805_v29, %s1282_s12  ;;  %745 = vrot.lane.b32.xlu0 %v1811_v15, %s1282_s12  ;;  %v1841_v41 = vmax.f32 %v272_v22, %v276_v52  ;;  %v1847_v10 = vmax.f32 %v271_v47, %v275_v16  ;;  %v281_v22 = vld [vmem:[%s1307_s11 + $0x520] sm:$0xff] }
  0xaa   : > { %1096 = vst.msk [vmem:[%s1671_s16 + $0x88] sm:$0xff] %vm1077_vm0, %v974_v40  ;;  %1095 = vst.msk [vmem:[%s1671_s16 + $0x80] sm:$0xff] %vm1077_vm0, %v973_v28  ;;  %v278_v28 = vld [vmem:[%s1307_s11 + $0x508] sm:$0xff] }
  0xab   : > { %v636_v53 = vpop.permute.xlu1 %635  ;;  %v634_v40 = vpop.permute.xlu0 %633 }
  0xac   : > { %v976_v46 = vmax.f32 %v1419_v58, %v636_v53  ;;  %v975_v34 = vmax.f32 %v1423_v59, %v634_v40  ;;  %v282_v58 = vld [vmem:[%s1307_s11 + $0x528] sm:$0xff]  ;;  %v277_v53 = vld [vmem:[%s1307_s11 + $0x500] sm:$0xff] }
  0xad   : > { %751 = vrot.lane.b32.xlu1 %v1823_v35, %s1282_s12  ;;  %749 = vrot.lane.b32.xlu0 %v1829_v3, %s1282_s12  ;;  %v1859_v47 = vmax.f32 %v278_v28, %v282_v58  ;;  %v1865_v16 = vmax.f32 %v277_v53, %v281_v22  ;;  %v283_v28 = vld [vmem:[%s1307_s11 + $0x530] sm:$0xff] }
  0xae   : > { %1098 = vst.msk [vmem:[%s1671_s16 + $0x98] sm:$0x3f] %vm1081_vm1, %v976_v46 }
  0xaf   : > { %1097 = vst.msk [vmem:[%s1671_s16 + $0x90] sm:$0xff] %vm1077_vm0, %v975_v34  ;;  %v640_v59 = vpop.permute.xlu1 %639  ;;  %v638_v46 = vpop.permute.xlu0 %637  ;;  %v280_v34 = vld [vmem:[%s1307_s11 + $0x518] sm:$0x3f] }
  0xb0   : > { %v978_v52 = vmax.f32 %v1431_v0, %v640_v59  ;;  %v977_v40 = vmax.f32 %v1435_v1, %v638_v46  ;;  %v284_v0 = vld [vmem:[%s1307_s11 + $0x538] sm:$0x3f]  ;;  %v279_v59 = vld [vmem:[%s1307_s11 + $0x510] sm:$0xff] }
  0xb1   : > { %755 = vrot.lane.b32.xlu1 %v1841_v41, %s1282_s12  ;;  %753 = vrot.lane.b32.xlu0 %v1847_v10, %s1282_s12  ;;  %v1877_v53 = vmax.f32 %v280_v34, %v284_v0  ;;  %v1883_v22 = vmax.f32 %v279_v59, %v283_v28  ;;  %v289_v34 = vld [vmem:[%s1307_s11 + $0x560] sm:$0xff] }
  0xb2   : > { %1100 = vst.msk [vmem:[%s1671_s16 + $0xa8] sm:$0xff] %vm1077_vm0, %v978_v52  ;;  %1099 = vst.msk [vmem:[%s1671_s16 + $0xa0] sm:$0xff] %vm1077_vm0, %v977_v40  ;;  %v286_v40 = vld [vmem:[%s1307_s11 + $0x548] sm:$0xff] }
  0xb3   : > { %v644_v1 = vpop.permute.xlu1 %643  ;;  %v642_v52 = vpop.permute.xlu0 %641 }
  0xb4   : > { %v980_v58 = vmax.f32 %v1443_v8, %v644_v1  ;;  %v979_v46 = vmax.f32 %v1447_v9, %v642_v52  ;;  %v290_v8 = vld [vmem:[%s1307_s11 + $0x568] sm:$0xff]  ;;  %v285_v1 = vld [vmem:[%s1307_s11 + $0x540] sm:$0xff] }
  0xb5   : > { %759 = vrot.lane.b32.xlu1 %v1859_v47, %s1282_s12  ;;  %757 = vrot.lane.b32.xlu0 %v1865_v16, %s1282_s12  ;;  %v1895_v59 = vmax.f32 %v286_v40, %v290_v8  ;;  %v1901_v28 = vmax.f32 %v285_v1, %v289_v34  ;;  %v291_v40 = vld [vmem:[%s1307_s11 + $0x570] sm:$0xff] }
  0xb6   : > { %1102 = vst.msk [vmem:[%s1671_s16 + $0xb8] sm:$0x3f] %vm1081_vm1, %v980_v58 }
  0xb7   : > { %1101 = vst.msk [vmem:[%s1671_s16 + $0xb0] sm:$0xff] %vm1077_vm0, %v979_v46  ;;  %v648_v9 = vpop.permute.xlu1 %647  ;;  %v646_v58 = vpop.permute.xlu0 %645  ;;  %v288_v46 = vld [vmem:[%s1307_s11 + $0x558] sm:$0x3f] }
  0xb8   : > { %v982_v0 = vmax.f32 %v1455_v18, %v648_v9  ;;  %v981_v52 = vmax.f32 %v1459_v19, %v646_v58  ;;  %v292_v18 = vld [vmem:[%s1307_s11 + $0x578] sm:$0x3f]  ;;  %v287_v9 = vld [vmem:[%s1307_s11 + $0x550] sm:$0xff] }
  0xb9   : > { %763 = vrot.lane.b32.xlu1 %v1877_v53, %s1282_s12  ;;  %761 = vrot.lane.b32.xlu0 %v1883_v22, %s1282_s12  ;;  %v1913_v1 = vmax.f32 %v288_v46, %v292_v18  ;;  %v1919_v34 = vmax.f32 %v287_v9, %v291_v40  ;;  %v297_v46 = vld [vmem:[%s1307_s11 + $0x5a0] sm:$0xff] }
  0xba   : > { %1104 = vst.msk [vmem:[%s1671_s16 + $0xc8] sm:$0xff] %vm1077_vm0, %v982_v0  ;;  %1103 = vst.msk [vmem:[%s1671_s16 + $0xc0] sm:$0xff] %vm1077_vm0, %v981_v52  ;;  %v294_v52 = vld [vmem:[%s1307_s11 + $0x588] sm:$0xff] }
  0xbb   : > { %v652_v19 = vpop.permute.xlu1 %651  ;;  %v650_v0 = vpop.permute.xlu0 %649 }
  0xbc   : > { %v984_v8 = vmax.f32 %v1467_v26, %v652_v19  ;;  %v983_v58 = vmax.f32 %v1471_v27, %v650_v0  ;;  %v298_v26 = vld [vmem:[%s1307_s11 + $0x5a8] sm:$0xff]  ;;  %v293_v19 = vld [vmem:[%s1307_s11 + $0x580] sm:$0xff] }
  0xbd   : > { %767 = vrot.lane.b32.xlu1 %v1895_v59, %s1282_s12  ;;  %765 = vrot.lane.b32.xlu0 %v1901_v28, %s1282_s12  ;;  %v1931_v9 = vmax.f32 %v294_v52, %v298_v26  ;;  %v1937_v40 = vmax.f32 %v293_v19, %v297_v46  ;;  %v299_v52 = vld [vmem:[%s1307_s11 + $0x5b0] sm:$0xff] }
  0xbe   : > { %1106 = vst.msk [vmem:[%s1671_s16 + $0xd8] sm:$0x3f] %vm1081_vm1, %v984_v8 }
  0xbf   : > { %1105 = vst.msk [vmem:[%s1671_s16 + $0xd0] sm:$0xff] %vm1077_vm0, %v983_v58  ;;  %v656_v27 = vpop.permute.xlu1 %655  ;;  %v654_v8 = vpop.permute.xlu0 %653  ;;  %v296_v58 = vld [vmem:[%s1307_s11 + $0x598] sm:$0x3f] }
  0xc0   : > { %v986_v18 = vmax.f32 %v1479_v36, %v656_v27  ;;  %v985_v0 = vmax.f32 %v1483_v37, %v654_v8  ;;  %v300_v36 = vld [vmem:[%s1307_s11 + $0x5b8] sm:$0x3f]  ;;  %v295_v27 = vld [vmem:[%s1307_s11 + $0x590] sm:$0xff] }
  0xc1   : > { %771 = vrot.lane.b32.xlu1 %v1913_v1, %s1282_s12  ;;  %769 = vrot.lane.b32.xlu0 %v1919_v34, %s1282_s12  ;;  %v1949_v19 = vmax.f32 %v296_v58, %v300_v36  ;;  %v1955_v46 = vmax.f32 %v295_v27, %v299_v52  ;;  %v305_v58 = vld [vmem:[%s1307_s11 + $0x5e0] sm:$0xff] }
  0xc2   : > { %1108 = vst.msk [vmem:[%s1671_s16 + $0xe8] sm:$0xff] %vm1077_vm0, %v986_v18  ;;  %1107 = vst.msk [vmem:[%s1671_s16 + $0xe0] sm:$0xff] %vm1077_vm0, %v985_v0  ;;  %v302_v0 = vld [vmem:[%s1307_s11 + $0x5c8] sm:$0xff] }
  0xc3   : > { %v660_v37 = vpop.permute.xlu1 %659  ;;  %v658_v18 = vpop.permute.xlu0 %657 }
  0xc4   : > { %v988_v26 = vmax.f32 %v1491_v44, %v660_v37  ;;  %v987_v8 = vmax.f32 %v1495_v45, %v658_v18  ;;  %v306_v44 = vld [vmem:[%s1307_s11 + $0x5e8] sm:$0xff]  ;;  %v301_v37 = vld [vmem:[%s1307_s11 + $0x5c0] sm:$0xff] }
  0xc5   : > { %775 = vrot.lane.b32.xlu1 %v1931_v9, %s1282_s12  ;;  %773 = vrot.lane.b32.xlu0 %v1937_v40, %s1282_s12  ;;  %v1967_v27 = vmax.f32 %v302_v0, %v306_v44  ;;  %v1973_v52 = vmax.f32 %v301_v37, %v305_v58  ;;  %v307_v0 = vld [vmem:[%s1307_s11 + $0x5f0] sm:$0xff] }
  0xc6   : > { %1110 = vst.msk [vmem:[%s1671_s16 + $0xf8] sm:$0x3f] %vm1081_vm1, %v988_v26 }
  0xc7   : > { %1109 = vst.msk [vmem:[%s1671_s16 + $0xf0] sm:$0xff] %vm1077_vm0, %v987_v8  ;;  %v664_v45 = vpop.permute.xlu1 %663  ;;  %v662_v26 = vpop.permute.xlu0 %661  ;;  %v304_v8 = vld [vmem:[%s1307_s11 + $0x5d8] sm:$0x3f] }
  0xc8   : > { %v990_v36 = vmax.f32 %v1503_v54, %v664_v45  ;;  %v989_v18 = vmax.f32 %v1507_v55, %v662_v26  ;;  %v308_v54 = vld [vmem:[%s1307_s11 + $0x5f8] sm:$0x3f]  ;;  %v303_v45 = vld [vmem:[%s1307_s11 + $0x5d0] sm:$0xff] }
  0xc9   : > { %779 = vrot.lane.b32.xlu1 %v1949_v19, %s1282_s12  ;;  %777 = vrot.lane.b32.xlu0 %v1955_v46, %s1282_s12  ;;  %v1985_v37 = vmax.f32 %v304_v8, %v308_v54  ;;  %v1991_v58 = vmax.f32 %v303_v45, %v307_v0  ;;  %v313_v8 = vld [vmem:[%s1307_s11 + $0x620] sm:$0xff] }
  0xca   : > { %1112 = vst.msk [vmem:[%s1671_s16 + $0x108] sm:$0xff] %vm1077_vm0, %v990_v36  ;;  %1111 = vst.msk [vmem:[%s1671_s16 + $0x100] sm:$0xff] %vm1077_vm0, %v989_v18  ;;  %v310_v18 = vld [vmem:[%s1307_s11 + $0x608] sm:$0xff] }
  0xcb   : > { %v668_v55 = vpop.permute.xlu1 %667  ;;  %v666_v36 = vpop.permute.xlu0 %665 }
  0xcc   : > { %v992_v44 = vmax.f32 %v1515_v62, %v668_v55  ;;  %v991_v26 = vmax.f32 %v1519_v63, %v666_v36  ;;  %v314_v62 = vld [vmem:[%s1307_s11 + $0x628] sm:$0xff]  ;;  %v309_v55 = vld [vmem:[%s1307_s11 + $0x600] sm:$0xff] }
  0xcd   : > { %783 = vrot.lane.b32.xlu1 %v1967_v27, %s1282_s12  ;;  %781 = vrot.lane.b32.xlu0 %v1973_v52, %s1282_s12  ;;  %v2003_v45 = vmax.f32 %v310_v18, %v314_v62  ;;  %v2009_v0 = vmax.f32 %v309_v55, %v313_v8  ;;  %v315_v18 = vld [vmem:[%s1307_s11 + $0x630] sm:$0xff] }
  0xce   : > { %1114 = vst.msk [vmem:[%s1671_s16 + $0x118] sm:$0x3f] %vm1081_vm1, %v992_v44 }
  0xcf   : > { %1113 = vst.msk [vmem:[%s1671_s16 + $0x110] sm:$0xff] %vm1077_vm0, %v991_v26  ;;  %v672_v63 = vpop.permute.xlu1 %671  ;;  %v670_v44 = vpop.permute.xlu0 %669  ;;  %v312_v26 = vld [vmem:[%s1307_s11 + $0x618] sm:$0x3f] }
  0xd0   : > { %v994_v54 = vmax.f32 %v1527_v12, %v672_v63  ;;  %v993_v36 = vmax.f32 %v1531_v13, %v670_v44  ;;  %v316_v12 = vld [vmem:[%s1307_s11 + $0x638] sm:$0x3f]  ;;  %v311_v63 = vld [vmem:[%s1307_s11 + $0x610] sm:$0xff] }
  0xd1   : > { %787 = vrot.lane.b32.xlu1 %v1985_v37, %s1282_s12  ;;  %785 = vrot.lane.b32.xlu0 %v1991_v58, %s1282_s12  ;;  %v2021_v55 = vmax.f32 %v312_v26, %v316_v12  ;;  %v2027_v8 = vmax.f32 %v311_v63, %v315_v18  ;;  %v321_v26 = vld [vmem:[%s1307_s11 + $0x660] sm:$0xff] }
  0xd2   : > { %1116 = vst.msk [vmem:[%s1671_s16 + $0x128] sm:$0xff] %vm1077_vm0, %v994_v54  ;;  %1115 = vst.msk [vmem:[%s1671_s16 + $0x120] sm:$0xff] %vm1077_vm0, %v993_v36  ;;  %v318_v36 = vld [vmem:[%s1307_s11 + $0x648] sm:$0xff] }
  0xd3   : > { %v676_v13 = vpop.permute.xlu1 %675  ;;  %v674_v54 = vpop.permute.xlu0 %673 }
  0xd4   : > { %v996_v62 = vmax.f32 %v1539_v24, %v676_v13  ;;  %v995_v44 = vmax.f32 %v1543_v25, %v674_v54  ;;  %v322_v24 = vld [vmem:[%s1307_s11 + $0x668] sm:$0xff]  ;;  %v317_v13 = vld [vmem:[%s1307_s11 + $0x640] sm:$0xff] }
  0xd5   : > { %791 = vrot.lane.b32.xlu1 %v2003_v45, %s1282_s12  ;;  %789 = vrot.lane.b32.xlu0 %v2009_v0, %s1282_s12  ;;  %v2039_v63 = vmax.f32 %v318_v36, %v322_v24  ;;  %v2045_v18 = vmax.f32 %v317_v13, %v321_v26  ;;  %v323_v36 = vld [vmem:[%s1307_s11 + $0x670] sm:$0xff] }
  0xd6   : > { %1118 = vst.msk [vmem:[%s1671_s16 + $0x138] sm:$0x3f] %vm1081_vm1, %v996_v62 }
  0xd7   : > { %1117 = vst.msk [vmem:[%s1671_s16 + $0x130] sm:$0xff] %vm1077_vm0, %v995_v44  ;;  %v680_v25 = vpop.permute.xlu1 %679  ;;  %v678_v62 = vpop.permute.xlu0 %677  ;;  %v320_v44 = vld [vmem:[%s1307_s11 + $0x658] sm:$0x3f] }
  0xd8   : > { %v998_v12 = vmax.f32 %v1551_v38, %v680_v25  ;;  %v997_v54 = vmax.f32 %v1555_v39, %v678_v62  ;;  %v324_v38 = vld [vmem:[%s1307_s11 + $0x678] sm:$0x3f]  ;;  %v319_v25 = vld [vmem:[%s1307_s11 + $0x650] sm:$0xff] }
  0xd9   : > { %795 = vrot.lane.b32.xlu1 %v2021_v55, %s1282_s12  ;;  %793 = vrot.lane.b32.xlu0 %v2027_v8, %s1282_s12  ;;  %v2057_v13 = vmax.f32 %v320_v44, %v324_v38  ;;  %v2063_v26 = vmax.f32 %v319_v25, %v323_v36  ;;  %v329_v44 = vld [vmem:[%s1307_s11 + $0x6a0] sm:$0xff] }
  0xda   : > { %1120 = vst.msk [vmem:[%s1671_s16 + $0x148] sm:$0xff] %vm1077_vm0, %v998_v12  ;;  %1119 = vst.msk [vmem:[%s1671_s16 + $0x140] sm:$0xff] %vm1077_vm0, %v997_v54  ;;  %v326_v54 = vld [vmem:[%s1307_s11 + $0x688] sm:$0xff] }
  0xdb   : > { %v684_v39 = vpop.permute.xlu1 %683  ;;  %v682_v12 = vpop.permute.xlu0 %681 }
  0xdc   : > { %v1000_v24 = vmax.f32 %v1563_v50, %v684_v39  ;;  %v999_v62 = vmax.f32 %v1567_v51, %v682_v12  ;;  %v330_v50 = vld [vmem:[%s1307_s11 + $0x6a8] sm:$0xff]  ;;  %v325_v39 = vld [vmem:[%s1307_s11 + $0x680] sm:$0xff] }
  0xdd   : > { %799 = vrot.lane.b32.xlu1 %v2039_v63, %s1282_s12  ;;  %797 = vrot.lane.b32.xlu0 %v2045_v18, %s1282_s12  ;;  %v2075_v25 = vmax.f32 %v326_v54, %v330_v50  ;;  %v2081_v36 = vmax.f32 %v325_v39, %v329_v44  ;;  %v331_v54 = vld [vmem:[%s1307_s11 + $0x6b0] sm:$0xff] }
  0xde   : > { %1122 = vst.msk [vmem:[%s1671_s16 + $0x158] sm:$0x3f] %vm1081_vm1, %v1000_v24 }
  0xdf   : > { %1121 = vst.msk [vmem:[%s1671_s16 + $0x150] sm:$0xff] %vm1077_vm0, %v999_v62  ;;  %v688_v51 = vpop.permute.xlu1 %687  ;;  %v686_v24 = vpop.permute.xlu0 %685  ;;  %v328_v62 = vld [vmem:[%s1307_s11 + $0x698] sm:$0x3f] }
  0xe0   : > { %v1002_v38 = vmax.f32 %v1575_v2, %v688_v51  ;;  %v1001_v12 = vmax.f32 %v1579_v4, %v686_v24  ;;  %v332_v2 = vld [vmem:[%s1307_s11 + $0x6b8] sm:$0x3f]  ;;  %v327_v51 = vld [vmem:[%s1307_s11 + $0x690] sm:$0xff] }
  0xe1   : > { %803 = vrot.lane.b32.xlu1 %v2057_v13, %s1282_s12  ;;  %801 = vrot.lane.b32.xlu0 %v2063_v26, %s1282_s12  ;;  %v2093_v39 = vmax.f32 %v328_v62, %v332_v2  ;;  %v2099_v44 = vmax.f32 %v327_v51, %v331_v54  ;;  %v337_v62 = vld [vmem:[%s1307_s11 + $0x6e0] sm:$0xff] }
  0xe2   : > { %1124 = vst.msk [vmem:[%s1671_s16 + $0x168] sm:$0xff] %vm1077_vm0, %v1002_v38  ;;  %1123 = vst.msk [vmem:[%s1671_s16 + $0x160] sm:$0xff] %vm1077_vm0, %v1001_v12  ;;  %v334_v12 = vld [vmem:[%s1307_s11 + $0x6c8] sm:$0xff] }
  0xe3   : > { %v692_v4 = vpop.permute.xlu1 %691  ;;  %v690_v38 = vpop.permute.xlu0 %689  ;;  %2422 = vst [vmem:[#allocation9_spill] sm:$0xff] %v2093_v39  ;;  %2423 = vst [vmem:[#allocation10_spill] sm:$0xff] %v2099_v44 }
  0xe4   : > { %v1004_v50 = vmax.f32 %v1587_v20, %v692_v4  ;;  %v1003_v24 = vmax.f32 %v1591_v21, %v690_v38  ;;  %v338_v20 = vld [vmem:[%s1307_s11 + $0x6e8] sm:$0xff]  ;;  %v333_v4 = vld [vmem:[%s1307_s11 + $0x6c0] sm:$0xff] }
  0xe5   : > { %807 = vrot.lane.b32.xlu1 %v2075_v25, %s1282_s12  ;;  %805 = vrot.lane.b32.xlu0 %v2081_v36, %s1282_s12  ;;  %v2111_v51 = vmax.f32 %v334_v12, %v338_v20  ;;  %v2117_v54 = vmax.f32 %v333_v4, %v337_v62  ;;  %v339_v12 = vld [vmem:[%s1307_s11 + $0x6f0] sm:$0xff] }
  0xe6   : > { %1126 = vst.msk [vmem:[%s1671_s16 + $0x178] sm:$0x3f] %vm1081_vm1, %v1004_v50 }
  0xe7   : > { %1125 = vst.msk [vmem:[%s1671_s16 + $0x170] sm:$0xff] %vm1077_vm0, %v1003_v24  ;;  %v696_v21 = vpop.permute.xlu1 %695  ;;  %v694_v50 = vpop.permute.xlu0 %693  ;;  %2424 = vst [vmem:[#allocation11_spill] sm:$0xff] %v2111_v51  ;;  %v336_v24 = vld [vmem:[%s1307_s11 + $0x6d8] sm:$0x3f] }
  0xe8   : > { %v1006_v2 = vmax.f32 %v1599_v42, %v696_v21  ;;  %v1005_v38 = vmax.f32 %v1603_v43, %v694_v50  ;;  %2425 = vst [vmem:[#allocation12_spill] sm:$0xff] %v2117_v54  ;;  %v340_v42 = vld [vmem:[%s1307_s11 + $0x6f8] sm:$0x3f]  ;;  %v335_v21 = vld [vmem:[%s1307_s11 + $0x6d0] sm:$0xff]  ;;  %v2426_v50 = vld [vmem:[#allocation2_spill] sm:$0xff] }
  0xe9   : > { %811 = vrot.lane.b32.xlu1 %v2093_v39, %s1282_s12  ;;  %809 = vrot.lane.b32.xlu0 %v2099_v44, %s1282_s12  ;;  %v2129_v4 = vmax.f32 %v336_v24, %v340_v42  ;;  %v2135_v62 = vmax.f32 %v335_v21, %v339_v12  ;;  %v345_v24 = vld [vmem:[%s1307_s11 + $0x720] sm:$0xff]  ;;  %v2429_v42 = vld [vmem:[#allocation3_spill] sm:$0xff]  ;;  %v344_v12 = vld [vmem:[%s1307_s11 + $0x718] sm:$0x3f] }
  0xea   : > { %1128 = vst.msk [vmem:[%s1671_s16 + $0x188] sm:$0xff] %vm1077_vm0, %v1006_v2  ;;  %1127 = vst.msk [vmem:[%s1671_s16 + $0x180] sm:$0xff] %vm1077_vm0, %v1005_v38  ;;  %v342_v38 = vld [vmem:[%s1307_s11 + $0x708] sm:$0xff] }
  0xeb   : > { %v700_v43 = vpop.permute.xlu1 %699  ;;  %v698_v2 = vpop.permute.xlu0 %697  ;;  %2427 = vst [vmem:[#allocation2_spill] sm:$0xff] %v2129_v4  ;;  %2428 = vst [vmem:[#allocation13_spill] sm:$0xff] %v2135_v62 }
  0xec   : > { %v1008_v20 = vmax.f32 %v1611_v60, %v700_v43  ;;  %v1007_v39 = vmax.f32 %v2426_v50, %v698_v2  ;;  %v346_v60 = vld [vmem:[%s1307_s11 + $0x728] sm:$0xff]  ;;  %v341_v2 = vld [vmem:[%s1307_s11 + $0x700] sm:$0xff] }
  0xed   : > { %815 = vrot.lane.b32.xlu1 %v2111_v51, %s1282_s12  ;;  %813 = vrot.lane.b32.xlu0 %v2117_v54, %s1282_s12  ;;  %v2430_v51 = vld [vmem:[#allocation4_spill] sm:$0xff]  ;;  %v2147_v21 = vmax.f32 %v342_v38, %v346_v60  ;;  %v2433_v60 = vld [vmem:[#allocation5_spill] sm:$0xff] }
  0xee   : > { %1130 = vst.msk [vmem:[%s1671_s16 + $0x198] sm:$0x3f] %vm1081_vm1, %v1008_v20  ;;  %v347_v38 = vld [vmem:[%s1307_s11 + $0x730] sm:$0xff] }
  0xef   : > { %1129 = vst.msk [vmem:[%s1671_s16 + $0x190] sm:$0xff] %vm1077_vm0, %v1007_v39  ;;  %v704_v43 = vpop.permute.xlu1 %703  ;;  %v702_v20 = vpop.permute.xlu0 %701  ;;  %2431 = vst [vmem:[#allocation3_spill] sm:$0xff] %v2147_v21  ;;  %v2153_v39 = vmax.f32 %v341_v2, %v345_v24  ;;  %v350_v24 = vld [vmem:[%s1307_s11 + $0x748] sm:$0xff] }
  0xf0   : > { %v1010_v50 = vmax.f32 %v2429_v42, %v704_v43  ;;  %v1009_v44 = vmax.f32 %v2430_v51, %v702_v20  ;;  %v348_v43 = vld [vmem:[%s1307_s11 + $0x738] sm:$0x3f]  ;;  %v343_v42 = vld [vmem:[%s1307_s11 + $0x710] sm:$0xff] }
  0xf1   : > { %819 = vrot.lane.b32.xlu1 %v2129_v4, %s1282_s12  ;;  %817 = vrot.lane.b32.xlu0 %v2135_v62, %s1282_s12  ;;  %2432 = vst [vmem:[#allocation4_spill] sm:$0xff] %v2153_v39  ;;  %v2434_v4 = vld [vmem:[#allocation6_spill] sm:$0xff]  ;;  %v2165_v2 = vmax.f32 %v344_v12, %v348_v43  ;;  %v2435_v43 = vld [vmem:[#allocation7_spill] sm:$0xff] }
  0xf2   : > { %1132 = vst.msk [vmem:[%s1671_s16 + $0x1a8] sm:$0xff] %vm1077_vm0, %v1010_v50  ;;  %1131 = vst.msk [vmem:[%s1671_s16 + $0x1a0] sm:$0xff] %vm1077_vm0, %v1009_v44  ;;  %v2171_v44 = vmax.f32 %v343_v42, %v347_v38  ;;  %v353_v12 = vld [vmem:[%s1307_s11 + $0x760] sm:$0xff]  ;;  %v352_v38 = vld [vmem:[%s1307_s11 + $0x758] sm:$0x3f] }
  0xf3   : > { %v708_v51 = vpop.permute.xlu1 %707  ;;  %v706_v50 = vpop.permute.xlu0 %705 }
  0xf4   : > { %v1012_v20 = vmax.f32 %v2433_v60, %v708_v51  ;;  %v1011_v54 = vmax.f32 %v2434_v4, %v706_v50  ;;  %v354_v51 = vld [vmem:[%s1307_s11 + $0x768] sm:$0xff]  ;;  %v349_v60 = vld [vmem:[%s1307_s11 + $0x740] sm:$0xff] }
  0xf5   : > { %823 = vrot.lane.b32.xlu1 %v2147_v21, %s1282_s12  ;;  %821 = vrot.lane.b32.xlu0 %v2153_v39, %s1282_s12  ;;  %v2436_v21 = vld [vmem:[#allocation8_spill] sm:$0xff]  ;;  %v2183_v42 = vmax.f32 %v350_v24, %v354_v51  ;;  %v356_v39 = vld [vmem:[%s1307_s11 + $0x778] sm:$0x3f] }
  0xf6   : > { %1134 = vst.msk [vmem:[%s1671_s16 + $0x1b8] sm:$0x3f] %vm1081_vm1, %v1012_v20 }
  0xf7   : > { %1133 = vst.msk [vmem:[%s1671_s16 + $0x1b0] sm:$0xff] %vm1077_vm0, %v1011_v54  ;;  %v712_v4 = vpop.permute.xlu1 %711  ;;  %v710_v20 = vpop.permute.xlu0 %709  ;;  %v2189_v54 = vmax.f32 %v349_v60, %v353_v12 }
  0xf8   : > { %v1014_v50 = vmax.f32 %v2435_v43, %v712_v4  ;;  %v1013_v62 = vmax.f32 %v2436_v21, %v710_v20  ;;  %v351_v21 = vld [vmem:[%s1307_s11 + $0x750] sm:$0xff] }
  0xf9   : > { %827 = vrot.lane.b32.xlu1 %v2165_v2, %s1282_s12  ;;  %825 = vrot.lane.b32.xlu0 %v2171_v44, %s1282_s12  ;;  %v355_v43 = vld [vmem:[%s1307_s11 + $0x770] sm:$0xff] }
  0xfa   : > { %1136 = vst.msk [vmem:[%s1671_s16 + $0x1c8] sm:$0xff] %vm1077_vm0, %v1014_v50  ;;  %1135 = vst.msk [vmem:[%s1671_s16 + $0x1c0] sm:$0xff] %vm1077_vm0, %v1013_v62  ;;  %v2201_v50 = vmax.f32 %v352_v38, %v356_v39  ;;  %v2207_v62 = vmax.f32 %v351_v21, %v355_v43 }
  0xfb   : > { %v716_v4 = vpop.permute.xlu1 %715  ;;  %v714_v24 = vpop.permute.xlu0 %713 }
  0xfc   : > { %v1016_v20 = vmax.f32 %v1660_v30, %v716_v4  ;;  %v1015_v51 = vmax.f32 %v1664_v5, %v714_v24 }
  0xfd   : > { %831 = vrot.lane.b32.xlu1 %v2183_v42, %s1282_s12  ;;  %829 = vrot.lane.b32.xlu0 %v2189_v54, %s1282_s12 }
  0xfe   : > { %1138 = vst.msk [vmem:[%s1671_s16 + $0x1d8] sm:$0x3f] %vm1081_vm1, %v1016_v20 }
  0xff   : > { %1137 = vst.msk [vmem:[%s1671_s16 + $0x1d0] sm:$0xff] %vm1077_vm0, %v1015_v51  ;;  %v720_v30 = vpop.permute.xlu1 %719  ;;  %v718_v5 = vpop.permute.xlu0 %717 }
 0x100   : > { %v1018_v60 = vmax.f32 %v1679_v61, %v720_v30  ;;  %v1017_v12 = vmax.f32 %v1685_v57, %v718_v5 }
 0x101   : > { %835 = vrot.lane.b32.xlu1 %v2201_v50, %s1282_s12  ;;  %833 = vrot.lane.b32.xlu0 %v2207_v62, %s1282_s12 }
 0x102   : > { %1140 = vst.msk [vmem:[%s1671_s16 + $0x1e8] sm:$0xff] %vm1077_vm0, %v1018_v60  ;;  %1139 = vst.msk [vmem:[%s1671_s16 + $0x1e0] sm:$0xff] %vm1077_vm0, %v1017_v12 }
 0x103   : > { %v724_v39 = vpop.permute.xlu1 %723  ;;  %v722_v61 = vpop.permute.xlu0 %721 }
 0x104   : > { %v1020_v38 = vmax.f32 %v1697_v33, %v724_v39  ;;  %v1019_v4 = vmax.f32 %v1703_v32, %v722_v61 }
 0x106   : > { %1142 = vst.msk [vmem:[%s1671_s16 + $0x1f8] sm:$0x3f] %vm1081_vm1, %v1020_v38 }
 0x107   : > { %1141 = vst.msk [vmem:[%s1671_s16 + $0x1f0] sm:$0xff] %vm1077_vm0, %v1019_v4  ;;  %v728_v57 = vpop.permute.xlu1 %727  ;;  %v726_v43 = vpop.permute.xlu0 %725 }
 0x108   : > { %v1022_v21 = vmax.f32 %v1715_v6, %v728_v57  ;;  %v1021_v20 = vmax.f32 %v1721_v14, %v726_v43 }
 0x10a   : > { %1144 = vst.msk [vmem:[%s1671_s16 + $0x208] sm:$0xff] %vm1077_vm0, %v1022_v21  ;;  %1143 = vst.msk [vmem:[%s1671_s16 + $0x200] sm:$0xff] %vm1077_vm0, %v1021_v20 }
 0x10b   : > { %v732_v33 = vpop.permute.xlu1 %731  ;;  %v730_v24 = vpop.permute.xlu0 %729 }
 0x10c   : > { %v1024_v32 = vmax.f32 %v1733_v7, %v732_v33  ;;  %v1023_v51 = vmax.f32 %v1739_v56, %v730_v24 }
 0x10e   : > { %1146 = vst.msk [vmem:[%s1671_s16 + $0x218] sm:$0x3f] %vm1081_vm1, %v1024_v32 }
 0x10f   : > { %1145 = vst.msk [vmem:[%s1671_s16 + $0x210] sm:$0xff] %vm1077_vm0, %v1023_v51  ;;  %v736_v6 = vpop.permute.xlu1 %735  ;;  %v734_v30 = vpop.permute.xlu0 %733 }
 0x110   : > { %v1026_v14 = vmax.f32 %v1751_v11, %v736_v6  ;;  %v1025_v60 = vmax.f32 %v1757_v48, %v734_v30 }
 0x112   : > { %1148 = vst.msk [vmem:[%s1671_s16 + $0x228] sm:$0xff] %vm1077_vm0, %v1026_v14  ;;  %1147 = vst.msk [vmem:[%s1671_s16 + $0x220] sm:$0xff] %vm1077_vm0, %v1025_v60 }
 0x113   : > { %v740_v7 = vpop.permute.xlu1 %739  ;;  %v738_v5 = vpop.permute.xlu0 %737 }
 0x114   : > { %v1028_v56 = vmax.f32 %v1769_v17, %v740_v7  ;;  %v1027_v12 = vmax.f32 %v1775_v49, %v738_v5 }
 0x116   : > { %1150 = vst.msk [vmem:[%s1671_s16 + $0x238] sm:$0x3f] %vm1081_vm1, %v1028_v56 }
 0x117   : > { %1149 = vst.msk [vmem:[%s1671_s16 + $0x230] sm:$0xff] %vm1077_vm0, %v1027_v12  ;;  %v744_v11 = vpop.permute.xlu1 %743  ;;  %v742_v39 = vpop.permute.xlu0 %741 }
 0x118   : > { %v1030_v48 = vmax.f32 %v1787_v23, %v744_v11  ;;  %v1029_v38 = vmax.f32 %v1793_v31, %v742_v39 }
 0x11a   : > { %1152 = vst.msk [vmem:[%s1671_s16 + $0x248] sm:$0xff] %vm1077_vm0, %v1030_v48  ;;  %1151 = vst.msk [vmem:[%s1671_s16 + $0x240] sm:$0xff] %vm1077_vm0, %v1029_v38 }
 0x11b   : > { %v748_v17 = vpop.permute.xlu1 %747  ;;  %v746_v61 = vpop.permute.xlu0 %745 }
 0x11c   : > { %v1032_v49 = vmax.f32 %v1805_v29, %v748_v17  ;;  %v1031_v4 = vmax.f32 %v1811_v15, %v746_v61 }
 0x11e   : > { %1154 = vst.msk [vmem:[%s1671_s16 + $0x258] sm:$0x3f] %vm1081_vm1, %v1032_v49 }
 0x11f   : > { %1153 = vst.msk [vmem:[%s1671_s16 + $0x250] sm:$0xff] %vm1077_vm0, %v1031_v4  ;;  %v752_v23 = vpop.permute.xlu1 %751  ;;  %v750_v57 = vpop.permute.xlu0 %749 }
 0x120   : > { %v1034_v31 = vmax.f32 %v1823_v35, %v752_v23  ;;  %v1033_v21 = vmax.f32 %v1829_v3, %v750_v57 }
 0x122   : > { %1156 = vst.msk [vmem:[%s1671_s16 + $0x268] sm:$0xff] %vm1077_vm0, %v1034_v31  ;;  %1155 = vst.msk [vmem:[%s1671_s16 + $0x260] sm:$0xff] %vm1077_vm0, %v1033_v21 }
 0x123   : > { %v756_v29 = vpop.permute.xlu1 %755  ;;  %v754_v43 = vpop.permute.xlu0 %753 }
 0x124   : > { %v1036_v15 = vmax.f32 %v1841_v41, %v756_v29  ;;  %v1035_v20 = vmax.f32 %v1847_v10, %v754_v43  ;;  %v2437_v43 = vld [vmem:[#allocation9_spill] sm:$0xff] }
 0x126   : > { %1158 = vst.msk [vmem:[%s1671_s16 + $0x278] sm:$0x3f] %vm1081_vm1, %v1036_v15 }
 0x127   : > { %1157 = vst.msk [vmem:[%s1671_s16 + $0x270] sm:$0xff] %vm1077_vm0, %v1035_v20  ;;  %v760_v35 = vpop.permute.xlu1 %759  ;;  %v758_v33 = vpop.permute.xlu0 %757 }
 0x128   : > { %v1038_v3 = vmax.f32 %v1859_v47, %v760_v35  ;;  %v1037_v32 = vmax.f32 %v1865_v16, %v758_v33  ;;  %v2438_v35 = vld [vmem:[#allocation10_spill] sm:$0xff]  ;;  %v2439_v33 = vld [vmem:[#allocation11_spill] sm:$0xff] }
 0x12a   : > { %1160 = vst.msk [vmem:[%s1671_s16 + $0x288] sm:$0xff] %vm1077_vm0, %v1038_v3  ;;  %1159 = vst.msk [vmem:[%s1671_s16 + $0x280] sm:$0xff] %vm1077_vm0, %v1037_v32 }
 0x12b   : > { %v764_v41 = vpop.permute.xlu1 %763  ;;  %v762_v24 = vpop.permute.xlu0 %761 }
 0x12c   : > { %v1040_v10 = vmax.f32 %v1877_v53, %v764_v41  ;;  %v1039_v51 = vmax.f32 %v1883_v22, %v762_v24  ;;  %v2440_v41 = vld [vmem:[#allocation12_spill] sm:$0xff] }
 0x12e   : > { %1162 = vst.msk [vmem:[%s1671_s16 + $0x298] sm:$0x3f] %vm1081_vm1, %v1040_v10 }
 0x12f   : > { %1161 = vst.msk [vmem:[%s1671_s16 + $0x290] sm:$0xff] %vm1077_vm0, %v1039_v51  ;;  %v768_v47 = vpop.permute.xlu1 %767  ;;  %v766_v6 = vpop.permute.xlu0 %765  ;;  %v2441_v51 = vld [vmem:[#allocation2_spill] sm:$0xff] }
 0x130   : > { %v1042_v16 = vmax.f32 %v1895_v59, %v768_v47  ;;  %v1041_v14 = vmax.f32 %v1901_v28, %v766_v6  ;;  %v2442_v6 = vld [vmem:[#allocation13_spill] sm:$0xff] }
 0x132   : > { %1164 = vst.msk [vmem:[%s1671_s16 + $0x2a8] sm:$0xff] %vm1077_vm0, %v1042_v16  ;;  %1163 = vst.msk [vmem:[%s1671_s16 + $0x2a0] sm:$0xff] %vm1077_vm0, %v1041_v14 }
 0x133   : > { %v772_v53 = vpop.permute.xlu1 %771  ;;  %v770_v30 = vpop.permute.xlu0 %769 }
 0x134   : > { %v1044_v22 = vmax.f32 %v1913_v1, %v772_v53  ;;  %v1043_v60 = vmax.f32 %v1919_v34, %v770_v30 }
 0x136   : > { %1166 = vst.msk [vmem:[%s1671_s16 + $0x2b8] sm:$0x3f] %vm1081_vm1, %v1044_v22  ;;  %v2443_v22 = vld [vmem:[#allocation3_spill] sm:$0xff] }
 0x137   : > { %1165 = vst.msk [vmem:[%s1671_s16 + $0x2b0] sm:$0xff] %vm1077_vm0, %v1043_v60  ;;  %v776_v59 = vpop.permute.xlu1 %775  ;;  %v774_v7 = vpop.permute.xlu0 %773 }
 0x138   : > { %v1046_v28 = vmax.f32 %v1931_v9, %v776_v59  ;;  %v1045_v56 = vmax.f32 %v1937_v40, %v774_v7  ;;  %v2444_v59 = vld [vmem:[#allocation4_spill] sm:$0xff] }
 0x13a   : > { %1168 = vst.msk [vmem:[%s1671_s16 + $0x2c8] sm:$0xff] %vm1077_vm0, %v1046_v28  ;;  %1167 = vst.msk [vmem:[%s1671_s16 + $0x2c0] sm:$0xff] %vm1077_vm0, %v1045_v56 }
 0x13b   : > { %v780_v1 = vpop.permute.xlu1 %779  ;;  %v778_v5 = vpop.permute.xlu0 %777 }
 0x13c   : > { %v1048_v34 = vmax.f32 %v1949_v19, %v780_v1  ;;  %v1047_v12 = vmax.f32 %v1955_v46, %v778_v5 }
 0x13e   : > { %1170 = vst.msk [vmem:[%s1671_s16 + $0x2d8] sm:$0x3f] %vm1081_vm1, %v1048_v34 }
 0x13f   : > { %1169 = vst.msk [vmem:[%s1671_s16 + $0x2d0] sm:$0xff] %vm1077_vm0, %v1047_v12  ;;  %v784_v9 = vpop.permute.xlu1 %783  ;;  %v782_v11 = vpop.permute.xlu0 %781 }
 0x140   : > { %v1050_v40 = vmax.f32 %v1967_v27, %v784_v9  ;;  %v1049_v48 = vmax.f32 %v1973_v52, %v782_v11 }
 0x142   : > { %1172 = vst.msk [vmem:[%s1671_s16 + $0x2e8] sm:$0xff] %vm1077_vm0, %v1050_v40  ;;  %1171 = vst.msk [vmem:[%s1671_s16 + $0x2e0] sm:$0xff] %vm1077_vm0, %v1049_v48 }
 0x143   : > { %v788_v19 = vpop.permute.xlu1 %787  ;;  %v786_v39 = vpop.permute.xlu0 %785 }
 0x144   : > { %v1052_v46 = vmax.f32 %v1985_v37, %v788_v19  ;;  %v1051_v38 = vmax.f32 %v1991_v58, %v786_v39 }
 0x146   : > { %1174 = vst.msk [vmem:[%s1671_s16 + $0x2f8] sm:$0x3f] %vm1081_vm1, %v1052_v46 }
 0x147   : > { %1173 = vst.msk [vmem:[%s1671_s16 + $0x2f0] sm:$0xff] %vm1077_vm0, %v1051_v38  ;;  %v792_v27 = vpop.permute.xlu1 %791  ;;  %v790_v17 = vpop.permute.xlu0 %789 }
 0x148   : > { %v1054_v52 = vmax.f32 %v2003_v45, %v792_v27  ;;  %v1053_v49 = vmax.f32 %v2009_v0, %v790_v17 }
 0x14a   : > { %1176 = vst.msk [vmem:[%s1671_s16 + $0x308] sm:$0xff] %vm1077_vm0, %v1054_v52  ;;  %1175 = vst.msk [vmem:[%s1671_s16 + $0x300] sm:$0xff] %vm1077_vm0, %v1053_v49 }
 0x14b   : > { %v796_v37 = vpop.permute.xlu1 %795  ;;  %v794_v61 = vpop.permute.xlu0 %793 }
 0x14c   : > { %v1056_v58 = vmax.f32 %v2021_v55, %v796_v37  ;;  %v1055_v4 = vmax.f32 %v2027_v8, %v794_v61 }
 0x14e   : > { %1178 = vst.msk [vmem:[%s1671_s16 + $0x318] sm:$0x3f] %vm1081_vm1, %v1056_v58 }
 0x14f   : > { %1177 = vst.msk [vmem:[%s1671_s16 + $0x310] sm:$0xff] %vm1077_vm0, %v1055_v4  ;;  %v800_v45 = vpop.permute.xlu1 %799  ;;  %v798_v23 = vpop.permute.xlu0 %797 }
 0x150   : > { %v1058_v0 = vmax.f32 %v2039_v63, %v800_v45  ;;  %v1057_v31 = vmax.f32 %v2045_v18, %v798_v23 }
 0x152   : > { %1180 = vst.msk [vmem:[%s1671_s16 + $0x328] sm:$0xff] %vm1077_vm0, %v1058_v0  ;;  %1179 = vst.msk [vmem:[%s1671_s16 + $0x320] sm:$0xff] %vm1077_vm0, %v1057_v31 }
 0x153   : > { %v804_v55 = vpop.permute.xlu1 %803  ;;  %v802_v57 = vpop.permute.xlu0 %801 }
 0x154   : > { %v1060_v8 = vmax.f32 %v2057_v13, %v804_v55  ;;  %v1059_v21 = vmax.f32 %v2063_v26, %v802_v57 }
 0x156   : > { %1182 = vst.msk [vmem:[%s1671_s16 + $0x338] sm:$0x3f] %vm1081_vm1, %v1060_v8 }
 0x157   : > { %1181 = vst.msk [vmem:[%s1671_s16 + $0x330] sm:$0xff] %vm1077_vm0, %v1059_v21  ;;  %v808_v63 = vpop.permute.xlu1 %807  ;;  %v806_v29 = vpop.permute.xlu0 %805 }
 0x158   : > { %v1062_v18 = vmax.f32 %v2075_v25, %v808_v63  ;;  %v1061_v15 = vmax.f32 %v2081_v36, %v806_v29 }
 0x15a   : > { %1184 = vst.msk [vmem:[%s1671_s16 + $0x348] sm:$0xff] %vm1077_vm0, %v1062_v18  ;;  %1183 = vst.msk [vmem:[%s1671_s16 + $0x340] sm:$0xff] %vm1077_vm0, %v1061_v15 }
 0x15b   : > { %v812_v13 = vpop.permute.xlu1 %811  ;;  %v810_v20 = vpop.permute.xlu0 %809 }
 0x15c   : > { %v1064_v26 = vmax.f32 %v2437_v43, %v812_v13  ;;  %v1063_v3 = vmax.f32 %v2438_v35, %v810_v20 }
 0x15e   : > { %1186 = vst.msk [vmem:[%s1671_s16 + $0x358] sm:$0x3f] %vm1081_vm1, %v1064_v26 }
 0x15f   : > { %1185 = vst.msk [vmem:[%s1671_s16 + $0x350] sm:$0xff] %vm1077_vm0, %v1063_v3  ;;  %v816_v25 = vpop.permute.xlu1 %815  ;;  %v814_v32 = vpop.permute.xlu0 %813 }
 0x160   : > { %v1066_v36 = vmax.f32 %v2439_v33, %v816_v25  ;;  %v1065_v10 = vmax.f32 %v2440_v41, %v814_v32 }
 0x162   : > { %1188 = vst.msk [vmem:[%s1671_s16 + $0x368] sm:$0xff] %vm1077_vm0, %v1066_v36  ;;  %1187 = vst.msk [vmem:[%s1671_s16 + $0x360] sm:$0xff] %vm1077_vm0, %v1065_v10 }
 0x163   : > { %v820_v24 = vpop.permute.xlu1 %819  ;;  %v818_v16 = vpop.permute.xlu0 %817 }
 0x164   : > { %v1068_v47 = vmax.f32 %v2441_v51, %v820_v24  ;;  %v1067_v14 = vmax.f32 %v2442_v6, %v818_v16 }
 0x166   : > { %1190 = vst.msk [vmem:[%s1671_s16 + $0x378] sm:$0x3f] %vm1081_vm1, %v1068_v47 }
 0x167   : > { %1189 = vst.msk [vmem:[%s1671_s16 + $0x370] sm:$0xff] %vm1077_vm0, %v1067_v14  ;;  %v824_v53 = vpop.permute.xlu1 %823  ;;  %v822_v60 = vpop.permute.xlu0 %821 }
 0x168   : > { %v1070_v30 = vmax.f32 %v2443_v22, %v824_v53  ;;  %v1069_v28 = vmax.f32 %v2444_v59, %v822_v60 }
 0x16a   : > { %1192 = vst.msk [vmem:[%s1671_s16 + $0x388] sm:$0xff] %vm1077_vm0, %v1070_v30  ;;  %1191 = vst.msk [vmem:[%s1671_s16 + $0x380] sm:$0xff] %vm1077_vm0, %v1069_v28 }
 0x16b   : > { %v828_v7 = vpop.permute.xlu1 %827  ;;  %v826_v1 = vpop.permute.xlu0 %825 }
 0x16c   : > { %v1072_v56 = vmax.f32 %v2165_v2, %v828_v7  ;;  %v1071_v34 = vmax.f32 %v2171_v44, %v826_v1 }
 0x16e   : > { %1194 = vst.msk [vmem:[%s1671_s16 + $0x398] sm:$0x3f] %vm1081_vm1, %v1072_v56 }
 0x16f   : > { %1193 = vst.msk [vmem:[%s1671_s16 + $0x390] sm:$0xff] %vm1077_vm0, %v1071_v34  ;;  %v832_v5 = vpop.permute.xlu1 %831  ;;  %v830_v9 = vpop.permute.xlu0 %829 }
 0x170   : > { %v1074_v12 = vmax.f32 %v2183_v42, %v832_v5  ;;  %v1073_v40 = vmax.f32 %v2189_v54, %v830_v9 }
 0x172   : > { %1196 = vst.msk [vmem:[%s1671_s16 + $0x3a8] sm:$0xff] %vm1077_vm0, %v1074_v12  ;;  %1195 = vst.msk [vmem:[%s1671_s16 + $0x3a0] sm:$0xff] %vm1077_vm0, %v1073_v40 }
 0x173   : > { %v836_v11 = vpop.permute.xlu1 %835  ;;  %v834_v48 = vpop.permute.xlu0 %833 }
 0x174   : > { %v1076_v2 = vmax.f32 %v2201_v50, %v836_v11  ;;  %v1075_v44 = vmax.f32 %v2207_v62, %v834_v48 }
 0x176   : > { %1198 = vst.msk [vmem:[%s1671_s16 + $0x3b8] sm:$0x3f] %vm1081_vm1, %v1076_v2 }
 0x177   : > { %1197 = vst.msk [vmem:[%s1671_s16 + $0x3b0] sm:$0xff] %vm1077_vm0, %v1075_v44 }
 0x178 PF: > { %s11_s6 = sadd.s32 1, %s1280_s6  }
 0x179   : > { %p8_p4 = scmp.ge.s32.totalorder %s11_s6, 4  }
 0x17b   :  { %10 = sbr.rel (!%p8_p4) target bundleno = 1 (0x1), region = 54 }

// kernel: net_forward.5
= control target key start
LH: loop header
LB: loop body
LE: loop exit
PB: predicated region body
PF: predicated region fallthrough
CT: control target
= control target key end

     0   :  { %s4405_s12 = smov 0   ;;  %s6353_s0 = inlined_call_operand.vmem [shape: f32[7200,288], index: 0, kind: input, shape index: {}]   ;;  %s6354_s1 = inlined_call_operand.vmem [shape: f32[288,64], index: 1, kind: input, shape index: {}]   ;;  %s6355_s2 = inlined_call_operand.vmem [shape: f32[1,64], index: 2, kind: input, shape index: {}]   ;;  %s6356_s3 = inlined_call_operand.vmem [shape: f32[7200,64], index: 3, kind: output, shape index: {}]  }
   0x1 LB: > { %s3648_s13 = sadd.s32 4294967295, %s4382_s12   ;;  %p3652_p0 = scmp.ge.s32.totalorder %s4382_s12, 1  ;;  %s4382_s12 = sphi %s4405_s12, %s13_s12  }
   0x2   : > { %p139_p1 = scmp.lt.s32.totalorder %s4382_s12, 6 }
   0x4   : > { %p140_p2 = pnand %p3652_p0, %p139_p1 }
   0x6   : > { %143 = sbr.rel (%p140_p2) target bundleno = 813 (0x32d), region = 32 }
   0xb   : > { %v732_v0 = vld [vmem:[%s6354_s1 + $0x78] sm:$0xff]  ;;  %v4384_v1 = vmov 0.0   ;;  %v731_v2 = vld [vmem:[%s6354_s1 + $0x70] sm:$0xff]  ;;  %v730_v3 = vld [vmem:[%s6354_s1 + $0x68] sm:$0xff]  ;;  %s164_s8 = smul.u32 180, %s3648_s13  ;;  %vm760_vm0 = vcmask 261120  }
   0xc   : > { %1301 = vmatprep.subr.mxu0 %v4384_v1  ;;  %4300 = vmatprep.subr.mxu1 %v4384_v1  ;;  %v729_v4 = vld [vmem:[%s6354_s1 + $0x60] sm:$0xff]  ;;  %v728_v5 = vld [vmem:[%s6354_s1 + $0x58] sm:$0xff]  ;;  %v727_v6 = vld [vmem:[%s6354_s1 + $0x50] sm:$0xff]  ;;  %vm3411_vm1 = vcmask 523264  }
   0xd   : > { %1302 = vmatpush1.msra.mxu0 %v732_v0  ;;  %4332 = vmatpush1.msra.mxu1 %v732_v0  ;;  %v726_v7 = vld [vmem:[%s6354_s1 + $0x48] sm:$0xff]  ;;  %v725_v8 = vld [vmem:[%s6354_s1 + $0x40] sm:$0xff]  ;;  %v724_v9 = vld [vmem:[%s6354_s1 + $0x38] sm:$0xff]  ;;  %p165_p3 = scmp.lt.s32.totalorder %s164_s8, 899 }
   0xe   : > { %1303 = vmatprep.subr.mxu0 %v4384_v1  ;;  %4301 = vmatprep.subr.mxu1 %v4384_v1  ;;  %v723_v10 = vld [vmem:[%s6354_s1 + $0x30] sm:$0xff]  ;;  %v722_v11 = vld [vmem:[%s6354_s1 + $0x28] sm:$0xff]  ;;  %v721_v12 = vld [vmem:[%s6354_s1 + $0x20] sm:$0xff] }
   0xf   : > { %1304 = vmatpush1.msra.mxu0 %v731_v2  ;;  %4333 = vmatpush1.msra.mxu1 %v731_v2  ;;  %v720_v13 = vld [vmem:[%s6354_s1 + $0x18] sm:$0xff]  ;;  %v719_v14 = vld [vmem:[%s6354_s1 + $0x10] sm:$0xff]  ;;  %v718_v15 = vld [vmem:[%s6354_s1 + $0x8] sm:$0xff]  ;;  %s6442_s8 = smov (!%p165_p3, %s164_s8), 899 }
  0x10   : > { %1305 = vmatprep.subr.mxu0 %v4384_v1  ;;  %4302 = vmatprep.subr.mxu1 %v4384_v1  ;;  %v717_v16 = vld [vmem:[%s6354_s1] sm:$0xff]  ;;  %v748_v17 = vld [vmem:[%s6354_s1 + $0xf8] sm:$0xff]  ;;  %v747_v18 = vld [vmem:[%s6354_s1 + $0xf0] sm:$0xff]  ;;  %s4364_s22 = smul.u32 24, %s6442_s8  ;;  %s3654_s17 = sshll.u32 %s6442_s8, 3 }
  0x11   : > { %1306 = vmatpush1.msra.mxu0 %v730_v3  ;;  %4334 = vmatpush1.msra.mxu1 %v730_v3  ;;  %v746_v19 = vld [vmem:[%s6354_s1 + $0xe8] sm:$0xff]  ;;  %v745_v20 = vld [vmem:[%s6354_s1 + $0xe0] sm:$0xff]  ;;  %v744_v21 = vld [vmem:[%s6354_s1 + $0xd8] sm:$0xff]  ;;  %s5269_s8 = scalar_lea.vmem %s6356_s3, %s3654_s17 }
  0x12   : > { %1307 = vmatprep.subr.mxu0 %v4384_v1  ;;  %4303 = vmatprep.subr.mxu1 %v4384_v1  ;;  %v743_v22 = vld [vmem:[%s6354_s1 + $0xd0] sm:$0xff]  ;;  %v742_v23 = vld [vmem:[%s6354_s1 + $0xc8] sm:$0xff]  ;;  %v741_v24 = vld [vmem:[%s6354_s1 + $0xc0] sm:$0xff]  ;;  %s4574_s29 = scalar_lea.vmem %s6353_s0, %s4364_s22 }
  0x13   : > { %1308 = vmatpush1.msra.mxu0 %v729_v4  ;;  %4335 = vmatpush1.msra.mxu1 %v729_v4  ;;  %v740_v25 = vld [vmem:[%s6354_s1 + $0xb8] sm:$0xff]  ;;  %v739_v26 = vld [vmem:[%s6354_s1 + $0xb0] sm:$0xff]  ;;  %v738_v27 = vld [vmem:[%s6354_s1 + $0xa8] sm:$0xff] }
  0x14   : > { %1309 = vmatprep.subr.mxu0 %v4384_v1  ;;  %4304 = vmatprep.subr.mxu1 %v4384_v1  ;;  %v737_v28 = vld [vmem:[%s6354_s1 + $0xa0] sm:$0xff]  ;;  %v736_v29 = vld [vmem:[%s6354_s1 + $0x98] sm:$0xff]  ;;  %v735_v30 = vld [vmem:[%s6354_s1 + $0x90] sm:$0xff] }
  0x15   : > { %1310 = vmatpush1.msra.mxu0 %v728_v5  ;;  %4336 = vmatpush1.msra.mxu1 %v728_v5  ;;  %v734_v31 = vld [vmem:[%s6354_s1 + $0x88] sm:$0xff]  ;;  %v733_v32 = vld [vmem:[%s6354_s1 + $0x80] sm:$0xff]  ;;  %v583_v34 = vld [vmem:[%s4574_s29 + $0xcb0] sm:$0xff] }
  0x16   : > { %1311 = vmatprep.subr.mxu0 %v4384_v1  ;;  %4305 = vmatprep.subr.mxu1 %v4384_v1  ;;  %v178_v33 = vld [vmem:[%s4574_s29 + $0x8] sm:$0xff]  ;;  %v177_v35 = vld [vmem:[%s4574_s29] sm:$0xff]  ;;  %v752_v37 = vld [vmem:[%s6354_s1 + $0x118] sm:$0xff] }
  0x17   : > { %1312 = vmatpush1.msra.mxu0 %v727_v6  ;;  %4337 = vmatpush1.msra.mxu1 %v727_v6  ;;  %v582_v36 = vld [vmem:[%s4574_s29 + $0xca8] sm:$0xff]  ;;  %v181_v38 = vld [vmem:[%s4574_s29 + $0x20] sm:$0xff]  ;;  %v751_v40 = vld [vmem:[%s6354_s1 + $0x110] sm:$0xff] }
  0x18   : > { %1313 = vmatprep.subr.mxu0 %v4384_v1  ;;  %4306 = vmatprep.subr.mxu1 %v4384_v1  ;;  %v586_v39 = vld [vmem:[%s4574_s29 + $0xcc8] sm:$0xff]  ;;  %v180_v41 = vld [vmem:[%s4574_s29 + $0x18] sm:$0xff]  ;;  %v585_v42 = vld [vmem:[%s4574_s29 + $0xcc0] sm:$0xff] }
  0x19   : > { %1314 = vmatpush1.msra.mxu0 %v726_v7  ;;  %4338 = vmatpush1.msra.mxu1 %v726_v7  ;;  %v184_v43 = vld [vmem:[%s4574_s29 + $0x38] sm:$0xff]  ;;  %v589_v44 = vld [vmem:[%s4574_s29 + $0xce0] sm:$0xff]  ;;  %v750_v45 = vld [vmem:[%s6354_s1 + $0x108] sm:$0xff] }
  0x1a   : > { %1315 = vmatprep.subr.mxu0 %v4384_v1  ;;  %4307 = vmatprep.subr.mxu1 %v4384_v1  ;;  %v183_v46 = vld [vmem:[%s4574_s29 + $0x30] sm:$0xff]  ;;  %v588_v47 = vld [vmem:[%s4574_s29 + $0xcd8] sm:$0xff]  ;;  %v749_v50 = vld [vmem:[%s6354_s1 + $0x100] sm:$0xff] }
  0x1b   : > { %1316 = vmatpush1.msra.mxu0 %v725_v8  ;;  %4339 = vmatpush1.msra.mxu1 %v725_v8  ;;  %v187_v48 = vld [vmem:[%s4574_s29 + $0x50] sm:$0xff]  ;;  %v592_v49 = vld [vmem:[%s4574_s29 + $0xcf8] sm:$0xff]  ;;  %v186_v51 = vld [vmem:[%s4574_s29 + $0x48] sm:$0xff] }
  0x1c   : > { %1317 = vmatprep.subr.mxu0 %v4384_v1  ;;  %4308 = vmatprep.subr.mxu1 %v4384_v1  ;;  %v591_v52 = vld [vmem:[%s4574_s29 + $0xcf0] sm:$0xff]  ;;  %v190_v53 = vld [vmem:[%s4574_s29 + $0x68] sm:$0xff]  ;;  %v189_v55 = vld [vmem:[%s4574_s29 + $0x60] sm:$0xff] }
  0x1d   : > { %1318 = vmatpush1.msra.mxu0 %v724_v9  ;;  %4340 = vmatpush1.msra.mxu1 %v724_v9  ;;  %v595_v54 = vld [vmem:[%s4574_s29 + $0xd10] sm:$0xff]  ;;  %v594_v56 = vld [vmem:[%s4574_s29 + $0xd08] sm:$0xff]  ;;  %v193_v57 = vld [vmem:[%s4574_s29 + $0x80] sm:$0xff] }
  0x1e   : > { %1319 = vmatprep.subr.mxu0 %v4384_v1  ;;  %4309 = vmatprep.subr.mxu1 %v4384_v1  ;;  %v598_v58 = vld [vmem:[%s4574_s29 + $0xd28] sm:$0xff]  ;;  %v192_v59 = vld [vmem:[%s4574_s29 + $0x78] sm:$0xff]  ;;  %v597_v60 = vld [vmem:[%s4574_s29 + $0xd20] sm:$0xff] }
  0x1f   : > { %1320 = vmatpush1.msra.mxu0 %v723_v10  ;;  %4341 = vmatpush1.msra.mxu1 %v723_v10  ;;  %v196_v61 = vld [vmem:[%s4574_s29 + $0x98] sm:$0xff]  ;;  %v601_v62 = vld [vmem:[%s4574_s29 + $0xd40] sm:$0xff]  ;;  %v195_v63 = vld [vmem:[%s4574_s29 + $0x90] sm:$0xff] }
  0x20   : > { %1321 = vmatprep.subr.mxu0 %v4384_v1  ;;  %4310 = vmatprep.subr.mxu1 %v4384_v1  ;;  %v600_v0 = vld [vmem:[%s4574_s29 + $0xd38] sm:$0xff]  ;;  %v198_v3 = vld [vmem:[%s4574_s29 + $0xa8] sm:$0xff]  ;;  %v603_v4 = vld [vmem:[%s4574_s29 + $0xd50] sm:$0xff] }
  0x21   : > { %1322 = vmatpush1.msra.mxu0 %v722_v11  ;;  %4342 = vmatpush1.msra.mxu1 %v722_v11  ;;  %v604_v2 = vld [vmem:[%s4574_s29 + $0xd58] sm:$0xff]  ;;  %v202_v5 = vld [vmem:[%s4574_s29 + $0xc8] sm:$0xff]  ;;  %v607_v6 = vld [vmem:[%s4574_s29 + $0xd70] sm:$0xff] }
  0x22   : > { %1323 = vmatprep.subr.mxu0 %v4384_v1  ;;  %4311 = vmatprep.subr.mxu1 %v4384_v1  ;;  %v201_v7 = vld [vmem:[%s4574_s29 + $0xc0] sm:$0xff]  ;;  %v606_v8 = vld [vmem:[%s4574_s29 + $0xd68] sm:$0xff]  ;;  %v204_v11 = vld [vmem:[%s4574_s29 + $0xd8] sm:$0xff] }
  0x23   : > { %1324 = vmatpush1.msra.mxu0 %v721_v12  ;;  %4343 = vmatpush1.msra.mxu1 %v721_v12  ;;  %v205_v9 = vld [vmem:[%s4574_s29 + $0xe0] sm:$0xff]  ;;  %v610_v10 = vld [vmem:[%s4574_s29 + $0xd88] sm:$0xff] }
  0x24   : > { %1325 = vmatprep.subr.mxu0 %v4384_v1  ;;  %4312 = vmatprep.subr.mxu1 %v4384_v1  ;;  %v609_v12 = vld [vmem:[%s4574_s29 + $0xd80] sm:$0xff] }
  0x25   : > { %1326 = vmatpush1.msra.mxu0 %v720_v13  ;;  %4344 = vmatpush1.msra.mxu1 %v720_v13  ;;  %v208_v13 = vld [vmem:[%s4574_s29 + $0xf8] sm:$0xff] }
  0x26   : > { %1327 = vmatprep.subr.mxu0 %v4384_v1  ;;  %4313 = vmatprep.subr.mxu1 %v4384_v1 }
  0x27   : > { %1328 = vmatpush1.msra.mxu0 %v719_v14  ;;  %4345 = vmatpush1.msra.mxu1 %v719_v14  ;;  %v613_v14 = vld [vmem:[%s4574_s29 + $0xda0] sm:$0xff] }
  0x28   : > { %1329 = vmatprep.subr.mxu0 %v4384_v1  ;;  %4314 = vmatprep.subr.mxu1 %v4384_v1 }
  0x29   : > { %1330 = vmatpush1.msra.mxu0 %v718_v15  ;;  %4346 = vmatpush1.msra.mxu1 %v718_v15  ;;  %v207_v15 = vld [vmem:[%s4574_s29 + $0xf0] sm:$0xff] }
  0x2a   : > { %1331 = vmatprep.subr.mxu0 %v4384_v1  ;;  %4315 = vmatprep.subr.mxu1 %v4384_v1 }
  0x2b   : > { %1332 = vmatpush1.msra.mxu0 %v717_v16  ;;  %4347 = vmatpush1.msra.mxu1 %v717_v16  ;;  %v612_v16 = vld [vmem:[%s4574_s29 + $0xd98] sm:$0xff] }
  0x2c   : > { %1333 = vmatprep.subr.mxu0 %v4384_v1  ;;  %4316 = vmatprep.subr.mxu1 %v4384_v1 }
  0x2d   : > { %1334 = vmatpush2.msra.mxu0 %v748_v17  ;;  %4348 = vmatpush2.msra.mxu1 %v748_v17  ;;  %v211_v17 = vld [vmem:[%s4574_s29 + $0x110] sm:$0xff] }
  0x2e   : > { %1335 = vmatprep.subr.mxu0 %v4384_v1  ;;  %4317 = vmatprep.subr.mxu1 %v4384_v1 }
  0x2f   : > { %1336 = vmatpush2.msra.mxu0 %v747_v18  ;;  %4349 = vmatpush2.msra.mxu1 %v747_v18  ;;  %v616_v18 = vld [vmem:[%s4574_s29 + $0xdb8] sm:$0xff] }
  0x30   : > { %1337 = vmatprep.subr.mxu0 %v4384_v1  ;;  %4318 = vmatprep.subr.mxu1 %v4384_v1 }
  0x31   : > { %1338 = vmatpush2.msra.mxu0 %v746_v19  ;;  %4350 = vmatpush2.msra.mxu1 %v746_v19  ;;  %v210_v19 = vld [vmem:[%s4574_s29 + $0x108] sm:$0xff] }
  0x32   : > { %1339 = vmatprep.subr.mxu0 %v4384_v1  ;;  %4319 = vmatprep.subr.mxu1 %v4384_v1 }
  0x33   : > { %1340 = vmatpush2.msra.mxu0 %v745_v20  ;;  %4351 = vmatpush2.msra.mxu1 %v745_v20  ;;  %v615_v20 = vld [vmem:[%s4574_s29 + $0xdb0] sm:$0xff] }
  0x34   : > { %1341 = vmatprep.subr.mxu0 %v4384_v1  ;;  %4320 = vmatprep.subr.mxu1 %v4384_v1 }
  0x35   : > { %1342 = vmatpush2.msra.mxu0 %v744_v21  ;;  %4352 = vmatpush2.msra.mxu1 %v744_v21  ;;  %v214_v21 = vld [vmem:[%s4574_s29 + $0x128] sm:$0xff] }
  0x36   : > { %1343 = vmatprep.subr.mxu0 %v4384_v1  ;;  %4321 = vmatprep.subr.mxu1 %v4384_v1 }
  0x37   : > { %1344 = vmatpush2.msra.mxu0 %v743_v22  ;;  %4353 = vmatpush2.msra.mxu1 %v743_v22  ;;  %v619_v22 = vld [vmem:[%s4574_s29 + $0xdd0] sm:$0xff] }
  0x38   : > { %1345 = vmatprep.subr.mxu0 %v4384_v1  ;;  %4322 = vmatprep.subr.mxu1 %v4384_v1 }
  0x39   : > { %1346 = vmatpush2.msra.mxu0 %v742_v23  ;;  %4354 = vmatpush2.msra.mxu1 %v742_v23  ;;  %v213_v23 = vld [vmem:[%s4574_s29 + $0x120] sm:$0xff] }
  0x3a   : > { %1347 = vmatprep.subr.mxu0 %v4384_v1  ;;  %4323 = vmatprep.subr.mxu1 %v4384_v1 }
  0x3b   : > { %1348 = vmatpush2.msra.mxu0 %v741_v24  ;;  %4355 = vmatpush2.msra.mxu1 %v741_v24  ;;  %v618_v24 = vld [vmem:[%s4574_s29 + $0xdc8] sm:$0xff] }
  0x3c   : > { %1349 = vmatprep.subr.mxu0 %v4384_v1  ;;  %4324 = vmatprep.subr.mxu1 %v4384_v1 }
  0x3d   : > { %1350 = vmatpush2.msra.mxu0 %v740_v25  ;;  %4356 = vmatpush2.msra.mxu1 %v740_v25  ;;  %v217_v25 = vld [vmem:[%s4574_s29 + $0x140] sm:$0xff] }
  0x3e   : > { %1351 = vmatprep.subr.mxu0 %v4384_v1  ;;  %4325 = vmatprep.subr.mxu1 %v4384_v1 }
  0x3f   : > { %1352 = vmatpush2.msra.mxu0 %v739_v26  ;;  %4357 = vmatpush2.msra.mxu1 %v739_v26  ;;  %v622_v26 = vld [vmem:[%s4574_s29 + $0xde8] sm:$0xff] }
  0x40   : > { %1353 = vmatprep.subr.mxu0 %v4384_v1  ;;  %4326 = vmatprep.subr.mxu1 %v4384_v1 }
  0x41   : > { %1354 = vmatpush2.msra.mxu0 %v738_v27  ;;  %4358 = vmatpush2.msra.mxu1 %v738_v27  ;;  %v216_v27 = vld [vmem:[%s4574_s29 + $0x138] sm:$0xff] }
  0x42   : > { %1355 = vmatprep.subr.mxu0 %v4384_v1  ;;  %4327 = vmatprep.subr.mxu1 %v4384_v1 }
  0x43   : > { %1356 = vmatpush2.msra.mxu0 %v737_v28  ;;  %4359 = vmatpush2.msra.mxu1 %v737_v28  ;;  %v621_v28 = vld [vmem:[%s4574_s29 + $0xde0] sm:$0xff] }
  0x44   : > { %1357 = vmatprep.subr.mxu0 %v4384_v1  ;;  %4328 = vmatprep.subr.mxu1 %v4384_v1 }
  0x45   : > { %1358 = vmatpush2.msra.mxu0 %v736_v29  ;;  %4360 = vmatpush2.msra.mxu1 %v736_v29  ;;  %v220_v29 = vld [vmem:[%s4574_s29 + $0x158] sm:$0xff] }
  0x46   : > { %1359 = vmatprep.subr.mxu0 %v4384_v1  ;;  %4329 = vmatprep.subr.mxu1 %v4384_v1 }
  0x47   : > { %1360 = vmatpush2.msra.mxu0 %v735_v30  ;;  %4361 = vmatpush2.msra.mxu1 %v735_v30  ;;  %v625_v30 = vld [vmem:[%s4574_s29 + $0xe00] sm:$0xff] }
  0x48   : > { %1361 = vmatprep.subr.mxu0 %v4384_v1  ;;  %4330 = vmatprep.subr.mxu1 %v4384_v1 }
  0x49   : > { %1362 = vmatpush2.msra.mxu0 %v734_v31  ;;  %4362 = vmatpush2.msra.mxu1 %v734_v31  ;;  %v219_v31 = vld [vmem:[%s4574_s29 + $0x150] sm:$0xff] }
  0x4a   : > { %1363 = vmatprep.subr.mxu0 %v4384_v1  ;;  %4331 = vmatprep.subr.mxu1 %v4384_v1  ;;  %v199_v1 = vld [vmem:[%s4574_s29 + $0xb0] sm:$0xff] }
  0x4b   : > { %1364 = vmatpush2.msra.mxu0 %v733_v32  ;;  %4363 = vmatpush2.msra.mxu1 %v733_v32  ;;  %v624_v32 = vld [vmem:[%s4574_s29 + $0xdf8] sm:$0xff] }
  0x4c   : > { %1365 = vmatprep.mubr.f32.mxu0 %v178_v33  ;;  %2040 = vmatprep.mubr.f32.mxu1 %v583_v34  ;;  %v223_v33 = vld [vmem:[%s4574_s29 + $0x170] sm:$0xff]  ;;  %v628_v34 = vld [vmem:[%s4574_s29 + $0xe18] sm:$0xff] }
  0x4d   : > { %1366 = vmatmul.mubr.f32.vlgmr.msra.gmra.mxu0 %v177_v35  ;;  %2041 = vmatmul.mubr.f32.vlgmr.msra.gmra.mxu1 %v582_v36  ;;  %v222_v35 = vld [vmem:[%s4574_s29 + $0x168] sm:$0xff]  ;;  %v627_v36 = vld [vmem:[%s4574_s29 + $0xe10] sm:$0xff] }
  0x4e   : > { %4022 = vmatprep.subr.mxu1 %v752_v37  ;;  %1370 = vmatprep.mubr.f32.mxu0 %v181_v38  ;;  %v631_v38 = vld [vmem:[%s4574_s29 + $0xe30] sm:$0xff] }
  0x4f   : > { %4023 = vmatpush3.msra.mxu1 %v752_v37  ;;  %2045 = vmatprep.mubr.f32.mxu1 %v586_v39  ;;  %v226_v37 = vld [vmem:[%s4574_s29 + $0x188] sm:$0xff]  ;;  %v225_v39 = vld [vmem:[%s4574_s29 + $0x180] sm:$0xff] }
  0x50   : > { %4024 = vmatprep.subr.mxu1 %v751_v40 }
  0x51   : > { %1371 = vmatmul.mubr.f32.gmra.mxu0 %v180_v41  ;;  %2046 = vmatmul.mubr.f32.gmra.mxu1 %v585_v42  ;;  %v229_v41 = vld [vmem:[%s4574_s29 + $0x1a0] sm:$0xff]  ;;  %v634_v42 = vld [vmem:[%s4574_s29 + $0xe48] sm:$0xff] }
  0x52   : > { %1375 = vmatprep.mubr.f32.mxu0 %v184_v43  ;;  %2050 = vmatprep.mubr.f32.mxu1 %v589_v44  ;;  %v228_v43 = vld [vmem:[%s4574_s29 + $0x198] sm:$0xff]  ;;  %v633_v44 = vld [vmem:[%s4574_s29 + $0xe40] sm:$0xff] }
  0x53   : > { %4025 = vmatpush3.msra.mxu1 %v751_v40  ;;  %v630_v40 = vld [vmem:[%s4574_s29 + $0xe28] sm:$0xff] }
  0x54   : > { %4026 = vmatprep.subr.mxu1 %v750_v45 }
  0x55   : > { %1376 = vmatmul.mubr.f32.gmra.mxu0 %v183_v46  ;;  %2051 = vmatmul.mubr.f32.gmra.mxu1 %v588_v47  ;;  %v637_v46 = vld [vmem:[%s4574_s29 + $0xe60] sm:$0xff]  ;;  %v231_v47 = vld [vmem:[%s4574_s29 + $0x1b0] sm:$0xff] }
  0x56   : > { %1380 = vmatprep.mubr.f32.mxu0 %v187_v48  ;;  %2055 = vmatprep.mubr.f32.mxu1 %v592_v49  ;;  %v636_v48 = vld [vmem:[%s4574_s29 + $0xe58] sm:$0xff]  ;;  %v235_v49 = vld [vmem:[%s4574_s29 + $0x1d0] sm:$0xff] }
  0x57   : > { %4027 = vmatpush3.msra.mxu1 %v750_v45  ;;  %v232_v45 = vld [vmem:[%s4574_s29 + $0x1b8] sm:$0xff] }
  0x58   : > { %4028 = vmatprep.subr.mxu1 %v749_v50 }
  0x59   : > { %1381 = vmatmul.mubr.f32.gmra.mxu0 %v186_v51  ;;  %2056 = vmatmul.mubr.f32.gmra.mxu1 %v591_v52  ;;  %v234_v51 = vld [vmem:[%s4574_s29 + $0x1c8] sm:$0xff]  ;;  %v639_v52 = vld [vmem:[%s4574_s29 + $0xe70] sm:$0xff] }
  0x5a   : > { %1385 = vmatprep.mubr.f32.mxu0 %v190_v53  ;;  %2060 = vmatprep.mubr.f32.mxu1 %v595_v54  ;;  %v238_v53 = vld [vmem:[%s4574_s29 + $0x1e8] sm:$0xff]  ;;  %v643_v54 = vld [vmem:[%s4574_s29 + $0xe90] sm:$0xff] }
  0x5b   : > { %4029 = vmatpush3.msra.mxu1 %v749_v50  ;;  %v640_v50 = vld [vmem:[%s4574_s29 + $0xe78] sm:$0xff] }
  0x5d   : > { %1386 = vmatmul.mubr.f32.gmra.mxu0 %v189_v55  ;;  %2061 = vmatmul.mubr.f32.gmra.mxu1 %v594_v56  ;;  %v237_v55 = vld [vmem:[%s4574_s29 + $0x1e0] sm:$0xff]  ;;  %v642_v56 = vld [vmem:[%s4574_s29 + $0xe88] sm:$0xff] }
  0x5e   : > { %1390 = vmatprep.mubr.f32.mxu0 %v193_v57  ;;  %2065 = vmatprep.mubr.f32.mxu1 %v598_v58  ;;  %v241_v57 = vld [vmem:[%s4574_s29 + $0x200] sm:$0xff]  ;;  %v646_v58 = vld [vmem:[%s4574_s29 + $0xea8] sm:$0xff] }
  0x61   : > { %1391 = vmatmul.mubr.f32.gmra.mxu0 %v192_v59  ;;  %2066 = vmatmul.mubr.f32.gmra.mxu1 %v597_v60  ;;  %v240_v59 = vld [vmem:[%s4574_s29 + $0x1f8] sm:$0xff]  ;;  %v645_v60 = vld [vmem:[%s4574_s29 + $0xea0] sm:$0xff] }
  0x62   : > { %1395 = vmatprep.mubr.f32.mxu0 %v196_v61  ;;  %2070 = vmatprep.mubr.f32.mxu1 %v601_v62  ;;  %v244_v61 = vld [vmem:[%s4574_s29 + $0x218] sm:$0xff]  ;;  %v649_v62 = vld [vmem:[%s4574_s29 + $0xec0] sm:$0xff] }
  0x65   : > { %1396 = vmatmul.mubr.f32.gmra.mxu0 %v195_v63  ;;  %2071 = vmatmul.mubr.f32.gmra.mxu1 %v600_v0  ;;  %v243_v63 = vld [vmem:[%s4574_s29 + $0x210] sm:$0xff]  ;;  %v648_v0 = vld [vmem:[%s4574_s29 + $0xeb8] sm:$0xff] }
  0x66   : > { %1400 = vmatprep.mubr.f32.mxu0 %v199_v1  ;;  %2075 = vmatprep.mubr.f32.mxu1 %v604_v2  ;;  %v247_v1 = vld [vmem:[%s4574_s29 + $0x230] sm:$0xff]  ;;  %v652_v2 = vld [vmem:[%s4574_s29 + $0xed8] sm:$0xff] }
  0x69   : > { %1401 = vmatmul.mubr.f32.gmra.mxu0 %v198_v3  ;;  %2076 = vmatmul.mubr.f32.gmra.mxu1 %v603_v4  ;;  %v246_v3 = vld [vmem:[%s4574_s29 + $0x228] sm:$0xff]  ;;  %v651_v4 = vld [vmem:[%s4574_s29 + $0xed0] sm:$0xff] }
  0x6a   : > { %1405 = vmatprep.mubr.f32.mxu0 %v202_v5  ;;  %2080 = vmatprep.mubr.f32.mxu1 %v607_v6  ;;  %v250_v5 = vld [vmem:[%s4574_s29 + $0x248] sm:$0xff]  ;;  %v655_v6 = vld [vmem:[%s4574_s29 + $0xef0] sm:$0xff] }
  0x6d   : > { %1406 = vmatmul.mubr.f32.gmra.mxu0 %v201_v7  ;;  %2081 = vmatmul.mubr.f32.gmra.mxu1 %v606_v8  ;;  %v249_v7 = vld [vmem:[%s4574_s29 + $0x240] sm:$0xff]  ;;  %v654_v8 = vld [vmem:[%s4574_s29 + $0xee8] sm:$0xff] }
  0x6e   : > { %1410 = vmatprep.mubr.f32.mxu0 %v205_v9  ;;  %2085 = vmatprep.mubr.f32.mxu1 %v610_v10  ;;  %v253_v9 = vld [vmem:[%s4574_s29 + $0x260] sm:$0xff]  ;;  %v658_v10 = vld [vmem:[%s4574_s29 + $0xf08] sm:$0xff] }
  0x71   : > { %1411 = vmatmul.mubr.f32.gmra.mxu0 %v204_v11  ;;  %2086 = vmatmul.mubr.f32.gmra.mxu1 %v609_v12  ;;  %v252_v11 = vld [vmem:[%s4574_s29 + $0x258] sm:$0xff]  ;;  %v657_v12 = vld [vmem:[%s4574_s29 + $0xf00] sm:$0xff] }
  0x72   : > { %1415 = vmatprep.mubr.f32.mxu0 %v208_v13  ;;  %2090 = vmatprep.mubr.f32.mxu1 %v613_v14  ;;  %v256_v13 = vld [vmem:[%s4574_s29 + $0x278] sm:$0xff]  ;;  %v661_v14 = vld [vmem:[%s4574_s29 + $0xf20] sm:$0xff] }
  0x75   : > { %1416 = vmatmul.mubr.f32.gmra.mxu0 %v207_v15  ;;  %2091 = vmatmul.mubr.f32.gmra.mxu1 %v612_v16  ;;  %v255_v15 = vld [vmem:[%s4574_s29 + $0x270] sm:$0xff]  ;;  %v660_v16 = vld [vmem:[%s4574_s29 + $0xf18] sm:$0xff] }
  0x76   : > { %1420 = vmatprep.mubr.f32.mxu0 %v211_v17  ;;  %2095 = vmatprep.mubr.f32.mxu1 %v616_v18  ;;  %v259_v17 = vld [vmem:[%s4574_s29 + $0x290] sm:$0xff]  ;;  %v664_v18 = vld [vmem:[%s4574_s29 + $0xf38] sm:$0xff] }
  0x79   : > { %1421 = vmatmul.mubr.f32.gmra.mxu0 %v210_v19  ;;  %2096 = vmatmul.mubr.f32.gmra.mxu1 %v615_v20  ;;  %v258_v19 = vld [vmem:[%s4574_s29 + $0x288] sm:$0xff]  ;;  %v663_v20 = vld [vmem:[%s4574_s29 + $0xf30] sm:$0xff] }
  0x7a   : > { %1425 = vmatprep.mubr.f32.mxu0 %v214_v21  ;;  %2100 = vmatprep.mubr.f32.mxu1 %v619_v22  ;;  %v262_v21 = vld [vmem:[%s4574_s29 + $0x2a8] sm:$0xff]  ;;  %v667_v22 = vld [vmem:[%s4574_s29 + $0xf50] sm:$0xff] }
  0x7d   : > { %1426 = vmatmul.mubr.f32.gmra.mxu0 %v213_v23  ;;  %2101 = vmatmul.mubr.f32.gmra.mxu1 %v618_v24  ;;  %v261_v23 = vld [vmem:[%s4574_s29 + $0x2a0] sm:$0xff]  ;;  %v666_v24 = vld [vmem:[%s4574_s29 + $0xf48] sm:$0xff] }
  0x7e   : > { %1430 = vmatprep.mubr.f32.mxu0 %v217_v25  ;;  %2105 = vmatprep.mubr.f32.mxu1 %v622_v26  ;;  %v265_v25 = vld [vmem:[%s4574_s29 + $0x2c0] sm:$0xff]  ;;  %v670_v26 = vld [vmem:[%s4574_s29 + $0xf68] sm:$0xff] }
  0x81   : > { %1431 = vmatmul.mubr.f32.gmra.mxu0 %v216_v27  ;;  %2106 = vmatmul.mubr.f32.gmra.mxu1 %v621_v28  ;;  %v264_v27 = vld [vmem:[%s4574_s29 + $0x2b8] sm:$0xff]  ;;  %v669_v28 = vld [vmem:[%s4574_s29 + $0xf60] sm:$0xff] }
  0x82   : > { %1435 = vmatprep.mubr.f32.mxu0 %v220_v29  ;;  %2110 = vmatprep.mubr.f32.mxu1 %v625_v30  ;;  %v268_v29 = vld [vmem:[%s4574_s29 + $0x2d8] sm:$0xff]  ;;  %v673_v30 = vld [vmem:[%s4574_s29 + $0xf80] sm:$0xff] }
  0x85   : > { %1436 = vmatmul.mubr.f32.gmra.mxu0 %v219_v31  ;;  %2111 = vmatmul.mubr.f32.gmra.mxu1 %v624_v32  ;;  %v267_v31 = vld [vmem:[%s4574_s29 + $0x2d0] sm:$0xff]  ;;  %v672_v32 = vld [vmem:[%s4574_s29 + $0xf78] sm:$0xff] }
  0x86   : > { %1440 = vmatprep.mubr.f32.mxu0 %v223_v33  ;;  %2115 = vmatprep.mubr.f32.mxu1 %v628_v34  ;;  %v271_v33 = vld [vmem:[%s4574_s29 + $0x2f0] sm:$0xff]  ;;  %v676_v34 = vld [vmem:[%s4574_s29 + $0xf98] sm:$0xff] }
  0x89   : > { %1441 = vmatmul.mubr.f32.gmra.mxu0 %v222_v35  ;;  %2116 = vmatmul.mubr.f32.gmra.mxu1 %v627_v36  ;;  %v270_v35 = vld [vmem:[%s4574_s29 + $0x2e8] sm:$0xff]  ;;  %v675_v36 = vld [vmem:[%s4574_s29 + $0xf90] sm:$0xff] }
  0x8a   : > { %1445 = vmatprep.mubr.f32.mxu0 %v226_v37  ;;  %2120 = vmatprep.mubr.f32.mxu1 %v631_v38  ;;  %v274_v37 = vld [vmem:[%s4574_s29 + $0x308] sm:$0xff]  ;;  %v679_v38 = vld [vmem:[%s4574_s29 + $0xfb0] sm:$0xff] }
  0x8d   : > { %1446 = vmatmul.mubr.f32.gmra.mxu0 %v225_v39  ;;  %2121 = vmatmul.mubr.f32.gmra.mxu1 %v630_v40  ;;  %v273_v39 = vld [vmem:[%s4574_s29 + $0x300] sm:$0xff]  ;;  %v678_v40 = vld [vmem:[%s4574_s29 + $0xfa8] sm:$0xff] }
  0x8e   : > { %1450 = vmatprep.mubr.f32.mxu0 %v229_v41  ;;  %2125 = vmatprep.mubr.f32.mxu1 %v634_v42  ;;  %v277_v41 = vld [vmem:[%s4574_s29 + $0x320] sm:$0xff]  ;;  %v682_v42 = vld [vmem:[%s4574_s29 + $0xfc8] sm:$0xff] }
  0x91   : > { %1451 = vmatmul.mubr.f32.gmra.mxu0 %v228_v43  ;;  %2126 = vmatmul.mubr.f32.gmra.mxu1 %v633_v44  ;;  %v276_v43 = vld [vmem:[%s4574_s29 + $0x318] sm:$0xff]  ;;  %v681_v44 = vld [vmem:[%s4574_s29 + $0xfc0] sm:$0xff] }
  0x92   : > { %1455 = vmatprep.mubr.f32.mxu0 %v232_v45  ;;  %2130 = vmatprep.mubr.f32.mxu1 %v637_v46  ;;  %v280_v45 = vld [vmem:[%s4574_s29 + $0x338] sm:$0xff]  ;;  %v685_v46 = vld [vmem:[%s4574_s29 + $0xfe0] sm:$0xff] }
  0x95   : > { %1456 = vmatmul.mubr.f32.gmra.mxu0 %v231_v47  ;;  %2131 = vmatmul.mubr.f32.gmra.mxu1 %v636_v48  ;;  %v279_v47 = vld [vmem:[%s4574_s29 + $0x330] sm:$0xff]  ;;  %v684_v48 = vld [vmem:[%s4574_s29 + $0xfd8] sm:$0xff] }
  0x96   : > { %1460 = vmatprep.mubr.f32.mxu0 %v235_v49  ;;  %2135 = vmatprep.mubr.f32.mxu1 %v640_v50  ;;  %v283_v49 = vld [vmem:[%s4574_s29 + $0x350] sm:$0xff]  ;;  %v688_v50 = vld [vmem:[%s4574_s29 + $0xff8] sm:$0xff] }
  0x99   : > { %1461 = vmatmul.mubr.f32.gmra.mxu0 %v234_v51  ;;  %2136 = vmatmul.mubr.f32.gmra.mxu1 %v639_v52  ;;  %v282_v51 = vld [vmem:[%s4574_s29 + $0x348] sm:$0xff]  ;;  %v687_v52 = vld [vmem:[%s4574_s29 + $0xff0] sm:$0xff] }
  0x9a   : > { %1465 = vmatprep.mubr.f32.mxu0 %v238_v53  ;;  %2140 = vmatprep.mubr.f32.mxu1 %v643_v54  ;;  %v286_v53 = vld [vmem:[%s4574_s29 + $0x368] sm:$0xff]  ;;  %v691_v54 = vld [vmem:[%s4574_s29 + $0x1010] sm:$0xff] }
  0x9d   : > { %1466 = vmatmul.mubr.f32.gmra.mxu0 %v237_v55  ;;  %2141 = vmatmul.mubr.f32.gmra.mxu1 %v642_v56  ;;  %v285_v55 = vld [vmem:[%s4574_s29 + $0x360] sm:$0xff]  ;;  %v690_v56 = vld [vmem:[%s4574_s29 + $0x1008] sm:$0xff] }
  0x9e   : > { %1470 = vmatprep.mubr.f32.mxu0 %v241_v57  ;;  %2145 = vmatprep.mubr.f32.mxu1 %v646_v58  ;;  %v289_v57 = vld [vmem:[%s4574_s29 + $0x380] sm:$0xff]  ;;  %v694_v58 = vld [vmem:[%s4574_s29 + $0x1028] sm:$0xff] }
  0xa1   : > { %1471 = vmatmul.mubr.f32.gmra.mxu0 %v240_v59  ;;  %2146 = vmatmul.mubr.f32.gmra.mxu1 %v645_v60  ;;  %v288_v59 = vld [vmem:[%s4574_s29 + $0x378] sm:$0xff]  ;;  %v693_v60 = vld [vmem:[%s4574_s29 + $0x1020] sm:$0xff] }
  0xa2   : > { %1475 = vmatprep.mubr.f32.mxu0 %v244_v61  ;;  %2150 = vmatprep.mubr.f32.mxu1 %v649_v62  ;;  %v292_v61 = vld [vmem:[%s4574_s29 + $0x398] sm:$0xff]  ;;  %v697_v62 = vld [vmem:[%s4574_s29 + $0x1040] sm:$0xff] }
  0xa5   : > { %1476 = vmatmul.mubr.f32.gmra.mxu0 %v243_v63  ;;  %2151 = vmatmul.mubr.f32.gmra.mxu1 %v648_v0  ;;  %v291_v63 = vld [vmem:[%s4574_s29 + $0x390] sm:$0xff]  ;;  %v696_v0 = vld [vmem:[%s4574_s29 + $0x1038] sm:$0xff] }
  0xa6   : > { %1480 = vmatprep.mubr.f32.mxu0 %v247_v1  ;;  %2155 = vmatprep.mubr.f32.mxu1 %v652_v2  ;;  %v295_v1 = vld [vmem:[%s4574_s29 + $0x3b0] sm:$0xff]  ;;  %v700_v2 = vld [vmem:[%s4574_s29 + $0x1058] sm:$0xff] }
  0xa9   : > { %1481 = vmatmul.mubr.f32.gmra.mxu0 %v246_v3  ;;  %2156 = vmatmul.mubr.f32.gmra.mxu1 %v651_v4  ;;  %v294_v3 = vld [vmem:[%s4574_s29 + $0x3a8] sm:$0xff]  ;;  %v699_v4 = vld [vmem:[%s4574_s29 + $0x1050] sm:$0xff] }
  0xaa   : > { %1485 = vmatprep.mubr.f32.mxu0 %v250_v5  ;;  %2160 = vmatprep.mubr.f32.mxu1 %v655_v6  ;;  %v298_v5 = vld [vmem:[%s4574_s29 + $0x3c8] sm:$0xff]  ;;  %v703_v6 = vld [vmem:[%s4574_s29 + $0x1070] sm:$0xff] }
  0xad   : > { %1486 = vmatmul.mubr.f32.gmra.mxu0 %v249_v7  ;;  %2161 = vmatmul.mubr.f32.gmra.mxu1 %v654_v8  ;;  %v297_v7 = vld [vmem:[%s4574_s29 + $0x3c0] sm:$0xff]  ;;  %v702_v8 = vld [vmem:[%s4574_s29 + $0x1068] sm:$0xff] }
  0xae   : > { %1490 = vmatprep.mubr.f32.mxu0 %v253_v9  ;;  %2165 = vmatprep.mubr.f32.mxu1 %v658_v10  ;;  %v301_v9 = vld [vmem:[%s4574_s29 + $0x3e0] sm:$0xff]  ;;  %v706_v10 = vld [vmem:[%s4574_s29 + $0x1088] sm:$0xff] }
  0xb1   : > { %1491 = vmatmul.mubr.f32.gmra.mxu0 %v252_v11  ;;  %2166 = vmatmul.mubr.f32.gmra.mxu1 %v657_v12  ;;  %v300_v11 = vld [vmem:[%s4574_s29 + $0x3d8] sm:$0xff]  ;;  %v705_v12 = vld [vmem:[%s4574_s29 + $0x1080] sm:$0xff] }
  0xb2   : > { %1495 = vmatprep.mubr.f32.mxu0 %v256_v13  ;;  %2170 = vmatprep.mubr.f32.mxu1 %v661_v14  ;;  %v304_v13 = vld [vmem:[%s4574_s29 + $0x3f8] sm:$0xff]  ;;  %v709_v14 = vld [vmem:[%s4574_s29 + $0x10a0] sm:$0xff] }
  0xb5   : > { %1496 = vmatmul.mubr.f32.gmra.mxu0 %v255_v15  ;;  %2171 = vmatmul.mubr.f32.gmra.mxu1 %v660_v16  ;;  %v303_v15 = vld [vmem:[%s4574_s29 + $0x3f0] sm:$0xff]  ;;  %v708_v16 = vld [vmem:[%s4574_s29 + $0x1098] sm:$0xff] }
  0xb6   : > { %1500 = vmatprep.mubr.f32.mxu0 %v259_v17  ;;  %2175 = vmatprep.mubr.f32.mxu1 %v664_v18  ;;  %v307_v17 = vld [vmem:[%s4574_s29 + $0x410] sm:$0xff]  ;;  %v712_v18 = vld [vmem:[%s4574_s29 + $0x10b8] sm:$0xff] }
  0xb9   : > { %1501 = vmatmul.mubr.f32.gmra.mxu0 %v258_v19  ;;  %2176 = vmatmul.mubr.f32.gmra.mxu1 %v663_v20  ;;  %v306_v19 = vld [vmem:[%s4574_s29 + $0x408] sm:$0xff]  ;;  %v711_v20 = vld [vmem:[%s4574_s29 + $0x10b0] sm:$0xff] }
  0xba   : > { %1505 = vmatprep.mubr.f32.mxu0 %v262_v21  ;;  %2180 = vmatprep.mubr.f32.mxu1 %v667_v22  ;;  %v310_v21 = vld [vmem:[%s4574_s29 + $0x428] sm:$0xff]  ;;  %v715_v22 = vld [vmem:[%s4574_s29 + $0x10d0] sm:$0xff] }
  0xbd   : > { %1506 = vmatmul.mubr.f32.gmra.mxu0 %v261_v23  ;;  %2181 = vmatmul.mubr.f32.gmra.mxu1 %v666_v24  ;;  %v309_v23 = vld [vmem:[%s4574_s29 + $0x420] sm:$0xff]  ;;  %v714_v24 = vld [vmem:[%s4574_s29 + $0x10c8] sm:$0xff] }
  0xbe   : > { %1510 = vmatprep.mubr.f32.mxu0 %v265_v25  ;;  %2185 = vmatprep.mubr.f32.mxu1 %v670_v26  ;;  %v313_v25 = vld [vmem:[%s4574_s29 + $0x440] sm:$0xff]  ;;  %v179_v26 = vld [vmem:[%s4574_s29 + $0x10] sm:$0xff] }
  0xc1   : > { %1511 = vmatmul.mubr.f32.gmra.mxu0 %v264_v27  ;;  %2186 = vmatmul.mubr.f32.gmra.mxu1 %v669_v28  ;;  %v312_v27 = vld [vmem:[%s4574_s29 + $0x438] sm:$0xff]  ;;  %v182_v28 = vld [vmem:[%s4574_s29 + $0x28] sm:$0xff] }
  0xc2   : > { %1515 = vmatprep.mubr.f32.mxu0 %v268_v29  ;;  %2190 = vmatprep.mubr.f32.mxu1 %v673_v30  ;;  %v316_v29 = vld [vmem:[%s4574_s29 + $0x458] sm:$0xff]  ;;  %v185_v30 = vld [vmem:[%s4574_s29 + $0x40] sm:$0xff] }
  0xc5   : > { %1516 = vmatmul.mubr.f32.gmra.mxu0 %v267_v31  ;;  %2191 = vmatmul.mubr.f32.gmra.mxu1 %v672_v32  ;;  %v315_v31 = vld [vmem:[%s4574_s29 + $0x450] sm:$0xff]  ;;  %v188_v32 = vld [vmem:[%s4574_s29 + $0x58] sm:$0xff] }
  0xc6   : > { %1520 = vmatprep.mubr.f32.mxu0 %v271_v33  ;;  %2195 = vmatprep.mubr.f32.mxu1 %v676_v34  ;;  %v319_v33 = vld [vmem:[%s4574_s29 + $0x470] sm:$0xff] }
  0xc7   : > { %v191_v34 = vld [vmem:[%s4574_s29 + $0x70] sm:$0xff] }
  0xc9   : > { %1521 = vmatmul.mubr.f32.gmra.mxu0 %v270_v35  ;;  %2196 = vmatmul.mubr.f32.gmra.mxu1 %v675_v36  ;;  %v318_v35 = vld [vmem:[%s4574_s29 + $0x468] sm:$0xff] }
  0xca   : > { %1525 = vmatprep.mubr.f32.mxu0 %v274_v37  ;;  %2200 = vmatprep.mubr.f32.mxu1 %v679_v38  ;;  %v194_v36 = vld [vmem:[%s4574_s29 + $0x88] sm:$0xff]  ;;  %v197_v38 = vld [vmem:[%s4574_s29 + $0xa0] sm:$0xff] }
  0xcb   : > { %v322_v37 = vld [vmem:[%s4574_s29 + $0x488] sm:$0xff] }
  0xcd   : > { %1526 = vmatmul.mubr.f32.gmra.mxu0 %v273_v39  ;;  %2201 = vmatmul.mubr.f32.gmra.mxu1 %v678_v40  ;;  %v321_v39 = vld [vmem:[%s4574_s29 + $0x480] sm:$0xff]  ;;  %v200_v40 = vld [vmem:[%s4574_s29 + $0xb8] sm:$0xff] }
  0xce   : > { %1530 = vmatprep.mubr.f32.mxu0 %v277_v41  ;;  %2205 = vmatprep.mubr.f32.mxu1 %v682_v42  ;;  %v325_v41 = vld [vmem:[%s4574_s29 + $0x4a0] sm:$0xff]  ;;  %v203_v42 = vld [vmem:[%s4574_s29 + $0xd0] sm:$0xff] }
  0xd1   : > { %1531 = vmatmul.mubr.f32.gmra.mxu0 %v276_v43  ;;  %2206 = vmatmul.mubr.f32.gmra.mxu1 %v681_v44 }
  0xd2   : > { %1535 = vmatprep.mubr.f32.mxu0 %v280_v45  ;;  %2210 = vmatprep.mubr.f32.mxu1 %v685_v46  ;;  %v324_v45 = vld [vmem:[%s4574_s29 + $0x498] sm:$0xff]  ;;  %v206_v46 = vld [vmem:[%s4574_s29 + $0xe8] sm:$0xff] }
  0xd5   : > { %1536 = vmatmul.mubr.f32.gmra.mxu0 %v279_v47  ;;  %2211 = vmatmul.mubr.f32.gmra.mxu1 %v684_v48 }
  0xd6   : > { %1540 = vmatprep.mubr.f32.mxu0 %v283_v49  ;;  %2215 = vmatprep.mubr.f32.mxu1 %v688_v50  ;;  %v328_v49 = vld [vmem:[%s4574_s29 + $0x4b8] sm:$0xff]  ;;  %v209_v50 = vld [vmem:[%s4574_s29 + $0x100] sm:$0xff] }
  0xd9   : > { %1541 = vmatmul.mubr.f32.gmra.mxu0 %v282_v51  ;;  %2216 = vmatmul.mubr.f32.gmra.mxu1 %v687_v52 }
  0xda   : > { %1545 = vmatprep.mubr.f32.mxu0 %v286_v53  ;;  %2220 = vmatprep.mubr.f32.mxu1 %v691_v54  ;;  %v327_v53 = vld [vmem:[%s4574_s29 + $0x4b0] sm:$0xff]  ;;  %v212_v54 = vld [vmem:[%s4574_s29 + $0x118] sm:$0xff] }
  0xdd   : > { %1546 = vmatmul.mubr.f32.gmra.mxu0 %v285_v55  ;;  %2221 = vmatmul.mubr.f32.gmra.mxu1 %v690_v56 }
  0xde   : > { %1550 = vmatprep.mubr.f32.mxu0 %v289_v57  ;;  %2225 = vmatprep.mubr.f32.mxu1 %v694_v58  ;;  %v331_v57 = vld [vmem:[%s4574_s29 + $0x4d0] sm:$0xff] }
  0xdf   : > { %v215_v58 = vld [vmem:[%s4574_s29 + $0x130] sm:$0xff] }
  0xe1   : > { %1551 = vmatmul.mubr.f32.gmra.mxu0 %v288_v59  ;;  %2226 = vmatmul.mubr.f32.gmra.mxu1 %v693_v60 }
  0xe2   : > { %1555 = vmatprep.mubr.f32.mxu0 %v292_v61  ;;  %2230 = vmatprep.mubr.f32.mxu1 %v697_v62  ;;  %v330_v61 = vld [vmem:[%s4574_s29 + $0x4c8] sm:$0xff] }
  0xe3   : > { %v218_v62 = vld [vmem:[%s4574_s29 + $0x148] sm:$0xff] }
  0xe5   : > { %1556 = vmatmul.mubr.f32.gmra.mxu0 %v291_v63  ;;  %2231 = vmatmul.mubr.f32.gmra.mxu1 %v696_v0 }
  0xe6   : > { %1560 = vmatprep.mubr.f32.mxu0 %v295_v1  ;;  %2235 = vmatprep.mubr.f32.mxu1 %v700_v2  ;;  %v334_v1 = vld [vmem:[%s4574_s29 + $0x4e8] sm:$0xff]  ;;  %v221_v2 = vld [vmem:[%s4574_s29 + $0x160] sm:$0xff] }
  0xe9   : > { %1561 = vmatmul.mubr.f32.gmra.mxu0 %v294_v3  ;;  %2236 = vmatmul.mubr.f32.gmra.mxu1 %v699_v4 }
  0xea   : > { %1565 = vmatprep.mubr.f32.mxu0 %v298_v5  ;;  %2240 = vmatprep.mubr.f32.mxu1 %v703_v6  ;;  %v333_v5 = vld [vmem:[%s4574_s29 + $0x4e0] sm:$0xff]  ;;  %v224_v6 = vld [vmem:[%s4574_s29 + $0x178] sm:$0xff] }
  0xed   : > { %1566 = vmatmul.mubr.f32.gmra.mxu0 %v297_v7  ;;  %2241 = vmatmul.mubr.f32.gmra.mxu1 %v702_v8 }
  0xee   : > { %1570 = vmatprep.mubr.f32.mxu0 %v301_v9  ;;  %2245 = vmatprep.mubr.f32.mxu1 %v706_v10  ;;  %v337_v9 = vld [vmem:[%s4574_s29 + $0x500] sm:$0xff]  ;;  %v227_v10 = vld [vmem:[%s4574_s29 + $0x190] sm:$0xff] }
  0xf1   : > { %1571 = vmatmul.mubr.f32.gmra.mxu0 %v300_v11  ;;  %2246 = vmatmul.mubr.f32.gmra.mxu1 %v705_v12 }
  0xf2   : > { %1575 = vmatprep.mubr.f32.mxu0 %v304_v13  ;;  %2250 = vmatprep.mubr.f32.mxu1 %v709_v14  ;;  %v336_v13 = vld [vmem:[%s4574_s29 + $0x4f8] sm:$0xff]  ;;  %v230_v14 = vld [vmem:[%s4574_s29 + $0x1a8] sm:$0xff] }
  0xf5   : > { %1576 = vmatmul.mubr.f32.gmra.mxu0 %v303_v15  ;;  %2251 = vmatmul.mubr.f32.gmra.mxu1 %v708_v16 }
  0xf6   : > { %1580 = vmatprep.mubr.f32.mxu0 %v307_v17  ;;  %2255 = vmatprep.mubr.f32.mxu1 %v712_v18  ;;  %v340_v17 = vld [vmem:[%s4574_s29 + $0x518] sm:$0xff]  ;;  %v233_v18 = vld [vmem:[%s4574_s29 + $0x1c0] sm:$0xff] }
  0xf9   : > { %1581 = vmatmul.mubr.f32.gmra.mxu0 %v306_v19  ;;  %2256 = vmatmul.mubr.f32.gmra.mxu1 %v711_v20 }
  0xfa   : > { %1585 = vmatprep.mubr.f32.mxu0 %v310_v21  ;;  %2260 = vmatprep.mubr.f32.mxu1 %v715_v22  ;;  %v339_v21 = vld [vmem:[%s4574_s29 + $0x510] sm:$0xff]  ;;  %v236_v22 = vld [vmem:[%s4574_s29 + $0x1d8] sm:$0xff] }
  0xfd   : > { %1586 = vmatmul.mubr.f32.gmra.mxu0 %v309_v23  ;;  %2261 = vmatmul.mubr.f32.gmra.mxu1 %v714_v24 }
  0xfe   : > { %1590 = vmatprep.mubr.f32.mxu0 %v313_v25  ;;  %4030 = vmatprep.mubr.msk.f32.mxu1 %vm760_vm0, %v179_v26  ;;  %v343_v25 = vld [vmem:[%s4574_s29 + $0x530] sm:$0xff] }
  0xff   : > { %v239_v26 = vld [vmem:[%s4574_s29 + $0x1f0] sm:$0xff] }
 0x101   : > { %1591 = vmatmul.mubr.f32.gmra.mxu0 %v312_v27  ;;  %4031 = vmatmul.mubr.msk.f32.vlgmr.msra.gmra.mxu1 %vm760_vm0, %v182_v28 }
 0x102   : > { %1595 = vmatprep.mubr.f32.mxu0 %v316_v29  ;;  %4033 = vmatprep.mubr.msk.f32.mxu1 %vm760_vm0, %v185_v30  ;;  %v342_v29 = vld [vmem:[%s4574_s29 + $0x528] sm:$0xff] }
 0x103   : > { %v242_v30 = vld [vmem:[%s4574_s29 + $0x208] sm:$0xff] }
 0x105   : > { %1596 = vmatmul.mubr.f32.gmra.mxu0 %v315_v31  ;;  %4034 = vmatmul.mubr.msk.f32.gmra.mxu1 %vm760_vm0, %v188_v32 }
 0x106   : > { %1600 = vmatprep.mubr.f32.mxu0 %v319_v33  ;;  %4036 = vmatprep.mubr.msk.f32.mxu1 %vm760_vm0, %v191_v34  ;;  %v346_v33 = vld [vmem:[%s4574_s29 + $0x548] sm:$0xff]  ;;  %v245_v34 = vld [vmem:[%s4574_s29 + $0x220] sm:$0xff] }
 0x109   : > { %1601 = vmatmul.mubr.f32.gmra.mxu0 %v318_v35  ;;  %4037 = vmatmul.mubr.msk.f32.gmra.mxu1 %vm760_vm0, %v194_v36 }
 0x10a   : > { %1605 = vmatprep.mubr.f32.mxu0 %v322_v37  ;;  %4039 = vmatprep.mubr.msk.f32.mxu1 %vm760_vm0, %v197_v38  ;;  %v345_v37 = vld [vmem:[%s4574_s29 + $0x540] sm:$0xff]  ;;  %v248_v38 = vld [vmem:[%s4574_s29 + $0x238] sm:$0xff] }
 0x10d   : > { %v4800_v43 = vpop.f32.mrf.mxu0  ;;  %1606 = vmatmul.mubr.f32.gmra.mxu0 %v321_v39  ;;  %v4802_v44 = vpop.f32.mrf.mxu1  ;;  %4040 = vmatmul.mubr.msk.f32.gmra.mxu1 %vm760_vm0, %v200_v40 }
 0x10e   : > { %1610 = vmatprep.mubr.f32.mxu0 %v325_v41  ;;  %4042 = vmatprep.mubr.msk.f32.mxu1 %vm760_vm0, %v203_v42  ;;  %v349_v41 = vld [vmem:[%s4574_s29 + $0x560] sm:$0xff]  ;;  %v251_v42 = vld [vmem:[%s4574_s29 + $0x250] sm:$0xff] }
 0x10f   : > { %v1369_v47 = vpop.f32.mrf.mxu0  ;;  %v2044_v48 = vpop.f32.mrf.mxu1 }
 0x110   : > { %v348_v47 = vld [vmem:[%s4574_s29 + $0x558] sm:$0xff]  ;;  %v254_v48 = vld [vmem:[%s4574_s29 + $0x268] sm:$0xff] }
 0x111   : > { %v4810_v51 = vpop.f32.mrf.mxu0  ;;  %1611 = vmatmul.mubr.f32.gmra.mxu0 %v324_v45  ;;  %v4812_v52 = vpop.f32.mrf.mxu1  ;;  %4043 = vmatmul.mubr.msk.f32.gmra.mxu1 %vm760_vm0, %v206_v46 }
 0x112   : > { %1615 = vmatprep.mubr.f32.mxu0 %v328_v49  ;;  %4045 = vmatprep.mubr.msk.f32.mxu1 %vm760_vm0, %v209_v50 }
 0x113   : > { %v1374_v55 = vpop.f32.mrf.mxu0  ;;  %v2049_v56 = vpop.f32.mrf.mxu1 }
 0x115   : > { %v4820_v59 = vpop.f32.mrf.mxu0  ;;  %1616 = vmatmul.mubr.f32.gmra.mxu0 %v327_v53  ;;  %v4822_v60 = vpop.f32.mrf.mxu1  ;;  %4046 = vmatmul.mubr.msk.f32.gmra.mxu1 %vm760_vm0, %v212_v54  ;;  %v352_v53 = vld [vmem:[%s4574_s29 + $0x578] sm:$0xff]  ;;  %v257_v54 = vld [vmem:[%s4574_s29 + $0x280] sm:$0xff] }
 0x116   : > { %1620 = vmatprep.mubr.f32.mxu0 %v331_v57  ;;  %4048 = vmatprep.mubr.msk.f32.mxu1 %vm760_vm0, %v215_v58  ;;  %v351_v57 = vld [vmem:[%s4574_s29 + $0x570] sm:$0xff]  ;;  %v260_v58 = vld [vmem:[%s4574_s29 + $0x298] sm:$0xff] }
 0x117   : > { %v1379_v63 = vpop.f32.mrf.mxu0  ;;  %v2054_v0 = vpop.f32.mrf.mxu1 }
 0x118   : > { %v355_v63 = vld [vmem:[%s4574_s29 + $0x590] sm:$0xff] }
 0x119   : > { %v4830_v3 = vpop.f32.mrf.mxu0  ;;  %1621 = vmatmul.mubr.f32.gmra.mxu0 %v330_v61  ;;  %v4832_v4 = vpop.f32.mrf.mxu1  ;;  %4049 = vmatmul.mubr.msk.f32.gmra.mxu1 %vm760_vm0, %v218_v62  ;;  %v263_v0 = vld [vmem:[%s4574_s29 + $0x2b0] sm:$0xff] }
 0x11a   : > { %6357 = vst [vmem:[#allocation2_spill] sm:$0xff] %v4832_v4  ;;  %1625 = vmatprep.mubr.f32.mxu0 %v334_v1  ;;  %4051 = vmatprep.mubr.msk.f32.mxu1 %vm760_vm0, %v221_v2 }
 0x11b   : > { %v1384_v7 = vpop.f32.mrf.mxu0  ;;  %v2059_v8 = vpop.f32.mrf.mxu1 }
 0x11d   : > { %v4840_v11 = vpop.f32.mrf.mxu0  ;;  %1626 = vmatmul.mubr.f32.gmra.mxu0 %v333_v5  ;;  %v4842_v12 = vpop.f32.mrf.mxu1  ;;  %4052 = vmatmul.mubr.msk.f32.gmra.mxu1 %vm760_vm0, %v224_v6  ;;  %v354_v5 = vld [vmem:[%s4574_s29 + $0x588] sm:$0xff] }
 0x11e   : > { %6358 = vst [vmem:[#allocation3_spill] sm:$0xff] %v4842_v12  ;;  %1630 = vmatprep.mubr.f32.mxu0 %v337_v9  ;;  %4054 = vmatprep.mubr.msk.f32.mxu1 %vm760_vm0, %v227_v10  ;;  %v266_v6 = vld [vmem:[%s4574_s29 + $0x2c8] sm:$0xff]  ;;  %v269_v10 = vld [vmem:[%s4574_s29 + $0x2e0] sm:$0xff] }
 0x11f   : > { %v1389_v15 = vpop.f32.mrf.mxu0  ;;  %v2064_v16 = vpop.f32.mrf.mxu1  ;;  %v358_v9 = vld [vmem:[%s4574_s29 + $0x5a8] sm:$0xff]  ;;  %v485_v12 = vld [vmem:[%s4574_s29 + $0x9a0] sm:$0xff] }
 0x120   : > { %v357_v15 = vld [vmem:[%s4574_s29 + $0x5a0] sm:$0xff]  ;;  %v272_v16 = vld [vmem:[%s4574_s29 + $0x2f8] sm:$0xff] }
 0x121   : > { %v4850_v19 = vpop.f32.mrf.mxu0  ;;  %1631 = vmatmul.mubr.f32.gmra.mxu0 %v336_v13  ;;  %v4852_v20 = vpop.f32.mrf.mxu1  ;;  %4055 = vmatmul.mubr.msk.f32.gmra.mxu1 %vm760_vm0, %v230_v14 }
 0x122   : > { %6359 = vst [vmem:[#allocation4_spill] sm:$0xff] %v4852_v20  ;;  %1635 = vmatprep.mubr.f32.mxu0 %v340_v17  ;;  %4057 = vmatprep.mubr.msk.f32.mxu1 %vm760_vm0, %v233_v18  ;;  %v479_v20 = vld [vmem:[%s4574_s29 + $0x970] sm:$0xff] }
 0x123   : > { %v1394_v23 = vpop.f32.mrf.mxu0  ;;  %v2069_v24 = vpop.f32.mrf.mxu1 }
 0x125   : > { %v4860_v27 = vpop.f32.mrf.mxu0  ;;  %1636 = vmatmul.mubr.f32.gmra.mxu0 %v339_v21  ;;  %v4862_v28 = vpop.f32.mrf.mxu1  ;;  %4058 = vmatmul.mubr.msk.f32.gmra.mxu1 %vm760_vm0, %v236_v22  ;;  %v361_v21 = vld [vmem:[%s4574_s29 + $0x5c0] sm:$0xff]  ;;  %v275_v22 = vld [vmem:[%s4574_s29 + $0x310] sm:$0xff] }
 0x126   : > { %6360 = vst [vmem:[#allocation5_spill] sm:$0xff] %v4862_v28  ;;  %1640 = vmatprep.mubr.f32.mxu0 %v343_v25  ;;  %4060 = vmatprep.mubr.msk.f32.mxu1 %vm760_vm0, %v239_v26  ;;  %v360_v25 = vld [vmem:[%s4574_s29 + $0x5b8] sm:$0xff]  ;;  %v278_v26 = vld [vmem:[%s4574_s29 + $0x328] sm:$0xff] }
 0x127   : > { %v1399_v31 = vpop.f32.mrf.mxu0  ;;  %v2074_v32 = vpop.f32.mrf.mxu1 }
 0x128   : > { %v364_v31 = vld [vmem:[%s4574_s29 + $0x5d8] sm:$0xff]  ;;  %v281_v32 = vld [vmem:[%s4574_s29 + $0x340] sm:$0xff] }
 0x129   : > { %v4870_v35 = vpop.f32.mrf.mxu0  ;;  %1641 = vmatmul.mubr.f32.gmra.mxu0 %v342_v29  ;;  %v4872_v36 = vpop.f32.mrf.mxu1  ;;  %4061 = vmatmul.mubr.msk.f32.gmra.mxu1 %vm760_vm0, %v242_v30 }
 0x12a   : > { %6361 = vst [vmem:[#allocation6_spill] sm:$0xff] %v4872_v36  ;;  %1645 = vmatprep.mubr.f32.mxu0 %v346_v33  ;;  %4063 = vmatprep.mubr.msk.f32.mxu1 %vm760_vm0, %v245_v34 }
 0x12b   : > { %v1404_v39 = vpop.f32.mrf.mxu0  ;;  %v2079_v40 = vpop.f32.mrf.mxu1 }
 0x12d   : > { %v4880_v45 = vpop.f32.mrf.mxu0  ;;  %1646 = vmatmul.mubr.f32.gmra.mxu0 %v345_v37  ;;  %v4882_v46 = vpop.f32.mrf.mxu1  ;;  %4064 = vmatmul.mubr.msk.f32.gmra.mxu1 %vm760_vm0, %v248_v38  ;;  %v363_v37 = vld [vmem:[%s4574_s29 + $0x5d0] sm:$0xff]  ;;  %v284_v38 = vld [vmem:[%s4574_s29 + $0x358] sm:$0xff] }
 0x12e   : > { %6362 = vst [vmem:[#allocation7_spill] sm:$0xff] %v4882_v46  ;;  %1650 = vmatprep.mubr.f32.mxu0 %v349_v41  ;;  %4066 = vmatprep.mubr.msk.f32.mxu1 %vm760_vm0, %v251_v42  ;;  %v367_v41 = vld [vmem:[%s4574_s29 + $0x5f0] sm:$0xff] }
 0x12f   : > { %v1409_v49 = vpop.f32.mrf.mxu0  ;;  %v2084_v50 = vpop.f32.mrf.mxu1  ;;  %v287_v42 = vld [vmem:[%s4574_s29 + $0x370] sm:$0xff] }
 0x130   : > { %v366_v49 = vld [vmem:[%s4574_s29 + $0x5e8] sm:$0xff] }
 0x131   : > { %v4890_v55 = vpop.f32.mrf.mxu0  ;;  %1651 = vmatmul.mubr.f32.gmra.mxu0 %v348_v47  ;;  %v4892_v56 = vpop.f32.mrf.mxu1  ;;  %4067 = vmatmul.mubr.msk.f32.gmra.mxu1 %vm760_vm0, %v254_v48  ;;  %v290_v50 = vld [vmem:[%s4574_s29 + $0x388] sm:$0xff] }
 0x132   : > { %6363 = vst [vmem:[#allocation8_spill] sm:$0xff] %v4892_v56  ;;  %1655 = vmatprep.mubr.f32.mxu0 %v352_v53  ;;  %4069 = vmatprep.mubr.msk.f32.mxu1 %vm760_vm0, %v257_v54 }
 0x133   : > { %v1414_v61 = vpop.f32.mrf.mxu0  ;;  %v2089_v62 = vpop.f32.mrf.mxu1 }
 0x135   : > { %v4900_v1 = vpop.f32.mrf.mxu0  ;;  %1656 = vmatmul.mubr.f32.gmra.mxu0 %v351_v57  ;;  %v4902_v2 = vpop.f32.mrf.mxu1  ;;  %4070 = vmatmul.mubr.msk.f32.gmra.mxu1 %vm760_vm0, %v260_v58  ;;  %v370_v57 = vld [vmem:[%s4574_s29 + $0x608] sm:$0xff]  ;;  %v293_v58 = vld [vmem:[%s4574_s29 + $0x3a0] sm:$0xff] }
 0x136   : > { %6364 = vst [vmem:[#allocation9_spill] sm:$0xff] %v4902_v2  ;;  %1660 = vmatprep.mubr.f32.mxu0 %v355_v63  ;;  %4072 = vmatprep.mubr.msk.f32.mxu1 %vm760_vm0, %v263_v0  ;;  %v369_v63 = vld [vmem:[%s4574_s29 + $0x600] sm:$0xff]  ;;  %v296_v0 = vld [vmem:[%s4574_s29 + $0x3b8] sm:$0xff] }
 0x137   : > { %v1419_v7 = vpop.f32.mrf.mxu0  ;;  %v2094_v8 = vpop.f32.mrf.mxu1 }
 0x138   : > { %v373_v7 = vld [vmem:[%s4574_s29 + $0x620] sm:$0xff]  ;;  %v299_v8 = vld [vmem:[%s4574_s29 + $0x3d0] sm:$0xff] }
 0x139   : > { %v4910_v13 = vpop.f32.mrf.mxu0  ;;  %1661 = vmatmul.mubr.f32.gmra.mxu0 %v354_v5  ;;  %v4912_v14 = vpop.f32.mrf.mxu1  ;;  %4073 = vmatmul.mubr.msk.f32.gmra.mxu1 %vm760_vm0, %v266_v6 }
 0x13a   : > { %6365 = vst [vmem:[#allocation10_spill] sm:$0xff] %v4912_v14  ;;  %1665 = vmatprep.mubr.f32.mxu0 %v358_v9  ;;  %4075 = vmatprep.mubr.msk.f32.mxu1 %vm760_vm0, %v269_v10 }
 0x13b   : > { %v1424_v17 = vpop.f32.mrf.mxu0  ;;  %v2099_v18 = vpop.f32.mrf.mxu1 }
 0x13d   : > { %v4920_v23 = vpop.f32.mrf.mxu0  ;;  %1666 = vmatmul.mubr.f32.gmra.mxu0 %v357_v15  ;;  %v4922_v24 = vpop.f32.mrf.mxu1  ;;  %4076 = vmatmul.mubr.msk.f32.gmra.mxu1 %vm760_vm0, %v272_v16  ;;  %v372_v15 = vld [vmem:[%s4574_s29 + $0x618] sm:$0xff]  ;;  %v302_v16 = vld [vmem:[%s4574_s29 + $0x3e8] sm:$0xff] }
 0x13e   : > { %6366 = vst [vmem:[#allocation11_spill] sm:$0xff] %v4922_v24  ;;  %1670 = vmatprep.mubr.f32.mxu0 %v361_v21  ;;  %4078 = vmatprep.mubr.msk.f32.mxu1 %vm760_vm0, %v275_v22  ;;  %v376_v21 = vld [vmem:[%s4574_s29 + $0x638] sm:$0xff]  ;;  %v305_v22 = vld [vmem:[%s4574_s29 + $0x400] sm:$0xff] }
 0x13f   : > { %v1429_v29 = vpop.f32.mrf.mxu0  ;;  %v2104_v30 = vpop.f32.mrf.mxu1 }
 0x140   : > { %v375_v29 = vld [vmem:[%s4574_s29 + $0x630] sm:$0xff]  ;;  %v308_v30 = vld [vmem:[%s4574_s29 + $0x418] sm:$0xff] }
 0x141   : > { %v4930_v33 = vpop.f32.mrf.mxu0  ;;  %1671 = vmatmul.mubr.f32.gmra.mxu0 %v360_v25  ;;  %v4932_v34 = vpop.f32.mrf.mxu1  ;;  %4079 = vmatmul.mubr.msk.f32.gmra.mxu1 %vm760_vm0, %v278_v26 }
 0x142   : > { %6367 = vst [vmem:[#allocation12_spill] sm:$0xff] %v4932_v34  ;;  %1675 = vmatprep.mubr.f32.mxu0 %v364_v31  ;;  %4081 = vmatprep.mubr.msk.f32.mxu1 %vm760_vm0, %v281_v32 }
 0x143   : > { %v1434_v39 = vpop.f32.mrf.mxu0  ;;  %v2109_v40 = vpop.f32.mrf.mxu1 }
 0x145   : > { %v4940_v47 = vpop.f32.mrf.mxu0  ;;  %1676 = vmatmul.mubr.f32.gmra.mxu0 %v363_v37  ;;  %v4942_v48 = vpop.f32.mrf.mxu1  ;;  %4082 = vmatmul.mubr.msk.f32.gmra.mxu1 %vm760_vm0, %v284_v38  ;;  %v379_v37 = vld [vmem:[%s4574_s29 + $0x650] sm:$0xff] }
 0x146   : > { %6368 = vst [vmem:[#allocation13_spill] sm:$0xff] %v4942_v48  ;;  %1680 = vmatprep.mubr.f32.mxu0 %v367_v41  ;;  %4084 = vmatprep.mubr.msk.f32.mxu1 %vm760_vm0, %v287_v42  ;;  %v311_v38 = vld [vmem:[%s4574_s29 + $0x430] sm:$0xff]  ;;  %v378_v41 = vld [vmem:[%s4574_s29 + $0x648] sm:$0xff] }
 0x147   : > { %v1439_v53 = vpop.f32.mrf.mxu0  ;;  %v2114_v54 = vpop.f32.mrf.mxu1  ;;  %v314_v42 = vld [vmem:[%s4574_s29 + $0x448] sm:$0xff] }
 0x148   : > { %v382_v53 = vld [vmem:[%s4574_s29 + $0x668] sm:$0xff]  ;;  %v317_v54 = vld [vmem:[%s4574_s29 + $0x460] sm:$0xff] }
 0x149   : > { %v4950_v61 = vpop.f32.mrf.mxu0  ;;  %1681 = vmatmul.mubr.f32.gmra.mxu0 %v366_v49  ;;  %v4952_v62 = vpop.f32.mrf.mxu1  ;;  %4085 = vmatmul.mubr.msk.f32.gmra.mxu1 %vm760_vm0, %v290_v50 }
 0x14a   : > { %6369 = vst [vmem:[#allocation14_spill] sm:$0xff] %v4952_v62  ;;  %1685 = vmatprep.mubr.f32.mxu0 %v370_v57  ;;  %4087 = vmatprep.mubr.msk.f32.mxu1 %vm760_vm0, %v293_v58 }
 0x14b   : > { %v1444_v5 = vpop.f32.mrf.mxu0  ;;  %v2119_v6 = vpop.f32.mrf.mxu1 }
 0x14d   : > { %v4960_v9 = vpop.f32.mrf.mxu0  ;;  %1686 = vmatmul.mubr.f32.gmra.mxu0 %v369_v63  ;;  %v4962_v10 = vpop.f32.mrf.mxu1  ;;  %4088 = vmatmul.mubr.msk.f32.gmra.mxu1 %vm760_vm0, %v296_v0  ;;  %v381_v63 = vld [vmem:[%s4574_s29 + $0x660] sm:$0xff]  ;;  %v320_v0 = vld [vmem:[%s4574_s29 + $0x478] sm:$0xff] }
 0x14e   : > { %6370 = vst [vmem:[#allocation15_spill] sm:$0xff] %v4962_v10  ;;  %1690 = vmatprep.mubr.f32.mxu0 %v373_v7  ;;  %4090 = vmatprep.mubr.msk.f32.mxu1 %vm760_vm0, %v299_v8  ;;  %v385_v7 = vld [vmem:[%s4574_s29 + $0x680] sm:$0xff]  ;;  %v323_v8 = vld [vmem:[%s4574_s29 + $0x490] sm:$0xff] }
 0x14f   : > { %v1449_v17 = vpop.f32.mrf.mxu0  ;;  %v2124_v18 = vpop.f32.mrf.mxu1 }
 0x150   : > { %v384_v17 = vld [vmem:[%s4574_s29 + $0x678] sm:$0xff]  ;;  %v326_v18 = vld [vmem:[%s4574_s29 + $0x4a8] sm:$0xff] }
 0x151   : > { %v4970_v25 = vpop.f32.mrf.mxu0  ;;  %1691 = vmatmul.mubr.f32.gmra.mxu0 %v372_v15  ;;  %v4972_v26 = vpop.f32.mrf.mxu1  ;;  %4091 = vmatmul.mubr.msk.f32.gmra.mxu1 %vm760_vm0, %v302_v16 }
 0x152   : > { %6371 = vst [vmem:[#allocation16_spill] sm:$0xff] %v4972_v26  ;;  %1695 = vmatprep.mubr.f32.mxu0 %v376_v21  ;;  %4093 = vmatprep.mubr.msk.f32.mxu1 %vm760_vm0, %v305_v22 }
 0x153   : > { %v1454_v31 = vpop.f32.mrf.mxu0  ;;  %v2129_v32 = vpop.f32.mrf.mxu1 }
 0x155   : > { %v4980_v39 = vpop.f32.mrf.mxu0  ;;  %1696 = vmatmul.mubr.f32.gmra.mxu0 %v375_v29  ;;  %v4982_v40 = vpop.f32.mrf.mxu1  ;;  %4094 = vmatmul.mubr.msk.f32.gmra.mxu1 %vm760_vm0, %v308_v30  ;;  %v388_v29 = vld [vmem:[%s4574_s29 + $0x698] sm:$0xff]  ;;  %v329_v30 = vld [vmem:[%s4574_s29 + $0x4c0] sm:$0xff] }
 0x156   : > { %6372 = vst [vmem:[#allocation17_spill] sm:$0xff] %v4982_v40  ;;  %1700 = vmatprep.mubr.f32.mxu0 %v379_v37  ;;  %4096 = vmatprep.mubr.msk.f32.mxu1 %vm760_vm0, %v311_v38  ;;  %v387_v37 = vld [vmem:[%s4574_s29 + $0x690] sm:$0xff]  ;;  %v332_v38 = vld [vmem:[%s4574_s29 + $0x4d8] sm:$0xff] }
 0x157   : > { %v1459_v49 = vpop.f32.mrf.mxu0  ;;  %v2134_v50 = vpop.f32.mrf.mxu1 }
 0x158   : > { %v391_v49 = vld [vmem:[%s4574_s29 + $0x6b0] sm:$0xff] }
 0x159   : > { %v4990_v57 = vpop.f32.mrf.mxu0  ;;  %1701 = vmatmul.mubr.f32.gmra.mxu0 %v378_v41  ;;  %v4992_v58 = vpop.f32.mrf.mxu1  ;;  %4097 = vmatmul.mubr.msk.f32.gmra.mxu1 %vm760_vm0, %v314_v42  ;;  %v335_v50 = vld [vmem:[%s4574_s29 + $0x4f0] sm:$0xff] }
 0x15a   : > { %6373 = vst [vmem:[#allocation18_spill] sm:$0xff] %v4992_v58  ;;  %1705 = vmatprep.mubr.f32.mxu0 %v382_v53  ;;  %4099 = vmatprep.mubr.msk.f32.mxu1 %vm760_vm0, %v317_v54 }
 0x15b   : > { %v1464_v5 = vpop.f32.mrf.mxu0  ;;  %v2139_v6 = vpop.f32.mrf.mxu1 }
 0x15d   : > { %v5000_v15 = vpop.f32.mrf.mxu0  ;;  %1706 = vmatmul.mubr.f32.gmra.mxu0 %v381_v63  ;;  %v5002_v16 = vpop.f32.mrf.mxu1  ;;  %4100 = vmatmul.mubr.msk.f32.gmra.mxu1 %vm760_vm0, %v320_v0  ;;  %v390_v63 = vld [vmem:[%s4574_s29 + $0x6a8] sm:$0xff] }
 0x15e   : > { %6374 = vst [vmem:[#allocation19_spill] sm:$0xff] %v5002_v16  ;;  %1710 = vmatprep.mubr.f32.mxu0 %v385_v7  ;;  %4102 = vmatprep.mubr.msk.f32.mxu1 %vm760_vm0, %v323_v8  ;;  %v338_v0 = vld [vmem:[%s4574_s29 + $0x508] sm:$0xff]  ;;  %v341_v8 = vld [vmem:[%s4574_s29 + $0x520] sm:$0xff] }
 0x15f   : > { %v1469_v21 = vpop.f32.mrf.mxu0  ;;  %v2144_v22 = vpop.f32.mrf.mxu1  ;;  %v394_v7 = vld [vmem:[%s4574_s29 + $0x6c8] sm:$0xff] }
 0x160   : > { %v393_v21 = vld [vmem:[%s4574_s29 + $0x6c0] sm:$0xff]  ;;  %v344_v22 = vld [vmem:[%s4574_s29 + $0x538] sm:$0xff] }
 0x161   : > { %v5010_v31 = vpop.f32.mrf.mxu0  ;;  %1711 = vmatmul.mubr.f32.gmra.mxu0 %v384_v17  ;;  %v5012_v32 = vpop.f32.mrf.mxu1  ;;  %4103 = vmatmul.mubr.msk.f32.gmra.mxu1 %vm760_vm0, %v326_v18 }
 0x162   : > { %6375 = vst [vmem:[#allocation20_spill] sm:$0xff] %v5012_v32  ;;  %1715 = vmatprep.mubr.f32.mxu0 %v388_v29  ;;  %4105 = vmatprep.mubr.msk.f32.mxu1 %vm760_vm0, %v329_v30 }
 0x163   : > { %v1474_v41 = vpop.f32.mrf.mxu0  ;;  %v2149_v42 = vpop.f32.mrf.mxu1 }
 0x165   : > { %v5020_v53 = vpop.f32.mrf.mxu0  ;;  %1716 = vmatmul.mubr.f32.gmra.mxu0 %v387_v37  ;;  %v5022_v54 = vpop.f32.mrf.mxu1  ;;  %4106 = vmatmul.mubr.msk.f32.gmra.mxu1 %vm760_vm0, %v332_v38  ;;  %v397_v37 = vld [vmem:[%s4574_s29 + $0x6e0] sm:$0xff]  ;;  %v347_v38 = vld [vmem:[%s4574_s29 + $0x550] sm:$0xff] }
 0x166   : > { %6376 = vst [vmem:[#allocation21_spill] sm:$0xff] %v5022_v54  ;;  %1720 = vmatprep.mubr.f32.mxu0 %v391_v49  ;;  %4108 = vmatprep.mubr.msk.f32.mxu1 %vm760_vm0, %v335_v50  ;;  %v396_v49 = vld [vmem:[%s4574_s29 + $0x6d8] sm:$0xff]  ;;  %v350_v50 = vld [vmem:[%s4574_s29 + $0x568] sm:$0xff] }
 0x167   : > { %v1479_v5 = vpop.f32.mrf.mxu0  ;;  %v2154_v6 = vpop.f32.mrf.mxu1 }
 0x168   : > { %v400_v5 = vld [vmem:[%s4574_s29 + $0x6f8] sm:$0xff]  ;;  %v353_v6 = vld [vmem:[%s4574_s29 + $0x580] sm:$0xff] }
 0x169   : > { %v5030_v17 = vpop.f32.mrf.mxu0  ;;  %1721 = vmatmul.mubr.f32.gmra.mxu0 %v390_v63  ;;  %v5032_v18 = vpop.f32.mrf.mxu1  ;;  %4109 = vmatmul.mubr.msk.f32.gmra.mxu1 %vm760_vm0, %v338_v0 }
 0x16a   : > { %6377 = vst [vmem:[#allocation22_spill] sm:$0xff] %v5032_v18  ;;  %1725 = vmatprep.mubr.f32.mxu0 %v394_v7  ;;  %4111 = vmatprep.mubr.msk.f32.mxu1 %vm760_vm0, %v341_v8 }
 0x16b   : > { %v1484_v29 = vpop.f32.mrf.mxu0  ;;  %v2159_v30 = vpop.f32.mrf.mxu1 }
 0x16d   : > { %v5040_v41 = vpop.f32.mrf.mxu0  ;;  %1726 = vmatmul.mubr.f32.gmra.mxu0 %v393_v21  ;;  %v5042_v42 = vpop.f32.mrf.mxu1  ;;  %4112 = vmatmul.mubr.msk.f32.gmra.mxu1 %vm760_vm0, %v344_v22  ;;  %v399_v21 = vld [vmem:[%s4574_s29 + $0x6f0] sm:$0xff]  ;;  %v356_v22 = vld [vmem:[%s4574_s29 + $0x598] sm:$0xff] }
 0x16e   : > { %6378 = vst [vmem:[#allocation23_spill] sm:$0xff] %v5042_v42  ;;  %1730 = vmatprep.mubr.f32.mxu0 %v397_v37  ;;  %4114 = vmatprep.mubr.msk.f32.mxu1 %vm760_vm0, %v347_v38  ;;  %v403_v37 = vld [vmem:[%s4574_s29 + $0x710] sm:$0xff] }
 0x16f   : > { %v1489_v63 = vpop.f32.mrf.mxu0  ;;  %v2164_v0 = vpop.f32.mrf.mxu1  ;;  %v359_v38 = vld [vmem:[%s4574_s29 + $0x5b0] sm:$0xff] }
 0x170   : > { %v362_v0 = vld [vmem:[%s4574_s29 + $0x5c8] sm:$0xff] }
 0x171   : > { %v5050_v7 = vpop.f32.mrf.mxu0  ;;  %1731 = vmatmul.mubr.f32.gmra.mxu0 %v396_v49  ;;  %v5052_v8 = vpop.f32.mrf.mxu1  ;;  %4115 = vmatmul.mubr.msk.f32.gmra.mxu1 %vm760_vm0, %v350_v50  ;;  %v402_v50 = vld [vmem:[%s4574_s29 + $0x708] sm:$0xff] }
 0x172   : > { %6379 = vst [vmem:[#allocation24_spill] sm:$0xff] %v5052_v8  ;;  %1735 = vmatprep.mubr.f32.mxu0 %v400_v5  ;;  %4117 = vmatprep.mubr.msk.f32.mxu1 %vm760_vm0, %v353_v6 }
 0x173   : > { %v1494_v29 = vpop.f32.mrf.mxu0  ;;  %v2169_v30 = vpop.f32.mrf.mxu1 }
 0x174   : > { %v406_v29 = vld [vmem:[%s4574_s29 + $0x728] sm:$0xff]  ;;  %v365_v30 = vld [vmem:[%s4574_s29 + $0x5e0] sm:$0xff] }
 0x175   : > { %v5060_v63 = vpop.f32.mrf.mxu0  ;;  %1736 = vmatmul.mubr.f32.gmra.mxu0 %v399_v21  ;;  %v5062_v49 = vpop.f32.mrf.mxu1  ;;  %4118 = vmatmul.mubr.msk.f32.gmra.mxu1 %vm760_vm0, %v356_v22  ;;  %v405_v22 = vld [vmem:[%s4574_s29 + $0x720] sm:$0xff] }
 0x176   : > { %6380 = vst [vmem:[#allocation25_spill] sm:$0xff] %v5062_v49  ;;  %1740 = vmatprep.mubr.f32.mxu0 %v403_v37  ;;  %4120 = vmatprep.mubr.msk.f32.mxu1 %vm760_vm0, %v359_v38  ;;  %v368_v37 = vld [vmem:[%s4574_s29 + $0x5f8] sm:$0xff]  ;;  %v371_v49 = vld [vmem:[%s4574_s29 + $0x610] sm:$0xff] }
 0x177   : > { %v1499_v5 = vpop.f32.mrf.mxu0  ;;  %v2174_v6 = vpop.f32.mrf.mxu1 }
 0x178   : > { %v409_v6 = vld [vmem:[%s4574_s29 + $0x740] sm:$0xff] }
 0x179   : > { %v5070_v8 = vpop.f32.mrf.mxu0  ;;  %1741 = vmatmul.mubr.f32.gmra.mxu0 %v402_v50  ;;  %v5072_v21 = vpop.f32.mrf.mxu1  ;;  %4121 = vmatmul.mubr.msk.f32.gmra.mxu1 %vm760_vm0, %v362_v0  ;;  %v408_v0 = vld [vmem:[%s4574_s29 + $0x738] sm:$0xff] }
 0x17a   : > { %6381 = vst [vmem:[#allocation26_spill] sm:$0xff] %v5072_v21  ;;  %1745 = vmatprep.mubr.f32.mxu0 %v406_v29  ;;  %4123 = vmatprep.mubr.msk.f32.mxu1 %vm760_vm0, %v365_v30  ;;  %v374_v29 = vld [vmem:[%s4574_s29 + $0x628] sm:$0xff]  ;;  %v377_v21 = vld [vmem:[%s4574_s29 + $0x640] sm:$0xff] }
 0x17b   : > { %v1504_v38 = vpop.f32.mrf.mxu0  ;;  %v2179_v5 = vpop.f32.mrf.mxu1 }
 0x17c   : > { %v412_v5 = vld [vmem:[%s4574_s29 + $0x758] sm:$0xff] }
 0x17d   : > { %v5080_v18 = vpop.f32.mrf.mxu0  ;;  %1746 = vmatmul.mubr.f32.gmra.mxu0 %v405_v22  ;;  %v5082_v50 = vpop.f32.mrf.mxu1  ;;  %4124 = vmatmul.mubr.msk.f32.gmra.mxu1 %vm760_vm0, %v368_v37  ;;  %v380_v37 = vld [vmem:[%s4574_s29 + $0x658] sm:$0xff] }
 0x17e   : > { %6382 = vst [vmem:[#allocation27_spill] sm:$0xff] %v5082_v50  ;;  %1750 = vmatprep.mubr.f32.mxu0 %v409_v6  ;;  %4126 = vmatprep.mubr.msk.f32.mxu1 %vm760_vm0, %v371_v49  ;;  %v411_v49 = vld [vmem:[%s4574_s29 + $0x750] sm:$0xff] }
 0x17f   : > { %v1509_v30 = vpop.f32.mrf.mxu0  ;;  %v2184_v38 = vpop.f32.mrf.mxu1  ;;  %v383_v50 = vld [vmem:[%s4574_s29 + $0x670] sm:$0xff] }
 0x180   : > { %v415_v38 = vld [vmem:[%s4574_s29 + $0x770] sm:$0xff] }
 0x181   : > { %v5090_v42 = vpop.f32.mrf.mxu0  ;;  %1751 = vmatmul.mubr.f32.gmra.mxu0 %v408_v0  ;;  %v5092_v22 = vpop.f32.mrf.mxu1  ;;  %4127 = vmatmul.mubr.msk.f32.gmra.mxu1 %vm760_vm0, %v374_v29  ;;  %v386_v29 = vld [vmem:[%s4574_s29 + $0x688] sm:$0xff] }
 0x182   : > { %6383 = vst [vmem:[#allocation28_spill] sm:$0xff] %v5092_v22  ;;  %1755 = vmatprep.mubr.f32.mxu0 %v412_v5  ;;  %4129 = vmatprep.mubr.msk.f32.mxu1 %vm760_vm0, %v377_v21  ;;  %v414_v21 = vld [vmem:[%s4574_s29 + $0x768] sm:$0xff]  ;;  %v389_v22 = vld [vmem:[%s4574_s29 + $0x6a0] sm:$0xff] }
 0x183   : > { %v1514_v6 = vpop.f32.mrf.mxu0  ;;  %v2189_v30 = vpop.f32.mrf.mxu1 }
 0x184   : > { %v418_v30 = vld [vmem:[%s4574_s29 + $0x788] sm:$0xff] }
 0x185   : > { %v5100_v32 = vpop.f32.mrf.mxu0  ;;  %1756 = vmatmul.mubr.f32.gmra.mxu0 %v411_v49  ;;  %v5102_v0 = vpop.f32.mrf.mxu1  ;;  %4130 = vmatmul.mubr.msk.f32.gmra.mxu1 %vm760_vm0, %v380_v37  ;;  %v392_v37 = vld [vmem:[%s4574_s29 + $0x6b8] sm:$0xff] }
 0x186   : > { %6384 = vst [vmem:[#allocation29_spill] sm:$0xff] %v5102_v0  ;;  %1760 = vmatprep.mubr.f32.mxu0 %v415_v38  ;;  %4132 = vmatprep.mubr.msk.f32.mxu1 %vm760_vm0, %v383_v50  ;;  %v417_v50 = vld [vmem:[%s4574_s29 + $0x780] sm:$0xff]  ;;  %v395_v0 = vld [vmem:[%s4574_s29 + $0x6d0] sm:$0xff] }
 0x187   : > { %v1519_v5 = vpop.f32.mrf.mxu0  ;;  %v2194_v6 = vpop.f32.mrf.mxu1 }
 0x188   : > { %v421_v6 = vld [vmem:[%s4574_s29 + $0x7a0] sm:$0xff] }
 0x189   : > { %v5110_v54 = vpop.f32.mrf.mxu0  ;;  %1761 = vmatmul.mubr.f32.gmra.mxu0 %v414_v21  ;;  %v5112_v49 = vpop.f32.mrf.mxu1  ;;  %4133 = vmatmul.mubr.msk.f32.gmra.mxu1 %vm760_vm0, %v386_v29  ;;  %v398_v29 = vld [vmem:[%s4574_s29 + $0x6e8] sm:$0xff] }
 0x18a   : > { %6385 = vst [vmem:[#allocation30_spill] sm:$0xff] %v5112_v49  ;;  %1765 = vmatprep.mubr.f32.mxu0 %v418_v30  ;;  %4135 = vmatprep.mubr.msk.f32.mxu1 %vm760_vm0, %v389_v22  ;;  %v420_v22 = vld [vmem:[%s4574_s29 + $0x798] sm:$0xff]  ;;  %v401_v49 = vld [vmem:[%s4574_s29 + $0x700] sm:$0xff] }
 0x18b   : > { %v1524_v38 = vpop.f32.mrf.mxu0  ;;  %v2199_v5 = vpop.f32.mrf.mxu1 }
 0x18c   : > { %v424_v5 = vld [vmem:[%s4574_s29 + $0x7b8] sm:$0xff] }
 0x18d   : > { %v5120_v58 = vpop.f32.mrf.mxu0  ;;  %1766 = vmatmul.mubr.f32.gmra.mxu0 %v417_v50  ;;  %v5122_v21 = vpop.f32.mrf.mxu1  ;;  %4136 = vmatmul.mubr.msk.f32.gmra.mxu1 %vm760_vm0, %v392_v37  ;;  %v404_v37 = vld [vmem:[%s4574_s29 + $0x718] sm:$0xff] }
 0x18e   : > { %6386 = vst [vmem:[#allocation31_spill] sm:$0xff] %v5122_v21  ;;  %1770 = vmatprep.mubr.f32.mxu0 %v421_v6  ;;  %4138 = vmatprep.mubr.msk.f32.mxu1 %vm760_vm0, %v395_v0  ;;  %v423_v0 = vld [vmem:[%s4574_s29 + $0x7b0] sm:$0xff] }
 0x18f   : > { %v1529_v30 = vpop.f32.mrf.mxu0  ;;  %v2204_v38 = vpop.f32.mrf.mxu1  ;;  %v407_v21 = vld [vmem:[%s4574_s29 + $0x730] sm:$0xff] }
 0x190   : > { %v427_v38 = vld [vmem:[%s4574_s29 + $0x7d0] sm:$0xff] }
 0x191   : > { %v5130_v16 = vpop.f32.mrf.mxu0  ;;  %1771 = vmatmul.mubr.f32.gmra.mxu0 %v420_v22  ;;  %v5132_v50 = vpop.f32.mrf.mxu1  ;;  %4139 = vmatmul.mubr.msk.f32.gmra.mxu1 %vm760_vm0, %v398_v29  ;;  %v410_v29 = vld [vmem:[%s4574_s29 + $0x748] sm:$0xff] }
 0x192   : > { %6387 = vst [vmem:[#allocation32_spill] sm:$0xff] %v5132_v50  ;;  %1775 = vmatprep.mubr.f32.mxu0 %v424_v5  ;;  %4141 = vmatprep.mubr.msk.f32.mxu1 %vm760_vm0, %v401_v49  ;;  %v426_v49 = vld [vmem:[%s4574_s29 + $0x7c8] sm:$0xff]  ;;  %v413_v50 = vld [vmem:[%s4574_s29 + $0x760] sm:$0xff] }
 0x193   : > { %v1534_v6 = vpop.f32.mrf.mxu0  ;;  %v2209_v30 = vpop.f32.mrf.mxu1 }
 0x194   : > { %v430_v30 = vld [vmem:[%s4574_s29 + $0x7e8] sm:$0xff] }
 0x195   : > { %v5140_v26 = vpop.f32.mrf.mxu0  ;;  %1776 = vmatmul.mubr.f32.gmra.mxu0 %v423_v0  ;;  %v5142_v22 = vpop.f32.mrf.mxu1  ;;  %4142 = vmatmul.mubr.msk.f32.gmra.mxu1 %vm760_vm0, %v404_v37  ;;  %v416_v37 = vld [vmem:[%s4574_s29 + $0x778] sm:$0xff] }
 0x196   : > { %6388 = vst [vmem:[#allocation33_spill] sm:$0xff] %v5142_v22  ;;  %1780 = vmatprep.mubr.f32.mxu0 %v427_v38  ;;  %4144 = vmatprep.mubr.msk.f32.mxu1 %vm760_vm0, %v407_v21  ;;  %v429_v21 = vld [vmem:[%s4574_s29 + $0x7e0] sm:$0xff]  ;;  %v419_v22 = vld [vmem:[%s4574_s29 + $0x790] sm:$0xff] }
 0x197   : > { %v1539_v5 = vpop.f32.mrf.mxu0  ;;  %v2214_v6 = vpop.f32.mrf.mxu1 }
 0x198   : > { %v433_v6 = vld [vmem:[%s4574_s29 + $0x800] sm:$0xff] }
 0x199   : > { %v5150_v40 = vpop.f32.mrf.mxu0  ;;  %1781 = vmatmul.mubr.f32.gmra.mxu0 %v426_v49  ;;  %v5152_v0 = vpop.f32.mrf.mxu1  ;;  %4145 = vmatmul.mubr.msk.f32.gmra.mxu1 %vm760_vm0, %v410_v29  ;;  %v422_v29 = vld [vmem:[%s4574_s29 + $0x7a8] sm:$0xff] }
 0x19a   : > { %6389 = vst [vmem:[#allocation34_spill] sm:$0xff] %v5152_v0  ;;  %1785 = vmatprep.mubr.f32.mxu0 %v430_v30  ;;  %4147 = vmatprep.mubr.msk.f32.mxu1 %vm760_vm0, %v413_v50  ;;  %v432_v50 = vld [vmem:[%s4574_s29 + $0x7f8] sm:$0xff]  ;;  %v425_v0 = vld [vmem:[%s4574_s29 + $0x7c0] sm:$0xff] }
 0x19b   : > { %v1544_v38 = vpop.f32.mrf.mxu0  ;;  %v2219_v5 = vpop.f32.mrf.mxu1 }
 0x19c   : > { %v436_v5 = vld [vmem:[%s4574_s29 + $0x818] sm:$0xff] }
 0x19d   : > { %v5160_v62 = vpop.f32.mrf.mxu0  ;;  %1786 = vmatmul.mubr.f32.gmra.mxu0 %v429_v21  ;;  %v5162_v49 = vpop.f32.mrf.mxu1  ;;  %4148 = vmatmul.mubr.msk.f32.gmra.mxu1 %vm760_vm0, %v416_v37  ;;  %v428_v37 = vld [vmem:[%s4574_s29 + $0x7d8] sm:$0xff] }
 0x19e   : > { %6390 = vst [vmem:[#allocation35_spill] sm:$0xff] %v5162_v49  ;;  %1790 = vmatprep.mubr.f32.mxu0 %v433_v6  ;;  %4150 = vmatprep.mubr.msk.f32.mxu1 %vm760_vm0, %v419_v22  ;;  %v435_v22 = vld [vmem:[%s4574_s29 + $0x810] sm:$0xff] }
 0x19f   : > { %v1549_v30 = vpop.f32.mrf.mxu0  ;;  %v2224_v38 = vpop.f32.mrf.mxu1  ;;  %v431_v49 = vld [vmem:[%s4574_s29 + $0x7f0] sm:$0xff] }
 0x1a0   : > { %v439_v38 = vld [vmem:[%s4574_s29 + $0x830] sm:$0xff] }
 0x1a1   : > { %v5170_v10 = vpop.f32.mrf.mxu0  ;;  %1791 = vmatmul.mubr.f32.gmra.mxu0 %v432_v50  ;;  %v5172_v21 = vpop.f32.mrf.mxu1  ;;  %4151 = vmatmul.mubr.msk.f32.gmra.mxu1 %vm760_vm0, %v422_v29  ;;  %v434_v29 = vld [vmem:[%s4574_s29 + $0x808] sm:$0xff] }
 0x1a2   : > { %6391 = vst [vmem:[#allocation36_spill] sm:$0xff] %v5172_v21  ;;  %1795 = vmatprep.mubr.f32.mxu0 %v436_v5  ;;  %4153 = vmatprep.mubr.msk.f32.mxu1 %vm760_vm0, %v425_v0  ;;  %v438_v0 = vld [vmem:[%s4574_s29 + $0x828] sm:$0xff]  ;;  %v437_v21 = vld [vmem:[%s4574_s29 + $0x820] sm:$0xff] }
 0x1a3   : > { %v1554_v6 = vpop.f32.mrf.mxu0  ;;  %v2229_v30 = vpop.f32.mrf.mxu1 }
 0x1a4   : > { %v442_v30 = vld [vmem:[%s4574_s29 + $0x848] sm:$0xff] }
 0x1a5   : > { %v5180_v34 = vpop.f32.mrf.mxu0  ;;  %1796 = vmatmul.mubr.f32.gmra.mxu0 %v435_v22  ;;  %v5182_v50 = vpop.f32.mrf.mxu1  ;;  %4154 = vmatmul.mubr.msk.f32.gmra.mxu1 %vm760_vm0, %v428_v37  ;;  %v440_v37 = vld [vmem:[%s4574_s29 + $0x838] sm:$0xff] }
 0x1a6   : > { %6392 = vst [vmem:[#allocation37_spill] sm:$0xff] %v5182_v50  ;;  %1800 = vmatprep.mubr.f32.mxu0 %v439_v38  ;;  %4156 = vmatprep.mubr.msk.f32.mxu1 %vm760_vm0, %v431_v49  ;;  %v441_v49 = vld [vmem:[%s4574_s29 + $0x840] sm:$0xff]  ;;  %v443_v50 = vld [vmem:[%s4574_s29 + $0x850] sm:$0xff] }
 0x1a7   : > { %v1559_v5 = vpop.f32.mrf.mxu0  ;;  %v2234_v6 = vpop.f32.mrf.mxu1 }
 0x1a8   : > { %v445_v6 = vld [vmem:[%s4574_s29 + $0x860] sm:$0xff] }
 0x1a9   : > { %v5190_v48 = vpop.f32.mrf.mxu0  ;;  %1801 = vmatmul.mubr.f32.gmra.mxu0 %v438_v0  ;;  %v5192_v22 = vpop.f32.mrf.mxu1  ;;  %4157 = vmatmul.mubr.msk.f32.gmra.mxu1 %vm760_vm0, %v434_v29  ;;  %v446_v29 = vld [vmem:[%s4574_s29 + $0x868] sm:$0xff] }
 0x1aa   : > { %6393 = vst [vmem:[#allocation38_spill] sm:$0xff] %v5192_v22  ;;  %1805 = vmatprep.mubr.f32.mxu0 %v442_v30  ;;  %4159 = vmatprep.mubr.msk.f32.mxu1 %vm760_vm0, %v437_v21  ;;  %v444_v21 = vld [vmem:[%s4574_s29 + $0x858] sm:$0xff]  ;;  %v449_v22 = vld [vmem:[%s4574_s29 + $0x880] sm:$0xff] }
 0x1ab   : > { %v1564_v38 = vpop.f32.mrf.mxu0  ;;  %v2239_v5 = vpop.f32.mrf.mxu1 }
 0x1ac   : > { %v448_v5 = vld [vmem:[%s4574_s29 + $0x878] sm:$0xff] }
 0x1ad   : > { %v5200_v14 = vpop.f32.mrf.mxu0  ;;  %1806 = vmatmul.mubr.f32.gmra.mxu0 %v441_v49  ;;  %v5202_v0 = vpop.f32.mrf.mxu1  ;;  %4160 = vmatmul.mubr.msk.f32.gmra.mxu1 %vm760_vm0, %v440_v37  ;;  %v452_v37 = vld [vmem:[%s4574_s29 + $0x898] sm:$0xff] }
 0x1ae   : > { %6394 = vst [vmem:[#allocation39_spill] sm:$0xff] %v5202_v0  ;;  %1810 = vmatprep.mubr.f32.mxu0 %v445_v6  ;;  %4162 = vmatprep.mubr.msk.f32.mxu1 %vm760_vm0, %v443_v50  ;;  %v447_v50 = vld [vmem:[%s4574_s29 + $0x870] sm:$0xff] }
 0x1af   : > { %v1569_v30 = vpop.f32.mrf.mxu0  ;;  %v2244_v38 = vpop.f32.mrf.mxu1  ;;  %v455_v0 = vld [vmem:[%s4574_s29 + $0x8b0] sm:$0xff] }
 0x1b0   : > { %v451_v38 = vld [vmem:[%s4574_s29 + $0x890] sm:$0xff] }
 0x1b1   : > { %v5210_v24 = vpop.f32.mrf.mxu0  ;;  %1811 = vmatmul.mubr.f32.gmra.mxu0 %v444_v21  ;;  %v5212_v49 = vpop.f32.mrf.mxu1  ;;  %4163 = vmatmul.mubr.msk.f32.gmra.mxu1 %vm760_vm0, %v446_v29  ;;  %v458_v29 = vld [vmem:[%s4574_s29 + $0x8c8] sm:$0xff] }
 0x1b2   : > { %6395 = vst [vmem:[#allocation40_spill] sm:$0xff] %v5212_v49  ;;  %1815 = vmatprep.mubr.f32.mxu0 %v448_v5  ;;  %4165 = vmatprep.mubr.msk.f32.mxu1 %vm760_vm0, %v449_v22  ;;  %v450_v22 = vld [vmem:[%s4574_s29 + $0x888] sm:$0xff]  ;;  %v461_v49 = vld [vmem:[%s4574_s29 + $0x8e0] sm:$0xff] }
 0x1b3   : > { %v1574_v6 = vpop.f32.mrf.mxu0  ;;  %v2249_v30 = vpop.f32.mrf.mxu1 }
 0x1b4   : > { %v454_v30 = vld [vmem:[%s4574_s29 + $0x8a8] sm:$0xff] }
 0x1b5   : > { %v5220_v56 = vpop.f32.mrf.mxu0  ;;  %1816 = vmatmul.mubr.f32.gmra.mxu0 %v447_v50  ;;  %v5222_v21 = vpop.f32.mrf.mxu1  ;;  %4166 = vmatmul.mubr.msk.f32.gmra.mxu1 %vm760_vm0, %v452_v37  ;;  %v464_v37 = vld [vmem:[%s4574_s29 + $0x8f8] sm:$0xff] }
 0x1b6   : > { %6396 = vst [vmem:[#allocation41_spill] sm:$0xff] %v5222_v21  ;;  %1820 = vmatprep.mubr.f32.mxu0 %v451_v38  ;;  %4168 = vmatprep.mubr.msk.f32.mxu1 %vm760_vm0, %v455_v0  ;;  %v453_v0 = vld [vmem:[%s4574_s29 + $0x8a0] sm:$0xff]  ;;  %v467_v21 = vld [vmem:[%s4574_s29 + $0x910] sm:$0xff] }
 0x1b7   : > { %v1579_v5 = vpop.f32.mrf.mxu0  ;;  %v2254_v6 = vpop.f32.mrf.mxu1 }
 0x1b8   : > { %v457_v6 = vld [vmem:[%s4574_s29 + $0x8c0] sm:$0xff] }
 0x1b9   : > { %v5230_v2 = vpop.f32.mrf.mxu0  ;;  %1821 = vmatmul.mubr.f32.gmra.mxu0 %v450_v22  ;;  %v5232_v50 = vpop.f32.mrf.mxu1  ;;  %4169 = vmatmul.mubr.msk.f32.gmra.mxu1 %vm760_vm0, %v458_v29  ;;  %v470_v29 = vld [vmem:[%s4574_s29 + $0x928] sm:$0xff] }
 0x1ba   : > { %6397 = vst [vmem:[#allocation42_spill] sm:$0xff] %v5232_v50  ;;  %1825 = vmatprep.mubr.f32.mxu0 %v454_v30  ;;  %4171 = vmatprep.mubr.msk.f32.mxu1 %vm760_vm0, %v461_v49  ;;  %v456_v49 = vld [vmem:[%s4574_s29 + $0x8b8] sm:$0xff]  ;;  %v5251_v30 = vld [vmem:[%s6355_s2] ss:$0 sm:$0xff] }
 0x1bb   : > { %v1584_v38 = vpop.f32.mrf.mxu0  ;;  %v2259_v5 = vpop.f32.mrf.mxu1  ;;  %v460_v50 = vld [vmem:[%s4574_s29 + $0x8d8] sm:$0xff] }
 0x1bd   : > { %v5240_v36 = vpop.f32.mrf.mxu0  ;;  %1826 = vmatmul.mubr.f32.gmra.mxu0 %v453_v0  ;;  %v5242_v22 = vpop.f32.mrf.mxu1  ;;  %4172 = vmatmul.mubr.msk.f32.gmra.mxu1 %vm760_vm0, %v464_v37  ;;  %v473_v0 = vld [vmem:[%s4574_s29 + $0x940] sm:$0xff] }
 0x1be   : > { %6398 = vst [vmem:[#allocation43_spill] sm:$0xff] %v5242_v22  ;;  %1830 = vmatprep.mubr.f32.mxu0 %v457_v6  ;;  %4174 = vmatprep.mubr.msk.f32.mxu1 %vm760_vm0, %v467_v21  ;;  %v1373_v22 = vadd.f32 %v5251_v30, %v4810_v51  ;;  %v1368_v6 = vadd.f32 %v5251_v30, %v4800_v43 }
 0x1bf   : > { %v1589_v38 = vpop.f32.mrf.mxu0  ;;  %v2264_v5 = vpop.f32.mrf.mxu1  ;;  %v1383_v43 = vadd.f32 %v5251_v30, %v4830_v3  ;;  %v462_v3 = vld [vmem:[%s4574_s29 + $0x8e8] sm:$0xff] }
 0x1c0   : > { %v459_v38 = vld [vmem:[%s4574_s29 + $0x8d0] sm:$0xff]  ;;  %v476_v5 = vld [vmem:[%s4574_s29 + $0x958] sm:$0xff] }
 0x1c1   : > { %v5258_v21 = vpop.f32.mrf.mxu0  ;;  %1831 = vmatmul.mubr.f32.gmra.mxu0 %v456_v49  ;;  %v4032_v37 = vpop.f32.mrf.mxu1  ;;  %4175 = vmatmul.mubr.msk.f32.gmra.mxu1 %vm760_vm0, %v470_v29  ;;  %v463_v29 = vld [vmem:[%s4574_s29 + $0x8f0] sm:$0xff] }
 0x1c2   : > { %v2338_v46 = vadd.f32 %v4032_v37, %v1373_v22  ;;  %1835 = vmatprep.mubr.f32.mxu0 %v460_v50  ;;  %4177 = vmatprep.mubr.msk.f32.mxu1 %vm760_vm0, %v473_v0 }
 0x1c3   : > { %v1594_v51 = vpop.f32.mrf.mxu0  ;;  %v2332_v49 = vpop.f32.mrf.mxu1 }
 0x1c4   : > { %v3232_v50 = vmax.f32 %v2338_v46, 0.0  ;;  %v2333_v22 = vadd.f32 %v2332_v49, %v1368_v6  ;;  %v1378_v51 = vadd.f32 %v5251_v30, %v4820_v59  ;;  %v482_v46 = vld [vmem:[%s4574_s29 + $0x988] sm:$0xff] }
 0x1c5   : > { %v5275_v0 = vpop.f32.mrf.mxu0  ;;  %1836 = vmatmul.mubr.f32.gmra.mxu0 %v459_v38  ;;  %v4035_v37 = vpop.f32.mrf.mxu1  ;;  %4178 = vmatmul.mubr.msk.f32.gmra.mxu1 %vm760_vm0, %v476_v5  ;;  %v466_v38 = vld [vmem:[%s4574_s29 + $0x908] sm:$0xff]  ;;  %v1393_v5 = vadd.f32 %v5251_v30, %v4850_v19 }
 0x1c6   : > { %3413 = vst.msk [vmem:[%s5269_s8 + $0x8] sm:$0xff] %vm3411_vm1, %v3232_v50  ;;  %v3231_v28 = vmax.f32 %v2333_v22, 0.0  ;;  %v2348_v4 = vadd.f32 %v4035_v37, %v1383_v43  ;;  %1840 = vmatprep.mubr.f32.mxu0 %v463_v29  ;;  %4180 = vmatprep.mubr.msk.f32.mxu1 %vm760_vm0, %v479_v20  ;;  %v1388_v50 = vadd.f32 %v5251_v30, %v4840_v11 }
 0x1c7   : > { %v1599_v6 = vpop.f32.mrf.mxu0  ;;  %v2342_v49 = vpop.f32.mrf.mxu1 }
 0x1c8   : > { %3412 = vst.msk [vmem:[%s5269_s8] sm:$0xff] %vm3411_vm1, %v3231_v28  ;;  %v3234_v59 = vmax.f32 %v2348_v4, 0.0  ;;  %v2343_v43 = vadd.f32 %v2342_v49, %v1378_v51  ;;  %v465_v4 = vld [vmem:[%s4574_s29 + $0x900] sm:$0xff]  ;;  %v488_v28 = vld [vmem:[%s4574_s29 + $0x9b8] sm:$0xff]  ;;  %v491_v6 = vld [vmem:[%s4574_s29 + $0x9d0] sm:$0xff] }
 0x1c9   : > { %v5291_v29 = vpop.f32.mrf.mxu0  ;;  %1841 = vmatmul.mubr.f32.gmra.mxu0 %v462_v3  ;;  %v4038_v20 = vpop.f32.mrf.mxu1  ;;  %4181 = vmatmul.mubr.msk.f32.gmra.mxu1 %vm760_vm0, %v482_v46  ;;  %v469_v3 = vld [vmem:[%s4574_s29 + $0x920] sm:$0xff]  ;;  %v1403_v46 = vadd.f32 %v5251_v30, %v4870_v35 }
 0x1ca   : > { %3415 = vst.msk [vmem:[%s5269_s8 + $0x18] sm:$0xff] %vm3411_vm1, %v3234_v59  ;;  %v3233_v22 = vmax.f32 %v2343_v43, 0.0  ;;  %v2358_v19 = vadd.f32 %v4038_v20, %v1393_v5  ;;  %1845 = vmatprep.mubr.f32.mxu0 %v466_v38  ;;  %4183 = vmatprep.mubr.msk.f32.mxu1 %vm760_vm0, %v485_v12  ;;  %v1398_v5 = vadd.f32 %v5251_v30, %v4860_v27  ;;  %v468_v43 = vld [vmem:[%s4574_s29 + $0x918] sm:$0xff]  ;;  %v494_v20 = vld [vmem:[%s4574_s29 + $0x9e8] sm:$0xff] }
 0x1cb   : > { %v1604_v37 = vpop.f32.mrf.mxu0  ;;  %v2352_v51 = vpop.f32.mrf.mxu1 }
 0x1cc   : > { %3414 = vst.msk [vmem:[%s5269_s8 + $0x10] sm:$0xff] %vm3411_vm1, %v3233_v22  ;;  %v3236_v11 = vmax.f32 %v2358_v19, 0.0  ;;  %v2353_v49 = vadd.f32 %v2352_v51, %v1388_v50  ;;  %v472_v19 = vld [vmem:[%s4574_s29 + $0x938] sm:$0xff] }
 0x1cd   : > { %v5307_v38 = vpop.f32.mrf.mxu0  ;;  %1846 = vmatmul.mubr.f32.gmra.mxu0 %v465_v4  ;;  %v4041_v12 = vpop.f32.mrf.mxu1  ;;  %4184 = vmatmul.mubr.msk.f32.gmra.mxu1 %vm760_vm0, %v488_v28  ;;  %v497_v4 = vld [vmem:[%s4574_s29 + $0xa00] sm:$0xff]  ;;  %v1413_v28 = vadd.f32 %v5251_v30, %v4890_v55 }
 0x1ce   : > { %3417 = vst.msk [vmem:[%s5269_s8 + $0x28] sm:$0xff] %vm3411_vm1, %v3236_v11  ;;  %v3235_v59 = vmax.f32 %v2353_v49, 0.0  ;;  %v2368_v35 = vadd.f32 %v4041_v12, %v1403_v46  ;;  %1850 = vmatprep.mubr.f32.mxu0 %v469_v3  ;;  %4186 = vmatprep.mubr.msk.f32.mxu1 %vm760_vm0, %v491_v6  ;;  %v1408_v6 = vadd.f32 %v5251_v30, %v4880_v45  ;;  %v471_v11 = vld [vmem:[%s4574_s29 + $0x930] sm:$0xff]  ;;  %v500_v49 = vld [vmem:[%s4574_s29 + $0xa18] sm:$0xff] }
 0x1cf   : > { %v1609_v50 = vpop.f32.mrf.mxu0  ;;  %v2362_v22 = vpop.f32.mrf.mxu1 }
 0x1d0   : > { %3416 = vst.msk [vmem:[%s5269_s8 + $0x20] sm:$0xff] %vm3411_vm1, %v3235_v59  ;;  %v3238_v27 = vmax.f32 %v2368_v35, 0.0  ;;  %v2363_v37 = vadd.f32 %v2362_v22, %v1398_v5  ;;  %v475_v59 = vld [vmem:[%s4574_s29 + $0x950] sm:$0xff] }
 0x1d1   : > { %v5323_v51 = vpop.f32.mrf.mxu0  ;;  %1851 = vmatmul.mubr.f32.gmra.mxu0 %v468_v43  ;;  %v4044_v3 = vpop.f32.mrf.mxu1  ;;  %4187 = vmatmul.mubr.msk.f32.gmra.mxu1 %vm760_vm0, %v494_v20  ;;  %v503_v35 = vld [vmem:[%s4574_s29 + $0xa30] sm:$0xff]  ;;  %v1423_v43 = vadd.f32 %v5251_v30, %v4910_v13 }
 0x1d2   : > { %3419 = vst.msk [vmem:[%s5269_s8 + $0x38] sm:$0xff] %vm3411_vm1, %v3238_v27  ;;  %v3237_v46 = vmax.f32 %v2363_v37, 0.0  ;;  %v2378_v55 = vadd.f32 %v4044_v3, %v1413_v28  ;;  %1855 = vmatprep.mubr.f32.mxu0 %v472_v19  ;;  %4189 = vmatprep.mubr.msk.f32.mxu1 %vm760_vm0, %v497_v4  ;;  %v1418_v19 = vadd.f32 %v5251_v30, %v4900_v1  ;;  %v474_v28 = vld [vmem:[%s4574_s29 + $0x948] sm:$0xff] }
 0x1d3   : > { %v1614_v12 = vpop.f32.mrf.mxu0  ;;  %v2372_v5 = vpop.f32.mrf.mxu1  ;;  %v506_v27 = vld [vmem:[%s4574_s29 + $0xa48] sm:$0xff] }
 0x1d4   : > { %3418 = vst.msk [vmem:[%s5269_s8 + $0x30] sm:$0xff] %vm3411_vm1, %v3237_v46  ;;  %v3240_v45 = vmax.f32 %v2378_v55, 0.0  ;;  %v2373_v20 = vadd.f32 %v2372_v5, %v1408_v6  ;;  %v478_v6 = vld [vmem:[%s4574_s29 + $0x968] sm:$0xff]  ;;  %v509_v46 = vld [vmem:[%s4574_s29 + $0xa60] sm:$0xff]  ;;  %v1433_v55 = vadd.f32 %v5251_v30, %v4930_v33  ;;  %v1428_v5 = vadd.f32 %v5251_v30, %v4920_v23 }
 0x1d5   : > { %v5339_v50 = vpop.f32.mrf.mxu0  ;;  %1856 = vmatmul.mubr.f32.gmra.mxu0 %v471_v11  ;;  %v4047_v22 = vpop.f32.mrf.mxu1  ;;  %4190 = vmatmul.mubr.msk.f32.gmra.mxu1 %vm760_vm0, %v500_v49 }
 0x1d6   : > { %3421 = vst.msk [vmem:[%s5269_s8 + $0x48] sm:$0xff] %vm3411_vm1, %v3240_v45  ;;  %v3239_v4 = vmax.f32 %v2373_v20, 0.0  ;;  %v2388_v13 = vadd.f32 %v4047_v22, %v1423_v43  ;;  %1860 = vmatprep.mubr.f32.mxu0 %v475_v59  ;;  %4192 = vmatprep.mubr.msk.f32.mxu1 %vm760_vm0, %v503_v35  ;;  %v477_v35 = vld [vmem:[%s4574_s29 + $0x960] sm:$0xff]  ;;  %v512_v43 = vld [vmem:[%s4574_s29 + $0xa78] sm:$0xff] }
 0x1d7   : > { %v1619_v37 = vpop.f32.mrf.mxu0  ;;  %v2382_v3 = vpop.f32.mrf.mxu1  ;;  %v481_v22 = vld [vmem:[%s4574_s29 + $0x980] sm:$0xff] }
 0x1d8   : > { %3420 = vst.msk [vmem:[%s5269_s8 + $0x40] sm:$0xff] %vm3411_vm1, %v3239_v4  ;;  %v3242_v1 = vmax.f32 %v2388_v13, 0.0  ;;  %v2383_v11 = vadd.f32 %v2382_v3, %v1418_v19  ;;  %v515_v19 = vld [vmem:[%s4574_s29 + $0xa90] sm:$0xff]  ;;  %v1443_v4 = vadd.f32 %v5251_v30, %v4950_v61  ;;  %v1438_v37 = vadd.f32 %v5251_v30, %v4940_v47 }
 0x1d9   : > { %v5355_v49 = vpop.f32.mrf.mxu0  ;;  %1861 = vmatmul.mubr.f32.gmra.mxu0 %v474_v28  ;;  %v4050_v12 = vpop.f32.mrf.mxu1  ;;  %4193 = vmatmul.mubr.msk.f32.gmra.mxu1 %vm760_vm0, %v506_v27 }
 0x1da   : > { %3423 = vst.msk [vmem:[%s5269_s8 + $0x58] sm:$0xff] %vm3411_vm1, %v3242_v1  ;;  %v3241_v59 = vmax.f32 %v2383_v11, 0.0  ;;  %v2398_v33 = vadd.f32 %v4050_v12, %v1433_v55  ;;  %1865 = vmatprep.mubr.f32.mxu0 %v478_v6  ;;  %4195 = vmatprep.mubr.msk.f32.mxu1 %vm760_vm0, %v509_v46  ;;  %v480_v6 = vld [vmem:[%s4574_s29 + $0x978] sm:$0xff]  ;;  %v518_v46 = vld [vmem:[%s4574_s29 + $0xaa8] sm:$0xff]  ;;  %v521_v12 = vld [vmem:[%s4574_s29 + $0xac0] sm:$0xff] }
 0x1db   : > { %v1624_v45 = vpop.f32.mrf.mxu0  ;;  %v2392_v20 = vpop.f32.mrf.mxu1  ;;  %v484_v11 = vld [vmem:[%s4574_s29 + $0x998] sm:$0xff] }
 0x1dc   : > { %3422 = vst.msk [vmem:[%s5269_s8 + $0x50] sm:$0xff] %vm3411_vm1, %v3241_v59  ;;  %v3244_v23 = vmax.f32 %v2398_v33, 0.0  ;;  %v2393_v13 = vadd.f32 %v2392_v20, %v1428_v5  ;;  %v1453_v5 = vadd.f32 %v5251_v30, %v4970_v25  ;;  %v483_v20 = vld [vmem:[%s4574_s29 + $0x990] sm:$0xff] }
 0x1dd   : > { %v5371_v28 = vpop.f32.mrf.mxu0  ;;  %1866 = vmatmul.mubr.f32.gmra.mxu0 %v477_v35  ;;  %v4053_v27 = vpop.f32.mrf.mxu1  ;;  %4196 = vmatmul.mubr.msk.f32.gmra.mxu1 %vm760_vm0, %v512_v43  ;;  %v1448_v43 = vadd.f32 %v5251_v30, %v4960_v9 }
 0x1de   : > { %3425 = vst.msk [vmem:[%s5269_s8 + $0x68] sm:$0xff] %vm3411_vm1, %v3244_v23  ;;  %v3243_v3 = vmax.f32 %v2393_v13, 0.0  ;;  %v2408_v61 = vadd.f32 %v4053_v27, %v1443_v4  ;;  %1870 = vmatprep.mubr.f32.mxu0 %v481_v22  ;;  %4198 = vmatprep.mubr.msk.f32.mxu1 %vm760_vm0, %v515_v19  ;;  %v524_v22 = vld [vmem:[%s4574_s29 + $0xad8] sm:$0xff]  ;;  %v487_v23 = vld [vmem:[%s4574_s29 + $0x9b0] sm:$0xff]  ;;  %v1463_v27 = vadd.f32 %v5251_v30, %v4990_v57 }
 0x1df   : > { %v1629_v55 = vpop.f32.mrf.mxu0  ;;  %v2402_v1 = vpop.f32.mrf.mxu1  ;;  %v527_v13 = vld [vmem:[%s4574_s29 + $0xaf0] sm:$0xff] }
 0x1e0   : > { %3424 = vst.msk [vmem:[%s5269_s8 + $0x60] sm:$0xff] %vm3411_vm1, %v3243_v3  ;;  %v3246_v47 = vmax.f32 %v2408_v61, 0.0  ;;  %v2403_v59 = vadd.f32 %v2402_v1, %v1438_v37  ;;  %v486_v55 = vld [vmem:[%s4574_s29 + $0x9a8] sm:$0xff] }
 0x1e1   : > { %v5387_v33 = vpop.f32.mrf.mxu0  ;;  %1871 = vmatmul.mubr.f32.gmra.mxu0 %v480_v6  ;;  %v4056_v35 = vpop.f32.mrf.mxu1  ;;  %4199 = vmatmul.mubr.msk.f32.gmra.mxu1 %vm760_vm0, %v518_v46  ;;  %v1458_v6 = vadd.f32 %v5251_v30, %v4980_v39  ;;  %v530_v1 = vld [vmem:[%s4574_s29 + $0xb08] sm:$0xff] }
 0x1e2   : > { %3427 = vst.msk [vmem:[%s5269_s8 + $0x78] sm:$0xff] %vm3411_vm1, %v3246_v47  ;;  %v3245_v45 = vmax.f32 %v2403_v59, 0.0  ;;  %v2418_v25 = vadd.f32 %v4056_v35, %v1453_v5  ;;  %1875 = vmatprep.mubr.f32.mxu0 %v484_v11  ;;  %4201 = vmatprep.mubr.msk.f32.mxu1 %vm760_vm0, %v521_v12  ;;  %v490_v5 = vld [vmem:[%s4574_s29 + $0x9c8] sm:$0xff]  ;;  %v533_v47 = vld [vmem:[%s4574_s29 + $0xb20] sm:$0xff]  ;;  %v1473_v59 = vadd.f32 %v5251_v30, %v5010_v31 }
 0x1e3   : > { %v1634_v19 = vpop.f32.mrf.mxu0  ;;  %v2412_v4 = vpop.f32.mrf.mxu1 }
 0x1e4   : > { %3426 = vst.msk [vmem:[%s5269_s8 + $0x70] sm:$0xff] %vm3411_vm1, %v3245_v45  ;;  %v3248_v9 = vmax.f32 %v2418_v25, 0.0  ;;  %v2413_v37 = vadd.f32 %v2412_v4, %v1448_v43  ;;  %v1468_v25 = vadd.f32 %v5251_v30, %v5000_v15  ;;  %v536_v19 = vld [vmem:[%s4574_s29 + $0xb38] sm:$0xff] }
 0x1e5   : > { %v5403_v3 = vpop.f32.mrf.mxu0  ;;  %1876 = vmatmul.mubr.f32.gmra.mxu0 %v483_v20  ;;  %v4059_v61 = vpop.f32.mrf.mxu1  ;;  %4202 = vmatmul.mubr.msk.f32.gmra.mxu1 %vm760_vm0, %v524_v22  ;;  %v489_v22 = vld [vmem:[%s4574_s29 + $0x9c0] sm:$0xff] }
 0x1e6   : > { %3429 = vst.msk [vmem:[%s5269_s8 + $0x88] sm:$0xff] %vm3411_vm1, %v3248_v9  ;;  %v3247_v46 = vmax.f32 %v2413_v37, 0.0  ;;  %v2428_v57 = vadd.f32 %v4059_v61, %v1463_v27  ;;  %1880 = vmatprep.mubr.f32.mxu0 %v487_v23  ;;  %4204 = vmatprep.mubr.msk.f32.mxu1 %vm760_vm0, %v527_v13  ;;  %v493_v13 = vld [vmem:[%s4574_s29 + $0x9e0] sm:$0xff]  ;;  %v539_v27 = vld [vmem:[%s4574_s29 + $0xb50] sm:$0xff]  ;;  %v1483_v9 = vadd.f32 %v5251_v30, %v5030_v17 }
 0x1e7   : > { %v1639_v11 = vpop.f32.mrf.mxu0  ;;  %v2422_v12 = vpop.f32.mrf.mxu1 }
 0x1e8   : > { %3428 = vst.msk [vmem:[%s5269_s8 + $0x80] sm:$0xff] %vm3411_vm1, %v3247_v46  ;;  %v3250_v39 = vmax.f32 %v2428_v57, 0.0  ;;  %v2423_v35 = vadd.f32 %v2422_v12, %v1458_v6  ;;  %v1478_v46 = vadd.f32 %v5251_v30, %v5020_v53 }
 0x1e9   : > { %v5419_v43 = vpop.f32.mrf.mxu0  ;;  %1881 = vmatmul.mubr.f32.gmra.mxu0 %v486_v55  ;;  %v4062_v45 = vpop.f32.mrf.mxu1  ;;  %4205 = vmatmul.mubr.msk.f32.gmra.mxu1 %vm760_vm0, %v530_v1  ;;  %v492_v55 = vld [vmem:[%s4574_s29 + $0x9d8] sm:$0xff]  ;;  %v542_v1 = vld [vmem:[%s4574_s29 + $0xb68] sm:$0xff] }
 0x1ea   : > { %3431 = vst.msk [vmem:[%s5269_s8 + $0x98] sm:$0xff] %vm3411_vm1, %v3250_v39  ;;  %v3249_v20 = vmax.f32 %v2423_v35, 0.0  ;;  %v2438_v31 = vadd.f32 %v4062_v45, %v1473_v59  ;;  %1885 = vmatprep.mubr.f32.mxu0 %v490_v5  ;;  %4207 = vmatprep.mubr.msk.f32.mxu1 %vm760_vm0, %v533_v47  ;;  %v496_v5 = vld [vmem:[%s4574_s29 + $0x9f8] sm:$0xff]  ;;  %v545_v47 = vld [vmem:[%s4574_s29 + $0xb80] sm:$0xff]  ;;  %v1493_v59 = vadd.f32 %v5251_v30, %v5050_v7 }
 0x1eb   : > { %v1644_v4 = vpop.f32.mrf.mxu0  ;;  %v2432_v23 = vpop.f32.mrf.mxu1 }
 0x1ec   : > { %3430 = vst.msk [vmem:[%s5269_s8 + $0x90] sm:$0xff] %vm3411_vm1, %v3249_v20  ;;  %v3252_v15 = vmax.f32 %v2438_v31, 0.0  ;;  %v2433_v37 = vadd.f32 %v2432_v23, %v1468_v25  ;;  %v1488_v25 = vadd.f32 %v5251_v30, %v5040_v41  ;;  %v495_v31 = vld [vmem:[%s4574_s29 + $0x9f0] sm:$0xff] }
 0x1ed   : > { %v5435_v61 = vpop.f32.mrf.mxu0  ;;  %1886 = vmatmul.mubr.f32.gmra.mxu0 %v489_v22  ;;  %v4065_v6 = vpop.f32.mrf.mxu1  ;;  %4208 = vmatmul.mubr.msk.f32.gmra.mxu1 %vm760_vm0, %v536_v19  ;;  %v548_v22 = vld [vmem:[%s4574_s29 + $0xb98] sm:$0xff]  ;;  %v499_v23 = vld [vmem:[%s4574_s29 + $0xa10] sm:$0xff] }
 0x1ee   : > { %3433 = vst.msk [vmem:[%s5269_s8 + $0xa8] sm:$0xff] %vm3411_vm1, %v3252_v15  ;;  %v3251_v57 = vmax.f32 %v2433_v37, 0.0  ;;  %v2448_v17 = vadd.f32 %v4065_v6, %v1483_v9  ;;  %1890 = vmatprep.mubr.f32.mxu0 %v493_v13  ;;  %4210 = vmatprep.mubr.msk.f32.mxu1 %vm760_vm0, %v539_v27  ;;  %v551_v13 = vld [vmem:[%s4574_s29 + $0xbb0] sm:$0xff]  ;;  %v1503_v27 = vadd.f32 %v5251_v30, %v5070_v8 }
 0x1ef   : > { %v1649_v11 = vpop.f32.mrf.mxu0  ;;  %v2442_v12 = vpop.f32.mrf.mxu1  ;;  %v1498_v6 = vadd.f32 %v5251_v30, %v5060_v63 }
 0x1f0   : > { %3432 = vst.msk [vmem:[%s5269_s8 + $0xa0] sm:$0xff] %vm3411_vm1, %v3251_v57  ;;  %v3254_v53 = vmax.f32 %v2448_v17, 0.0  ;;  %v2443_v39 = vadd.f32 %v2442_v12, %v1478_v46  ;;  %v498_v57 = vld [vmem:[%s4574_s29 + $0xa08] sm:$0xff]  ;;  %v557_v12 = vld [vmem:[%s4574_s29 + $0xbe0] sm:$0xff] }
 0x1f1   : > { %v5451_v35 = vpop.f32.mrf.mxu0  ;;  %1891 = vmatmul.mubr.f32.gmra.mxu0 %v492_v55  ;;  %v4068_v45 = vpop.f32.mrf.mxu1  ;;  %4211 = vmatmul.mubr.msk.f32.gmra.mxu1 %vm760_vm0, %v542_v1  ;;  %v554_v17 = vld [vmem:[%s4574_s29 + $0xbc8] sm:$0xff] }
 0x1f2   : > { %3435 = vst.msk [vmem:[%s5269_s8 + $0xb8] sm:$0xff] %vm3411_vm1, %v3254_v53  ;;  %v3253_v20 = vmax.f32 %v2443_v39, 0.0  ;;  %v2458_v7 = vadd.f32 %v4068_v45, %v1493_v59  ;;  %1895 = vmatprep.mubr.f32.mxu0 %v496_v5  ;;  %4213 = vmatprep.mubr.msk.f32.mxu1 %vm760_vm0, %v545_v47  ;;  %v502_v11 = vld [vmem:[%s4574_s29 + $0xa28] sm:$0xff]  ;;  %v1513_v5 = vadd.f32 %v5251_v30, %v5090_v42 }
 0x1f3   : > { %v1654_v19 = vpop.f32.mrf.mxu0  ;;  %v2452_v4 = vpop.f32.mrf.mxu1  ;;  %v1508_v39 = vadd.f32 %v5251_v30, %v5080_v18 }
 0x1f4   : > { %3434 = vst.msk [vmem:[%s5269_s8 + $0xb0] sm:$0xff] %vm3411_vm1, %v3253_v20  ;;  %v3256_v41 = vmax.f32 %v2458_v7, 0.0  ;;  %v2453_v9 = vadd.f32 %v2452_v4, %v1488_v25  ;;  %v501_v25 = vld [vmem:[%s4574_s29 + $0xa20] sm:$0xff]  ;;  %v560_v20 = vld [vmem:[%s4574_s29 + $0xbf8] sm:$0xff]  ;;  %v563_v19 = vld [vmem:[%s4574_s29 + $0xc10] sm:$0xff]  ;;  %v1523_v4 = vadd.f32 %v5251_v30, %v5110_v54 }
 0x1f5   : > { %v5467_v15 = vpop.f32.mrf.mxu0  ;;  %1896 = vmatmul.mubr.f32.gmra.mxu0 %v495_v31  ;;  %v4071_v37 = vpop.f32.mrf.mxu1  ;;  %4214 = vmatmul.mubr.msk.f32.gmra.mxu1 %vm760_vm0, %v548_v22  ;;  %v505_v22 = vld [vmem:[%s4574_s29 + $0xa40] sm:$0xff] }
 0x1f6   : > { %3437 = vst.msk [vmem:[%s5269_s8 + $0xc8] sm:$0xff] %vm3411_vm1, %v3256_v41  ;;  %v3255_v46 = vmax.f32 %v2453_v9, 0.0  ;;  %v2468_v8 = vadd.f32 %v4071_v37, %v1503_v27  ;;  %1900 = vmatprep.mubr.f32.mxu0 %v499_v23  ;;  %4216 = vmatprep.mubr.msk.f32.mxu1 %vm760_vm0, %v551_v13  ;;  %v1518_v41 = vadd.f32 %v5251_v30, %v5100_v32  ;;  %v504_v37 = vld [vmem:[%s4574_s29 + $0xa38] sm:$0xff] }
 0x1f7   : > { %v1659_v55 = vpop.f32.mrf.mxu0  ;;  %v2462_v1 = vpop.f32.mrf.mxu1 }
 0x1f8   : > { %3436 = vst.msk [vmem:[%s5269_s8 + $0xc0] sm:$0xff] %vm3411_vm1, %v3255_v46  ;;  %v3258_v63 = vmax.f32 %v2468_v8, 0.0  ;;  %v2463_v47 = vadd.f32 %v2462_v1, %v1498_v6  ;;  %v566_v6 = vld [vmem:[%s4574_s29 + $0xc28] sm:$0xff]  ;;  %v1533_v55 = vadd.f32 %v5251_v30, %v5130_v16 }
 0x1f9   : > { %v5483_v59 = vpop.f32.mrf.mxu0  ;;  %1901 = vmatmul.mubr.f32.gmra.mxu0 %v498_v57  ;;  %v4074_v53 = vpop.f32.mrf.mxu1  ;;  %4217 = vmatmul.mubr.msk.f32.gmra.mxu1 %vm760_vm0, %v554_v17  ;;  %v508_v57 = vld [vmem:[%s4574_s29 + $0xa58] sm:$0xff]  ;;  %v569_v17 = vld [vmem:[%s4574_s29 + $0xc40] sm:$0xff] }
 0x1fa   : > { %3439 = vst.msk [vmem:[%s5269_s8 + $0xd8] sm:$0xff] %vm3411_vm1, %v3258_v63  ;;  %v3257_v45 = vmax.f32 %v2463_v47, 0.0  ;;  %v2478_v42 = vadd.f32 %v4074_v53, %v1513_v5  ;;  %1905 = vmatprep.mubr.f32.mxu0 %v502_v11  ;;  %4219 = vmatprep.mubr.msk.f32.mxu1 %vm760_vm0, %v557_v12  ;;  %v1528_v5 = vadd.f32 %v5251_v30, %v5120_v58  ;;  %v507_v47 = vld [vmem:[%s4574_s29 + $0xa50] sm:$0xff]  ;;  %v572_v53 = vld [vmem:[%s4574_s29 + $0xc58] sm:$0xff] }
 0x1fb   : > { %v1664_v7 = vpop.f32.mrf.mxu0  ;;  %v2472_v31 = vpop.f32.mrf.mxu1 }
 0x1fc   : > { %3438 = vst.msk [vmem:[%s5269_s8 + $0xd0] sm:$0xff] %vm3411_vm1, %v3257_v45  ;;  %v3260_v18 = vmax.f32 %v2478_v42, 0.0  ;;  %v2473_v23 = vadd.f32 %v2472_v31, %v1508_v39  ;;  %v511_v42 = vld [vmem:[%s4574_s29 + $0xa70] sm:$0xff] }
 0x1fd   : > { %v5499_v13 = vpop.f32.mrf.mxu0  ;;  %1906 = vmatmul.mubr.f32.gmra.mxu0 %v501_v25  ;;  %v4077_v27 = vpop.f32.mrf.mxu1  ;;  %4220 = vmatmul.mubr.msk.f32.gmra.mxu1 %vm760_vm0, %v560_v20  ;;  %v575_v25 = vld [vmem:[%s4574_s29 + $0xc70] sm:$0xff]  ;;  %v1543_v20 = vadd.f32 %v5251_v30, %v5150_v40 }
 0x1fe   : > { %3441 = vst.msk [vmem:[%s5269_s8 + $0xe8] sm:$0xff] %vm3411_vm1, %v3260_v18  ;;  %v3259_v9 = vmax.f32 %v2473_v23, 0.0  ;;  %v2488_v54 = vadd.f32 %v4077_v27, %v1523_v4  ;;  %1910 = vmatprep.mubr.f32.mxu0 %v505_v22  ;;  %4222 = vmatprep.mubr.msk.f32.mxu1 %vm760_vm0, %v563_v19  ;;  %v1538_v19 = vadd.f32 %v5251_v30, %v5140_v26  ;;  %v510_v18 = vld [vmem:[%s4574_s29 + $0xa68] sm:$0xff] }
 0x1ff   : > { %v1669_v46 = vpop.f32.mrf.mxu0  ;;  %v2482_v8 = vpop.f32.mrf.mxu1  ;;  %v578_v23 = vld [vmem:[%s4574_s29 + $0xc88] sm:$0xff] }
 0x200   : > { %3440 = vst.msk [vmem:[%s5269_s8 + $0xe0] sm:$0xff] %vm3411_vm1, %v3259_v9  ;;  %v3262_v32 = vmax.f32 %v2488_v54, 0.0  ;;  %v2483_v1 = vadd.f32 %v2482_v8, %v1518_v41  ;;  %v514_v9 = vld [vmem:[%s4574_s29 + $0xa88] sm:$0xff]  ;;  %v581_v54 = vld [vmem:[%s4574_s29 + $0xca0] sm:$0xff] }
 0x201   : > { %v5515_v11 = vpop.f32.mrf.mxu0  ;;  %1911 = vmatmul.mubr.f32.gmra.mxu0 %v504_v37  ;;  %v4080_v12 = vpop.f32.mrf.mxu1  ;;  %4223 = vmatmul.mubr.msk.f32.gmra.mxu1 %vm760_vm0, %v566_v6  ;;  %v1553_v37 = vadd.f32 %v5251_v30, %v5170_v10 }
 0x202   : > { %3443 = vst.msk [vmem:[%s5269_s8 + $0xf8] sm:$0xff] %vm3411_vm1, %v3262_v32  ;;  %v3261_v63 = vmax.f32 %v2483_v1, 0.0  ;;  %v2498_v16 = vadd.f32 %v4080_v12, %v1533_v55  ;;  %1915 = vmatprep.mubr.f32.mxu0 %v508_v57  ;;  %4225 = vmatprep.mubr.msk.f32.mxu1 %vm760_vm0, %v569_v17  ;;  %v1548_v57 = vadd.f32 %v5251_v30, %v5160_v62  ;;  %v513_v55 = vld [vmem:[%s4574_s29 + $0xa80] sm:$0xff]  ;;  %v584_v32 = vld [vmem:[%s4574_s29 + $0xcb8] sm:$0xff] }
 0x203   : > { %v1674_v39 = vpop.f32.mrf.mxu0  ;;  %v2492_v45 = vpop.f32.mrf.mxu1 }
 0x204   : > { %3442 = vst.msk [vmem:[%s5269_s8 + $0xf0] sm:$0xff] %vm3411_vm1, %v3261_v63  ;;  %v3264_v58 = vmax.f32 %v2498_v16, 0.0  ;;  %v2493_v7 = vadd.f32 %v2492_v45, %v1528_v5  ;;  %v517_v5 = vld [vmem:[%s4574_s29 + $0xaa0] sm:$0xff]  ;;  %v587_v63 = vld [vmem:[%s4574_s29 + $0xcd0] sm:$0xff]  ;;  %v1563_v16 = vadd.f32 %v5251_v30, %v5190_v48  ;;  %v1558_v45 = vadd.f32 %v5251_v30, %v5180_v34 }
 0x205   : > { %v5531_v31 = vpop.f32.mrf.mxu0  ;;  %1916 = vmatmul.mubr.f32.gmra.mxu0 %v507_v47  ;;  %v4083_v22 = vpop.f32.mrf.mxu1  ;;  %4226 = vmatmul.mubr.msk.f32.gmra.mxu1 %vm760_vm0, %v572_v53 }
 0x206   : > { %3445 = vst.msk [vmem:[%s5269_s8 + $0x108] sm:$0xff] %vm3411_vm1, %v3264_v58  ;;  %v3263_v4 = vmax.f32 %v2493_v7, 0.0  ;;  %v2508_v40 = vadd.f32 %v4083_v22, %v1543_v20  ;;  %1920 = vmatprep.mubr.f32.mxu0 %v511_v42  ;;  %4228 = vmatprep.mubr.msk.f32.mxu1 %vm760_vm0, %v575_v25  ;;  %v516_v25 = vld [vmem:[%s4574_s29 + $0xa98] sm:$0xff]  ;;  %v590_v20 = vld [vmem:[%s4574_s29 + $0xce8] sm:$0xff] }
 0x207   : > { %v1679_v27 = vpop.f32.mrf.mxu0  ;;  %v2502_v41 = vpop.f32.mrf.mxu1  ;;  %v520_v22 = vld [vmem:[%s4574_s29 + $0xab8] sm:$0xff] }
 0x208   : > { %3444 = vst.msk [vmem:[%s5269_s8 + $0x100] sm:$0xff] %vm3411_vm1, %v3263_v4  ;;  %v3266_v26 = vmax.f32 %v2508_v40, 0.0  ;;  %v2503_v6 = vadd.f32 %v2502_v41, %v1538_v19  ;;  %v593_v19 = vld [vmem:[%s4574_s29 + $0xd00] sm:$0xff]  ;;  %v1573_v4 = vadd.f32 %v5251_v30, %v5210_v24  ;;  %v1568_v27 = vadd.f32 %v5251_v30, %v5200_v14 }
 0x209   : > { %v5547_v46 = vpop.f32.mrf.mxu0  ;;  %1921 = vmatmul.mubr.f32.gmra.mxu0 %v510_v18  ;;  %v4086_v8 = vpop.f32.mrf.mxu1  ;;  %4229 = vmatmul.mubr.msk.f32.gmra.mxu1 %vm760_vm0, %v578_v23 }
 0x20a   : > { %3447 = vst.msk [vmem:[%s5269_s8 + $0x118] sm:$0xff] %vm3411_vm1, %v3266_v26  ;;  %v3265_v17 = vmax.f32 %v2503_v6, 0.0  ;;  %v2518_v10 = vadd.f32 %v4086_v8, %v1553_v37  ;;  %1925 = vmatprep.mubr.f32.mxu0 %v514_v9  ;;  %4231 = vmatprep.mubr.msk.f32.mxu1 %vm760_vm0, %v581_v54  ;;  %v519_v9 = vld [vmem:[%s4574_s29 + $0xab0] sm:$0xff]  ;;  %v596_v54 = vld [vmem:[%s4574_s29 + $0xd18] sm:$0xff] }
 0x20b   : > { %v1684_v1 = vpop.f32.mrf.mxu0  ;;  %v2512_v12 = vpop.f32.mrf.mxu1  ;;  %v523_v6 = vld [vmem:[%s4574_s29 + $0xad0] sm:$0xff] }
 0x20c   : > { %3446 = vst.msk [vmem:[%s5269_s8 + $0x110] sm:$0xff] %vm3411_vm1, %v3265_v17  ;;  %v3268_v62 = vmax.f32 %v2518_v10, 0.0  ;;  %v2513_v47 = vadd.f32 %v2512_v12, %v1548_v57  ;;  %v599_v8 = vld [vmem:[%s4574_s29 + $0xd30] sm:$0xff]  ;;  %v1583_v57 = vadd.f32 %v5251_v30, %v5230_v2  ;;  %v522_v12 = vld [vmem:[%s4574_s29 + $0xac8] sm:$0xff] }
 0x20d   : > { %v5563_v53 = vpop.f32.mrf.mxu0  ;;  %1926 = vmatmul.mubr.f32.gmra.mxu0 %v513_v55  ;;  %v4089_v39 = vpop.f32.mrf.mxu1  ;;  %4232 = vmatmul.mubr.msk.f32.gmra.mxu1 %vm760_vm0, %v584_v32  ;;  %v1578_v32 = vadd.f32 %v5251_v30, %v5220_v56 }
 0x20e   : > { %3449 = vst.msk [vmem:[%s5269_s8 + $0x128] sm:$0xff] %vm3411_vm1, %v3268_v62  ;;  %v3267_v42 = vmax.f32 %v2513_v47, 0.0  ;;  %v2528_v48 = vadd.f32 %v4089_v39, %v1563_v16  ;;  %1930 = vmatprep.mubr.f32.mxu0 %v517_v5  ;;  %4234 = vmatprep.mubr.msk.f32.mxu1 %vm760_vm0, %v587_v63  ;;  %v602_v5 = vld [vmem:[%s4574_s29 + $0xd48] sm:$0xff]  ;;  %v605_v47 = vld [vmem:[%s4574_s29 + $0xd60] sm:$0xff]  ;;  %v1593_v39 = vadd.f32 %v5251_v30, %v5258_v21 }
 0x20f   : > { %v1689_v58 = vpop.f32.mrf.mxu0  ;;  %v2522_v7 = vpop.f32.mrf.mxu1  ;;  %v526_v62 = vld [vmem:[%s4574_s29 + $0xae8] sm:$0xff] }
 0x210   : > { %3448 = vst.msk [vmem:[%s5269_s8 + $0x120] sm:$0xff] %vm3411_vm1, %v3267_v42  ;;  %v3270_v34 = vmax.f32 %v2528_v48, 0.0  ;;  %v2523_v40 = vadd.f32 %v2522_v7, %v1558_v45  ;;  %v525_v58 = vld [vmem:[%s4574_s29 + $0xae0] sm:$0xff]  ;;  %v608_v7 = vld [vmem:[%s4574_s29 + $0xd78] sm:$0xff] }
 0x211   : > { %v5579_v18 = vpop.f32.mrf.mxu0  ;;  %1931 = vmatmul.mubr.f32.gmra.mxu0 %v516_v25  ;;  %v4092_v23 = vpop.f32.mrf.mxu1  ;;  %4235 = vmatmul.mubr.msk.f32.gmra.mxu1 %vm760_vm0, %v590_v20  ;;  %v1588_v25 = vadd.f32 %v5251_v30, %v5240_v36 }
 0x212   : > { %3451 = vst.msk [vmem:[%s5269_s8 + $0x138] sm:$0xff] %vm3411_vm1, %v3270_v34  ;;  %v3269_v41 = vmax.f32 %v2523_v40, 0.0  ;;  %v2538_v24 = vadd.f32 %v4092_v23, %v1573_v4  ;;  %1935 = vmatprep.mubr.f32.mxu0 %v520_v22  ;;  %4237 = vmatprep.mubr.msk.f32.mxu1 %vm760_vm0, %v593_v19  ;;  %v529_v4 = vld [vmem:[%s4574_s29 + $0xb00] sm:$0xff]  ;;  %v611_v34 = vld [vmem:[%s4574_s29 + $0xd90] sm:$0xff]  ;;  %v1603_v40 = vadd.f32 %v5251_v30, %v5291_v29 }
 0x213   : > { %v1694_v37 = vpop.f32.mrf.mxu0  ;;  %v2532_v26 = vpop.f32.mrf.mxu1 }
 0x214   : > { %3450 = vst.msk [vmem:[%s5269_s8 + $0x130] sm:$0xff] %vm3411_vm1, %v3269_v41  ;;  %v3272_v14 = vmax.f32 %v2538_v24, 0.0  ;;  %v2533_v17 = vadd.f32 %v2532_v26, %v1568_v27  ;;  %v1598_v24 = vadd.f32 %v5251_v30, %v5275_v0  ;;  %v614_v37 = vld [vmem:[%s4574_s29 + $0xda8] sm:$0xff] }
 0x215   : > { %v5595_v10 = vpop.f32.mrf.mxu0  ;;  %1936 = vmatmul.mubr.f32.gmra.mxu0 %v519_v9  ;;  %v4095_v55 = vpop.f32.mrf.mxu1  ;;  %4238 = vmatmul.mubr.msk.f32.gmra.mxu1 %vm760_vm0, %v596_v54  ;;  %v528_v54 = vld [vmem:[%s4574_s29 + $0xaf8] sm:$0xff] }
 0x216   : > { %3453 = vst.msk [vmem:[%s5269_s8 + $0x148] sm:$0xff] %vm3411_vm1, %v3272_v14  ;;  %v3271_v1 = vmax.f32 %v2533_v17, 0.0  ;;  %v2548_v2 = vadd.f32 %v4095_v55, %v1583_v57  ;;  %1940 = vmatprep.mubr.f32.mxu0 %v523_v6  ;;  %4240 = vmatprep.mubr.msk.f32.mxu1 %vm760_vm0, %v599_v8  ;;  %v532_v8 = vld [vmem:[%s4574_s29 + $0xb18] sm:$0xff]  ;;  %v617_v57 = vld [vmem:[%s4574_s29 + $0xdc0] sm:$0xff]  ;;  %v1613_v14 = vadd.f32 %v5251_v30, %v5323_v51 }
 0x217   : > { %v1699_v63 = vpop.f32.mrf.mxu0  ;;  %v2542_v16 = vpop.f32.mrf.mxu1 }
 0x218   : > { %3452 = vst.msk [vmem:[%s5269_s8 + $0x140] sm:$0xff] %vm3411_vm1, %v3271_v1  ;;  %v3274_v56 = vmax.f32 %v2548_v2, 0.0  ;;  %v2543_v45 = vadd.f32 %v2542_v16, %v1578_v32  ;;  %v1608_v1 = vadd.f32 %v5251_v30, %v5307_v38 }
 0x219   : > { %v5611_v42 = vpop.f32.mrf.mxu0  ;;  %1941 = vmatmul.mubr.f32.gmra.mxu0 %v522_v12  ;;  %v4098_v48 = vpop.f32.mrf.mxu1  ;;  %4241 = vmatmul.mubr.msk.f32.gmra.mxu1 %vm760_vm0, %v602_v5  ;;  %v531_v12 = vld [vmem:[%s4574_s29 + $0xb10] sm:$0xff]  ;;  %v620_v5 = vld [vmem:[%s4574_s29 + $0xdd8] sm:$0xff] }
 0x21a   : > { %3455 = vst.msk [vmem:[%s5269_s8 + $0x158] sm:$0xff] %vm3411_vm1, %v3274_v56  ;;  %v3273_v20 = vmax.f32 %v2543_v45, 0.0  ;;  %v2558_v21 = vadd.f32 %v4098_v48, %v1593_v39  ;;  %1945 = vmatprep.mubr.f32.mxu0 %v526_v62  ;;  %4243 = vmatprep.mubr.msk.f32.mxu1 %vm760_vm0, %v605_v47  ;;  %v535_v62 = vld [vmem:[%s4574_s29 + $0xb30] sm:$0xff]  ;;  %v1623_v39 = vadd.f32 %v5251_v30, %v5355_v49 }
 0x21b   : > { %v1704_v22 = vpop.f32.mrf.mxu0  ;;  %v2552_v19 = vpop.f32.mrf.mxu1  ;;  %v623_v47 = vld [vmem:[%s4574_s29 + $0xdf0] sm:$0xff] }
 0x21c   : > { %3454 = vst.msk [vmem:[%s5269_s8 + $0x150] sm:$0xff] %vm3411_vm1, %v3273_v20  ;;  %v3276_v36 = vmax.f32 %v2558_v21, 0.0  ;;  %v2553_v23 = vadd.f32 %v2552_v19, %v1588_v25  ;;  %v1618_v25 = vadd.f32 %v5251_v30, %v5339_v50  ;;  %v534_v21 = vld [vmem:[%s4574_s29 + $0xb28] sm:$0xff] }
 0x21d   : > { %v5627_v27 = vpop.f32.mrf.mxu0  ;;  %1946 = vmatmul.mubr.f32.gmra.mxu0 %v525_v58  ;;  %v4101_v41 = vpop.f32.mrf.mxu1  ;;  %4244 = vmatmul.mubr.msk.f32.gmra.mxu1 %vm760_vm0, %v608_v7  ;;  %v626_v58 = vld [vmem:[%s4574_s29 + $0xe08] sm:$0xff] }
 0x21e   : > { %3457 = vst.msk [vmem:[%s5269_s8 + $0x168] sm:$0xff] %vm3411_vm1, %v3276_v36  ;;  %v3275_v9 = vmax.f32 %v2553_v23, 0.0  ;;  %v2568_v29 = vadd.f32 %v4101_v41, %v1603_v40  ;;  %1950 = vmatprep.mubr.f32.mxu0 %v529_v4  ;;  %4246 = vmatprep.mubr.msk.f32.mxu1 %vm760_vm0, %v611_v34  ;;  %v538_v19 = vld [vmem:[%s4574_s29 + $0xb48] sm:$0xff]  ;;  %v629_v4 = vld [vmem:[%s4574_s29 + $0xe20] sm:$0xff] }
 0x21f   : > { %v1709_v26 = vpop.f32.mrf.mxu0  ;;  %v2562_v6 = vpop.f32.mrf.mxu1  ;;  %v5674_v34 = vld [vmem:[%s6355_s2] ss:$0 sm:$0xff] }
 0x220   : > { %3456 = vst.msk [vmem:[%s5269_s8 + $0x160] sm:$0xff] %vm3411_vm1, %v3275_v9  ;;  %v3278_v0 = vmax.f32 %v2568_v29, 0.0  ;;  %v2563_v17 = vadd.f32 %v2562_v6, %v1598_v24  ;;  %v1633_v30 = vadd.f32 %v5674_v34, %v5387_v33  ;;  %v1628_v41 = vadd.f32 %v5674_v34, %v5371_v28  ;;  %v537_v9 = vld [vmem:[%s4574_s29 + $0xb40] sm:$0xff]  ;;  %v632_v29 = vld [vmem:[%s4574_s29 + $0xe38] sm:$0xff]  ;;  %v635_v6 = vld [vmem:[%s4574_s29 + $0xe50] sm:$0xff] }
 0x221   : > { %v5643_v55 = vpop.f32.mrf.mxu0  ;;  %1951 = vmatmul.mubr.f32.gmra.mxu0 %v528_v54  ;;  %v4104_v32 = vpop.f32.mrf.mxu1  ;;  %4247 = vmatmul.mubr.msk.f32.gmra.mxu1 %vm760_vm0, %v614_v37  ;;  %v541_v26 = vld [vmem:[%s4574_s29 + $0xb60] sm:$0xff] }
 0x222   : > { %3459 = vst.msk [vmem:[%s5269_s8 + $0x178] sm:$0xff] %vm3411_vm1, %v3278_v0  ;;  %v3277_v2 = vmax.f32 %v2563_v17, 0.0  ;;  %v2578_v51 = vadd.f32 %v4104_v32, %v1613_v14  ;;  %1955 = vmatprep.mubr.f32.mxu0 %v532_v8  ;;  %4249 = vmatprep.mubr.msk.f32.mxu1 %vm760_vm0, %v617_v57  ;;  %v1643_v8 = vadd.f32 %v5674_v34, %v5419_v43 }
 0x223   : > { %v1714_v63 = vpop.f32.mrf.mxu0  ;;  %v2572_v16 = vpop.f32.mrf.mxu1  ;;  %v1638_v17 = vadd.f32 %v5674_v34, %v5403_v3 }
 0x224   : > { %3458 = vst.msk [vmem:[%s5269_s8 + $0x170] sm:$0xff] %vm3411_vm1, %v3277_v2  ;;  %v3280_v38 = vmax.f32 %v2578_v51, 0.0  ;;  %v2573_v56 = vadd.f32 %v2572_v16, %v1608_v1  ;;  %v540_v1 = vld [vmem:[%s4574_s29 + $0xb58] sm:$0xff]  ;;  %v638_v2 = vld [vmem:[%s4574_s29 + $0xe68] sm:$0xff]  ;;  %v641_v63 = vld [vmem:[%s4574_s29 + $0xe80] sm:$0xff]  ;;  %v1653_v16 = vadd.f32 %v5674_v34, %v5451_v35 }
 0x225   : > { %v5659_v45 = vpop.f32.mrf.mxu0  ;;  %1956 = vmatmul.mubr.f32.gmra.mxu0 %v531_v12  ;;  %v4107_v48 = vpop.f32.mrf.mxu1  ;;  %4250 = vmatmul.mubr.msk.f32.gmra.mxu1 %vm760_vm0, %v620_v5  ;;  %v544_v5 = vld [vmem:[%s4574_s29 + $0xb78] sm:$0xff] }
 0x226   : > { %3461 = vst.msk [vmem:[%s5269_s8 + $0x188] sm:$0xff] %vm3411_vm1, %v3280_v38  ;;  %v3279_v20 = vmax.f32 %v2573_v56, 0.0  ;;  %v2588_v49 = vadd.f32 %v4107_v48, %v1623_v39  ;;  %1960 = vmatprep.mubr.f32.mxu0 %v535_v62  ;;  %4252 = vmatprep.mubr.msk.f32.mxu1 %vm760_vm0, %v623_v47  ;;  %v1648_v38 = vadd.f32 %v5674_v34, %v5435_v61  ;;  %v543_v48 = vld [vmem:[%s4574_s29 + $0xb70] sm:$0xff] }
 0x227   : > { %v1719_v7 = vpop.f32.mrf.mxu0  ;;  %v2582_v22 = vpop.f32.mrf.mxu1 }
 0x228   : > { %3460 = vst.msk [vmem:[%s5269_s8 + $0x180] sm:$0xff] %vm3411_vm1, %v3279_v20  ;;  %v3282_v50 = vmax.f32 %v2588_v49, 0.0  ;;  %v2583_v40 = vadd.f32 %v2582_v22, %v1618_v25  ;;  %v644_v25 = vld [vmem:[%s4574_s29 + $0xe98] sm:$0xff]  ;;  %v1663_v7 = vadd.f32 %v5674_v34, %v5483_v59 }
 0x229   : > { %v5680_v36 = vpop.f32.mrf.mxu0  ;;  %1961 = vmatmul.mubr.f32.gmra.mxu0 %v534_v21  ;;  %v4110_v23 = vpop.f32.mrf.mxu1  ;;  %4253 = vmatmul.mubr.msk.f32.gmra.mxu1 %vm760_vm0, %v626_v58  ;;  %v547_v21 = vld [vmem:[%s4574_s29 + $0xb90] sm:$0xff] }
 0x22a   : > { %3463 = vst.msk [vmem:[%s5269_s8 + $0x198] sm:$0xff] %vm3411_vm1, %v3282_v50  ;;  %v3281_v24 = vmax.f32 %v2583_v40, 0.0  ;;  %v2598_v33 = vadd.f32 %v4110_v23, %v1633_v30  ;;  %1965 = vmatprep.mubr.f32.mxu0 %v538_v19  ;;  %4255 = vmatprep.mubr.msk.f32.mxu1 %vm760_vm0, %v629_v4  ;;  %v647_v58 = vld [vmem:[%s4574_s29 + $0xeb0] sm:$0xff]  ;;  %v1658_v30 = vadd.f32 %v5674_v34, %v5467_v15  ;;  %v546_v40 = vld [vmem:[%s4574_s29 + $0xb88] sm:$0xff] }
 0x22b   : > { %v1724_v54 = vpop.f32.mrf.mxu0  ;;  %v2592_v37 = vpop.f32.mrf.mxu1  ;;  %v650_v23 = vld [vmem:[%s4574_s29 + $0xec8] sm:$0xff] }
 0x22c   : > { %3462 = vst.msk [vmem:[%s5269_s8 + $0x190] sm:$0xff] %vm3411_vm1, %v3281_v24  ;;  %v3284_v28 = vmax.f32 %v2598_v33, 0.0  ;;  %v2593_v57 = vadd.f32 %v2592_v37, %v1628_v41  ;;  %v550_v33 = vld [vmem:[%s4574_s29 + $0xba8] sm:$0xff] }
 0x22d   : > { %v5696_v14 = vpop.f32.mrf.mxu0  ;;  %1966 = vmatmul.mubr.f32.gmra.mxu0 %v537_v9  ;;  %v4113_v0 = vpop.f32.mrf.mxu1  ;;  %4256 = vmatmul.mubr.msk.f32.gmra.mxu1 %vm760_vm0, %v632_v29  ;;  %v653_v9 = vld [vmem:[%s4574_s29 + $0xee0] sm:$0xff]  ;;  %v1673_v29 = vadd.f32 %v5674_v34, %v5515_v11 }
 0x22e   : > { %3465 = vst.msk [vmem:[%s5269_s8 + $0x1a8] sm:$0xff] %vm3411_vm1, %v3284_v28  ;;  %v3283_v32 = vmax.f32 %v2593_v57, 0.0  ;;  %v2608_v43 = vadd.f32 %v4113_v0, %v1643_v8  ;;  %1970 = vmatprep.mubr.f32.mxu0 %v541_v26  ;;  %4258 = vmatprep.mubr.msk.f32.mxu1 %vm760_vm0, %v635_v6  ;;  %v1668_v6 = vadd.f32 %v5674_v34, %v5499_v13  ;;  %v549_v28 = vld [vmem:[%s4574_s29 + $0xba0] sm:$0xff]  ;;  %v656_v57 = vld [vmem:[%s4574_s29 + $0xef8] sm:$0xff] }
 0x22f   : > { %v1729_v51 = vpop.f32.mrf.mxu0  ;;  %v2602_v12 = vpop.f32.mrf.mxu1 }
 0x230   : > { %3464 = vst.msk [vmem:[%s5269_s8 + $0x1a0] sm:$0xff] %vm3411_vm1, %v3283_v32  ;;  %v3286_v3 = vmax.f32 %v2608_v43, 0.0  ;;  %v2603_v62 = vadd.f32 %v2602_v12, %v1638_v17  ;;  %v553_v32 = vld [vmem:[%s4574_s29 + $0xbc0] sm:$0xff]  ;;  %v659_v43 = vld [vmem:[%s4574_s29 + $0xf10] sm:$0xff] }
 0x231   : > { %v5712_v47 = vpop.f32.mrf.mxu0  ;;  %1971 = vmatmul.mubr.f32.gmra.mxu0 %v540_v1  ;;  %v4116_v39 = vpop.f32.mrf.mxu1  ;;  %4259 = vmatmul.mubr.msk.f32.gmra.mxu1 %vm760_vm0, %v638_v2  ;;  %v1683_v1 = vadd.f32 %v5674_v34, %v5547_v46 }
 0x232   : > { %3467 = vst.msk [vmem:[%s5269_s8 + $0x1b8] sm:$0xff] %vm3411_vm1, %v3286_v3  ;;  %v3285_v56 = vmax.f32 %v2603_v62, 0.0  ;;  %v2618_v35 = vadd.f32 %v4116_v39, %v1653_v16  ;;  %1975 = vmatprep.mubr.f32.mxu0 %v544_v5  ;;  %4261 = vmatprep.mubr.msk.f32.mxu1 %vm760_vm0, %v641_v63  ;;  %v1678_v5 = vadd.f32 %v5674_v34, %v5531_v31  ;;  %v552_v16 = vld [vmem:[%s4574_s29 + $0xbb8] sm:$0xff]  ;;  %v662_v3 = vld [vmem:[%s4574_s29 + $0xf28] sm:$0xff] }
 0x233   : > { %v1734_v20 = vpop.f32.mrf.mxu0  ;;  %v2612_v49 = vpop.f32.mrf.mxu1 }
 0x234   : > { %3466 = vst.msk [vmem:[%s5269_s8 + $0x1b0] sm:$0xff] %vm3411_vm1, %v3285_v56  ;;  %v3288_v61 = vmax.f32 %v2618_v35, 0.0  ;;  %v2613_v22 = vadd.f32 %v2612_v49, %v1648_v38  ;;  %v556_v38 = vld [vmem:[%s4574_s29 + $0xbd8] sm:$0xff]  ;;  %v665_v56 = vld [vmem:[%s4574_s29 + $0xf40] sm:$0xff]  ;;  %v1693_v35 = vadd.f32 %v5674_v34, %v5579_v18  ;;  %v1688_v49 = vadd.f32 %v5674_v34, %v5563_v53 }
 0x235   : > { %v5728_v19 = vpop.f32.mrf.mxu0  ;;  %1976 = vmatmul.mubr.f32.gmra.mxu0 %v543_v48  ;;  %v4119_v4 = vpop.f32.mrf.mxu1  ;;  %4262 = vmatmul.mubr.msk.f32.gmra.mxu1 %vm760_vm0, %v644_v25 }
 0x236   : > { %3469 = vst.msk [vmem:[%s5269_s8 + $0x1c8] sm:$0xff] %vm3411_vm1, %v3288_v61  ;;  %v3287_v50 = vmax.f32 %v2613_v22, 0.0  ;;  %v2628_v59 = vadd.f32 %v4119_v4, %v1663_v7  ;;  %1980 = vmatprep.mubr.f32.mxu0 %v547_v21  ;;  %4264 = vmatprep.mubr.msk.f32.mxu1 %vm760_vm0, %v647_v58  ;;  %v555_v58 = vld [vmem:[%s4574_s29 + $0xbd0] sm:$0xff]  ;;  %v668_v7 = vld [vmem:[%s4574_s29 + $0xf58] sm:$0xff] }
 0x237   : > { %v1739_v41 = vpop.f32.mrf.mxu0  ;;  %v2622_v24 = vpop.f32.mrf.mxu1  ;;  %v559_v4 = vld [vmem:[%s4574_s29 + $0xbf0] sm:$0xff] }
 0x238   : > { %3468 = vst.msk [vmem:[%s5269_s8 + $0x1c0] sm:$0xff] %vm3411_vm1, %v3287_v50  ;;  %v3290_v15 = vmax.f32 %v2628_v59, 0.0  ;;  %v2623_v54 = vadd.f32 %v2622_v24, %v1658_v30  ;;  %v671_v30 = vld [vmem:[%s4574_s29 + $0xf70] sm:$0xff]  ;;  %v1703_v50 = vadd.f32 %v5674_v34, %v5611_v42  ;;  %v1698_v41 = vadd.f32 %v5674_v34, %v5595_v10 }
 0x239   : > { %v5744_v37 = vpop.f32.mrf.mxu0  ;;  %1981 = vmatmul.mubr.f32.gmra.mxu0 %v546_v40  ;;  %v4122_v26 = vpop.f32.mrf.mxu1  ;;  %4265 = vmatmul.mubr.msk.f32.gmra.mxu1 %vm760_vm0, %v650_v23 }
 0x23a   : > { %3471 = vst.msk [vmem:[%s5269_s8 + $0x1d8] sm:$0xff] %vm3411_vm1, %v3290_v15  ;;  %v3289_v8 = vmax.f32 %v2623_v54, 0.0  ;;  %v2638_v11 = vadd.f32 %v4122_v26, %v1673_v29  ;;  %1985 = vmatprep.mubr.f32.mxu0 %v550_v33  ;;  %4267 = vmatprep.mubr.msk.f32.mxu1 %vm760_vm0, %v653_v9  ;;  %v558_v33 = vld [vmem:[%s4574_s29 + $0xbe8] sm:$0xff]  ;;  %v677_v26 = vld [vmem:[%s4574_s29 + $0xfa0] sm:$0xff] }
 0x23b   : > { %v1744_v0 = vpop.f32.mrf.mxu0  ;;  %v2632_v17 = vpop.f32.mrf.mxu1  ;;  %v674_v9 = vld [vmem:[%s4574_s29 + $0xf88] sm:$0xff] }
 0x23c   : > { %3470 = vst.msk [vmem:[%s5269_s8 + $0x1d0] sm:$0xff] %vm3411_vm1, %v3289_v8  ;;  %v3292_v13 = vmax.f32 %v2638_v11, 0.0  ;;  %v2633_v2 = vadd.f32 %v2632_v17, %v1668_v6  ;;  %v562_v54 = vld [vmem:[%s4574_s29 + $0xc08] sm:$0xff]  ;;  %v1713_v6 = vadd.f32 %v5674_v34, %v5643_v55  ;;  %v561_v17 = vld [vmem:[%s4574_s29 + $0xc00] sm:$0xff] }
 0x23d   : > { %v5760_v51 = vpop.f32.mrf.mxu0  ;;  %1986 = vmatmul.mubr.f32.gmra.mxu0 %v549_v28  ;;  %v4125_v12 = vpop.f32.mrf.mxu1  ;;  %4268 = vmatmul.mubr.msk.f32.gmra.mxu1 %vm760_vm0, %v656_v57  ;;  %v1708_v57 = vadd.f32 %v5674_v34, %v5627_v27 }
 0x23e   : > { %3473 = vst.msk [vmem:[%s5269_s8 + $0x1e8] sm:$0xff] %vm3411_vm1, %v3292_v13  ;;  %v3291_v63 = vmax.f32 %v2633_v2, 0.0  ;;  %v2648_v46 = vadd.f32 %v4125_v12, %v1683_v1  ;;  %1990 = vmatprep.mubr.f32.mxu0 %v553_v32  ;;  %4270 = vmatprep.mubr.msk.f32.mxu1 %vm760_vm0, %v659_v43  ;;  %v680_v32 = vld [vmem:[%s4574_s29 + $0xfb8] sm:$0xff]  ;;  %v565_v13 = vld [vmem:[%s4574_s29 + $0xc20] sm:$0xff]  ;;  %v683_v2 = vld [vmem:[%s4574_s29 + $0xfd0] sm:$0xff]  ;;  %v1723_v12 = vadd.f32 %v5674_v34, %v5680_v36 }
 0x23f   : > { %v1749_v62 = vpop.f32.mrf.mxu0  ;;  %v2642_v39 = vpop.f32.mrf.mxu1 }
 0x240   : > { %3472 = vst.msk [vmem:[%s5269_s8 + $0x1e0] sm:$0xff] %vm3411_vm1, %v3291_v63  ;;  %v3294_v31 = vmax.f32 %v2648_v46, 0.0  ;;  %v2643_v48 = vadd.f32 %v2642_v39, %v1678_v5  ;;  %v564_v62 = vld [vmem:[%s4574_s29 + $0xc18] sm:$0xff]  ;;  %v686_v39 = vld [vmem:[%s4574_s29 + $0xfe8] sm:$0xff] }
 0x241   : > { %v5776_v25 = vpop.f32.mrf.mxu0  ;;  %1991 = vmatmul.mubr.f32.gmra.mxu0 %v552_v16  ;;  %v4128_v20 = vpop.f32.mrf.mxu1  ;;  %4271 = vmatmul.mubr.msk.f32.gmra.mxu1 %vm760_vm0, %v662_v3  ;;  %v1718_v16 = vadd.f32 %v5674_v34, %v5659_v45 }
 0x242   : > { %3475 = vst.msk [vmem:[%s5269_s8 + $0x1f8] sm:$0xff] %vm3411_vm1, %v3294_v31  ;;  %v3293_v21 = vmax.f32 %v2643_v48, 0.0  ;;  %v2658_v18 = vadd.f32 %v4128_v20, %v1693_v35  ;;  %1995 = vmatprep.mubr.f32.mxu0 %v556_v38  ;;  %4273 = vmatprep.mubr.msk.f32.mxu1 %vm760_vm0, %v665_v56  ;;  %v568_v35 = vld [vmem:[%s4574_s29 + $0xc38] sm:$0xff]  ;;  %v689_v31 = vld [vmem:[%s4574_s29 + $0x1000] sm:$0xff]  ;;  %v1733_v48 = vadd.f32 %v5674_v34, %v5712_v47 }
 0x243   : > { %v1754_v61 = vpop.f32.mrf.mxu0  ;;  %v2652_v22 = vpop.f32.mrf.mxu1 }
 0x244   : > { %3474 = vst.msk [vmem:[%s5269_s8 + $0x1f0] sm:$0xff] %vm3411_vm1, %v3293_v21  ;;  %v3296_v53 = vmax.f32 %v2658_v18, 0.0  ;;  %v2653_v59 = vadd.f32 %v2652_v22, %v1688_v49  ;;  %v1728_v18 = vadd.f32 %v5674_v34, %v5696_v14  ;;  %v692_v61 = vld [vmem:[%s4574_s29 + $0x1018] sm:$0xff] }
 0x245   : > { %v5792_v40 = vpop.f32.mrf.mxu0  ;;  %1996 = vmatmul.mubr.f32.gmra.mxu0 %v555_v58  ;;  %v4131_v23 = vpop.f32.mrf.mxu1  ;;  %4274 = vmatmul.mubr.msk.f32.gmra.mxu1 %vm760_vm0, %v668_v7  ;;  %v567_v7 = vld [vmem:[%s4574_s29 + $0xc30] sm:$0xff] }
 0x246   : > { %3477 = vst.msk [vmem:[%s5269_s8 + $0x208] sm:$0xff] %vm3411_vm1, %v3296_v53  ;;  %v3295_v24 = vmax.f32 %v2653_v59, 0.0  ;;  %v2668_v42 = vadd.f32 %v4131_v23, %v1703_v50  ;;  %2000 = vmatprep.mubr.f32.mxu0 %v559_v4  ;;  %4276 = vmatprep.mubr.msk.f32.mxu1 %vm760_vm0, %v671_v30  ;;  %v571_v30 = vld [vmem:[%s4574_s29 + $0xc50] sm:$0xff]  ;;  %v1743_v53 = vadd.f32 %v5674_v34, %v5744_v37 }
 0x247   : > { %v1759_v29 = vpop.f32.mrf.mxu0  ;;  %v2662_v15 = vpop.f32.mrf.mxu1  ;;  %v695_v50 = vld [vmem:[%s4574_s29 + $0x1030] sm:$0xff] }
 0x248   : > { %3476 = vst.msk [vmem:[%s5269_s8 + $0x200] sm:$0xff] %vm3411_vm1, %v3295_v24  ;;  %v3298_v10 = vmax.f32 %v2668_v42, 0.0  ;;  %v2663_v8 = vadd.f32 %v2662_v15, %v1698_v41  ;;  %v1738_v24 = vadd.f32 %v5674_v34, %v5728_v19 }
 0x249   : > { %v5808_v11 = vpop.f32.mrf.mxu0  ;;  %2001 = vmatmul.mubr.f32.gmra.mxu0 %v558_v33  ;;  %v4134_v28 = vpop.f32.mrf.mxu1  ;;  %4277 = vmatmul.mubr.msk.f32.gmra.mxu1 %vm760_vm0, %v674_v9  ;;  %v570_v33 = vld [vmem:[%s4574_s29 + $0xc48] sm:$0xff] }
 0x24a   : > { %3479 = vst.msk [vmem:[%s5269_s8 + $0x218] sm:$0xff] %vm3411_vm1, %v3298_v10  ;;  %v3297_v0 = vmax.f32 %v2663_v8, 0.0  ;;  %v2678_v55 = vadd.f32 %v4134_v28, %v1713_v6  ;;  %2005 = vmatprep.mubr.f32.mxu0 %v562_v54  ;;  %4279 = vmatprep.mubr.msk.f32.mxu1 %vm760_vm0, %v677_v26  ;;  %v698_v9 = vld [vmem:[%s4574_s29 + $0x1048] sm:$0xff]  ;;  %v701_v26 = vld [vmem:[%s4574_s29 + $0x1060] sm:$0xff]  ;;  %v1753_v6 = vadd.f32 %v5674_v34, %v5776_v25 }
 0x24b   : > { %v1764_v43 = vpop.f32.mrf.mxu0  ;;  %v2672_v1 = vpop.f32.mrf.mxu1  ;;  %v574_v54 = vld [vmem:[%s4574_s29 + $0xc68] sm:$0xff]  ;;  %v573_v25 = vld [vmem:[%s4574_s29 + $0xc60] sm:$0xff] }
 0x24c   : > { %3478 = vst.msk [vmem:[%s5269_s8 + $0x210] sm:$0xff] %vm3411_vm1, %v3297_v0  ;;  %v3300_v27 = vmax.f32 %v2678_v55, 0.0  ;;  %v2673_v5 = vadd.f32 %v2672_v1, %v1708_v57  ;;  %v1748_v57 = vadd.f32 %v5674_v34, %v5760_v51  ;;  %v577_v1 = vld [vmem:[%s4574_s29 + $0xc80] sm:$0xff] }
 0x24d   : > { %v5824_v63 = vpop.f32.mrf.mxu0  ;;  %2006 = vmatmul.mubr.f32.gmra.mxu0 %v561_v17  ;;  %v4137_v46 = vpop.f32.mrf.mxu1  ;;  %4280 = vmatmul.mubr.msk.f32.gmra.mxu1 %vm760_vm0, %v680_v32  ;;  %v704_v17 = vld [vmem:[%s4574_s29 + $0x1078] sm:$0xff] }
 0x24e   : > { %3481 = vst.msk [vmem:[%s5269_s8 + $0x228] sm:$0xff] %vm3411_vm1, %v3300_v27  ;;  %v3299_v3 = vmax.f32 %v2673_v5, 0.0  ;;  %v2688_v36 = vadd.f32 %v4137_v46, %v1723_v12  ;;  %2010 = vmatprep.mubr.f32.mxu0 %v565_v13  ;;  %4282 = vmatprep.mubr.msk.f32.mxu1 %vm760_vm0, %v683_v2  ;;  %v707_v13 = vld [vmem:[%s4574_s29 + $0x1090] sm:$0xff]  ;;  %v1763_v2 = vadd.f32 %v5674_v34, %v5808_v11  ;;  %v576_v11 = vld [vmem:[%s4574_s29 + $0xc78] sm:$0xff] }
 0x24f   : > { %v1769_v38 = vpop.f32.mrf.mxu0  ;;  %v2682_v56 = vpop.f32.mrf.mxu1  ;;  %v1758_v46 = vadd.f32 %v5674_v34, %v5792_v40 }
 0x250   : > { %3480 = vst.msk [vmem:[%s5269_s8 + $0x220] sm:$0xff] %vm3411_vm1, %v3299_v3  ;;  %v3302_v45 = vmax.f32 %v2688_v36, 0.0  ;;  %v2683_v20 = vadd.f32 %v2682_v56, %v1718_v16  ;;  %v710_v36 = vld [vmem:[%s4574_s29 + $0x10a8] sm:$0xff]  ;;  %v580_v38 = vld [vmem:[%s4574_s29 + $0xc98] sm:$0xff]  ;;  %v713_v56 = vld [vmem:[%s4574_s29 + $0x10c0] sm:$0xff] }
 0x251   : > { %v5840_v49 = vpop.f32.mrf.mxu0  ;;  %2011 = vmatmul.mubr.f32.gmra.mxu0 %v564_v62  ;;  %v4140_v21 = vpop.f32.mrf.mxu1  ;;  %4283 = vmatmul.mubr.msk.f32.gmra.mxu1 %vm760_vm0, %v686_v39 }
 0x252   : > { %3483 = vst.msk [vmem:[%s5269_s8 + $0x238] sm:$0xff] %vm3411_vm1, %v3302_v45  ;;  %v3301_v58 = vmax.f32 %v2683_v20, 0.0  ;;  %v2698_v47 = vadd.f32 %v4140_v21, %v1733_v48  ;;  %2015 = vmatprep.mubr.f32.mxu0 %v568_v35  ;;  %4285 = vmatprep.mubr.msk.f32.mxu1 %vm760_vm0, %v689_v31  ;;  %v1773_v35 = vadd.f32 %v5674_v34, %v5840_v49  ;;  %v579_v49 = vld [vmem:[%s4574_s29 + $0xc90] sm:$0xff] }
 0x253   : > { %v1774_v22 = vpop.f32.mrf.mxu0  ;;  %v2692_v4 = vpop.f32.mrf.mxu1  ;;  %v1768_v20 = vadd.f32 %v5674_v34, %v5824_v63 }
 0x254   : > { %3482 = vst.msk [vmem:[%s5269_s8 + $0x230] sm:$0xff] %vm3411_vm1, %v3301_v58  ;;  %v3304_v14 = vmax.f32 %v2698_v47, 0.0  ;;  %v2693_v59 = vadd.f32 %v2692_v4, %v1728_v18  ;;  %v716_v58 = vld [vmem:[%s4574_s29 + $0x10d8] sm:$0xff] }
 0x255   : > { %v5856_v23 = vpop.f32.mrf.mxu0  ;;  %2016 = vmatmul.mubr.f32.gmra.mxu0 %v567_v7  ;;  %v4143_v41 = vpop.f32.mrf.mxu1  ;;  %4286 = vmatmul.mubr.msk.f32.gmra.mxu1 %vm760_vm0, %v692_v61 }
 0x256   : > { %3485 = vst.msk [vmem:[%s5269_s8 + $0x248] sm:$0xff] %vm3411_vm1, %v3304_v14  ;;  %v3303_v42 = vmax.f32 %v2693_v59, 0.0  ;;  %v2708_v37 = vadd.f32 %v4143_v41, %v1743_v53  ;;  %2020 = vmatprep.mubr.f32.mxu0 %v571_v30  ;;  %4288 = vmatprep.mubr.msk.f32.mxu1 %vm760_vm0, %v695_v50  ;;  %v1778_v50 = vadd.f32 %v5674_v34, %v5856_v23 }
 0x257   : > { %v1779_v29 = vpop.f32.mrf.mxu0  ;;  %v2702_v15 = vpop.f32.mrf.mxu1 }
 0x258   : > { %3484 = vst.msk [vmem:[%s5269_s8 + $0x240] sm:$0xff] %vm3411_vm1, %v3303_v42  ;;  %v3306_v19 = vmax.f32 %v2708_v37, 0.0  ;;  %v2703_v10 = vadd.f32 %v2702_v15, %v1738_v24 }
 0x259   : > { %v1782_v8 = vpop.f32.mrf.mxu0  ;;  %2021 = vmatmul.mubr.f32.gmra.mxu0 %v570_v33  ;;  %v4146_v28 = vpop.f32.mrf.mxu1  ;;  %4289 = vmatmul.mubr.msk.f32.gmra.mxu1 %vm760_vm0, %v698_v9 }
 0x25a   : > { %3487 = vst.msk [vmem:[%s5269_s8 + $0x258] sm:$0xff] %vm3411_vm1, %v3306_v19  ;;  %v3305_v0 = vmax.f32 %v2703_v10, 0.0  ;;  %v2718_v55 = vadd.f32 %v4146_v28, %v1753_v6  ;;  %2025 = vmatprep.mubr.f32.mxu0 %v574_v54  ;;  %4291 = vmatprep.mubr.msk.f32.mxu1 %vm760_vm0, %v701_v26  ;;  %v1783_v61 = vadd.f32 %v5674_v34, %v1782_v8 }
 0x25b   : > { %v1784_v32 = vpop.f32.mrf.mxu0  ;;  %v2712_v43 = vpop.f32.mrf.mxu1 }
 0x25c   : > { %3486 = vst.msk [vmem:[%s5269_s8 + $0x250] sm:$0xff] %vm3411_vm1, %v3305_v0  ;;  %v3308_v51 = vmax.f32 %v2718_v55, 0.0  ;;  %v2713_v12 = vadd.f32 %v2712_v43, %v1748_v57 }
 0x25d   : > { %v1787_v27 = vpop.f32.mrf.mxu0  ;;  %2026 = vmatmul.mubr.f32.gmra.mxu0 %v573_v25  ;;  %v4149_v5 = vpop.f32.mrf.mxu1  ;;  %4292 = vmatmul.mubr.msk.f32.gmra.mxu1 %vm760_vm0, %v704_v17 }
 0x25e   : > { %3489 = vst.msk [vmem:[%s5269_s8 + $0x268] sm:$0xff] %vm3411_vm1, %v3308_v51  ;;  %v3307_v16 = vmax.f32 %v2713_v12, 0.0  ;;  %v2728_v3 = vadd.f32 %v4149_v5, %v1763_v2  ;;  %2030 = vmatprep.mubr.f32.mxu0 %v577_v1  ;;  %4294 = vmatprep.mubr.msk.f32.mxu1 %vm760_vm0, %v707_v13  ;;  %v1788_v29 = vadd.f32 %v5674_v34, %v1787_v27 }
 0x25f   : > { %v1789_v62 = vpop.f32.mrf.mxu0  ;;  %v2722_v39 = vpop.f32.mrf.mxu1 }
 0x260   : > { %3488 = vst.msk [vmem:[%s5269_s8 + $0x260] sm:$0xff] %vm3411_vm1, %v3307_v16  ;;  %v3310_v40 = vmax.f32 %v2728_v3, 0.0  ;;  %v2723_v31 = vadd.f32 %v2722_v39, %v1758_v46 }
 0x261   : > { %v1792_v48 = vpop.f32.mrf.mxu0  ;;  %2031 = vmatmul.mubr.f32.gmra.mxu0 %v576_v11  ;;  %v4152_v45 = vpop.f32.mrf.mxu1  ;;  %4295 = vmatmul.mubr.msk.f32.gmra.mxu1 %vm760_vm0, %v710_v36 }
 0x262   : > { %3491 = vst.msk [vmem:[%s5269_s8 + $0x278] sm:$0xff] %vm3411_vm1, %v3310_v40  ;;  %v3309_v21 = vmax.f32 %v2723_v31, 0.0  ;;  %v2738_v18 = vadd.f32 %v4152_v45, %v1773_v35  ;;  %2035 = vmatprep.mubr.f32.mxu0 %v580_v38  ;;  %4297 = vmatprep.mubr.msk.f32.mxu1 %vm760_vm0, %v713_v56  ;;  %v1793_v24 = vadd.f32 %v5674_v34, %v1792_v48 }
 0x263   : > { %v1794_v47 = vpop.f32.mrf.mxu0  ;;  %v2732_v7 = vpop.f32.mrf.mxu1 }
 0x264   : > { %3490 = vst.msk [vmem:[%s5269_s8 + $0x270] sm:$0xff] %vm3411_vm1, %v3309_v21  ;;  %v3312_v22 = vmax.f32 %v2738_v18, 0.0  ;;  %v2733_v4 = vadd.f32 %v2732_v7, %v1768_v20 }
 0x265   : > { %v1797_v63 = vpop.f32.mrf.mxu0  ;;  %2036 = vmatmul.mubr.f32.gmra.mxu0 %v579_v49  ;;  %v4155_v30 = vpop.f32.mrf.mxu1  ;;  %4298 = vmatmul.mubr.msk.f32.gmra.mxu1 %vm760_vm0, %v716_v58 }
 0x266   : > { %3493 = vst.msk [vmem:[%s5269_s8 + $0x288] sm:$0xff] %vm3411_vm1, %v3312_v22  ;;  %v3311_v53 = vmax.f32 %v2733_v4, 0.0  ;;  %v2748_v14 = vadd.f32 %v4155_v30, %v1783_v61  ;;  %v1798_v57 = vadd.f32 %v5674_v34, %v1797_v63 }
 0x267   : > { %v1799_v59 = vpop.f32.mrf.mxu0  ;;  %v2742_v41 = vpop.f32.mrf.mxu1 }
 0x268   : > { %3492 = vst.msk [vmem:[%s5269_s8 + $0x280] sm:$0xff] %vm3411_vm1, %v3311_v53  ;;  %v3314_v42 = vmax.f32 %v2748_v14, 0.0  ;;  %v2743_v37 = vadd.f32 %v2742_v41, %v1778_v50 }
 0x269   : > { %v1802_v33 = vpop.f32.mrf.mxu0  ;;  %v4158_v9 = vpop.f32.mrf.mxu1 }
 0x26a   : > { %3495 = vst.msk [vmem:[%s5269_s8 + $0x298] sm:$0xff] %vm3411_vm1, %v3314_v42  ;;  %v3313_v23 = vmax.f32 %v2743_v37, 0.0  ;;  %v2758_v15 = vadd.f32 %v4158_v9, %v1793_v24  ;;  %v1803_v6 = vadd.f32 %v5674_v34, %v1802_v33 }
 0x26b   : > { %v1804_v54 = vpop.f32.mrf.mxu0  ;;  %v2752_v26 = vpop.f32.mrf.mxu1 }
 0x26c   : > { %3494 = vst.msk [vmem:[%s5269_s8 + $0x290] sm:$0xff] %vm3411_vm1, %v3313_v23  ;;  %v3316_v19 = vmax.f32 %v2758_v15, 0.0  ;;  %v2753_v10 = vadd.f32 %v2752_v26, %v1788_v29 }
 0x26d   : > { %v1807_v8 = vpop.f32.mrf.mxu0  ;;  %v4161_v28 = vpop.f32.mrf.mxu1 }
 0x26e   : > { %3497 = vst.msk [vmem:[%s5269_s8 + $0x2a8] sm:$0xff] %vm3411_vm1, %v3316_v19  ;;  %v3315_v0 = vmax.f32 %v2753_v10, 0.0  ;;  %v2768_v55 = vadd.f32 %v4161_v28, %v1803_v6  ;;  %v1808_v2 = vadd.f32 %v5674_v34, %v1807_v8 }
 0x26f   : > { %v1809_v25 = vpop.f32.mrf.mxu0  ;;  %v2762_v17 = vpop.f32.mrf.mxu1 }
 0x270   : > { %3496 = vst.msk [vmem:[%s5269_s8 + $0x2a0] sm:$0xff] %vm3411_vm1, %v3315_v0  ;;  %v3318_v32 = vmax.f32 %v2768_v55, 0.0  ;;  %v2763_v43 = vadd.f32 %v2762_v17, %v1798_v57 }
 0x271   : > { %v1812_v1 = vpop.f32.mrf.mxu0  ;;  %v4164_v13 = vpop.f32.mrf.mxu1 }
 0x272   : > { %3499 = vst.msk [vmem:[%s5269_s8 + $0x2b8] sm:$0xff] %vm3411_vm1, %v3318_v32  ;;  %v3317_v51 = vmax.f32 %v2763_v43, 0.0  ;;  %v1813_v12 = vadd.f32 %v5674_v34, %v1812_v1 }
 0x273   : > { %v1814_v27 = vpop.f32.mrf.mxu0  ;;  %v2772_v5 = vpop.f32.mrf.mxu1 }
 0x274   : > { %3498 = vst.msk [vmem:[%s5269_s8 + $0x2b0] sm:$0xff] %vm3411_vm1, %v3317_v51  ;;  %v2778_v46 = vadd.f32 %v4164_v13, %v1813_v12  ;;  %v2773_v16 = vadd.f32 %v2772_v5, %v1808_v2 }
 0x275   : > { %v1817_v3 = vpop.f32.mrf.mxu0  ;;  %v4167_v11 = vpop.f32.mrf.mxu1 }
 0x276   : > { %v3320_v36 = vmax.f32 %v2778_v46, 0.0  ;;  %v3319_v62 = vmax.f32 %v2773_v16, 0.0  ;;  %v1818_v39 = vadd.f32 %v5674_v34, %v1817_v3 }
 0x277   : > { %v1819_v38 = vpop.f32.mrf.mxu0  ;;  %v2782_v56 = vpop.f32.mrf.mxu1 }
 0x278   : > { %3501 = vst.msk [vmem:[%s5269_s8 + $0x2c8] sm:$0xff] %vm3411_vm1, %v3320_v36  ;;  %3500 = vst.msk [vmem:[%s5269_s8 + $0x2c0] sm:$0xff] %vm3411_vm1, %v3319_v62  ;;  %v2783_v35 = vadd.f32 %v2782_v56, %v1818_v39 }
 0x279   : > { %v1822_v40 = vpop.f32.mrf.mxu0  ;;  %v4170_v31 = vpop.f32.mrf.mxu1 }
 0x27a   : > { %v3321_v48 = vmax.f32 %v2783_v35, 0.0  ;;  %v1823_v45 = vadd.f32 %v5674_v34, %v1822_v40 }
 0x27b   : > { %v1824_v20 = vpop.f32.mrf.mxu0  ;;  %v2792_v21 = vpop.f32.mrf.mxu1 }
 0x27c   : > { %3502 = vst.msk [vmem:[%s5269_s8 + $0x2d0] sm:$0xff] %vm3411_vm1, %v3321_v48  ;;  %v2788_v18 = vadd.f32 %v4167_v11, %v1823_v45 }
 0x27d   : > { %v1827_v49 = vpop.f32.mrf.mxu0  ;;  %v4173_v58 = vpop.f32.mrf.mxu1 }
 0x27e   : > { %v3322_v47 = vmax.f32 %v2788_v18, 0.0  ;;  %v1828_v7 = vadd.f32 %v5674_v34, %v1827_v49 }
 0x27f   : > { %v1829_v61 = vpop.f32.mrf.mxu0  ;;  %v2802_v22 = vpop.f32.mrf.mxu1 }
 0x280   : > { %3503 = vst.msk [vmem:[%s5269_s8 + $0x2d8] sm:$0xff] %vm3411_vm1, %v3322_v47  ;;  %v2793_v4 = vadd.f32 %v2792_v21, %v1828_v7 }
 0x281   : > { %v1832_v63 = vpop.f32.mrf.mxu0  ;;  %v4176_v30 = vpop.f32.mrf.mxu1 }
 0x282   : > { %v3323_v50 = vmax.f32 %v2793_v4, 0.0  ;;  %v1833_v53 = vadd.f32 %v5674_v34, %v1832_v63 }
 0x283   : > { %v1834_v14 = vpop.f32.mrf.mxu0  ;;  %v2812_v59 = vpop.f32.mrf.mxu1 }
 0x284   : > { %3504 = vst.msk [vmem:[%s5269_s8 + $0x2e0] sm:$0xff] %vm3411_vm1, %v3323_v50  ;;  %v2798_v41 = vadd.f32 %v4170_v31, %v1833_v53 }
 0x285   : > { %v1837_v24 = vpop.f32.mrf.mxu0  ;;  %v4179_v42 = vpop.f32.mrf.mxu1 }
 0x286   : > { %v3324_v37 = vmax.f32 %v2798_v41, 0.0  ;;  %v1838_v33 = vadd.f32 %v5674_v34, %v1837_v24 }
 0x287   : > { %v1839_v9 = vpop.f32.mrf.mxu0  ;;  %v2822_v29 = vpop.f32.mrf.mxu1 }
 0x288   : > { %3505 = vst.msk [vmem:[%s5269_s8 + $0x2e8] sm:$0xff] %vm3411_vm1, %v3324_v37  ;;  %v2803_v23 = vadd.f32 %v2802_v22, %v1838_v33 }
 0x289   : > { %v1842_v15 = vpop.f32.mrf.mxu0  ;;  %v4182_v54 = vpop.f32.mrf.mxu1 }
 0x28a   : > { %v3325_v26 = vmax.f32 %v2803_v23, 0.0  ;;  %v1843_v6 = vadd.f32 %v5674_v34, %v1842_v15 }
 0x28b   : > { %v1844_v19 = vpop.f32.mrf.mxu0  ;;  %v2832_v10 = vpop.f32.mrf.mxu1 }
 0x28c   : > { %3506 = vst.msk [vmem:[%s5269_s8 + $0x2f0] sm:$0xff] %vm3411_vm1, %v3325_v26  ;;  %v2808_v8 = vadd.f32 %v4173_v58, %v1843_v6 }
 0x28d   : > { %v1847_v28 = vpop.f32.mrf.mxu0  ;;  %v4185_v57 = vpop.f32.mrf.mxu1 }
 0x28e   : > { %v3326_v0 = vmax.f32 %v2808_v8, 0.0  ;;  %v1848_v55 = vadd.f32 %v5674_v34, %v1847_v28 }
 0x28f   : > { %v1849_v25 = vpop.f32.mrf.mxu0  ;;  %v2842_v17 = vpop.f32.mrf.mxu1 }
 0x290   : > { %3507 = vst.msk [vmem:[%s5269_s8 + $0x2f8] sm:$0xff] %vm3411_vm1, %v3326_v0  ;;  %v2813_v32 = vadd.f32 %v2812_v59, %v1848_v55 }
 0x291   : > { %v1852_v43 = vpop.f32.mrf.mxu0  ;;  %v5959_v1 = vpop.f32.mrf.mxu1 }
 0x292   : > { %v3327_v13 = vmax.f32 %v2813_v32, 0.0  ;;  %v1853_v2 = vadd.f32 %v5674_v34, %v1852_v43 }
 0x293   : > { %v1854_v51 = vpop.f32.mrf.mxu0  ;;  %v2852_v12 = vpop.f32.mrf.mxu1 }
 0x294   : > { %3508 = vst.msk [vmem:[%s5269_s8 + $0x300] sm:$0xff] %vm3411_vm1, %v3327_v13  ;;  %v2818_v27 = vadd.f32 %v4176_v30, %v1853_v2 }
 0x295   : > { %v1857_v5 = vpop.f32.mrf.mxu0  ;;  %v5964_v46 = vpop.f32.mrf.mxu1 }
 0x296   : > { %v3328_v16 = vmax.f32 %v2818_v27, 0.0  ;;  %v1858_v3 = vadd.f32 %v5674_v34, %v1857_v5 }
 0x297   : > { %v1859_v11 = vpop.f32.mrf.mxu0  ;;  %v5967_v36 = vpop.f32.mrf.mxu1 }
 0x298   : > { %3509 = vst.msk [vmem:[%s5269_s8 + $0x308] sm:$0xff] %vm3411_vm1, %v3328_v16  ;;  %v2823_v62 = vadd.f32 %v2822_v29, %v1858_v3 }
 0x299   : > { %v1862_v39 = vpop.f32.mrf.mxu0  ;;  %v5971_v38 = vpop.f32.mrf.mxu1 }
 0x29a   : > { %v3329_v56 = vmax.f32 %v2823_v62, 0.0  ;;  %v1863_v35 = vadd.f32 %v5674_v34, %v1862_v39 }
 0x29b   : > { %v1864_v40 = vpop.f32.mrf.mxu0  ;;  %v5974_v31 = vpop.f32.mrf.mxu1 }
 0x29c   : > { %3510 = vst.msk [vmem:[%s5269_s8 + $0x310] sm:$0xff] %vm3411_vm1, %v3329_v56  ;;  %v2828_v48 = vadd.f32 %v4179_v42, %v1863_v35 }
 0x29d   : > { %v1867_v45 = vpop.f32.mrf.mxu0  ;;  %v5978_v20 = vpop.f32.mrf.mxu1 }
 0x29e   : > { %v3330_v21 = vmax.f32 %v2828_v48, 0.0  ;;  %v1868_v18 = vadd.f32 %v5674_v34, %v1867_v45 }
 0x29f   : > { %v1869_v49 = vpop.f32.mrf.mxu0  ;;  %v5981_v58 = vpop.f32.mrf.mxu1 }
 0x2a0   : > { %3511 = vst.msk [vmem:[%s5269_s8 + $0x318] sm:$0xff] %vm3411_vm1, %v3330_v21  ;;  %v2833_v47 = vadd.f32 %v2832_v10, %v1868_v18 }
 0x2a1   : > { %v1872_v7 = vpop.f32.mrf.mxu0  ;;  %v5985_v61 = vpop.f32.mrf.mxu1 }
 0x2a2   : > { %v3331_v22 = vmax.f32 %v2833_v47, 0.0  ;;  %v1873_v4 = vadd.f32 %v5674_v34, %v1872_v7 }
 0x2a3   : > { %v1874_v63 = vpop.f32.mrf.mxu0  ;;  %v5988_v30 = vpop.f32.mrf.mxu1 }
 0x2a4   : > { %3512 = vst.msk [vmem:[%s5269_s8 + $0x320] sm:$0xff] %vm3411_vm1, %v3331_v22  ;;  %v2838_v50 = vadd.f32 %v4182_v54, %v1873_v4 }
 0x2a5   : > { %v1877_v53 = vpop.f32.mrf.mxu0  ;;  %v5992_v14 = vpop.f32.mrf.mxu1 }
 0x2a6   : > { %v3332_v59 = vmax.f32 %v2838_v50, 0.0  ;;  %v1878_v41 = vadd.f32 %v5674_v34, %v1877_v53 }
 0x2a7   : > { %v1879_v24 = vpop.f32.mrf.mxu0  ;;  %v5995_v42 = vpop.f32.mrf.mxu1 }
 0x2a8   : > { %3513 = vst.msk [vmem:[%s5269_s8 + $0x328] sm:$0xff] %vm3411_vm1, %v3332_v59  ;;  %v2843_v37 = vadd.f32 %v2842_v17, %v1878_v41 }
 0x2a9   : > { %v1882_v33 = vpop.f32.mrf.mxu0  ;;  %v5999_v9 = vpop.f32.mrf.mxu1 }
 0x2aa   : > { %v3333_v29 = vmax.f32 %v2843_v37, 0.0  ;;  %v1883_v23 = vadd.f32 %v5674_v34, %v1882_v33 }
 0x2ab   : > { %v1884_v15 = vpop.f32.mrf.mxu0  ;;  %v6002_v54 = vpop.f32.mrf.mxu1 }
 0x2ac   : > { %3514 = vst.msk [vmem:[%s5269_s8 + $0x330] sm:$0xff] %vm3411_vm1, %v3333_v29  ;;  %v2848_v26 = vadd.f32 %v4185_v57, %v1883_v23 }
 0x2ad   : > { %v1887_v6 = vpop.f32.mrf.mxu0  ;;  %v6006_v19 = vpop.f32.mrf.mxu1 }
 0x2ae   : > { %v3334_v10 = vmax.f32 %v2848_v26, 0.0  ;;  %v1888_v8 = vadd.f32 %v5674_v34, %v1887_v6 }
 0x2af   : > { %v1889_v28 = vpop.f32.mrf.mxu0  ;;  %v6009_v0 = vpop.f32.mrf.mxu1 }
 0x2b0   : > { %3515 = vst.msk [vmem:[%s5269_s8 + $0x338] sm:$0xff] %vm3411_vm1, %v3334_v10  ;;  %v2853_v55 = vadd.f32 %v2852_v12, %v1888_v8 }
 0x2b1   : > { %v1892_v25 = vpop.f32.mrf.mxu0  ;;  %v6013_v17 = vpop.f32.mrf.mxu1 }
 0x2b2   : > { %v3335_v32 = vmax.f32 %v2853_v55, 0.0  ;;  %v1893_v43 = vadd.f32 %v5674_v34, %v1892_v25 }
 0x2b3   : > { %v1894_v57 = vpop.f32.mrf.mxu0  ;;  %v6016_v13 = vpop.f32.mrf.mxu1 }
 0x2b4   : > { %3516 = vst.msk [vmem:[%s5269_s8 + $0x340] sm:$0xff] %vm3411_vm1, %v3335_v32  ;;  %v2858_v2 = vadd.f32 %v5959_v1, %v1893_v43 }
 0x2b5   : > { %v1897_v51 = vpop.f32.mrf.mxu0  ;;  %v6021_v27 = vpop.f32.mrf.mxu1 }
 0x2b6   : > { %v3336_v5 = vmax.f32 %v2858_v2, 0.0  ;;  %v1898_v12 = vadd.f32 %v5674_v34, %v1897_v51 }
 0x2b7   : > { %v1899_v16 = vpop.f32.mrf.mxu0  ;;  %v6024_v3 = vpop.f32.mrf.mxu1 }
 0x2b8   : > { %3517 = vst.msk [vmem:[%s5269_s8 + $0x348] sm:$0xff] %vm3411_vm1, %v3336_v5  ;;  %v2863_v11 = vadd.f32 %v5967_v36, %v1898_v12 }
 0x2b9   : > { %v1902_v62 = vpop.f32.mrf.mxu0  ;;  %v6029_v39 = vpop.f32.mrf.mxu1 }
 0x2ba   : > { %v3337_v56 = vmax.f32 %v2863_v11, 0.0  ;;  %v1903_v1 = vadd.f32 %v5674_v34, %v1902_v62 }
 0x2bb   : > { %v1904_v35 = vpop.f32.mrf.mxu0  ;;  %v6032_v40 = vpop.f32.mrf.mxu1 }
 0x2bc   : > { %3518 = vst.msk [vmem:[%s5269_s8 + $0x350] sm:$0xff] %vm3411_vm1, %v3337_v56  ;;  %v2868_v48 = vadd.f32 %v5964_v46, %v1903_v1 }
 0x2bd   : > { %v1907_v45 = vpop.f32.mrf.mxu0  ;;  %v6037_v21 = vpop.f32.mrf.mxu1 }
 0x2be   : > { %v3338_v18 = vmax.f32 %v2868_v48, 0.0  ;;  %v1908_v36 = vadd.f32 %v5674_v34, %v1907_v45 }
 0x2bf   : > { %v1909_v49 = vpop.f32.mrf.mxu0  ;;  %v6040_v47 = vpop.f32.mrf.mxu1 }
 0x2c0   : > { %3519 = vst.msk [vmem:[%s5269_s8 + $0x358] sm:$0xff] %vm3411_vm1, %v3338_v18  ;;  %v2873_v7 = vadd.f32 %v5974_v31, %v1908_v36  ;;  %v6058_v31 = vld [vmem:[%s6355_s2] ss:$0 sm:$0xff] }
 0x2c1   : > { %v1912_v22 = vpop.f32.mrf.mxu0  ;;  %v6045_v4 = vpop.f32.mrf.mxu1  ;;  %v2043_v28 = vadd.f32 %v6058_v31, %v4802_v44  ;;  %v2053_v5 = vadd.f32 %v6058_v31, %v4822_v60  ;;  %v2048_v11 = vadd.f32 %v6058_v31, %v4812_v52  ;;  %v6399_v60 = vld [vmem:[#allocation3_spill] sm:$0xff]  ;;  %v6400_v36 = vld [vmem:[#allocation2_spill] sm:$0xff] }
 0x2c2   : > { %v3339_v63 = vmax.f32 %v2873_v7, 0.0  ;;  %v1913_v46 = vadd.f32 %v5674_v34, %v1912_v22  ;;  %v2063_v45 = vadd.f32 %v6058_v31, %v6399_v60  ;;  %v2058_v49 = vadd.f32 %v6058_v31, %v6400_v36 }
 0x2c3   : > { %v1914_v50 = vpop.f32.mrf.mxu0  ;;  %v6048_v53 = vpop.f32.mrf.mxu1 }
 0x2c4   : > { %3520 = vst.msk [vmem:[%s5269_s8 + $0x360] sm:$0xff] %vm3411_vm1, %v3339_v63  ;;  %v2878_v59 = vadd.f32 %v5971_v38, %v1913_v46 }
 0x2c5   : > { %v1917_v41 = vpop.f32.mrf.mxu0  ;;  %v6053_v24 = vpop.f32.mrf.mxu1 }
 0x2c6   : > { %v3340_v37 = vmax.f32 %v2878_v59, 0.0  ;;  %v1918_v33 = vadd.f32 %v6058_v31, %v1917_v41 }
 0x2c7   : > { %v1919_v34 = vpop.f32.mrf.mxu0  ;;  %v6061_v29 = vpop.f32.mrf.mxu1 }
 0x2c8   : > { %3521 = vst.msk [vmem:[%s5269_s8 + $0x368] sm:$0xff] %vm3411_vm1, %v3340_v37  ;;  %v2883_v23 = vadd.f32 %v5981_v58, %v1918_v33  ;;  %v6401_v33 = vld [vmem:[#allocation5_spill] sm:$0xff] }
 0x2c9   : > { %v1922_v38 = vpop.f32.mrf.mxu0  ;;  %v6066_v15 = vpop.f32.mrf.mxu1 }
 0x2ca   : > { %v3341_v26 = vmax.f32 %v2883_v23, 0.0  ;;  %v1923_v6 = vadd.f32 %v6058_v31, %v1922_v38 }
 0x2cb   : > { %v1924_v10 = vpop.f32.mrf.mxu0  ;;  %v6069_v8 = vpop.f32.mrf.mxu1 }
 0x2cc   : > { %3522 = vst.msk [vmem:[%s5269_s8 + $0x370] sm:$0xff] %vm3411_vm1, %v3341_v26  ;;  %v2888_v55 = vadd.f32 %v5978_v20, %v1923_v6  ;;  %v6402_v26 = vld [vmem:[#allocation4_spill] sm:$0xff] }
 0x2cd   : > { %v1927_v25 = vpop.f32.mrf.mxu0  ;;  %v4233_v58 = vpop.f32.mrf.mxu1  ;;  %v2068_v6 = vadd.f32 %v6058_v31, %v6402_v26  ;;  %v6408_v26 = vld [vmem:[#allocation10_spill] sm:$0xff] }
 0x2ce   : > { %v3342_v32 = vmax.f32 %v2888_v55, 0.0  ;;  %v1928_v43 = vadd.f32 %v6058_v31, %v1927_v25  ;;  %v3008_v57 = vadd.f32 %v4233_v58, %v2043_v28 }
 0x2cf   : > { %v1929_v2 = vpop.f32.mrf.mxu0  ;;  %v6077_v51 = vpop.f32.mrf.mxu1 }
 0x2d0   : > { %3523 = vst.msk [vmem:[%s5269_s8 + $0x378] sm:$0xff] %vm3411_vm1, %v3342_v32  ;;  %v2893_v44 = vadd.f32 %v5988_v30, %v1928_v43  ;;  %v3366_v12 = vmax.f32 %v3008_v57, 0.0  ;;  %v6403_v2 = vld [vmem:[#allocation7_spill] sm:$0xff] }
 0x2d1   : > { %v1932_v20 = vpop.f32.mrf.mxu0  ;;  %v4236_v16 = vpop.f32.mrf.mxu1 }
 0x2d2   : > { %v3343_v62 = vmax.f32 %v2893_v44, 0.0  ;;  %3547 = vst.msk [vmem:[%s5269_s8 + $0x438] sm:$0xff] %vm3411_vm1, %v3366_v12  ;;  %v1933_v56 = vadd.f32 %v6058_v31, %v1932_v20  ;;  %v3018_v1 = vadd.f32 %v4236_v16, %v2053_v5  ;;  %v6404_v20 = vld [vmem:[#allocation6_spill] sm:$0xff] }
 0x2d3   : > { %v1934_v35 = vpop.f32.mrf.mxu0  ;;  %v3012_v48 = vpop.f32.mrf.mxu1  ;;  %v2078_v16 = vadd.f32 %v6058_v31, %v6404_v20 }
 0x2d4   : > { %3524 = vst.msk [vmem:[%s5269_s8 + $0x380] sm:$0xff] %vm3411_vm1, %v3343_v62  ;;  %v2898_v30 = vadd.f32 %v5985_v61, %v1933_v56  ;;  %v3368_v18 = vmax.f32 %v3018_v1, 0.0  ;;  %v3013_v52 = vadd.f32 %v3012_v48, %v2048_v11  ;;  %v2073_v61 = vadd.f32 %v6058_v31, %v6401_v33 }
 0x2d5   : > { %v1937_v7 = vpop.f32.mrf.mxu0  ;;  %v4239_v22 = vpop.f32.mrf.mxu1 }
 0x2d6   : > { %v3344_v63 = vmax.f32 %v2898_v30, 0.0  ;;  %3549 = vst.msk [vmem:[%s5269_s8 + $0x448] sm:$0xff] %vm3411_vm1, %v3368_v18  ;;  %v3367_v46 = vmax.f32 %v3013_v52, 0.0  ;;  %v1938_v50 = vadd.f32 %v6058_v31, %v1937_v7  ;;  %v3028_v59 = vadd.f32 %v4239_v22, %v2063_v45  ;;  %v6405_v30 = vld [vmem:[#allocation9_spill] sm:$0xff] }
 0x2d7   : > { %v1939_v41 = vpop.f32.mrf.mxu0  ;;  %v3022_v37 = vpop.f32.mrf.mxu1 }
 0x2d8   : > { %3525 = vst.msk [vmem:[%s5269_s8 + $0x388] sm:$0xff] %vm3411_vm1, %v3344_v63  ;;  %3548 = vst.msk [vmem:[%s5269_s8 + $0x440] sm:$0xff] %vm3411_vm1, %v3367_v46  ;;  %v2903_v34 = vadd.f32 %v5995_v42, %v1938_v50  ;;  %v3370_v23 = vmax.f32 %v3028_v59, 0.0  ;;  %v3023_v38 = vadd.f32 %v3022_v37, %v2058_v49  ;;  %v2083_v42 = vadd.f32 %v6058_v31, %v6403_v2  ;;  %v6406_v49 = vld [vmem:[#allocation8_spill] sm:$0xff]  ;;  %v6409_v2 = vld [vmem:[#allocation13_spill] sm:$0xff] }
 0x2d9   : > { %v1942_v10 = vpop.f32.mrf.mxu0  ;;  %v4242_v28 = vpop.f32.mrf.mxu1  ;;  %v2088_v7 = vadd.f32 %v6058_v31, %v6406_v49 }
 0x2da   : > { %v3345_v55 = vmax.f32 %v2903_v34, 0.0  ;;  %3551 = vst.msk [vmem:[%s5269_s8 + $0x458] sm:$0xff] %vm3411_vm1, %v3370_v23  ;;  %v3369_v25 = vmax.f32 %v3023_v38, 0.0  ;;  %v1943_v58 = vadd.f32 %v6058_v31, %v1942_v10  ;;  %v3038_v32 = vadd.f32 %v4242_v28, %v2073_v61  ;;  %v6407_v61 = vld [vmem:[#allocation11_spill] sm:$0xff] }
 0x2db   : > { %v1944_v43 = vpop.f32.mrf.mxu0  ;;  %v3032_v57 = vpop.f32.mrf.mxu1 }
 0x2dc   : > { %3526 = vst.msk [vmem:[%s5269_s8 + $0x390] sm:$0xff] %vm3411_vm1, %v3345_v55  ;;  %3550 = vst.msk [vmem:[%s5269_s8 + $0x450] sm:$0xff] %vm3411_vm1, %v3369_v25  ;;  %v2908_v5 = vadd.f32 %v5992_v14, %v1943_v58  ;;  %v3372_v44 = vmax.f32 %v3038_v32, 0.0  ;;  %v3033_v12 = vadd.f32 %v3032_v57, %v2068_v6  ;;  %v2093_v14 = vadd.f32 %v6058_v31, %v6405_v30 }
 0x2dd   : > { %v1947_v11 = vpop.f32.mrf.mxu0  ;;  %v4245_v62 = vpop.f32.mrf.mxu1  ;;  %v2098_v6 = vadd.f32 %v6058_v31, %v6408_v26 }
 0x2de   : > { %v3346_v56 = vmax.f32 %v2908_v5, 0.0  ;;  %3553 = vst.msk [vmem:[%s5269_s8 + $0x468] sm:$0xff] %vm3411_vm1, %v3372_v44  ;;  %v3371_v1 = vmax.f32 %v3033_v12, 0.0  ;;  %v1948_v35 = vadd.f32 %v6058_v31, %v1947_v11  ;;  %v3048_v48 = vadd.f32 %v4245_v62, %v2083_v42  ;;  %v6410_v12 = vld [vmem:[#allocation12_spill] sm:$0xff] }
 0x2df   : > { %v1949_v60 = vpop.f32.mrf.mxu0  ;;  %v3042_v45 = vpop.f32.mrf.mxu1  ;;  %v2108_v20 = vadd.f32 %v6058_v31, %v6410_v12 }
 0x2e0   : > { %3527 = vst.msk [vmem:[%s5269_s8 + $0x398] sm:$0xff] %vm3411_vm1, %v3346_v56  ;;  %3552 = vst.msk [vmem:[%s5269_s8 + $0x460] sm:$0xff] %vm3411_vm1, %v3371_v1  ;;  %v2913_v18 = vadd.f32 %v6002_v54, %v1948_v35  ;;  %v3374_v52 = vmax.f32 %v3048_v48, 0.0  ;;  %v3043_v36 = vadd.f32 %v3042_v45, %v2078_v16  ;;  %v2103_v54 = vadd.f32 %v6058_v31, %v6407_v61  ;;  %v6411_v45 = vld [vmem:[#allocation15_spill] sm:$0xff] }
 0x2e1   : > { %v1952_v22 = vpop.f32.mrf.mxu0  ;;  %v4248_v63 = vpop.f32.mrf.mxu1 }
 0x2e2   : > { %v3347_v46 = vmax.f32 %v2913_v18, 0.0  ;;  %3555 = vst.msk [vmem:[%s5269_s8 + $0x478] sm:$0xff] %vm3411_vm1, %v3374_v52  ;;  %v3373_v50 = vmax.f32 %v3043_v36, 0.0  ;;  %v1953_v59 = vadd.f32 %v6058_v31, %v1952_v22  ;;  %v3058_v41 = vadd.f32 %v4248_v63, %v2093_v14  ;;  %v6412_v52 = vld [vmem:[#allocation14_spill] sm:$0xff] }
 0x2e3   : > { %v1954_v37 = vpop.f32.mrf.mxu0  ;;  %v3052_v33 = vpop.f32.mrf.mxu1  ;;  %v2118_v36 = vadd.f32 %v6058_v31, %v6412_v52 }
 0x2e4   : > { %3528 = vst.msk [vmem:[%s5269_s8 + $0x3a0] sm:$0xff] %vm3411_vm1, %v3347_v46  ;;  %3554 = vst.msk [vmem:[%s5269_s8 + $0x470] sm:$0xff] %vm3411_vm1, %v3373_v50  ;;  %v2918_v34 = vadd.f32 %v5999_v9, %v1953_v59  ;;  %v3376_v23 = vmax.f32 %v3058_v41, 0.0  ;;  %v3053_v38 = vadd.f32 %v3052_v33, %v2088_v7  ;;  %v2113_v9 = vadd.f32 %v6058_v31, %v6409_v2  ;;  %v6413_v37 = vld [vmem:[#allocation17_spill] sm:$0xff] }
 0x2e5   : > { %v1957_v10 = vpop.f32.mrf.mxu0  ;;  %v4251_v28 = vpop.f32.mrf.mxu1 }
 0x2e6   : > { %v3348_v55 = vmax.f32 %v2918_v34, 0.0  ;;  %3557 = vst.msk [vmem:[%s5269_s8 + $0x488] sm:$0xff] %vm3411_vm1, %v3376_v23  ;;  %v3375_v25 = vmax.f32 %v3053_v38, 0.0  ;;  %v1958_v58 = vadd.f32 %v6058_v31, %v1957_v10  ;;  %v3068_v32 = vadd.f32 %v4251_v28, %v2103_v54  ;;  %v6414_v34 = vld [vmem:[#allocation16_spill] sm:$0xff] }
 0x2e7   : > { %v1959_v43 = vpop.f32.mrf.mxu0  ;;  %v3062_v57 = vpop.f32.mrf.mxu1  ;;  %v2128_v23 = vadd.f32 %v6058_v31, %v6414_v34 }
 0x2e8   : > { %3529 = vst.msk [vmem:[%s5269_s8 + $0x3a8] sm:$0xff] %vm3411_vm1, %v3348_v55  ;;  %3556 = vst.msk [vmem:[%s5269_s8 + $0x480] sm:$0xff] %vm3411_vm1, %v3375_v25  ;;  %v2923_v42 = vadd.f32 %v6009_v0, %v1958_v58  ;;  %v3378_v5 = vmax.f32 %v3068_v32, 0.0  ;;  %v3063_v44 = vadd.f32 %v3062_v57, %v2098_v6  ;;  %v2123_v0 = vadd.f32 %v6058_v31, %v6411_v45  ;;  %v6415_v32 = vld [vmem:[#allocation19_spill] sm:$0xff]  ;;  %v6418_v45 = vld [vmem:[#allocation20_spill] sm:$0xff] }
 0x2e9   : > { %v1962_v16 = vpop.f32.mrf.mxu0  ;;  %v4254_v11 = vpop.f32.mrf.mxu1 }
 0x2ea   : > { %v3349_v62 = vmax.f32 %v2923_v42, 0.0  ;;  %3559 = vst.msk [vmem:[%s5269_s8 + $0x498] sm:$0xff] %vm3411_vm1, %v3378_v5  ;;  %v3377_v56 = vmax.f32 %v3063_v44, 0.0  ;;  %v1963_v1 = vadd.f32 %v6058_v31, %v1962_v16  ;;  %v3078_v35 = vadd.f32 %v4254_v11, %v2113_v9  ;;  %v6416_v9 = vld [vmem:[#allocation18_spill] sm:$0xff] }
 0x2eb   : > { %v1964_v48 = vpop.f32.mrf.mxu0  ;;  %v3072_v60 = vpop.f32.mrf.mxu1  ;;  %v2138_v42 = vadd.f32 %v6058_v31, %v6416_v9 }
 0x2ec   : > { %3530 = vst.msk [vmem:[%s5269_s8 + $0x3b0] sm:$0xff] %vm3411_vm1, %v3349_v62  ;;  %3558 = vst.msk [vmem:[%s5269_s8 + $0x490] sm:$0xff] %vm3411_vm1, %v3377_v56  ;;  %v2928_v30 = vadd.f32 %v6006_v19, %v1963_v1  ;;  %v3380_v14 = vmax.f32 %v3078_v35, 0.0  ;;  %v3073_v18 = vadd.f32 %v3072_v60, %v2108_v20  ;;  %v2133_v19 = vadd.f32 %v6058_v31, %v6413_v37  ;;  %v6417_v1 = vld [vmem:[#allocation21_spill] sm:$0xff] }
 0x2ed   : > { %v1967_v49 = vpop.f32.mrf.mxu0  ;;  %v4257_v7 = vpop.f32.mrf.mxu1 }
 0x2ee   : > { %v3350_v22 = vmax.f32 %v2928_v30, 0.0  ;;  %3561 = vst.msk [vmem:[%s5269_s8 + $0x4a8] sm:$0xff] %vm3411_vm1, %v3380_v14  ;;  %v3379_v63 = vmax.f32 %v3073_v18, 0.0  ;;  %v1968_v46 = vadd.f32 %v6058_v31, %v1967_v49  ;;  %v3088_v50 = vadd.f32 %v4257_v7, %v2123_v0 }
 0x2ef   : > { %v1969_v59 = vpop.f32.mrf.mxu0  ;;  %v3082_v41 = vpop.f32.mrf.mxu1  ;;  %v2148_v0 = vadd.f32 %v6058_v31, %v6418_v45 }
 0x2f0   : > { %3531 = vst.msk [vmem:[%s5269_s8 + $0x3b8] sm:$0xff] %vm3411_vm1, %v3350_v22  ;;  %3560 = vst.msk [vmem:[%s5269_s8 + $0x4a0] sm:$0xff] %vm3411_vm1, %v3379_v63  ;;  %v2933_v33 = vadd.f32 %v6016_v13, %v1968_v46  ;;  %v3382_v61 = vmax.f32 %v3088_v50, 0.0  ;;  %v3083_v54 = vadd.f32 %v3082_v41, %v2118_v36  ;;  %v2143_v13 = vadd.f32 %v6058_v31, %v6415_v32  ;;  %v6419_v63 = vld [vmem:[#allocation23_spill] sm:$0xff]  ;;  %v6420_v41 = vld [vmem:[#allocation22_spill] sm:$0xff] }
 0x2f1   : > { %v1972_v38 = vpop.f32.mrf.mxu0  ;;  %v4260_v26 = vpop.f32.mrf.mxu1  ;;  %v2158_v37 = vadd.f32 %v6058_v31, %v6420_v41 }
 0x2f2   : > { %v3351_v6 = vmax.f32 %v2933_v33, 0.0  ;;  %3563 = vst.msk [vmem:[%s5269_s8 + $0x4b8] sm:$0xff] %vm3411_vm1, %v3382_v61  ;;  %v3381_v10 = vmax.f32 %v3083_v54, 0.0  ;;  %v1973_v28 = vadd.f32 %v6058_v31, %v1972_v38  ;;  %v3098_v55 = vadd.f32 %v4260_v26, %v2133_v19 }
 0x2f3   : > { %v1974_v25 = vpop.f32.mrf.mxu0  ;;  %v3092_v58 = vpop.f32.mrf.mxu1 }
 0x2f4   : > { %3532 = vst.msk [vmem:[%s5269_s8 + $0x3c0] sm:$0xff] %vm3411_vm1, %v3351_v6  ;;  %3562 = vst.msk [vmem:[%s5269_s8 + $0x4b0] sm:$0xff] %vm3411_vm1, %v3381_v10  ;;  %v2938_v43 = vadd.f32 %v6013_v17, %v1973_v28  ;;  %v3384_v57 = vmax.f32 %v3098_v55, 0.0  ;;  %v3093_v2 = vadd.f32 %v3092_v58, %v2128_v23  ;;  %v2153_v17 = vadd.f32 %v6058_v31, %v6417_v1  ;;  %v6421_v6 = vld [vmem:[#allocation25_spill] sm:$0xff]  ;;  %v6422_v25 = vld [vmem:[#allocation24_spill] sm:$0xff] }
 0x2f5   : > { %v1977_v5 = vpop.f32.mrf.mxu0  ;;  %v4263_v44 = vpop.f32.mrf.mxu1  ;;  %v2168_v58 = vadd.f32 %v6058_v31, %v6422_v25  ;;  %v6429_v25 = vld [vmem:[#allocation33_spill] sm:$0xff] }
 0x2f6   : > { %v3352_v12 = vmax.f32 %v2938_v43, 0.0  ;;  %3565 = vst.msk [vmem:[%s5269_s8 + $0x4c8] sm:$0xff] %vm3411_vm1, %v3384_v57  ;;  %v3383_v20 = vmax.f32 %v3093_v2, 0.0  ;;  %v1978_v16 = vadd.f32 %v6058_v31, %v1977_v5  ;;  %v3108_v11 = vadd.f32 %v4263_v44, %v2143_v13  ;;  %v6423_v44 = vld [vmem:[#allocation27_spill] sm:$0xff] }
 0x2f7   : > { %v1979_v62 = vpop.f32.mrf.mxu0  ;;  %v3102_v56 = vpop.f32.mrf.mxu1 }
 0x2f8   : > { %3533 = vst.msk [vmem:[%s5269_s8 + $0x3c8] sm:$0xff] %vm3411_vm1, %v3352_v12  ;;  %3564 = vst.msk [vmem:[%s5269_s8 + $0x4c0] sm:$0xff] %vm3411_vm1, %v3383_v20  ;;  %v2943_v35 = vadd.f32 %v6024_v3, %v1978_v16  ;;  %v3386_v48 = vmax.f32 %v3108_v11, 0.0  ;;  %v3103_v60 = vadd.f32 %v3102_v56, %v2138_v42  ;;  %v2163_v3 = vadd.f32 %v6058_v31, %v6419_v63  ;;  %v6424_v11 = vld [vmem:[#allocation26_spill] sm:$0xff] }
 0x2f9   : > { %v1982_v30 = vpop.f32.mrf.mxu0  ;;  %v4266_v14 = vpop.f32.mrf.mxu1  ;;  %v2178_v62 = vadd.f32 %v6058_v31, %v6424_v11 }
 0x2fa   : > { %v3353_v18 = vmax.f32 %v2943_v35, 0.0  ;;  %3567 = vst.msk [vmem:[%s5269_s8 + $0x4d8] sm:$0xff] %vm3411_vm1, %v3386_v48  ;;  %v3385_v52 = vmax.f32 %v3103_v60, 0.0  ;;  %v1983_v36 = vadd.f32 %v6058_v31, %v1982_v30  ;;  %v3118_v49 = vadd.f32 %v4266_v14, %v2153_v17  ;;  %v6425_v30 = vld [vmem:[#allocation29_spill] sm:$0xff] }
 0x2fb   : > { %v1984_v7 = vpop.f32.mrf.mxu0  ;;  %v3112_v22 = vpop.f32.mrf.mxu1 }
 0x2fc   : > { %3534 = vst.msk [vmem:[%s5269_s8 + $0x3d0] sm:$0xff] %vm3411_vm1, %v3353_v18  ;;  %3566 = vst.msk [vmem:[%s5269_s8 + $0x4d0] sm:$0xff] %vm3411_vm1, %v3385_v52  ;;  %v2948_v46 = vadd.f32 %v6021_v27, %v1983_v36  ;;  %v3388_v50 = vmax.f32 %v3118_v49, 0.0  ;;  %v3113_v59 = vadd.f32 %v3112_v22, %v2148_v0  ;;  %v2173_v27 = vadd.f32 %v6058_v31, %v6421_v6  ;;  %v6426_v36 = vld [vmem:[#allocation28_spill] sm:$0xff] }
 0x2fd   : > { %v1987_v19 = vpop.f32.mrf.mxu0  ;;  %v4269_v33 = vpop.f32.mrf.mxu1  ;;  %v2188_v49 = vadd.f32 %v6058_v31, %v6426_v36 }
 0x2fe   : > { %v3354_v61 = vmax.f32 %v2948_v46, 0.0  ;;  %3569 = vst.msk [vmem:[%s5269_s8 + $0x4e8] sm:$0xff] %vm3411_vm1, %v3388_v50  ;;  %v3387_v54 = vmax.f32 %v3113_v59, 0.0  ;;  %v1988_v34 = vadd.f32 %v6058_v31, %v1987_v19  ;;  %v3128_v23 = vadd.f32 %v4269_v33, %v2163_v3 }
 0x2ff   : > { %v1989_v38 = vpop.f32.mrf.mxu0  ;;  %v3122_v26 = vpop.f32.mrf.mxu1 }
 0x300   : > { %3535 = vst.msk [vmem:[%s5269_s8 + $0x3d8] sm:$0xff] %vm3411_vm1, %v3354_v61  ;;  %3568 = vst.msk [vmem:[%s5269_s8 + $0x4e0] sm:$0xff] %vm3411_vm1, %v3387_v54  ;;  %v2953_v10 = vadd.f32 %v6032_v40, %v1988_v34  ;;  %v3390_v28 = vmax.f32 %v3128_v23, 0.0  ;;  %v3123_v55 = vadd.f32 %v3122_v26, %v2158_v37  ;;  %v2183_v40 = vadd.f32 %v6058_v31, %v6423_v44  ;;  %v6427_v37 = vld [vmem:[#allocation31_spill] sm:$0xff]  ;;  %v6428_v54 = vld [vmem:[#allocation30_spill] sm:$0xff] }
 0x301   : > { %v1992_v32 = vpop.f32.mrf.mxu0  ;;  %v4272_v13 = vpop.f32.mrf.mxu1  ;;  %v2198_v34 = vadd.f32 %v6058_v31, %v6428_v54 }
 0x302   : > { %v3355_v43 = vmax.f32 %v2953_v10, 0.0  ;;  %3571 = vst.msk [vmem:[%s5269_s8 + $0x4f8] sm:$0xff] %vm3411_vm1, %v3390_v28  ;;  %v3389_v57 = vmax.f32 %v3123_v55, 0.0  ;;  %v1993_v2 = vadd.f32 %v6058_v31, %v1992_v32  ;;  %v3138_v9 = vadd.f32 %v4272_v13, %v2173_v27 }
 0x303   : > { %v1994_v42 = vpop.f32.mrf.mxu0  ;;  %v3132_v5 = vpop.f32.mrf.mxu1 }
 0x304   : > { %3536 = vst.msk [vmem:[%s5269_s8 + $0x3e0] sm:$0xff] %vm3411_vm1, %v3355_v43  ;;  %3570 = vst.msk [vmem:[%s5269_s8 + $0x4f0] sm:$0xff] %vm3411_vm1, %v3389_v57  ;;  %v2958_v12 = vadd.f32 %v6029_v39, %v1993_v2  ;;  %v3392_v20 = vmax.f32 %v3138_v9, 0.0  ;;  %v3133_v16 = vadd.f32 %v3132_v5, %v2168_v58  ;;  %v2193_v39 = vadd.f32 %v6058_v31, %v6425_v30  ;;  %v6430_v43 = vld [vmem:[#allocation32_spill] sm:$0xff] }
 0x305   : > { %v1997_v56 = vpop.f32.mrf.mxu0  ;;  %v4275_v1 = vpop.f32.mrf.mxu1  ;;  %v2208_v57 = vadd.f32 %v6058_v31, %v6430_v43  ;;  %v6438_v43 = vld [vmem:[#allocation40_spill] sm:$0xff] }
 0x306   : > { %v3356_v17 = vmax.f32 %v2958_v12, 0.0  ;;  %3573 = vst.msk [vmem:[%s5269_s8 + $0x508] sm:$0xff] %vm3411_vm1, %v3392_v20  ;;  %v3391_v35 = vmax.f32 %v3133_v16, 0.0  ;;  %v1998_v48 = vadd.f32 %v6058_v31, %v1997_v56  ;;  %v3148_v60 = vadd.f32 %v4275_v1, %v2183_v40  ;;  %v6431_v16 = vld [vmem:[#allocation35_spill] sm:$0xff]  ;;  %v6432_v1 = vld [vmem:[#allocation34_spill] sm:$0xff] }
 0x307   : > { %v1999_v45 = vpop.f32.mrf.mxu0  ;;  %v3142_v0 = vpop.f32.mrf.mxu1 }
 0x308   : > { %3537 = vst.msk [vmem:[%s5269_s8 + $0x3e8] sm:$0xff] %vm3411_vm1, %v3356_v17  ;;  %3572 = vst.msk [vmem:[%s5269_s8 + $0x500] sm:$0xff] %vm3411_vm1, %v3391_v35  ;;  %v2963_v14 = vadd.f32 %v6040_v47, %v1998_v48  ;;  %v3394_v18 = vmax.f32 %v3148_v60, 0.0  ;;  %v3143_v52 = vadd.f32 %v3142_v0, %v2178_v62  ;;  %v2203_v47 = vadd.f32 %v6058_v31, %v6427_v37 }
 0x309   : > { %v2002_v7 = vpop.f32.mrf.mxu0  ;;  %v4278_v22 = vpop.f32.mrf.mxu1  ;;  %v2218_v17 = vadd.f32 %v6058_v31, %v6432_v1 }
 0x30a   : > { %v3357_v63 = vmax.f32 %v2963_v14, 0.0  ;;  %3575 = vst.msk [vmem:[%s5269_s8 + $0x518] sm:$0xff] %vm3411_vm1, %v3394_v18  ;;  %v3393_v3 = vmax.f32 %v3143_v52, 0.0  ;;  %v2003_v46 = vadd.f32 %v6058_v31, %v2002_v7  ;;  %v3158_v50 = vadd.f32 %v4278_v22, %v2193_v39  ;;  %v6433_v18 = vld [vmem:[#allocation37_spill] sm:$0xff]  ;;  %v6434_v7 = vld [vmem:[#allocation36_spill] sm:$0xff] }
 0x30b   : > { %v2004_v59 = vpop.f32.mrf.mxu0  ;;  %v3152_v41 = vpop.f32.mrf.mxu1  ;;  %v2228_v22 = vadd.f32 %v6058_v31, %v6434_v7 }
 0x30c   : > { %3538 = vst.msk [vmem:[%s5269_s8 + $0x3f0] sm:$0xff] %vm3411_vm1, %v3357_v63  ;;  %3574 = vst.msk [vmem:[%s5269_s8 + $0x510] sm:$0xff] %vm3411_vm1, %v3393_v3  ;;  %v2968_v19 = vadd.f32 %v6037_v21, %v2003_v46  ;;  %v3396_v33 = vmax.f32 %v3158_v50, 0.0  ;;  %v3153_v61 = vadd.f32 %v3152_v41, %v2188_v49  ;;  %v2213_v21 = vadd.f32 %v6058_v31, %v6429_v25 }
 0x30d   : > { %v2007_v23 = vpop.f32.mrf.mxu0  ;;  %v4281_v38 = vpop.f32.mrf.mxu1 }
 0x30e   : > { %v3358_v26 = vmax.f32 %v2968_v19, 0.0  ;;  %3577 = vst.msk [vmem:[%s5269_s8 + $0x528] sm:$0xff] %vm3411_vm1, %v3396_v33  ;;  %v3395_v6 = vmax.f32 %v3153_v61, 0.0  ;;  %v2008_v27 = vadd.f32 %v6058_v31, %v2007_v23  ;;  %v3168_v10 = vadd.f32 %v4281_v38, %v2203_v47  ;;  %v6435_v19 = vld [vmem:[#allocation39_spill] sm:$0xff] }
 0x30f   : > { %v2009_v28 = vpop.f32.mrf.mxu0  ;;  %v3162_v55 = vpop.f32.mrf.mxu1 }
 0x310   : > { %3539 = vst.msk [vmem:[%s5269_s8 + $0x3f8] sm:$0xff] %vm3411_vm1, %v3358_v26  ;;  %3576 = vst.msk [vmem:[%s5269_s8 + $0x520] sm:$0xff] %vm3411_vm1, %v3395_v6  ;;  %v2973_v58 = vadd.f32 %v6048_v53, %v2008_v27  ;;  %v3398_v32 = vmax.f32 %v3168_v10, 0.0  ;;  %v3163_v13 = vadd.f32 %v3162_v55, %v2198_v34  ;;  %v2223_v53 = vadd.f32 %v6058_v31, %v6431_v16  ;;  %v6436_v34 = vld [vmem:[#allocation38_spill] sm:$0xff]  ;;  %v6439_v16 = vld [vmem:[#allocation43_spill] sm:$0xff] }
 0x311   : > { %v2012_v2 = vpop.f32.mrf.mxu0  ;;  %v4284_v9 = vpop.f32.mrf.mxu1  ;;  %v2238_v23 = vadd.f32 %v6058_v31, %v6436_v34 }
 0x312   : > { %v3359_v42 = vmax.f32 %v2973_v58, 0.0  ;;  %3579 = vst.msk [vmem:[%s5269_s8 + $0x538] sm:$0xff] %vm3411_vm1, %v3398_v32  ;;  %v3397_v5 = vmax.f32 %v3163_v13, 0.0  ;;  %v2013_v44 = vadd.f32 %v6058_v31, %v2012_v2  ;;  %v3178_v40 = vadd.f32 %v4284_v9, %v2213_v21  ;;  %v6437_v21 = vld [vmem:[#allocation41_spill] sm:$0xff] }
 0x313   : > { %v2014_v12 = vpop.f32.mrf.mxu0  ;;  %v3172_v20 = vpop.f32.mrf.mxu1 }
 0x314   : > { %3540 = vst.msk [vmem:[%s5269_s8 + $0x400] sm:$0xff] %vm3411_vm1, %v3359_v42  ;;  %3578 = vst.msk [vmem:[%s5269_s8 + $0x530] sm:$0xff] %vm3411_vm1, %v3397_v5  ;;  %v2978_v11 = vadd.f32 %v6045_v4, %v2013_v44  ;;  %v3400_v62 = vmax.f32 %v3178_v40, 0.0  ;;  %v3173_v56 = vadd.f32 %v3172_v20, %v2208_v57  ;;  %v2233_v4 = vadd.f32 %v6058_v31, %v6433_v18 }
 0x315   : > { %v2017_v35 = vpop.f32.mrf.mxu0  ;;  %v4287_v48 = vpop.f32.mrf.mxu1  ;;  %v2248_v57 = vadd.f32 %v6058_v31, %v6438_v43 }
 0x316   : > { %v3360_v60 = vmax.f32 %v2978_v11, 0.0  ;;  %3581 = vst.msk [vmem:[%s5269_s8 + $0x548] sm:$0xff] %vm3411_vm1, %v3400_v62  ;;  %v3399_v45 = vmax.f32 %v3173_v56, 0.0  ;;  %v2018_v0 = vadd.f32 %v6058_v31, %v2017_v35  ;;  %v3188_v30 = vadd.f32 %v4287_v48, %v2223_v53  ;;  %v6440_v56 = vld [vmem:[#allocation42_spill] sm:$0xff] }
 0x317   : > { %v2019_v39 = vpop.f32.mrf.mxu0  ;;  %v3182_v14 = vpop.f32.mrf.mxu1  ;;  %v2258_v1 = vadd.f32 %v6058_v31, %v6440_v56 }
 0x318   : > { %3541 = vst.msk [vmem:[%s5269_s8 + $0x408] sm:$0xff] %vm3411_vm1, %v3360_v60  ;;  %3580 = vst.msk [vmem:[%s5269_s8 + $0x540] sm:$0xff] %vm3411_vm1, %v3399_v45  ;;  %v2983_v52 = vadd.f32 %v6061_v29, %v2018_v0  ;;  %v3402_v36 = vmax.f32 %v3188_v30, 0.0  ;;  %v3183_v49 = vadd.f32 %v3182_v14, %v2218_v17  ;;  %v2243_v29 = vadd.f32 %v6058_v31, %v6435_v19 }
 0x319   : > { %v2022_v63 = vpop.f32.mrf.mxu0  ;;  %v4290_v3 = vpop.f32.mrf.mxu1 }
 0x31a   : > { %v3361_v46 = vmax.f32 %v2983_v52, 0.0  ;;  %3583 = vst.msk [vmem:[%s5269_s8 + $0x558] sm:$0xff] %vm3411_vm1, %v3402_v36  ;;  %v3401_v50 = vmax.f32 %v3183_v49, 0.0  ;;  %v2023_v59 = vadd.f32 %v6058_v31, %v2022_v63  ;;  %v3198_v41 = vadd.f32 %v4290_v3, %v2233_v4 }
 0x31b   : > { %v2024_v37 = vpop.f32.mrf.mxu0  ;;  %v3192_v47 = vpop.f32.mrf.mxu1 }
 0x31c   : > { %3542 = vst.msk [vmem:[%s5269_s8 + $0x410] sm:$0xff] %vm3411_vm1, %v3361_v46  ;;  %3582 = vst.msk [vmem:[%s5269_s8 + $0x550] sm:$0xff] %vm3411_vm1, %v3401_v50  ;;  %v2988_v33 = vadd.f32 %v6053_v24, %v2023_v59  ;;  %v3404_v61 = vmax.f32 %v3198_v41, 0.0  ;;  %v3193_v54 = vadd.f32 %v3192_v47, %v2228_v22  ;;  %v2253_v24 = vadd.f32 %v6058_v31, %v6437_v21 }
 0x31d   : > { %v2027_v38 = vpop.f32.mrf.mxu0  ;;  %v4293_v26 = vpop.f32.mrf.mxu1 }
 0x31e   : > { %v3362_v6 = vmax.f32 %v2988_v33, 0.0  ;;  %3585 = vst.msk [vmem:[%s5269_s8 + $0x568] sm:$0xff] %vm3411_vm1, %v3404_v61  ;;  %v3403_v27 = vmax.f32 %v3193_v54, 0.0  ;;  %v2028_v10 = vadd.f32 %v6058_v31, %v2027_v38  ;;  %v3208_v28 = vadd.f32 %v4293_v26, %v2243_v29 }
 0x31f   : > { %v2029_v55 = vpop.f32.mrf.mxu0  ;;  %v3202_v25 = vpop.f32.mrf.mxu1 }
 0x320   : > { %3543 = vst.msk [vmem:[%s5269_s8 + $0x418] sm:$0xff] %vm3411_vm1, %v3362_v6  ;;  %3584 = vst.msk [vmem:[%s5269_s8 + $0x560] sm:$0xff] %vm3411_vm1, %v3403_v27  ;;  %v2993_v58 = vadd.f32 %v6069_v8, %v2028_v10  ;;  %v3406_v32 = vmax.f32 %v3208_v28, 0.0  ;;  %v3203_v13 = vadd.f32 %v3202_v25, %v2238_v23  ;;  %v2263_v8 = vadd.f32 %v6058_v31, %v6439_v16 }
 0x321   : > { %v2032_v2 = vpop.f32.mrf.mxu0  ;;  %v4296_v9 = vpop.f32.mrf.mxu1 }
 0x322   : > { %v3363_v42 = vmax.f32 %v2993_v58, 0.0  ;;  %3587 = vst.msk [vmem:[%s5269_s8 + $0x578] sm:$0xff] %vm3411_vm1, %v3406_v32  ;;  %v3405_v5 = vmax.f32 %v3203_v13, 0.0  ;;  %v2033_v44 = vadd.f32 %v6058_v31, %v2032_v2  ;;  %v3218_v40 = vadd.f32 %v4296_v9, %v2253_v24 }
 0x323   : > { %v2034_v12 = vpop.f32.mrf.mxu0  ;;  %v3212_v20 = vpop.f32.mrf.mxu1 }
 0x324   : > { %3544 = vst.msk [vmem:[%s5269_s8 + $0x420] sm:$0xff] %vm3411_vm1, %v3363_v42  ;;  %3586 = vst.msk [vmem:[%s5269_s8 + $0x570] sm:$0xff] %vm3411_vm1, %v3405_v5  ;;  %v2998_v53 = vadd.f32 %v6066_v15, %v2033_v44  ;;  %v3408_v11 = vmax.f32 %v3218_v40, 0.0  ;;  %v3213_v62 = vadd.f32 %v3212_v20, %v2248_v57 }
 0x325   : > { %v2037_v17 = vpop.f32.mrf.mxu0  ;;  %v4299_v35 = vpop.f32.mrf.mxu1 }
 0x326   : > { %v3364_v48 = vmax.f32 %v2998_v53, 0.0  ;;  %3589 = vst.msk [vmem:[%s5269_s8 + $0x588] sm:$0xff] %vm3411_vm1, %v3408_v11  ;;  %v3407_v60 = vmax.f32 %v3213_v62, 0.0  ;;  %v2038_v45 = vadd.f32 %v6058_v31, %v2037_v17  ;;  %v3228_v0 = vadd.f32 %v4299_v35, %v2263_v8 }
 0x327   : > { %v2039_v30 = vpop.f32.mrf.mxu0  ;;  %v3222_v39 = vpop.f32.mrf.mxu1 }
 0x328   : > { %3545 = vst.msk [vmem:[%s5269_s8 + $0x428] sm:$0xff] %vm3411_vm1, %v3364_v48  ;;  %3588 = vst.msk [vmem:[%s5269_s8 + $0x580] sm:$0xff] %vm3411_vm1, %v3407_v60  ;;  %v3003_v15 = vadd.f32 %v6077_v51, %v2038_v45  ;;  %v3410_v14 = vmax.f32 %v3228_v0, 0.0  ;;  %v3223_v18 = vadd.f32 %v3222_v39, %v2258_v1 }
 0x32a   : > { %v3365_v4 = vmax.f32 %v3003_v15, 0.0  ;;  %3591 = vst.msk [vmem:[%s5269_s8 + $0x598] sm:$0xff] %vm3411_vm1, %v3410_v14  ;;  %v3409_v52 = vmax.f32 %v3223_v18, 0.0 }
 0x32c   : > { %3546 = vst.msk [vmem:[%s5269_s8 + $0x430] sm:$0xff] %vm3411_vm1, %v3365_v4  ;;  %3590 = vst.msk [vmem:[%s5269_s8 + $0x590] sm:$0xff] %vm3411_vm1, %v3409_v52 }
 0x32d PF: > { %s13_s12 = sadd.s32 1, %s4382_s12  }
 0x32e   : > { %p10_p4 = scmp.ge.s32.totalorder %s13_s12, 7  }
 0x330   :  { %12 = sbr.rel (!%p10_p4) target bundleno = 1 (0x1), region = 62 }

// kernel: net_forward.7
= control target key start
LH: loop header
LB: loop body
LE: loop exit
PB: predicated region body
PF: predicated region fallthrough
CT: control target
= control target key end

     0   :  { %s3987_s20 = smov 0   ;;  %s4918_s0 = inlined_call_operand.vmem [shape: f32[8,57600], index: 0, kind: input, shape index: {}]   ;;  %s4919_s1 = inlined_call_operand.vmem [shape: f32[57600,128], index: 1, kind: input, shape index: {}]   ;;  %s4920_s2 = inlined_call_operand.vmem [shape: f32[1,128], index: 2, kind: input, shape index: {}]   ;;  %s4921_s3 = inlined_call_operand.vmem [shape: f32[128,1], index: 3, kind: input, shape index: {}]   ;;  %s4922_s4 = inlined_call_operand.<no memory space> [shape: f32[1,1], index: 4, kind: input, shape index: {}]   ;;  %s4923_s5 = inlined_call_operand.vmem [shape: f32[8,1], index: 5, kind: output, shape index: {}]  }
   0x1   :  { %v10_v0 = vstv %s4922_s4 }
   0x2   :  { %11 = vst [vmem:[#allocation3] sm:$0x1] %v10_v0 }
   0x3 LB: > { %s3993_s21 = sadd.s32 4294967295, %s3949_s20   ;;  %p2996_p0 = scmp.ge.s32.totalorder %s3949_s20, 1  ;;  %s3949_s20 = sphi %s3987_s20, %s17_s20  }
   0x4   : > { %p196_p1 = scmp.lt.s32.totalorder %s3949_s20, 10 }
   0x6   : > { %p197_p2 = pnand %p2996_p0, %p196_p1 }
   0x7   : > { %s224_s4 = smul.u32 (!%p197_p2), 50, %s3993_s21  ;;  %p2999_p5 = scmp.ne.s32.totalorder (!%p197_p2), %s3993_s21, 0 }
   0x8   : > { %200 = sbr.rel (%p197_p2) target bundleno = 895 (0x37f), region = 40 }
   0x9   : > { %s230_s22 = smul.u32 (!%p197_p2), 800, %s3993_s21  ;;  %p225_p3 = scmp.lt.s32.totalorder (!%p197_p2), %s224_s4, 449 }
   0xb   : > { %p231_p4 = scmp.lt.s32.totalorder (!%p197_p2), %s230_s22, 7199 }
   0xd   : > { %s4925_s4 = smov (!%p225_p3, %s224_s4), 449  ;;  %s4927_s22 = smov (!%p231_p4, %s230_s22), 7199 }
   0xe   : > { %s2997_s23 = sshll.u32 %s4925_s4, 3  ;;  %s2998_s27 = sshll.u32 %s4927_s22, 3 }
   0xf   : > { %s4002_s26 = scalar_lea.vmem %s4918_s0, %s2997_s23  ;;  %s4007_s30 = scalar_lea.vmem %s4919_s1, %s2998_s27 }
  0x10   : > { %239 = sbr.rel (%p2999_p5) target bundleno = 23 (0x17), region = 44 }
  0x15   : > { %v3951_v1 = vmov 0.0  }
  0x16   : > { %240 = vst [vmem:[#allocation2] sm:$0xff] %v3951_v1 }
  0x17 PF: > { %v323_v2 = vld [vmem:[%s4007_s30 + $0xf8] sm:$0xff]  ;;  %v322_v6 = vld [vmem:[%s4007_s30 + $0xf0] sm:$0xff]  ;;  %v321_v10 = vld [vmem:[%s4007_s30 + $0xe8] sm:$0xff]  ;;  %p3000_p6 = scmp.ne.s32.totalorder %s3993_s21, 8 }
  0x18   : > { %v355_v3 = vld [vmem:[%s4007_s30 + $0x1f8] sm:$0xff]  ;;  %3005 = vmatprep.subr.mxu0 %v323_v2  ;;  %v354_v7 = vld [vmem:[%s4007_s30 + $0x1f0] sm:$0xff]  ;;  %v353_v11 = vld [vmem:[%s4007_s30 + $0x1e8] sm:$0xff] }
  0x19   : > { %v307_v4 = vld [vmem:[%s4007_s30 + $0x78] sm:$0xff]  ;;  %3040 = vmatprep.subr.mxu1 %v355_v3  ;;  %v306_v8 = vld [vmem:[%s4007_s30 + $0x70] sm:$0xff]  ;;  %v305_v12 = vld [vmem:[%s4007_s30 + $0x68] sm:$0xff] }
  0x1a   : > { %v339_v5 = vld [vmem:[%s4007_s30 + $0x178] sm:$0xff]  ;;  %3006 = vmatpush3.msra.mxu0 %v307_v4  ;;  %v338_v9 = vld [vmem:[%s4007_s30 + $0x170] sm:$0xff]  ;;  %v337_v13 = vld [vmem:[%s4007_s30 + $0x168] sm:$0xff] }
  0x1b   : > { %3041 = vmatpush3.msra.mxu1 %v339_v5  ;;  %3007 = vmatprep.subr.mxu0 %v322_v6  ;;  %v320_v14 = vld [vmem:[%s4007_s30 + $0xe0] sm:$0xff]  ;;  %v319_v18 = vld [vmem:[%s4007_s30 + $0xd8] sm:$0xff]  ;;  %v318_v22 = vld [vmem:[%s4007_s30 + $0xd0] sm:$0xff] }
  0x1c   : > { %3042 = vmatprep.subr.mxu1 %v354_v7  ;;  %3008 = vmatpush3.msra.mxu0 %v306_v8  ;;  %v352_v15 = vld [vmem:[%s4007_s30 + $0x1e0] sm:$0xff]  ;;  %v351_v19 = vld [vmem:[%s4007_s30 + $0x1d8] sm:$0xff]  ;;  %v350_v23 = vld [vmem:[%s4007_s30 + $0x1d0] sm:$0xff] }
  0x1d   : > { %3043 = vmatpush3.msra.mxu1 %v338_v9  ;;  %3009 = vmatprep.subr.mxu0 %v321_v10  ;;  %v304_v16 = vld [vmem:[%s4007_s30 + $0x60] sm:$0xff]  ;;  %v303_v20 = vld [vmem:[%s4007_s30 + $0x58] sm:$0xff]  ;;  %v302_v24 = vld [vmem:[%s4007_s30 + $0x50] sm:$0xff] }
  0x1e   : > { %3044 = vmatprep.subr.mxu1 %v353_v11  ;;  %v336_v17 = vld [vmem:[%s4007_s30 + $0x160] sm:$0xff]  ;;  %3010 = vmatpush3.msra.mxu0 %v305_v12  ;;  %v335_v21 = vld [vmem:[%s4007_s30 + $0x158] sm:$0xff]  ;;  %v334_v25 = vld [vmem:[%s4007_s30 + $0x150] sm:$0xff] }
  0x1f   : > { %3045 = vmatpush3.msra.mxu1 %v337_v13  ;;  %3011 = vmatprep.subr.mxu0 %v320_v14  ;;  %v317_v26 = vld [vmem:[%s4007_s30 + $0xc8] sm:$0xff]  ;;  %v316_v30 = vld [vmem:[%s4007_s30 + $0xc0] sm:$0xff]  ;;  %v315_v34 = vld [vmem:[%s4007_s30 + $0xb8] sm:$0xff] }
  0x20   : > { %3046 = vmatprep.subr.mxu1 %v352_v15  ;;  %3012 = vmatpush3.msra.mxu0 %v304_v16  ;;  %v349_v27 = vld [vmem:[%s4007_s30 + $0x1c8] sm:$0xff]  ;;  %v348_v31 = vld [vmem:[%s4007_s30 + $0x1c0] sm:$0xff]  ;;  %v347_v35 = vld [vmem:[%s4007_s30 + $0x1b8] sm:$0xff] }
  0x21   : > { %3047 = vmatpush3.msra.mxu1 %v336_v17  ;;  %3013 = vmatprep.subr.mxu0 %v319_v18  ;;  %v301_v28 = vld [vmem:[%s4007_s30 + $0x48] sm:$0xff]  ;;  %v300_v32 = vld [vmem:[%s4007_s30 + $0x40] sm:$0xff]  ;;  %v299_v36 = vld [vmem:[%s4007_s30 + $0x38] sm:$0xff] }
  0x22   : > { %3048 = vmatprep.subr.mxu1 %v351_v19  ;;  %3014 = vmatpush3.msra.mxu0 %v303_v20  ;;  %v333_v29 = vld [vmem:[%s4007_s30 + $0x148] sm:$0xff]  ;;  %v332_v33 = vld [vmem:[%s4007_s30 + $0x140] sm:$0xff]  ;;  %v331_v37 = vld [vmem:[%s4007_s30 + $0x138] sm:$0xff] }
  0x23   : > { %3049 = vmatpush3.msra.mxu1 %v335_v21  ;;  %3015 = vmatprep.subr.mxu0 %v318_v22  ;;  %v314_v38 = vld [vmem:[%s4007_s30 + $0xb0] sm:$0xff]  ;;  %v313_v42 = vld [vmem:[%s4007_s30 + $0xa8] sm:$0xff]  ;;  %v312_v46 = vld [vmem:[%s4007_s30 + $0xa0] sm:$0xff] }
  0x24   : > { %3050 = vmatprep.subr.mxu1 %v350_v23  ;;  %3016 = vmatpush3.msra.mxu0 %v302_v24  ;;  %v346_v39 = vld [vmem:[%s4007_s30 + $0x1b0] sm:$0xff]  ;;  %v345_v43 = vld [vmem:[%s4007_s30 + $0x1a8] sm:$0xff]  ;;  %v344_v47 = vld [vmem:[%s4007_s30 + $0x1a0] sm:$0xff] }
  0x25   : > { %3051 = vmatpush3.msra.mxu1 %v334_v25  ;;  %3017 = vmatprep.subr.mxu0 %v317_v26  ;;  %v298_v40 = vld [vmem:[%s4007_s30 + $0x30] sm:$0xff]  ;;  %v297_v44 = vld [vmem:[%s4007_s30 + $0x28] sm:$0xff]  ;;  %v296_v48 = vld [vmem:[%s4007_s30 + $0x20] sm:$0xff] }
  0x26   : > { %3052 = vmatprep.subr.mxu1 %v349_v27  ;;  %3018 = vmatpush3.msra.mxu0 %v301_v28  ;;  %v330_v41 = vld [vmem:[%s4007_s30 + $0x130] sm:$0xff]  ;;  %v329_v45 = vld [vmem:[%s4007_s30 + $0x128] sm:$0xff]  ;;  %v328_v49 = vld [vmem:[%s4007_s30 + $0x120] sm:$0xff] }
  0x27   : > { %3053 = vmatpush3.msra.mxu1 %v333_v29  ;;  %3019 = vmatprep.subr.mxu0 %v316_v30  ;;  %v311_v50 = vld [vmem:[%s4007_s30 + $0x98] sm:$0xff]  ;;  %v310_v54 = vld [vmem:[%s4007_s30 + $0x90] sm:$0xff]  ;;  %v309_v58 = vld [vmem:[%s4007_s30 + $0x88] sm:$0xff] }
  0x28   : > { %3054 = vmatprep.subr.mxu1 %v348_v31  ;;  %3020 = vmatpush3.msra.mxu0 %v300_v32  ;;  %v343_v51 = vld [vmem:[%s4007_s30 + $0x198] sm:$0xff]  ;;  %v342_v55 = vld [vmem:[%s4007_s30 + $0x190] sm:$0xff]  ;;  %v341_v59 = vld [vmem:[%s4007_s30 + $0x188] sm:$0xff] }
  0x29   : > { %3055 = vmatpush3.msra.mxu1 %v332_v33  ;;  %3021 = vmatprep.subr.mxu0 %v315_v34  ;;  %v295_v52 = vld [vmem:[%s4007_s30 + $0x18] sm:$0xff]  ;;  %v294_v56 = vld [vmem:[%s4007_s30 + $0x10] sm:$0xff]  ;;  %v293_v60 = vld [vmem:[%s4007_s30 + $0x8] sm:$0xff] }
  0x2a   : > { %3056 = vmatprep.subr.mxu1 %v347_v35  ;;  %3022 = vmatpush3.msra.mxu0 %v299_v36  ;;  %v327_v53 = vld [vmem:[%s4007_s30 + $0x118] sm:$0xff]  ;;  %v326_v57 = vld [vmem:[%s4007_s30 + $0x110] sm:$0xff]  ;;  %v325_v61 = vld [vmem:[%s4007_s30 + $0x108] sm:$0xff] }
  0x2b   : > { %3057 = vmatpush3.msra.mxu1 %v331_v37  ;;  %3023 = vmatprep.subr.mxu0 %v314_v38  ;;  %v308_v62 = vld [vmem:[%s4007_s30 + $0x80] sm:$0xff]  ;;  %v243_v1 = vld [vmem:[%s4002_s26 + $0x8] sm:$0xff]  ;;  %v245_v3 = vld [vmem:[%s4002_s26 + $0x18] sm:$0xff] }
  0x2c   : > { %3058 = vmatprep.subr.mxu1 %v346_v39  ;;  %3024 = vmatpush3.msra.mxu0 %v298_v40  ;;  %v340_v63 = vld [vmem:[%s4007_s30 + $0x180] sm:$0xff]  ;;  %v244_v5 = vld [vmem:[%s4002_s26 + $0x10] sm:$0xff]  ;;  %v387_v6 = vld [vmem:[%s4007_s30 + $0x2f8] sm:$0xff] }
  0x2d   : > { %3059 = vmatpush3.msra.mxu1 %v330_v41  ;;  %3025 = vmatprep.subr.mxu0 %v313_v42  ;;  %v292_v0 = vld [vmem:[%s4007_s30] sm:$0xff]  ;;  %v419_v7 = vld [vmem:[%s4007_s30 + $0x3f8] sm:$0xff]  ;;  %v386_v10 = vld [vmem:[%s4007_s30 + $0x2f0] sm:$0xff] }
  0x2e   : > { %3060 = vmatprep.subr.mxu1 %v345_v43  ;;  %3026 = vmatpush3.msra.mxu0 %v297_v44  ;;  %v324_v2 = vld [vmem:[%s4007_s30 + $0x100] sm:$0xff]  ;;  %v371_v8 = vld [vmem:[%s4007_s30 + $0x278] sm:$0xff]  ;;  %v418_v11 = vld [vmem:[%s4007_s30 + $0x3f0] sm:$0xff] }
  0x2f   : > { %3061 = vmatpush3.msra.mxu1 %v329_v45  ;;  %3027 = vmatprep.subr.mxu0 %v312_v46  ;;  %v242_v4 = vld [vmem:[%s4002_s26] sm:$0xff]  ;;  %v403_v9 = vld [vmem:[%s4007_s30 + $0x378] sm:$0xff]  ;;  %v370_v12 = vld [vmem:[%s4007_s30 + $0x270] sm:$0xff] }
  0x30   : > { %3062 = vmatprep.subr.mxu1 %v344_v47  ;;  %3028 = vmatpush3.msra.mxu0 %v296_v48  ;;  %v402_v13 = vld [vmem:[%s4007_s30 + $0x370] sm:$0xff]  ;;  %v385_v14 = vld [vmem:[%s4007_s30 + $0x2e8] sm:$0xff]  ;;  %v384_v18 = vld [vmem:[%s4007_s30 + $0x2e0] sm:$0xff] }
  0x31   : > { %3063 = vmatpush3.msra.mxu1 %v328_v49  ;;  %3029 = vmatprep.subr.mxu0 %v311_v50  ;;  %v417_v15 = vld [vmem:[%s4007_s30 + $0x3e8] sm:$0xff]  ;;  %v416_v19 = vld [vmem:[%s4007_s30 + $0x3e0] sm:$0xff]  ;;  %v383_v22 = vld [vmem:[%s4007_s30 + $0x2d8] sm:$0xff] }
  0x32   : > { %3064 = vmatprep.subr.mxu1 %v343_v51  ;;  %3030 = vmatpush3.msra.mxu0 %v295_v52  ;;  %v369_v16 = vld [vmem:[%s4007_s30 + $0x268] sm:$0xff]  ;;  %v368_v20 = vld [vmem:[%s4007_s30 + $0x260] sm:$0xff]  ;;  %v415_v23 = vld [vmem:[%s4007_s30 + $0x3d8] sm:$0xff] }
  0x33   : > { %3065 = vmatpush3.msra.mxu1 %v327_v53  ;;  %3031 = vmatprep.subr.mxu0 %v310_v54  ;;  %v401_v17 = vld [vmem:[%s4007_s30 + $0x368] sm:$0xff]  ;;  %v400_v21 = vld [vmem:[%s4007_s30 + $0x360] sm:$0xff]  ;;  %v367_v24 = vld [vmem:[%s4007_s30 + $0x258] sm:$0xff] }
  0x34   : > { %3066 = vmatprep.subr.mxu1 %v342_v55  ;;  %3032 = vmatpush3.msra.mxu0 %v294_v56  ;;  %v399_v25 = vld [vmem:[%s4007_s30 + $0x358] sm:$0xff]  ;;  %v382_v26 = vld [vmem:[%s4007_s30 + $0x2d0] sm:$0xff]  ;;  %v381_v30 = vld [vmem:[%s4007_s30 + $0x2c8] sm:$0xff] }
  0x35   : > { %3067 = vmatpush3.msra.mxu1 %v326_v57  ;;  %3033 = vmatprep.subr.mxu0 %v309_v58  ;;  %v414_v27 = vld [vmem:[%s4007_s30 + $0x3d0] sm:$0xff]  ;;  %v413_v31 = vld [vmem:[%s4007_s30 + $0x3c8] sm:$0xff]  ;;  %v380_v34 = vld [vmem:[%s4007_s30 + $0x2c0] sm:$0xff] }
  0x36   : > { %3068 = vmatprep.subr.mxu1 %v341_v59  ;;  %3034 = vmatpush3.msra.mxu0 %v293_v60  ;;  %v366_v28 = vld [vmem:[%s4007_s30 + $0x250] sm:$0xff]  ;;  %v365_v32 = vld [vmem:[%s4007_s30 + $0x248] sm:$0xff]  ;;  %v412_v35 = vld [vmem:[%s4007_s30 + $0x3c0] sm:$0xff] }
  0x37   : > { %3069 = vmatpush3.msra.mxu1 %v325_v61  ;;  %3035 = vmatprep.subr.mxu0 %v308_v62  ;;  %v398_v29 = vld [vmem:[%s4007_s30 + $0x350] sm:$0xff]  ;;  %v397_v33 = vld [vmem:[%s4007_s30 + $0x348] sm:$0xff]  ;;  %v364_v36 = vld [vmem:[%s4007_s30 + $0x240] sm:$0xff] }
  0x38   : > { %3070 = vmatprep.subr.mxu1 %v340_v63  ;;  %3036 = vmatpush3.msra.mxu0 %v292_v0  ;;  %v396_v37 = vld [vmem:[%s4007_s30 + $0x340] sm:$0xff]  ;;  %v379_v38 = vld [vmem:[%s4007_s30 + $0x2b8] sm:$0xff]  ;;  %v378_v42 = vld [vmem:[%s4007_s30 + $0x2b0] sm:$0xff] }
  0x39   : > { %1156 = vmatprep.mubr.f32.mxu0 %v243_v1  ;;  %3071 = vmatpush3.msra.mxu1 %v324_v2  ;;  %v411_v39 = vld [vmem:[%s4007_s30 + $0x3b8] sm:$0xff]  ;;  %v410_v43 = vld [vmem:[%s4007_s30 + $0x3b0] sm:$0xff]  ;;  %v377_v46 = vld [vmem:[%s4007_s30 + $0x2a8] sm:$0xff] }
  0x3a   : > { %1226 = vmatprep.mubr.f32.mxu1 %v245_v3  ;;  %1157 = vmatmul.mubr.f32.vlgmr.msra.gmra.mxu0 %v242_v4  ;;  %v363_v40 = vld [vmem:[%s4007_s30 + $0x238] sm:$0xff]  ;;  %v362_v44 = vld [vmem:[%s4007_s30 + $0x230] sm:$0xff]  ;;  %v409_v47 = vld [vmem:[%s4007_s30 + $0x3a8] sm:$0xff] }
  0x3b   : > { %1227 = vmatmul.mubr.f32.vlgmr.msra.gmra.mxu1 %v244_v5  ;;  %3075 = vmatprep.subr.mxu0 %v387_v6  ;;  %v395_v41 = vld [vmem:[%s4007_s30 + $0x338] sm:$0xff]  ;;  %v394_v45 = vld [vmem:[%s4007_s30 + $0x330] sm:$0xff]  ;;  %v361_v48 = vld [vmem:[%s4007_s30 + $0x228] sm:$0xff] }
  0x3c   : > { %3110 = vmatprep.subr.mxu1 %v419_v7  ;;  %3076 = vmatpush3.msra.mxu0 %v371_v8  ;;  %v393_v49 = vld [vmem:[%s4007_s30 + $0x328] sm:$0xff]  ;;  %v376_v50 = vld [vmem:[%s4007_s30 + $0x2a0] sm:$0xff]  ;;  %v375_v54 = vld [vmem:[%s4007_s30 + $0x298] sm:$0xff] }
  0x3d   : > { %3111 = vmatpush3.msra.mxu1 %v403_v9  ;;  %3077 = vmatprep.subr.mxu0 %v386_v10  ;;  %v408_v51 = vld [vmem:[%s4007_s30 + $0x3a0] sm:$0xff]  ;;  %v407_v55 = vld [vmem:[%s4007_s30 + $0x398] sm:$0xff]  ;;  %v374_v58 = vld [vmem:[%s4007_s30 + $0x290] sm:$0xff] }
  0x3e   : > { %3112 = vmatprep.subr.mxu1 %v418_v11  ;;  %3078 = vmatpush3.msra.mxu0 %v370_v12  ;;  %v360_v52 = vld [vmem:[%s4007_s30 + $0x220] sm:$0xff]  ;;  %v359_v56 = vld [vmem:[%s4007_s30 + $0x218] sm:$0xff]  ;;  %v406_v59 = vld [vmem:[%s4007_s30 + $0x390] sm:$0xff] }
  0x3f   : > { %3113 = vmatpush3.msra.mxu1 %v402_v13  ;;  %3079 = vmatprep.subr.mxu0 %v385_v14  ;;  %v392_v53 = vld [vmem:[%s4007_s30 + $0x320] sm:$0xff]  ;;  %v391_v57 = vld [vmem:[%s4007_s30 + $0x318] sm:$0xff]  ;;  %v358_v60 = vld [vmem:[%s4007_s30 + $0x210] sm:$0xff] }
  0x40   : > { %3114 = vmatprep.subr.mxu1 %v417_v15  ;;  %3080 = vmatpush3.msra.mxu0 %v369_v16  ;;  %v390_v61 = vld [vmem:[%s4007_s30 + $0x310] sm:$0xff]  ;;  %v373_v62 = vld [vmem:[%s4007_s30 + $0x288] sm:$0xff]  ;;  %v372_v2 = vld [vmem:[%s4007_s30 + $0x280] sm:$0xff] }
  0x41   : > { %3115 = vmatpush3.msra.mxu1 %v401_v17  ;;  %3081 = vmatprep.subr.mxu0 %v384_v18  ;;  %v405_v63 = vld [vmem:[%s4007_s30 + $0x388] sm:$0xff]  ;;  %v356_v4 = vld [vmem:[%s4007_s30 + $0x200] sm:$0xff]  ;;  %v451_v7 = vld [vmem:[%s4007_s30 + $0x4f8] sm:$0xff] }
  0x42   : > { %3116 = vmatprep.subr.mxu1 %v416_v19  ;;  %3082 = vmatpush3.msra.mxu0 %v368_v20  ;;  %v357_v0 = vld [vmem:[%s4007_s30 + $0x208] sm:$0xff]  ;;  %v404_v5 = vld [vmem:[%s4007_s30 + $0x380] sm:$0xff]  ;;  %v249_v9 = vld [vmem:[%s4002_s26 + $0x38] sm:$0xff] }
  0x43   : > { %3117 = vmatpush3.msra.mxu1 %v400_v21  ;;  %3083 = vmatprep.subr.mxu0 %v383_v22  ;;  %v247_v1 = vld [vmem:[%s4002_s26 + $0x28] sm:$0xff]  ;;  %v246_v6 = vld [vmem:[%s4002_s26 + $0x20] sm:$0xff]  ;;  %v435_v10 = vld [vmem:[%s4007_s30 + $0x478] sm:$0xff] }
  0x44   : > { %3118 = vmatprep.subr.mxu1 %v415_v23  ;;  %3084 = vmatpush3.msra.mxu0 %v367_v24  ;;  %v389_v3 = vld [vmem:[%s4007_s30 + $0x308] sm:$0xff]  ;;  %v388_v8 = vld [vmem:[%s4007_s30 + $0x300] sm:$0xff]  ;;  %v248_v11 = vld [vmem:[%s4002_s26 + $0x30] sm:$0xff] }
  0x45   : > { %3119 = vmatpush3.msra.mxu1 %v399_v25  ;;  %3085 = vmatprep.subr.mxu0 %v382_v26  ;;  %v450_v12 = vld [vmem:[%s4007_s30 + $0x4f0] sm:$0xff]  ;;  %v483_v13 = vld [vmem:[%s4007_s30 + $0x5f8] sm:$0xff]  ;;  %v449_v16 = vld [vmem:[%s4007_s30 + $0x4e8] sm:$0xff] }
  0x46   : > { %3120 = vmatprep.subr.mxu1 %v414_v27  ;;  %3086 = vmatpush3.msra.mxu0 %v366_v28  ;;  %v434_v14 = vld [vmem:[%s4007_s30 + $0x470] sm:$0xff]  ;;  %v467_v15 = vld [vmem:[%s4007_s30 + $0x578] sm:$0xff]  ;;  %v433_v18 = vld [vmem:[%s4007_s30 + $0x468] sm:$0xff] }
  0x47   : > { %3121 = vmatpush3.msra.mxu1 %v398_v29  ;;  %3087 = vmatprep.subr.mxu0 %v381_v30  ;;  %v482_v17 = vld [vmem:[%s4007_s30 + $0x5f0] sm:$0xff]  ;;  %v448_v20 = vld [vmem:[%s4007_s30 + $0x4e0] sm:$0xff]  ;;  %v481_v21 = vld [vmem:[%s4007_s30 + $0x5e8] sm:$0xff] }
  0x48   : > { %3122 = vmatprep.subr.mxu1 %v413_v31  ;;  %3088 = vmatpush3.msra.mxu0 %v365_v32  ;;  %v466_v19 = vld [vmem:[%s4007_s30 + $0x570] sm:$0xff]  ;;  %v432_v22 = vld [vmem:[%s4007_s30 + $0x460] sm:$0xff]  ;;  %v465_v23 = vld [vmem:[%s4007_s30 + $0x568] sm:$0xff] }
  0x49   : > { %3123 = vmatpush3.msra.mxu1 %v397_v33  ;;  %3089 = vmatprep.subr.mxu0 %v380_v34  ;;  %v447_v24 = vld [vmem:[%s4007_s30 + $0x4d8] sm:$0xff]  ;;  %v480_v25 = vld [vmem:[%s4007_s30 + $0x5e0] sm:$0xff]  ;;  %v446_v28 = vld [vmem:[%s4007_s30 + $0x4d0] sm:$0xff] }
  0x4a   : > { %3124 = vmatprep.subr.mxu1 %v412_v35  ;;  %3090 = vmatpush3.msra.mxu0 %v364_v36  ;;  %v431_v26 = vld [vmem:[%s4007_s30 + $0x458] sm:$0xff]  ;;  %v464_v27 = vld [vmem:[%s4007_s30 + $0x560] sm:$0xff]  ;;  %v430_v30 = vld [vmem:[%s4007_s30 + $0x450] sm:$0xff] }
  0x4b   : > { %3125 = vmatpush3.msra.mxu1 %v396_v37  ;;  %3091 = vmatprep.subr.mxu0 %v379_v38  ;;  %v479_v29 = vld [vmem:[%s4007_s30 + $0x5d8] sm:$0xff]  ;;  %v445_v32 = vld [vmem:[%s4007_s30 + $0x4c8] sm:$0xff]  ;;  %v478_v33 = vld [vmem:[%s4007_s30 + $0x5d0] sm:$0xff] }
  0x4c   : > { %3126 = vmatprep.subr.mxu1 %v411_v39  ;;  %3092 = vmatpush3.msra.mxu0 %v363_v40  ;;  %v463_v31 = vld [vmem:[%s4007_s30 + $0x558] sm:$0xff]  ;;  %v429_v34 = vld [vmem:[%s4007_s30 + $0x448] sm:$0xff]  ;;  %v462_v35 = vld [vmem:[%s4007_s30 + $0x550] sm:$0xff] }
  0x4d   : > { %3127 = vmatpush3.msra.mxu1 %v395_v41  ;;  %3093 = vmatprep.subr.mxu0 %v378_v42  ;;  %v444_v36 = vld [vmem:[%s4007_s30 + $0x4c0] sm:$0xff]  ;;  %v477_v37 = vld [vmem:[%s4007_s30 + $0x5c8] sm:$0xff]  ;;  %v443_v40 = vld [vmem:[%s4007_s30 + $0x4b8] sm:$0xff] }
  0x4e   : > { %3128 = vmatprep.subr.mxu1 %v410_v43  ;;  %3094 = vmatpush3.msra.mxu0 %v362_v44  ;;  %v428_v38 = vld [vmem:[%s4007_s30 + $0x440] sm:$0xff]  ;;  %v461_v39 = vld [vmem:[%s4007_s30 + $0x548] sm:$0xff]  ;;  %v427_v42 = vld [vmem:[%s4007_s30 + $0x438] sm:$0xff] }
  0x4f   : > { %3129 = vmatpush3.msra.mxu1 %v394_v45  ;;  %3095 = vmatprep.subr.mxu0 %v377_v46  ;;  %v476_v41 = vld [vmem:[%s4007_s30 + $0x5c0] sm:$0xff]  ;;  %v442_v44 = vld [vmem:[%s4007_s30 + $0x4b0] sm:$0xff]  ;;  %v475_v45 = vld [vmem:[%s4007_s30 + $0x5b8] sm:$0xff] }
  0x50   : > { %3130 = vmatprep.subr.mxu1 %v409_v47  ;;  %3096 = vmatpush3.msra.mxu0 %v361_v48  ;;  %v460_v43 = vld [vmem:[%s4007_s30 + $0x540] sm:$0xff]  ;;  %v426_v46 = vld [vmem:[%s4007_s30 + $0x430] sm:$0xff]  ;;  %v459_v47 = vld [vmem:[%s4007_s30 + $0x538] sm:$0xff] }
  0x51   : > { %3131 = vmatpush3.msra.mxu1 %v393_v49  ;;  %3097 = vmatprep.subr.mxu0 %v376_v50  ;;  %v441_v48 = vld [vmem:[%s4007_s30 + $0x4a8] sm:$0xff]  ;;  %v474_v49 = vld [vmem:[%s4007_s30 + $0x5b0] sm:$0xff] }
  0x52   : > { %3132 = vmatprep.subr.mxu1 %v408_v51  ;;  %3098 = vmatpush3.msra.mxu0 %v360_v52  ;;  %v425_v50 = vld [vmem:[%s4007_s30 + $0x428] sm:$0xff]  ;;  %v458_v51 = vld [vmem:[%s4007_s30 + $0x530] sm:$0xff]  ;;  %v440_v52 = vld [vmem:[%s4007_s30 + $0x4a0] sm:$0xff] }
  0x53   : > { %3133 = vmatpush3.msra.mxu1 %v392_v53  ;;  %3099 = vmatprep.subr.mxu0 %v375_v54  ;;  %v473_v53 = vld [vmem:[%s4007_s30 + $0x5a8] sm:$0xff]  ;;  %v424_v54 = vld [vmem:[%s4007_s30 + $0x420] sm:$0xff] }
  0x54   : > { %3134 = vmatprep.subr.mxu1 %v407_v55  ;;  %3100 = vmatpush3.msra.mxu0 %v359_v56  ;;  %v457_v55 = vld [vmem:[%s4007_s30 + $0x528] sm:$0xff]  ;;  %v439_v56 = vld [vmem:[%s4007_s30 + $0x498] sm:$0xff] }
  0x55   : > { %3135 = vmatpush3.msra.mxu1 %v391_v57  ;;  %3101 = vmatprep.subr.mxu0 %v374_v58  ;;  %v472_v57 = vld [vmem:[%s4007_s30 + $0x5a0] sm:$0xff]  ;;  %v423_v58 = vld [vmem:[%s4007_s30 + $0x418] sm:$0xff] }
  0x56   : > { %3136 = vmatprep.subr.mxu1 %v406_v59  ;;  %3102 = vmatpush3.msra.mxu0 %v358_v60  ;;  %v456_v59 = vld [vmem:[%s4007_s30 + $0x520] sm:$0xff]  ;;  %v438_v60 = vld [vmem:[%s4007_s30 + $0x490] sm:$0xff] }
  0x57   : > { %3137 = vmatpush3.msra.mxu1 %v390_v61  ;;  %3103 = vmatprep.subr.mxu0 %v373_v62  ;;  %v471_v61 = vld [vmem:[%s4007_s30 + $0x598] sm:$0xff]  ;;  %v422_v62 = vld [vmem:[%s4007_s30 + $0x410] sm:$0xff] }
  0x58   : > { %3138 = vmatprep.subr.mxu1 %v405_v63  ;;  %3104 = vmatpush3.msra.mxu0 %v357_v0  ;;  %v455_v63 = vld [vmem:[%s4007_s30 + $0x518] sm:$0xff]  ;;  %v437_v0 = vld [vmem:[%s4007_s30 + $0x488] sm:$0xff] }
  0x59   : > { %1296 = vmatprep.mubr.f32.mxu0 %v247_v1  ;;  %3105 = vmatprep.subr.mxu0 %v372_v2  ;;  %v470_v1 = vld [vmem:[%s4007_s30 + $0x590] sm:$0xff]  ;;  %v421_v2 = vld [vmem:[%s4007_s30 + $0x408] sm:$0xff] }
  0x5a   : > { %3139 = vmatpush3.msra.mxu1 %v389_v3  ;;  %3106 = vmatpush3.msra.mxu0 %v356_v4  ;;  %v454_v3 = vld [vmem:[%s4007_s30 + $0x510] sm:$0xff]  ;;  %v436_v4 = vld [vmem:[%s4007_s30 + $0x480] sm:$0xff] }
  0x5b   : > { %3140 = vmatprep.subr.mxu1 %v404_v5  ;;  %1297 = vmatmul.mubr.f32.vlgmr.msra.gmra.mxu0 %v246_v6  ;;  %v469_v5 = vld [vmem:[%s4007_s30 + $0x588] sm:$0xff]  ;;  %v420_v6 = vld [vmem:[%s4007_s30 + $0x400] sm:$0xff] }
  0x5c   : > { %3145 = vmatprep.subr.mxu0 %v451_v7  ;;  %3141 = vmatpush3.msra.mxu1 %v388_v8  ;;  %v251_v7 = vld [vmem:[%s4002_s26 + $0x48] sm:$0xff] }
  0x5d   : > { %1366 = vmatprep.mubr.f32.mxu1 %v249_v9  ;;  %3146 = vmatpush3.msra.mxu0 %v435_v10  ;;  %v453_v8 = vld [vmem:[%s4007_s30 + $0x508] sm:$0xff]  ;;  %v250_v9 = vld [vmem:[%s4002_s26 + $0x40] sm:$0xff] }
  0x5e   : > { %1367 = vmatmul.mubr.f32.vlgmr.msra.gmra.mxu1 %v248_v11  ;;  %3147 = vmatprep.subr.mxu0 %v450_v12  ;;  %v468_v10 = vld [vmem:[%s4007_s30 + $0x580] sm:$0xff]  ;;  %v515_v11 = vld [vmem:[%s4007_s30 + $0x6f8] sm:$0xff] }
  0x5f   : > { %3180 = vmatprep.subr.mxu1 %v483_v13  ;;  %3148 = vmatpush3.msra.mxu0 %v434_v14  ;;  %v452_v12 = vld [vmem:[%s4007_s30 + $0x500] sm:$0xff]  ;;  %v253_v13 = vld [vmem:[%s4002_s26 + $0x58] sm:$0xff] }
  0x60   : > { %3181 = vmatpush3.msra.mxu1 %v467_v15  ;;  %3149 = vmatprep.subr.mxu0 %v449_v16  ;;  %v499_v14 = vld [vmem:[%s4007_s30 + $0x678] sm:$0xff]  ;;  %v252_v15 = vld [vmem:[%s4002_s26 + $0x50] sm:$0xff] }
  0x61   : > { %3182 = vmatprep.subr.mxu1 %v482_v17  ;;  %3150 = vmatpush3.msra.mxu0 %v433_v18  ;;  %v514_v16 = vld [vmem:[%s4007_s30 + $0x6f0] sm:$0xff]  ;;  %v547_v17 = vld [vmem:[%s4007_s30 + $0x7f8] sm:$0xff] }
  0x62   : > { %3183 = vmatpush3.msra.mxu1 %v466_v19  ;;  %3151 = vmatprep.subr.mxu0 %v448_v20  ;;  %v498_v18 = vld [vmem:[%s4007_s30 + $0x670] sm:$0xff]  ;;  %v531_v19 = vld [vmem:[%s4007_s30 + $0x778] sm:$0xff]  ;;  %v513_v20 = vld [vmem:[%s4007_s30 + $0x6e8] sm:$0xff] }
  0x63   : > { %3184 = vmatprep.subr.mxu1 %v481_v21  ;;  %3152 = vmatpush3.msra.mxu0 %v432_v22  ;;  %v546_v21 = vld [vmem:[%s4007_s30 + $0x7f0] sm:$0xff]  ;;  %v497_v22 = vld [vmem:[%s4007_s30 + $0x668] sm:$0xff] }
  0x64   : > { %3185 = vmatpush3.msra.mxu1 %v465_v23  ;;  %3153 = vmatprep.subr.mxu0 %v447_v24  ;;  %v530_v23 = vld [vmem:[%s4007_s30 + $0x770] sm:$0xff]  ;;  %v512_v24 = vld [vmem:[%s4007_s30 + $0x6e0] sm:$0xff] }
  0x65   : > { %3186 = vmatprep.subr.mxu1 %v480_v25  ;;  %3154 = vmatpush3.msra.mxu0 %v431_v26  ;;  %v545_v25 = vld [vmem:[%s4007_s30 + $0x7e8] sm:$0xff]  ;;  %v496_v26 = vld [vmem:[%s4007_s30 + $0x660] sm:$0xff] }
  0x66   : > { %3187 = vmatpush3.msra.mxu1 %v464_v27  ;;  %3155 = vmatprep.subr.mxu0 %v446_v28  ;;  %v529_v27 = vld [vmem:[%s4007_s30 + $0x768] sm:$0xff]  ;;  %v511_v28 = vld [vmem:[%s4007_s30 + $0x6d8] sm:$0xff] }
  0x67   : > { %3188 = vmatprep.subr.mxu1 %v479_v29  ;;  %3156 = vmatpush3.msra.mxu0 %v430_v30  ;;  %v544_v29 = vld [vmem:[%s4007_s30 + $0x7e0] sm:$0xff]  ;;  %v495_v30 = vld [vmem:[%s4007_s30 + $0x658] sm:$0xff] }
  0x68   : > { %3189 = vmatpush3.msra.mxu1 %v463_v31  ;;  %3157 = vmatprep.subr.mxu0 %v445_v32  ;;  %v528_v31 = vld [vmem:[%s4007_s30 + $0x760] sm:$0xff]  ;;  %v510_v32 = vld [vmem:[%s4007_s30 + $0x6d0] sm:$0xff] }
  0x69   : > { %3190 = vmatprep.subr.mxu1 %v478_v33  ;;  %3158 = vmatpush3.msra.mxu0 %v429_v34  ;;  %v543_v33 = vld [vmem:[%s4007_s30 + $0x7d8] sm:$0xff]  ;;  %v494_v34 = vld [vmem:[%s4007_s30 + $0x650] sm:$0xff] }
  0x6a   : > { %3191 = vmatpush3.msra.mxu1 %v462_v35  ;;  %3159 = vmatprep.subr.mxu0 %v444_v36  ;;  %v527_v35 = vld [vmem:[%s4007_s30 + $0x758] sm:$0xff]  ;;  %v509_v36 = vld [vmem:[%s4007_s30 + $0x6c8] sm:$0xff] }
  0x6b   : > { %3192 = vmatprep.subr.mxu1 %v477_v37  ;;  %3160 = vmatpush3.msra.mxu0 %v428_v38  ;;  %v542_v37 = vld [vmem:[%s4007_s30 + $0x7d0] sm:$0xff]  ;;  %v493_v38 = vld [vmem:[%s4007_s30 + $0x648] sm:$0xff] }
  0x6c   : > { %3193 = vmatpush3.msra.mxu1 %v461_v39  ;;  %3161 = vmatprep.subr.mxu0 %v443_v40  ;;  %v526_v39 = vld [vmem:[%s4007_s30 + $0x750] sm:$0xff]  ;;  %v508_v40 = vld [vmem:[%s4007_s30 + $0x6c0] sm:$0xff] }
  0x6d   : > { %3194 = vmatprep.subr.mxu1 %v476_v41  ;;  %3162 = vmatpush3.msra.mxu0 %v427_v42  ;;  %v541_v41 = vld [vmem:[%s4007_s30 + $0x7c8] sm:$0xff]  ;;  %v492_v42 = vld [vmem:[%s4007_s30 + $0x640] sm:$0xff] }
  0x6e   : > { %3195 = vmatpush3.msra.mxu1 %v460_v43  ;;  %3163 = vmatprep.subr.mxu0 %v442_v44  ;;  %v525_v43 = vld [vmem:[%s4007_s30 + $0x748] sm:$0xff]  ;;  %v507_v44 = vld [vmem:[%s4007_s30 + $0x6b8] sm:$0xff] }
  0x6f   : > { %3196 = vmatprep.subr.mxu1 %v475_v45  ;;  %3164 = vmatpush3.msra.mxu0 %v426_v46  ;;  %v540_v45 = vld [vmem:[%s4007_s30 + $0x7c0] sm:$0xff]  ;;  %v491_v46 = vld [vmem:[%s4007_s30 + $0x638] sm:$0xff] }
  0x70   : > { %3197 = vmatpush3.msra.mxu1 %v459_v47  ;;  %3165 = vmatprep.subr.mxu0 %v441_v48  ;;  %v524_v47 = vld [vmem:[%s4007_s30 + $0x740] sm:$0xff]  ;;  %v506_v48 = vld [vmem:[%s4007_s30 + $0x6b0] sm:$0xff] }
  0x71   : > { %3198 = vmatprep.subr.mxu1 %v474_v49  ;;  %3166 = vmatpush3.msra.mxu0 %v425_v50  ;;  %v539_v49 = vld [vmem:[%s4007_s30 + $0x7b8] sm:$0xff]  ;;  %v490_v50 = vld [vmem:[%s4007_s30 + $0x630] sm:$0xff] }
  0x72   : > { %3199 = vmatpush3.msra.mxu1 %v458_v51  ;;  %3167 = vmatprep.subr.mxu0 %v440_v52  ;;  %v523_v51 = vld [vmem:[%s4007_s30 + $0x738] sm:$0xff]  ;;  %v505_v52 = vld [vmem:[%s4007_s30 + $0x6a8] sm:$0xff] }
  0x73   : > { %3200 = vmatprep.subr.mxu1 %v473_v53  ;;  %3168 = vmatpush3.msra.mxu0 %v424_v54  ;;  %v538_v53 = vld [vmem:[%s4007_s30 + $0x7b0] sm:$0xff]  ;;  %v489_v54 = vld [vmem:[%s4007_s30 + $0x628] sm:$0xff] }
  0x74   : > { %3201 = vmatpush3.msra.mxu1 %v457_v55  ;;  %3169 = vmatprep.subr.mxu0 %v439_v56  ;;  %v522_v55 = vld [vmem:[%s4007_s30 + $0x730] sm:$0xff]  ;;  %v504_v56 = vld [vmem:[%s4007_s30 + $0x6a0] sm:$0xff] }
  0x75   : > { %3202 = vmatprep.subr.mxu1 %v472_v57  ;;  %3170 = vmatpush3.msra.mxu0 %v423_v58  ;;  %v537_v57 = vld [vmem:[%s4007_s30 + $0x7a8] sm:$0xff]  ;;  %v488_v58 = vld [vmem:[%s4007_s30 + $0x620] sm:$0xff] }
  0x76   : > { %3203 = vmatpush3.msra.mxu1 %v456_v59  ;;  %3171 = vmatprep.subr.mxu0 %v438_v60  ;;  %v521_v59 = vld [vmem:[%s4007_s30 + $0x728] sm:$0xff]  ;;  %v503_v60 = vld [vmem:[%s4007_s30 + $0x698] sm:$0xff] }
  0x77   : > { %3204 = vmatprep.subr.mxu1 %v471_v61  ;;  %3172 = vmatpush3.msra.mxu0 %v422_v62  ;;  %v536_v61 = vld [vmem:[%s4007_s30 + $0x7a0] sm:$0xff]  ;;  %v487_v62 = vld [vmem:[%s4007_s30 + $0x618] sm:$0xff] }
  0x78   : > { %3205 = vmatpush3.msra.mxu1 %v455_v63  ;;  %3173 = vmatprep.subr.mxu0 %v437_v0  ;;  %v520_v63 = vld [vmem:[%s4007_s30 + $0x720] sm:$0xff]  ;;  %v502_v0 = vld [vmem:[%s4007_s30 + $0x690] sm:$0xff] }
  0x79   : > { %3206 = vmatprep.subr.mxu1 %v470_v1  ;;  %3174 = vmatpush3.msra.mxu0 %v421_v2  ;;  %v535_v1 = vld [vmem:[%s4007_s30 + $0x798] sm:$0xff]  ;;  %v486_v2 = vld [vmem:[%s4007_s30 + $0x610] sm:$0xff] }
  0x7a   : > { %3207 = vmatpush3.msra.mxu1 %v454_v3  ;;  %3175 = vmatprep.subr.mxu0 %v436_v4  ;;  %v519_v3 = vld [vmem:[%s4007_s30 + $0x718] sm:$0xff]  ;;  %v501_v4 = vld [vmem:[%s4007_s30 + $0x688] sm:$0xff] }
  0x7b   : > { %3208 = vmatprep.subr.mxu1 %v469_v5  ;;  %3176 = vmatpush3.msra.mxu0 %v420_v6  ;;  %v534_v5 = vld [vmem:[%s4007_s30 + $0x790] sm:$0xff]  ;;  %v485_v6 = vld [vmem:[%s4007_s30 + $0x608] sm:$0xff] }
  0x7c   : > { %1436 = vmatprep.mubr.f32.mxu0 %v251_v7  ;;  %3209 = vmatpush3.msra.mxu1 %v453_v8  ;;  %v518_v7 = vld [vmem:[%s4007_s30 + $0x710] sm:$0xff]  ;;  %v500_v8 = vld [vmem:[%s4007_s30 + $0x680] sm:$0xff] }
  0x7d   : > { %1437 = vmatmul.mubr.f32.vlgmr.msra.gmra.mxu0 %v250_v9  ;;  %3210 = vmatprep.subr.mxu1 %v468_v10  ;;  %v533_v9 = vld [vmem:[%s4007_s30 + $0x788] sm:$0xff]  ;;  %v484_v10 = vld [vmem:[%s4007_s30 + $0x600] sm:$0xff] }
  0x7e   : > { %3215 = vmatprep.subr.mxu0 %v515_v11  ;;  %3211 = vmatpush3.msra.mxu1 %v452_v12  ;;  %v255_v11 = vld [vmem:[%s4002_s26 + $0x68] sm:$0xff] }
  0x7f   : > { %1506 = vmatprep.mubr.f32.mxu1 %v253_v13  ;;  %3216 = vmatpush3.msra.mxu0 %v499_v14  ;;  %v517_v12 = vld [vmem:[%s4007_s30 + $0x708] sm:$0xff]  ;;  %v254_v13 = vld [vmem:[%s4002_s26 + $0x60] sm:$0xff] }
  0x80   : > { %1507 = vmatmul.mubr.f32.vlgmr.msra.gmra.mxu1 %v252_v15  ;;  %3217 = vmatprep.subr.mxu0 %v514_v16  ;;  %v532_v14 = vld [vmem:[%s4007_s30 + $0x780] sm:$0xff]  ;;  %v579_v15 = vld [vmem:[%s4007_s30 + $0x8f8] sm:$0xff] }
  0x81   : > { %3250 = vmatprep.subr.mxu1 %v547_v17  ;;  %3218 = vmatpush3.msra.mxu0 %v498_v18  ;;  %v516_v16 = vld [vmem:[%s4007_s30 + $0x700] sm:$0xff]  ;;  %v257_v17 = vld [vmem:[%s4002_s26 + $0x78] sm:$0xff] }
  0x82   : > { %3251 = vmatpush3.msra.mxu1 %v531_v19  ;;  %3219 = vmatprep.subr.mxu0 %v513_v20  ;;  %v563_v18 = vld [vmem:[%s4007_s30 + $0x878] sm:$0xff]  ;;  %v256_v19 = vld [vmem:[%s4002_s26 + $0x70] sm:$0xff] }
  0x83   : > { %3252 = vmatprep.subr.mxu1 %v546_v21  ;;  %3220 = vmatpush3.msra.mxu0 %v497_v22  ;;  %v578_v20 = vld [vmem:[%s4007_s30 + $0x8f0] sm:$0xff]  ;;  %v611_v21 = vld [vmem:[%s4007_s30 + $0x9f8] sm:$0xff] }
  0x84   : > { %3253 = vmatpush3.msra.mxu1 %v530_v23  ;;  %3221 = vmatprep.subr.mxu0 %v512_v24  ;;  %v562_v22 = vld [vmem:[%s4007_s30 + $0x870] sm:$0xff]  ;;  %v595_v23 = vld [vmem:[%s4007_s30 + $0x978] sm:$0xff]  ;;  %v577_v24 = vld [vmem:[%s4007_s30 + $0x8e8] sm:$0xff] }
  0x85   : > { %3254 = vmatprep.subr.mxu1 %v545_v25  ;;  %3222 = vmatpush3.msra.mxu0 %v496_v26  ;;  %v610_v25 = vld [vmem:[%s4007_s30 + $0x9f0] sm:$0xff]  ;;  %v561_v26 = vld [vmem:[%s4007_s30 + $0x868] sm:$0xff] }
  0x86   : > { %3255 = vmatpush3.msra.mxu1 %v529_v27  ;;  %3223 = vmatprep.subr.mxu0 %v511_v28  ;;  %v594_v27 = vld [vmem:[%s4007_s30 + $0x970] sm:$0xff]  ;;  %v576_v28 = vld [vmem:[%s4007_s30 + $0x8e0] sm:$0xff] }
  0x87   : > { %3256 = vmatprep.subr.mxu1 %v544_v29  ;;  %3224 = vmatpush3.msra.mxu0 %v495_v30  ;;  %v609_v29 = vld [vmem:[%s4007_s30 + $0x9e8] sm:$0xff]  ;;  %v560_v30 = vld [vmem:[%s4007_s30 + $0x860] sm:$0xff] }
  0x88   : > { %3257 = vmatpush3.msra.mxu1 %v528_v31  ;;  %3225 = vmatprep.subr.mxu0 %v510_v32  ;;  %v593_v31 = vld [vmem:[%s4007_s30 + $0x968] sm:$0xff]  ;;  %v575_v32 = vld [vmem:[%s4007_s30 + $0x8d8] sm:$0xff] }
  0x89   : > { %3258 = vmatprep.subr.mxu1 %v543_v33  ;;  %3226 = vmatpush3.msra.mxu0 %v494_v34  ;;  %v608_v33 = vld [vmem:[%s4007_s30 + $0x9e0] sm:$0xff]  ;;  %v559_v34 = vld [vmem:[%s4007_s30 + $0x858] sm:$0xff] }
  0x8a   : > { %3259 = vmatpush3.msra.mxu1 %v527_v35  ;;  %3227 = vmatprep.subr.mxu0 %v509_v36  ;;  %v592_v35 = vld [vmem:[%s4007_s30 + $0x960] sm:$0xff]  ;;  %v574_v36 = vld [vmem:[%s4007_s30 + $0x8d0] sm:$0xff] }
  0x8b   : > { %3260 = vmatprep.subr.mxu1 %v542_v37  ;;  %3228 = vmatpush3.msra.mxu0 %v493_v38  ;;  %v607_v37 = vld [vmem:[%s4007_s30 + $0x9d8] sm:$0xff]  ;;  %v558_v38 = vld [vmem:[%s4007_s30 + $0x850] sm:$0xff] }
  0x8c   : > { %3261 = vmatpush3.msra.mxu1 %v526_v39  ;;  %3229 = vmatprep.subr.mxu0 %v508_v40  ;;  %v591_v39 = vld [vmem:[%s4007_s30 + $0x958] sm:$0xff]  ;;  %v573_v40 = vld [vmem:[%s4007_s30 + $0x8c8] sm:$0xff] }
  0x8d   : > { %3262 = vmatprep.subr.mxu1 %v541_v41  ;;  %3230 = vmatpush3.msra.mxu0 %v492_v42  ;;  %v606_v41 = vld [vmem:[%s4007_s30 + $0x9d0] sm:$0xff]  ;;  %v557_v42 = vld [vmem:[%s4007_s30 + $0x848] sm:$0xff] }
  0x8e   : > { %3263 = vmatpush3.msra.mxu1 %v525_v43  ;;  %3231 = vmatprep.subr.mxu0 %v507_v44  ;;  %v590_v43 = vld [vmem:[%s4007_s30 + $0x950] sm:$0xff]  ;;  %v572_v44 = vld [vmem:[%s4007_s30 + $0x8c0] sm:$0xff] }
  0x8f   : > { %3264 = vmatprep.subr.mxu1 %v540_v45  ;;  %3232 = vmatpush3.msra.mxu0 %v491_v46  ;;  %v605_v45 = vld [vmem:[%s4007_s30 + $0x9c8] sm:$0xff]  ;;  %v556_v46 = vld [vmem:[%s4007_s30 + $0x840] sm:$0xff] }
  0x90   : > { %3265 = vmatpush3.msra.mxu1 %v524_v47  ;;  %3233 = vmatprep.subr.mxu0 %v506_v48  ;;  %v589_v47 = vld [vmem:[%s4007_s30 + $0x948] sm:$0xff]  ;;  %v571_v48 = vld [vmem:[%s4007_s30 + $0x8b8] sm:$0xff] }
  0x91   : > { %3266 = vmatprep.subr.mxu1 %v539_v49  ;;  %3234 = vmatpush3.msra.mxu0 %v490_v50  ;;  %v604_v49 = vld [vmem:[%s4007_s30 + $0x9c0] sm:$0xff]  ;;  %v555_v50 = vld [vmem:[%s4007_s30 + $0x838] sm:$0xff] }
  0x92   : > { %3267 = vmatpush3.msra.mxu1 %v523_v51  ;;  %3235 = vmatprep.subr.mxu0 %v505_v52  ;;  %v588_v51 = vld [vmem:[%s4007_s30 + $0x940] sm:$0xff]  ;;  %v570_v52 = vld [vmem:[%s4007_s30 + $0x8b0] sm:$0xff] }
  0x93   : > { %3268 = vmatprep.subr.mxu1 %v538_v53  ;;  %3236 = vmatpush3.msra.mxu0 %v489_v54  ;;  %v603_v53 = vld [vmem:[%s4007_s30 + $0x9b8] sm:$0xff]  ;;  %v554_v54 = vld [vmem:[%s4007_s30 + $0x830] sm:$0xff] }
  0x94   : > { %3269 = vmatpush3.msra.mxu1 %v522_v55  ;;  %3237 = vmatprep.subr.mxu0 %v504_v56  ;;  %v587_v55 = vld [vmem:[%s4007_s30 + $0x938] sm:$0xff]  ;;  %v569_v56 = vld [vmem:[%s4007_s30 + $0x8a8] sm:$0xff] }
  0x95   : > { %3270 = vmatprep.subr.mxu1 %v537_v57  ;;  %3238 = vmatpush3.msra.mxu0 %v488_v58  ;;  %v602_v57 = vld [vmem:[%s4007_s30 + $0x9b0] sm:$0xff]  ;;  %v553_v58 = vld [vmem:[%s4007_s30 + $0x828] sm:$0xff] }
  0x96   : > { %3271 = vmatpush3.msra.mxu1 %v521_v59  ;;  %3239 = vmatprep.subr.mxu0 %v503_v60  ;;  %v586_v59 = vld [vmem:[%s4007_s30 + $0x930] sm:$0xff]  ;;  %v568_v60 = vld [vmem:[%s4007_s30 + $0x8a0] sm:$0xff] }
  0x97   : > { %3272 = vmatprep.subr.mxu1 %v536_v61  ;;  %3240 = vmatpush3.msra.mxu0 %v487_v62  ;;  %v601_v61 = vld [vmem:[%s4007_s30 + $0x9a8] sm:$0xff]  ;;  %v552_v62 = vld [vmem:[%s4007_s30 + $0x820] sm:$0xff] }
  0x98   : > { %3273 = vmatpush3.msra.mxu1 %v520_v63  ;;  %3241 = vmatprep.subr.mxu0 %v502_v0  ;;  %v585_v63 = vld [vmem:[%s4007_s30 + $0x928] sm:$0xff]  ;;  %v567_v0 = vld [vmem:[%s4007_s30 + $0x898] sm:$0xff] }
  0x99   : > { %3274 = vmatprep.subr.mxu1 %v535_v1  ;;  %3242 = vmatpush3.msra.mxu0 %v486_v2  ;;  %v600_v1 = vld [vmem:[%s4007_s30 + $0x9a0] sm:$0xff]  ;;  %v551_v2 = vld [vmem:[%s4007_s30 + $0x818] sm:$0xff] }
  0x9a   : > { %3275 = vmatpush3.msra.mxu1 %v519_v3  ;;  %3243 = vmatprep.subr.mxu0 %v501_v4  ;;  %v584_v3 = vld [vmem:[%s4007_s30 + $0x920] sm:$0xff]  ;;  %v566_v4 = vld [vmem:[%s4007_s30 + $0x890] sm:$0xff] }
  0x9b   : > { %3276 = vmatprep.subr.mxu1 %v534_v5  ;;  %3244 = vmatpush3.msra.mxu0 %v485_v6  ;;  %v599_v5 = vld [vmem:[%s4007_s30 + $0x998] sm:$0xff]  ;;  %v550_v6 = vld [vmem:[%s4007_s30 + $0x810] sm:$0xff] }
  0x9c   : > { %3277 = vmatpush3.msra.mxu1 %v518_v7  ;;  %3245 = vmatprep.subr.mxu0 %v500_v8  ;;  %v583_v7 = vld [vmem:[%s4007_s30 + $0x918] sm:$0xff]  ;;  %v565_v8 = vld [vmem:[%s4007_s30 + $0x888] sm:$0xff] }
  0x9d   : > { %3278 = vmatprep.subr.mxu1 %v533_v9  ;;  %3246 = vmatpush3.msra.mxu0 %v484_v10  ;;  %v598_v9 = vld [vmem:[%s4007_s30 + $0x990] sm:$0xff]  ;;  %v549_v10 = vld [vmem:[%s4007_s30 + $0x808] sm:$0xff] }
  0x9e   : > { %1576 = vmatprep.mubr.f32.mxu0 %v255_v11  ;;  %3279 = vmatpush3.msra.mxu1 %v517_v12  ;;  %v582_v11 = vld [vmem:[%s4007_s30 + $0x910] sm:$0xff]  ;;  %v564_v12 = vld [vmem:[%s4007_s30 + $0x880] sm:$0xff] }
  0x9f   : > { %1577 = vmatmul.mubr.f32.vlgmr.msra.gmra.mxu0 %v254_v13  ;;  %3280 = vmatprep.subr.mxu1 %v532_v14  ;;  %v597_v13 = vld [vmem:[%s4007_s30 + $0x988] sm:$0xff]  ;;  %v548_v14 = vld [vmem:[%s4007_s30 + $0x800] sm:$0xff] }
  0xa0   : > { %3285 = vmatprep.subr.mxu0 %v579_v15  ;;  %3281 = vmatpush3.msra.mxu1 %v516_v16  ;;  %v259_v15 = vld [vmem:[%s4002_s26 + $0x88] sm:$0xff] }
  0xa1   : > { %1646 = vmatprep.mubr.f32.mxu1 %v257_v17  ;;  %3286 = vmatpush3.msra.mxu0 %v563_v18  ;;  %v581_v16 = vld [vmem:[%s4007_s30 + $0x908] sm:$0xff]  ;;  %v258_v17 = vld [vmem:[%s4002_s26 + $0x80] sm:$0xff] }
  0xa2   : > { %1647 = vmatmul.mubr.f32.vlgmr.msra.gmra.mxu1 %v256_v19  ;;  %3287 = vmatprep.subr.mxu0 %v578_v20  ;;  %v596_v18 = vld [vmem:[%s4007_s30 + $0x980] sm:$0xff]  ;;  %v643_v19 = vld [vmem:[%s4007_s30 + $0xaf8] sm:$0xff] }
  0xa3   : > { %3320 = vmatprep.subr.mxu1 %v611_v21  ;;  %3288 = vmatpush3.msra.mxu0 %v562_v22  ;;  %v580_v20 = vld [vmem:[%s4007_s30 + $0x900] sm:$0xff]  ;;  %v261_v21 = vld [vmem:[%s4002_s26 + $0x98] sm:$0xff] }
  0xa4   : > { %3321 = vmatpush3.msra.mxu1 %v595_v23  ;;  %3289 = vmatprep.subr.mxu0 %v577_v24  ;;  %v627_v22 = vld [vmem:[%s4007_s30 + $0xa78] sm:$0xff]  ;;  %v260_v23 = vld [vmem:[%s4002_s26 + $0x90] sm:$0xff] }
  0xa5   : > { %3322 = vmatprep.subr.mxu1 %v610_v25  ;;  %3290 = vmatpush3.msra.mxu0 %v561_v26  ;;  %v642_v24 = vld [vmem:[%s4007_s30 + $0xaf0] sm:$0xff]  ;;  %v675_v25 = vld [vmem:[%s4007_s30 + $0xbf8] sm:$0xff] }
  0xa6   : > { %3323 = vmatpush3.msra.mxu1 %v594_v27  ;;  %3291 = vmatprep.subr.mxu0 %v576_v28  ;;  %v626_v26 = vld [vmem:[%s4007_s30 + $0xa70] sm:$0xff]  ;;  %v659_v27 = vld [vmem:[%s4007_s30 + $0xb78] sm:$0xff]  ;;  %v641_v28 = vld [vmem:[%s4007_s30 + $0xae8] sm:$0xff] }
  0xa7   : > { %3324 = vmatprep.subr.mxu1 %v609_v29  ;;  %3292 = vmatpush3.msra.mxu0 %v560_v30  ;;  %v674_v29 = vld [vmem:[%s4007_s30 + $0xbf0] sm:$0xff]  ;;  %v625_v30 = vld [vmem:[%s4007_s30 + $0xa68] sm:$0xff] }
  0xa8   : > { %3325 = vmatpush3.msra.mxu1 %v593_v31  ;;  %3293 = vmatprep.subr.mxu0 %v575_v32  ;;  %v658_v31 = vld [vmem:[%s4007_s30 + $0xb70] sm:$0xff]  ;;  %v640_v32 = vld [vmem:[%s4007_s30 + $0xae0] sm:$0xff] }
  0xa9   : > { %3326 = vmatprep.subr.mxu1 %v608_v33  ;;  %3294 = vmatpush3.msra.mxu0 %v559_v34  ;;  %v673_v33 = vld [vmem:[%s4007_s30 + $0xbe8] sm:$0xff]  ;;  %v624_v34 = vld [vmem:[%s4007_s30 + $0xa60] sm:$0xff] }
  0xaa   : > { %3327 = vmatpush3.msra.mxu1 %v592_v35  ;;  %3295 = vmatprep.subr.mxu0 %v574_v36  ;;  %v657_v35 = vld [vmem:[%s4007_s30 + $0xb68] sm:$0xff]  ;;  %v639_v36 = vld [vmem:[%s4007_s30 + $0xad8] sm:$0xff] }
  0xab   : > { %3328 = vmatprep.subr.mxu1 %v607_v37  ;;  %3296 = vmatpush3.msra.mxu0 %v558_v38  ;;  %v672_v37 = vld [vmem:[%s4007_s30 + $0xbe0] sm:$0xff]  ;;  %v623_v38 = vld [vmem:[%s4007_s30 + $0xa58] sm:$0xff] }
  0xac   : > { %3329 = vmatpush3.msra.mxu1 %v591_v39  ;;  %3297 = vmatprep.subr.mxu0 %v573_v40  ;;  %v656_v39 = vld [vmem:[%s4007_s30 + $0xb60] sm:$0xff]  ;;  %v638_v40 = vld [vmem:[%s4007_s30 + $0xad0] sm:$0xff] }
  0xad   : > { %3330 = vmatprep.subr.mxu1 %v606_v41  ;;  %3298 = vmatpush3.msra.mxu0 %v557_v42  ;;  %v671_v41 = vld [vmem:[%s4007_s30 + $0xbd8] sm:$0xff]  ;;  %v622_v42 = vld [vmem:[%s4007_s30 + $0xa50] sm:$0xff] }
  0xae   : > { %3331 = vmatpush3.msra.mxu1 %v590_v43  ;;  %3299 = vmatprep.subr.mxu0 %v572_v44  ;;  %v655_v43 = vld [vmem:[%s4007_s30 + $0xb58] sm:$0xff]  ;;  %v637_v44 = vld [vmem:[%s4007_s30 + $0xac8] sm:$0xff] }
  0xaf   : > { %3332 = vmatprep.subr.mxu1 %v605_v45  ;;  %3300 = vmatpush3.msra.mxu0 %v556_v46  ;;  %v670_v45 = vld [vmem:[%s4007_s30 + $0xbd0] sm:$0xff]  ;;  %v621_v46 = vld [vmem:[%s4007_s30 + $0xa48] sm:$0xff] }
  0xb0   : > { %3333 = vmatpush3.msra.mxu1 %v589_v47  ;;  %3301 = vmatprep.subr.mxu0 %v571_v48  ;;  %v654_v47 = vld [vmem:[%s4007_s30 + $0xb50] sm:$0xff]  ;;  %v636_v48 = vld [vmem:[%s4007_s30 + $0xac0] sm:$0xff] }
  0xb1   : > { %3334 = vmatprep.subr.mxu1 %v604_v49  ;;  %3302 = vmatpush3.msra.mxu0 %v555_v50  ;;  %v669_v49 = vld [vmem:[%s4007_s30 + $0xbc8] sm:$0xff]  ;;  %v620_v50 = vld [vmem:[%s4007_s30 + $0xa40] sm:$0xff] }
  0xb2   : > { %3335 = vmatpush3.msra.mxu1 %v588_v51  ;;  %3303 = vmatprep.subr.mxu0 %v570_v52  ;;  %v653_v51 = vld [vmem:[%s4007_s30 + $0xb48] sm:$0xff]  ;;  %v635_v52 = vld [vmem:[%s4007_s30 + $0xab8] sm:$0xff] }
  0xb3   : > { %3336 = vmatprep.subr.mxu1 %v603_v53  ;;  %3304 = vmatpush3.msra.mxu0 %v554_v54  ;;  %v668_v53 = vld [vmem:[%s4007_s30 + $0xbc0] sm:$0xff]  ;;  %v619_v54 = vld [vmem:[%s4007_s30 + $0xa38] sm:$0xff] }
  0xb4   : > { %3337 = vmatpush3.msra.mxu1 %v587_v55  ;;  %3305 = vmatprep.subr.mxu0 %v569_v56  ;;  %v652_v55 = vld [vmem:[%s4007_s30 + $0xb40] sm:$0xff]  ;;  %v634_v56 = vld [vmem:[%s4007_s30 + $0xab0] sm:$0xff] }
  0xb5   : > { %3338 = vmatprep.subr.mxu1 %v602_v57  ;;  %3306 = vmatpush3.msra.mxu0 %v553_v58  ;;  %v667_v57 = vld [vmem:[%s4007_s30 + $0xbb8] sm:$0xff]  ;;  %v618_v58 = vld [vmem:[%s4007_s30 + $0xa30] sm:$0xff] }
  0xb6   : > { %3339 = vmatpush3.msra.mxu1 %v586_v59  ;;  %3307 = vmatprep.subr.mxu0 %v568_v60  ;;  %v651_v59 = vld [vmem:[%s4007_s30 + $0xb38] sm:$0xff]  ;;  %v633_v60 = vld [vmem:[%s4007_s30 + $0xaa8] sm:$0xff] }
  0xb7   : > { %3340 = vmatprep.subr.mxu1 %v601_v61  ;;  %3308 = vmatpush3.msra.mxu0 %v552_v62  ;;  %v666_v61 = vld [vmem:[%s4007_s30 + $0xbb0] sm:$0xff]  ;;  %v617_v62 = vld [vmem:[%s4007_s30 + $0xa28] sm:$0xff] }
  0xb8   : > { %3341 = vmatpush3.msra.mxu1 %v585_v63  ;;  %3309 = vmatprep.subr.mxu0 %v567_v0  ;;  %v650_v63 = vld [vmem:[%s4007_s30 + $0xb30] sm:$0xff]  ;;  %v632_v0 = vld [vmem:[%s4007_s30 + $0xaa0] sm:$0xff] }
  0xb9   : > { %3342 = vmatprep.subr.mxu1 %v600_v1  ;;  %3310 = vmatpush3.msra.mxu0 %v551_v2  ;;  %v665_v1 = vld [vmem:[%s4007_s30 + $0xba8] sm:$0xff]  ;;  %v616_v2 = vld [vmem:[%s4007_s30 + $0xa20] sm:$0xff] }
  0xba   : > { %3343 = vmatpush3.msra.mxu1 %v584_v3  ;;  %3311 = vmatprep.subr.mxu0 %v566_v4  ;;  %v649_v3 = vld [vmem:[%s4007_s30 + $0xb28] sm:$0xff]  ;;  %v631_v4 = vld [vmem:[%s4007_s30 + $0xa98] sm:$0xff] }
  0xbb   : > { %3344 = vmatprep.subr.mxu1 %v599_v5  ;;  %3312 = vmatpush3.msra.mxu0 %v550_v6  ;;  %v664_v5 = vld [vmem:[%s4007_s30 + $0xba0] sm:$0xff]  ;;  %v615_v6 = vld [vmem:[%s4007_s30 + $0xa18] sm:$0xff] }
  0xbc   : > { %3345 = vmatpush3.msra.mxu1 %v583_v7  ;;  %3313 = vmatprep.subr.mxu0 %v565_v8  ;;  %v648_v7 = vld [vmem:[%s4007_s30 + $0xb20] sm:$0xff]  ;;  %v630_v8 = vld [vmem:[%s4007_s30 + $0xa90] sm:$0xff] }
  0xbd   : > { %3346 = vmatprep.subr.mxu1 %v598_v9  ;;  %3314 = vmatpush3.msra.mxu0 %v549_v10  ;;  %v663_v9 = vld [vmem:[%s4007_s30 + $0xb98] sm:$0xff]  ;;  %v614_v10 = vld [vmem:[%s4007_s30 + $0xa10] sm:$0xff] }
  0xbe   : > { %3347 = vmatpush3.msra.mxu1 %v582_v11  ;;  %3315 = vmatprep.subr.mxu0 %v564_v12  ;;  %v647_v11 = vld [vmem:[%s4007_s30 + $0xb18] sm:$0xff]  ;;  %v629_v12 = vld [vmem:[%s4007_s30 + $0xa88] sm:$0xff] }
  0xbf   : > { %3348 = vmatprep.subr.mxu1 %v597_v13  ;;  %3316 = vmatpush3.msra.mxu0 %v548_v14  ;;  %v662_v13 = vld [vmem:[%s4007_s30 + $0xb90] sm:$0xff]  ;;  %v613_v14 = vld [vmem:[%s4007_s30 + $0xa08] sm:$0xff] }
  0xc0   : > { %1716 = vmatprep.mubr.f32.mxu0 %v259_v15  ;;  %3349 = vmatpush3.msra.mxu1 %v581_v16  ;;  %v646_v15 = vld [vmem:[%s4007_s30 + $0xb10] sm:$0xff]  ;;  %v628_v16 = vld [vmem:[%s4007_s30 + $0xa80] sm:$0xff] }
  0xc1   : > { %1717 = vmatmul.mubr.f32.vlgmr.msra.gmra.mxu0 %v258_v17  ;;  %3350 = vmatprep.subr.mxu1 %v596_v18  ;;  %v661_v17 = vld [vmem:[%s4007_s30 + $0xb88] sm:$0xff]  ;;  %v612_v18 = vld [vmem:[%s4007_s30 + $0xa00] sm:$0xff] }
  0xc2   : > { %3355 = vmatprep.subr.mxu0 %v643_v19  ;;  %3351 = vmatpush3.msra.mxu1 %v580_v20  ;;  %v263_v19 = vld [vmem:[%s4002_s26 + $0xa8] sm:$0xff] }
  0xc3   : > { %1786 = vmatprep.mubr.f32.mxu1 %v261_v21  ;;  %3356 = vmatpush3.msra.mxu0 %v627_v22  ;;  %v645_v20 = vld [vmem:[%s4007_s30 + $0xb08] sm:$0xff]  ;;  %v262_v21 = vld [vmem:[%s4002_s26 + $0xa0] sm:$0xff] }
  0xc4   : > { %1787 = vmatmul.mubr.f32.vlgmr.msra.gmra.mxu1 %v260_v23  ;;  %3357 = vmatprep.subr.mxu0 %v642_v24  ;;  %v660_v22 = vld [vmem:[%s4007_s30 + $0xb80] sm:$0xff]  ;;  %v707_v23 = vld [vmem:[%s4007_s30 + $0xcf8] sm:$0xff] }
  0xc5   : > { %3390 = vmatprep.subr.mxu1 %v675_v25  ;;  %3358 = vmatpush3.msra.mxu0 %v626_v26  ;;  %v644_v24 = vld [vmem:[%s4007_s30 + $0xb00] sm:$0xff]  ;;  %v265_v25 = vld [vmem:[%s4002_s26 + $0xb8] sm:$0xff] }
  0xc6   : > { %3391 = vmatpush3.msra.mxu1 %v659_v27  ;;  %3359 = vmatprep.subr.mxu0 %v641_v28  ;;  %v691_v26 = vld [vmem:[%s4007_s30 + $0xc78] sm:$0xff]  ;;  %v264_v27 = vld [vmem:[%s4002_s26 + $0xb0] sm:$0xff] }
  0xc7   : > { %3392 = vmatprep.subr.mxu1 %v674_v29  ;;  %3360 = vmatpush3.msra.mxu0 %v625_v30  ;;  %v706_v28 = vld [vmem:[%s4007_s30 + $0xcf0] sm:$0xff]  ;;  %v739_v29 = vld [vmem:[%s4007_s30 + $0xdf8] sm:$0xff] }
  0xc8   : > { %3393 = vmatpush3.msra.mxu1 %v658_v31  ;;  %3361 = vmatprep.subr.mxu0 %v640_v32  ;;  %v690_v30 = vld [vmem:[%s4007_s30 + $0xc70] sm:$0xff]  ;;  %v723_v31 = vld [vmem:[%s4007_s30 + $0xd78] sm:$0xff]  ;;  %v705_v32 = vld [vmem:[%s4007_s30 + $0xce8] sm:$0xff] }
  0xc9   : > { %3394 = vmatprep.subr.mxu1 %v673_v33  ;;  %3362 = vmatpush3.msra.mxu0 %v624_v34  ;;  %v738_v33 = vld [vmem:[%s4007_s30 + $0xdf0] sm:$0xff]  ;;  %v689_v34 = vld [vmem:[%s4007_s30 + $0xc68] sm:$0xff] }
  0xca   : > { %3395 = vmatpush3.msra.mxu1 %v657_v35  ;;  %3363 = vmatprep.subr.mxu0 %v639_v36  ;;  %v722_v35 = vld [vmem:[%s4007_s30 + $0xd70] sm:$0xff]  ;;  %v704_v36 = vld [vmem:[%s4007_s30 + $0xce0] sm:$0xff] }
  0xcb   : > { %3396 = vmatprep.subr.mxu1 %v672_v37  ;;  %3364 = vmatpush3.msra.mxu0 %v623_v38  ;;  %v737_v37 = vld [vmem:[%s4007_s30 + $0xde8] sm:$0xff]  ;;  %v688_v38 = vld [vmem:[%s4007_s30 + $0xc60] sm:$0xff] }
  0xcc   : > { %3397 = vmatpush3.msra.mxu1 %v656_v39  ;;  %3365 = vmatprep.subr.mxu0 %v638_v40  ;;  %v721_v39 = vld [vmem:[%s4007_s30 + $0xd68] sm:$0xff]  ;;  %v703_v40 = vld [vmem:[%s4007_s30 + $0xcd8] sm:$0xff] }
  0xcd   : > { %3398 = vmatprep.subr.mxu1 %v671_v41  ;;  %3366 = vmatpush3.msra.mxu0 %v622_v42  ;;  %v736_v41 = vld [vmem:[%s4007_s30 + $0xde0] sm:$0xff]  ;;  %v687_v42 = vld [vmem:[%s4007_s30 + $0xc58] sm:$0xff] }
  0xce   : > { %3399 = vmatpush3.msra.mxu1 %v655_v43  ;;  %3367 = vmatprep.subr.mxu0 %v637_v44  ;;  %v720_v43 = vld [vmem:[%s4007_s30 + $0xd60] sm:$0xff]  ;;  %v702_v44 = vld [vmem:[%s4007_s30 + $0xcd0] sm:$0xff] }
  0xcf   : > { %3400 = vmatprep.subr.mxu1 %v670_v45  ;;  %3368 = vmatpush3.msra.mxu0 %v621_v46  ;;  %v735_v45 = vld [vmem:[%s4007_s30 + $0xdd8] sm:$0xff]  ;;  %v686_v46 = vld [vmem:[%s4007_s30 + $0xc50] sm:$0xff] }
  0xd0   : > { %3401 = vmatpush3.msra.mxu1 %v654_v47  ;;  %3369 = vmatprep.subr.mxu0 %v636_v48  ;;  %v719_v47 = vld [vmem:[%s4007_s30 + $0xd58] sm:$0xff]  ;;  %v701_v48 = vld [vmem:[%s4007_s30 + $0xcc8] sm:$0xff] }
  0xd1   : > { %3402 = vmatprep.subr.mxu1 %v669_v49  ;;  %3370 = vmatpush3.msra.mxu0 %v620_v50  ;;  %v734_v49 = vld [vmem:[%s4007_s30 + $0xdd0] sm:$0xff]  ;;  %v685_v50 = vld [vmem:[%s4007_s30 + $0xc48] sm:$0xff] }
  0xd2   : > { %3403 = vmatpush3.msra.mxu1 %v653_v51  ;;  %3371 = vmatprep.subr.mxu0 %v635_v52  ;;  %v718_v51 = vld [vmem:[%s4007_s30 + $0xd50] sm:$0xff]  ;;  %v700_v52 = vld [vmem:[%s4007_s30 + $0xcc0] sm:$0xff] }
  0xd3   : > { %3404 = vmatprep.subr.mxu1 %v668_v53  ;;  %3372 = vmatpush3.msra.mxu0 %v619_v54  ;;  %v733_v53 = vld [vmem:[%s4007_s30 + $0xdc8] sm:$0xff]  ;;  %v684_v54 = vld [vmem:[%s4007_s30 + $0xc40] sm:$0xff] }
  0xd4   : > { %3405 = vmatpush3.msra.mxu1 %v652_v55  ;;  %3373 = vmatprep.subr.mxu0 %v634_v56  ;;  %v717_v55 = vld [vmem:[%s4007_s30 + $0xd48] sm:$0xff]  ;;  %v699_v56 = vld [vmem:[%s4007_s30 + $0xcb8] sm:$0xff] }
  0xd5   : > { %3406 = vmatprep.subr.mxu1 %v667_v57  ;;  %3374 = vmatpush3.msra.mxu0 %v618_v58  ;;  %v732_v57 = vld [vmem:[%s4007_s30 + $0xdc0] sm:$0xff]  ;;  %v683_v58 = vld [vmem:[%s4007_s30 + $0xc38] sm:$0xff] }
  0xd6   : > { %3407 = vmatpush3.msra.mxu1 %v651_v59  ;;  %3375 = vmatprep.subr.mxu0 %v633_v60  ;;  %v716_v59 = vld [vmem:[%s4007_s30 + $0xd40] sm:$0xff]  ;;  %v698_v60 = vld [vmem:[%s4007_s30 + $0xcb0] sm:$0xff] }
  0xd7   : > { %3408 = vmatprep.subr.mxu1 %v666_v61  ;;  %3376 = vmatpush3.msra.mxu0 %v617_v62  ;;  %v731_v61 = vld [vmem:[%s4007_s30 + $0xdb8] sm:$0xff]  ;;  %v682_v62 = vld [vmem:[%s4007_s30 + $0xc30] sm:$0xff] }
  0xd8   : > { %3409 = vmatpush3.msra.mxu1 %v650_v63  ;;  %3377 = vmatprep.subr.mxu0 %v632_v0  ;;  %v715_v63 = vld [vmem:[%s4007_s30 + $0xd38] sm:$0xff]  ;;  %v697_v0 = vld [vmem:[%s4007_s30 + $0xca8] sm:$0xff] }
  0xd9   : > { %3410 = vmatprep.subr.mxu1 %v665_v1  ;;  %3378 = vmatpush3.msra.mxu0 %v616_v2  ;;  %v730_v1 = vld [vmem:[%s4007_s30 + $0xdb0] sm:$0xff]  ;;  %v681_v2 = vld [vmem:[%s4007_s30 + $0xc28] sm:$0xff] }
  0xda   : > { %3411 = vmatpush3.msra.mxu1 %v649_v3  ;;  %3379 = vmatprep.subr.mxu0 %v631_v4  ;;  %v714_v3 = vld [vmem:[%s4007_s30 + $0xd30] sm:$0xff]  ;;  %v696_v4 = vld [vmem:[%s4007_s30 + $0xca0] sm:$0xff] }
  0xdb   : > { %3412 = vmatprep.subr.mxu1 %v664_v5  ;;  %3380 = vmatpush3.msra.mxu0 %v615_v6  ;;  %v729_v5 = vld [vmem:[%s4007_s30 + $0xda8] sm:$0xff]  ;;  %v680_v6 = vld [vmem:[%s4007_s30 + $0xc20] sm:$0xff] }
  0xdc   : > { %3413 = vmatpush3.msra.mxu1 %v648_v7  ;;  %3381 = vmatprep.subr.mxu0 %v630_v8  ;;  %v713_v7 = vld [vmem:[%s4007_s30 + $0xd28] sm:$0xff]  ;;  %v695_v8 = vld [vmem:[%s4007_s30 + $0xc98] sm:$0xff] }
  0xdd   : > { %3414 = vmatprep.subr.mxu1 %v663_v9  ;;  %3382 = vmatpush3.msra.mxu0 %v614_v10  ;;  %v728_v9 = vld [vmem:[%s4007_s30 + $0xda0] sm:$0xff]  ;;  %v679_v10 = vld [vmem:[%s4007_s30 + $0xc18] sm:$0xff] }
  0xde   : > { %3415 = vmatpush3.msra.mxu1 %v647_v11  ;;  %3383 = vmatprep.subr.mxu0 %v629_v12  ;;  %v712_v11 = vld [vmem:[%s4007_s30 + $0xd20] sm:$0xff]  ;;  %v694_v12 = vld [vmem:[%s4007_s30 + $0xc90] sm:$0xff] }
  0xdf   : > { %3416 = vmatprep.subr.mxu1 %v662_v13  ;;  %3384 = vmatpush3.msra.mxu0 %v613_v14  ;;  %v727_v13 = vld [vmem:[%s4007_s30 + $0xd98] sm:$0xff]  ;;  %v678_v14 = vld [vmem:[%s4007_s30 + $0xc10] sm:$0xff] }
  0xe0   : > { %3417 = vmatpush3.msra.mxu1 %v646_v15  ;;  %3385 = vmatprep.subr.mxu0 %v628_v16  ;;  %v711_v15 = vld [vmem:[%s4007_s30 + $0xd18] sm:$0xff]  ;;  %v693_v16 = vld [vmem:[%s4007_s30 + $0xc88] sm:$0xff] }
  0xe1   : > { %3418 = vmatprep.subr.mxu1 %v661_v17  ;;  %3386 = vmatpush3.msra.mxu0 %v612_v18  ;;  %v726_v17 = vld [vmem:[%s4007_s30 + $0xd90] sm:$0xff]  ;;  %v677_v18 = vld [vmem:[%s4007_s30 + $0xc08] sm:$0xff] }
  0xe2   : > { %1856 = vmatprep.mubr.f32.mxu0 %v263_v19  ;;  %3419 = vmatpush3.msra.mxu1 %v645_v20  ;;  %v710_v19 = vld [vmem:[%s4007_s30 + $0xd10] sm:$0xff]  ;;  %v692_v20 = vld [vmem:[%s4007_s30 + $0xc80] sm:$0xff] }
  0xe3   : > { %1857 = vmatmul.mubr.f32.vlgmr.msra.gmra.mxu0 %v262_v21  ;;  %3420 = vmatprep.subr.mxu1 %v660_v22  ;;  %v725_v21 = vld [vmem:[%s4007_s30 + $0xd88] sm:$0xff]  ;;  %v676_v22 = vld [vmem:[%s4007_s30 + $0xc00] sm:$0xff] }
  0xe4   : > { %3425 = vmatprep.subr.mxu0 %v707_v23  ;;  %3421 = vmatpush3.msra.mxu1 %v644_v24  ;;  %v267_v23 = vld [vmem:[%s4002_s26 + $0xc8] sm:$0xff] }
  0xe5   : > { %1926 = vmatprep.mubr.f32.mxu1 %v265_v25  ;;  %3426 = vmatpush3.msra.mxu0 %v691_v26  ;;  %v709_v24 = vld [vmem:[%s4007_s30 + $0xd08] sm:$0xff]  ;;  %v266_v25 = vld [vmem:[%s4002_s26 + $0xc0] sm:$0xff] }
  0xe6   : > { %1927 = vmatmul.mubr.f32.vlgmr.msra.gmra.mxu1 %v264_v27  ;;  %3427 = vmatprep.subr.mxu0 %v706_v28  ;;  %v724_v26 = vld [vmem:[%s4007_s30 + $0xd80] sm:$0xff]  ;;  %v771_v27 = vld [vmem:[%s4007_s30 + $0xef8] sm:$0xff] }
  0xe7   : > { %3460 = vmatprep.subr.mxu1 %v739_v29  ;;  %3428 = vmatpush3.msra.mxu0 %v690_v30  ;;  %v708_v28 = vld [vmem:[%s4007_s30 + $0xd00] sm:$0xff]  ;;  %v269_v29 = vld [vmem:[%s4002_s26 + $0xd8] sm:$0xff] }
  0xe8   : > { %3461 = vmatpush3.msra.mxu1 %v723_v31  ;;  %3429 = vmatprep.subr.mxu0 %v705_v32  ;;  %v755_v30 = vld [vmem:[%s4007_s30 + $0xe78] sm:$0xff]  ;;  %v268_v31 = vld [vmem:[%s4002_s26 + $0xd0] sm:$0xff] }
  0xe9   : > { %3462 = vmatprep.subr.mxu1 %v738_v33  ;;  %3430 = vmatpush3.msra.mxu0 %v689_v34  ;;  %v770_v32 = vld [vmem:[%s4007_s30 + $0xef0] sm:$0xff]  ;;  %v803_v33 = vld [vmem:[%s4007_s30 + $0xff8] sm:$0xff] }
  0xea   : > { %3463 = vmatpush3.msra.mxu1 %v722_v35  ;;  %3431 = vmatprep.subr.mxu0 %v704_v36  ;;  %v754_v34 = vld [vmem:[%s4007_s30 + $0xe70] sm:$0xff]  ;;  %v787_v35 = vld [vmem:[%s4007_s30 + $0xf78] sm:$0xff]  ;;  %v769_v36 = vld [vmem:[%s4007_s30 + $0xee8] sm:$0xff] }
  0xeb   : > { %3464 = vmatprep.subr.mxu1 %v737_v37  ;;  %3432 = vmatpush3.msra.mxu0 %v688_v38  ;;  %v802_v37 = vld [vmem:[%s4007_s30 + $0xff0] sm:$0xff]  ;;  %v753_v38 = vld [vmem:[%s4007_s30 + $0xe68] sm:$0xff] }
  0xec   : > { %3465 = vmatpush3.msra.mxu1 %v721_v39  ;;  %3433 = vmatprep.subr.mxu0 %v703_v40  ;;  %v786_v39 = vld [vmem:[%s4007_s30 + $0xf70] sm:$0xff]  ;;  %v768_v40 = vld [vmem:[%s4007_s30 + $0xee0] sm:$0xff] }
  0xed   : > { %3466 = vmatprep.subr.mxu1 %v736_v41  ;;  %3434 = vmatpush3.msra.mxu0 %v687_v42  ;;  %v801_v41 = vld [vmem:[%s4007_s30 + $0xfe8] sm:$0xff]  ;;  %v752_v42 = vld [vmem:[%s4007_s30 + $0xe60] sm:$0xff] }
  0xee   : > { %3467 = vmatpush3.msra.mxu1 %v720_v43  ;;  %3435 = vmatprep.subr.mxu0 %v702_v44  ;;  %v785_v43 = vld [vmem:[%s4007_s30 + $0xf68] sm:$0xff]  ;;  %v767_v44 = vld [vmem:[%s4007_s30 + $0xed8] sm:$0xff] }
  0xef   : > { %3468 = vmatprep.subr.mxu1 %v735_v45  ;;  %3436 = vmatpush3.msra.mxu0 %v686_v46  ;;  %v800_v45 = vld [vmem:[%s4007_s30 + $0xfe0] sm:$0xff]  ;;  %v751_v46 = vld [vmem:[%s4007_s30 + $0xe58] sm:$0xff] }
  0xf0   : > { %3469 = vmatpush3.msra.mxu1 %v719_v47  ;;  %3437 = vmatprep.subr.mxu0 %v701_v48  ;;  %v784_v47 = vld [vmem:[%s4007_s30 + $0xf60] sm:$0xff]  ;;  %v766_v48 = vld [vmem:[%s4007_s30 + $0xed0] sm:$0xff] }
  0xf1   : > { %3470 = vmatprep.subr.mxu1 %v734_v49  ;;  %3438 = vmatpush3.msra.mxu0 %v685_v50  ;;  %v799_v49 = vld [vmem:[%s4007_s30 + $0xfd8] sm:$0xff]  ;;  %v750_v50 = vld [vmem:[%s4007_s30 + $0xe50] sm:$0xff] }
  0xf2   : > { %3471 = vmatpush3.msra.mxu1 %v718_v51  ;;  %3439 = vmatprep.subr.mxu0 %v700_v52  ;;  %v783_v51 = vld [vmem:[%s4007_s30 + $0xf58] sm:$0xff]  ;;  %v765_v52 = vld [vmem:[%s4007_s30 + $0xec8] sm:$0xff] }
  0xf3   : > { %3472 = vmatprep.subr.mxu1 %v733_v53  ;;  %3440 = vmatpush3.msra.mxu0 %v684_v54  ;;  %v798_v53 = vld [vmem:[%s4007_s30 + $0xfd0] sm:$0xff]  ;;  %v749_v54 = vld [vmem:[%s4007_s30 + $0xe48] sm:$0xff] }
  0xf4   : > { %3473 = vmatpush3.msra.mxu1 %v717_v55  ;;  %3441 = vmatprep.subr.mxu0 %v699_v56  ;;  %v782_v55 = vld [vmem:[%s4007_s30 + $0xf50] sm:$0xff]  ;;  %v764_v56 = vld [vmem:[%s4007_s30 + $0xec0] sm:$0xff] }
  0xf5   : > { %3474 = vmatprep.subr.mxu1 %v732_v57  ;;  %3442 = vmatpush3.msra.mxu0 %v683_v58  ;;  %v797_v57 = vld [vmem:[%s4007_s30 + $0xfc8] sm:$0xff]  ;;  %v748_v58 = vld [vmem:[%s4007_s30 + $0xe40] sm:$0xff] }
  0xf6   : > { %3475 = vmatpush3.msra.mxu1 %v716_v59  ;;  %3443 = vmatprep.subr.mxu0 %v698_v60  ;;  %v781_v59 = vld [vmem:[%s4007_s30 + $0xf48] sm:$0xff]  ;;  %v763_v60 = vld [vmem:[%s4007_s30 + $0xeb8] sm:$0xff] }
  0xf7   : > { %3476 = vmatprep.subr.mxu1 %v731_v61  ;;  %3444 = vmatpush3.msra.mxu0 %v682_v62  ;;  %v796_v61 = vld [vmem:[%s4007_s30 + $0xfc0] sm:$0xff]  ;;  %v747_v62 = vld [vmem:[%s4007_s30 + $0xe38] sm:$0xff] }
  0xf8   : > { %3477 = vmatpush3.msra.mxu1 %v715_v63  ;;  %3445 = vmatprep.subr.mxu0 %v697_v0  ;;  %v780_v63 = vld [vmem:[%s4007_s30 + $0xf40] sm:$0xff]  ;;  %v762_v0 = vld [vmem:[%s4007_s30 + $0xeb0] sm:$0xff] }
  0xf9   : > { %3478 = vmatprep.subr.mxu1 %v730_v1  ;;  %3446 = vmatpush3.msra.mxu0 %v681_v2  ;;  %v795_v1 = vld [vmem:[%s4007_s30 + $0xfb8] sm:$0xff]  ;;  %v746_v2 = vld [vmem:[%s4007_s30 + $0xe30] sm:$0xff] }
  0xfa   : > { %3479 = vmatpush3.msra.mxu1 %v714_v3  ;;  %3447 = vmatprep.subr.mxu0 %v696_v4  ;;  %v779_v3 = vld [vmem:[%s4007_s30 + $0xf38] sm:$0xff]  ;;  %v761_v4 = vld [vmem:[%s4007_s30 + $0xea8] sm:$0xff] }
  0xfb   : > { %3480 = vmatprep.subr.mxu1 %v729_v5  ;;  %3448 = vmatpush3.msra.mxu0 %v680_v6  ;;  %v794_v5 = vld [vmem:[%s4007_s30 + $0xfb0] sm:$0xff]  ;;  %v745_v6 = vld [vmem:[%s4007_s30 + $0xe28] sm:$0xff] }
  0xfc   : > { %3481 = vmatpush3.msra.mxu1 %v713_v7  ;;  %3449 = vmatprep.subr.mxu0 %v695_v8  ;;  %v778_v7 = vld [vmem:[%s4007_s30 + $0xf30] sm:$0xff]  ;;  %v760_v8 = vld [vmem:[%s4007_s30 + $0xea0] sm:$0xff] }
  0xfd   : > { %3482 = vmatprep.subr.mxu1 %v728_v9  ;;  %3450 = vmatpush3.msra.mxu0 %v679_v10  ;;  %v793_v9 = vld [vmem:[%s4007_s30 + $0xfa8] sm:$0xff]  ;;  %v744_v10 = vld [vmem:[%s4007_s30 + $0xe20] sm:$0xff] }
  0xfe   : > { %3483 = vmatpush3.msra.mxu1 %v712_v11  ;;  %3451 = vmatprep.subr.mxu0 %v694_v12  ;;  %v777_v11 = vld [vmem:[%s4007_s30 + $0xf28] sm:$0xff]  ;;  %v759_v12 = vld [vmem:[%s4007_s30 + $0xe98] sm:$0xff] }
  0xff   : > { %3484 = vmatprep.subr.mxu1 %v727_v13  ;;  %3452 = vmatpush3.msra.mxu0 %v678_v14  ;;  %v792_v13 = vld [vmem:[%s4007_s30 + $0xfa0] sm:$0xff]  ;;  %v743_v14 = vld [vmem:[%s4007_s30 + $0xe18] sm:$0xff] }
 0x100   : > { %3485 = vmatpush3.msra.mxu1 %v711_v15  ;;  %3453 = vmatprep.subr.mxu0 %v693_v16  ;;  %v776_v15 = vld [vmem:[%s4007_s30 + $0xf20] sm:$0xff]  ;;  %v758_v16 = vld [vmem:[%s4007_s30 + $0xe90] sm:$0xff] }
 0x101   : > { %3486 = vmatprep.subr.mxu1 %v726_v17  ;;  %3454 = vmatpush3.msra.mxu0 %v677_v18  ;;  %v791_v17 = vld [vmem:[%s4007_s30 + $0xf98] sm:$0xff]  ;;  %v742_v18 = vld [vmem:[%s4007_s30 + $0xe10] sm:$0xff] }
 0x102   : > { %3487 = vmatpush3.msra.mxu1 %v710_v19  ;;  %3455 = vmatprep.subr.mxu0 %v692_v20  ;;  %v775_v19 = vld [vmem:[%s4007_s30 + $0xf18] sm:$0xff]  ;;  %v757_v20 = vld [vmem:[%s4007_s30 + $0xe88] sm:$0xff] }
 0x103   : > { %3488 = vmatprep.subr.mxu1 %v725_v21  ;;  %3456 = vmatpush3.msra.mxu0 %v676_v22  ;;  %v790_v21 = vld [vmem:[%s4007_s30 + $0xf90] sm:$0xff]  ;;  %v741_v22 = vld [vmem:[%s4007_s30 + $0xe08] sm:$0xff] }
 0x104   : > { %1996 = vmatprep.mubr.f32.mxu0 %v267_v23  ;;  %3489 = vmatpush3.msra.mxu1 %v709_v24  ;;  %v774_v23 = vld [vmem:[%s4007_s30 + $0xf10] sm:$0xff]  ;;  %v756_v24 = vld [vmem:[%s4007_s30 + $0xe80] sm:$0xff] }
 0x105   : > { %1997 = vmatmul.mubr.f32.vlgmr.msra.gmra.mxu0 %v266_v25  ;;  %3490 = vmatprep.subr.mxu1 %v724_v26  ;;  %v789_v25 = vld [vmem:[%s4007_s30 + $0xf88] sm:$0xff]  ;;  %v740_v26 = vld [vmem:[%s4007_s30 + $0xe00] sm:$0xff] }
 0x106   : > { %3495 = vmatprep.subr.mxu0 %v771_v27  ;;  %3491 = vmatpush3.msra.mxu1 %v708_v28  ;;  %v271_v27 = vld [vmem:[%s4002_s26 + $0xe8] sm:$0xff] }
 0x107   : > { %2066 = vmatprep.mubr.f32.mxu1 %v269_v29  ;;  %3496 = vmatpush3.msra.mxu0 %v755_v30  ;;  %v773_v28 = vld [vmem:[%s4007_s30 + $0xf08] sm:$0xff]  ;;  %v270_v29 = vld [vmem:[%s4002_s26 + $0xe0] sm:$0xff] }
 0x108   : > { %2067 = vmatmul.mubr.f32.vlgmr.msra.gmra.mxu1 %v268_v31  ;;  %3497 = vmatprep.subr.mxu0 %v770_v32  ;;  %v788_v30 = vld [vmem:[%s4007_s30 + $0xf80] sm:$0xff]  ;;  %v835_v31 = vld [vmem:[%s4007_s30 + $0x10f8] sm:$0xff] }
 0x109   : > { %3530 = vmatprep.subr.mxu1 %v803_v33  ;;  %3498 = vmatpush3.msra.mxu0 %v754_v34  ;;  %v772_v32 = vld [vmem:[%s4007_s30 + $0xf00] sm:$0xff]  ;;  %v273_v33 = vld [vmem:[%s4002_s26 + $0xf8] sm:$0xff] }
 0x10a   : > { %3531 = vmatpush3.msra.mxu1 %v787_v35  ;;  %3499 = vmatprep.subr.mxu0 %v769_v36  ;;  %v819_v34 = vld [vmem:[%s4007_s30 + $0x1078] sm:$0xff]  ;;  %v272_v35 = vld [vmem:[%s4002_s26 + $0xf0] sm:$0xff] }
 0x10b   : > { %3532 = vmatprep.subr.mxu1 %v802_v37  ;;  %3500 = vmatpush3.msra.mxu0 %v753_v38  ;;  %v834_v36 = vld [vmem:[%s4007_s30 + $0x10f0] sm:$0xff]  ;;  %v867_v37 = vld [vmem:[%s4007_s30 + $0x11f8] sm:$0xff] }
 0x10c   : > { %3533 = vmatpush3.msra.mxu1 %v786_v39  ;;  %3501 = vmatprep.subr.mxu0 %v768_v40  ;;  %v818_v38 = vld [vmem:[%s4007_s30 + $0x1070] sm:$0xff]  ;;  %v851_v39 = vld [vmem:[%s4007_s30 + $0x1178] sm:$0xff]  ;;  %v833_v40 = vld [vmem:[%s4007_s30 + $0x10e8] sm:$0xff] }
 0x10d   : > { %3534 = vmatprep.subr.mxu1 %v801_v41  ;;  %3502 = vmatpush3.msra.mxu0 %v752_v42  ;;  %v866_v41 = vld [vmem:[%s4007_s30 + $0x11f0] sm:$0xff]  ;;  %v817_v42 = vld [vmem:[%s4007_s30 + $0x1068] sm:$0xff] }
 0x10e   : > { %3535 = vmatpush3.msra.mxu1 %v785_v43  ;;  %3503 = vmatprep.subr.mxu0 %v767_v44  ;;  %v850_v43 = vld [vmem:[%s4007_s30 + $0x1170] sm:$0xff]  ;;  %v832_v44 = vld [vmem:[%s4007_s30 + $0x10e0] sm:$0xff] }
 0x10f   : > { %3536 = vmatprep.subr.mxu1 %v800_v45  ;;  %3504 = vmatpush3.msra.mxu0 %v751_v46  ;;  %v865_v45 = vld [vmem:[%s4007_s30 + $0x11e8] sm:$0xff]  ;;  %v816_v46 = vld [vmem:[%s4007_s30 + $0x1060] sm:$0xff] }
 0x110   : > { %3537 = vmatpush3.msra.mxu1 %v784_v47  ;;  %3505 = vmatprep.subr.mxu0 %v766_v48  ;;  %v849_v47 = vld [vmem:[%s4007_s30 + $0x1168] sm:$0xff]  ;;  %v831_v48 = vld [vmem:[%s4007_s30 + $0x10d8] sm:$0xff] }
 0x111   : > { %3538 = vmatprep.subr.mxu1 %v799_v49  ;;  %3506 = vmatpush3.msra.mxu0 %v750_v50  ;;  %v864_v49 = vld [vmem:[%s4007_s30 + $0x11e0] sm:$0xff]  ;;  %v815_v50 = vld [vmem:[%s4007_s30 + $0x1058] sm:$0xff] }
 0x112   : > { %3539 = vmatpush3.msra.mxu1 %v783_v51  ;;  %3507 = vmatprep.subr.mxu0 %v765_v52  ;;  %v848_v51 = vld [vmem:[%s4007_s30 + $0x1160] sm:$0xff]  ;;  %v830_v52 = vld [vmem:[%s4007_s30 + $0x10d0] sm:$0xff] }
 0x113   : > { %3540 = vmatprep.subr.mxu1 %v798_v53  ;;  %3508 = vmatpush3.msra.mxu0 %v749_v54  ;;  %v863_v53 = vld [vmem:[%s4007_s30 + $0x11d8] sm:$0xff]  ;;  %v814_v54 = vld [vmem:[%s4007_s30 + $0x1050] sm:$0xff] }
 0x114   : > { %3541 = vmatpush3.msra.mxu1 %v782_v55  ;;  %3509 = vmatprep.subr.mxu0 %v764_v56  ;;  %v847_v55 = vld [vmem:[%s4007_s30 + $0x1158] sm:$0xff]  ;;  %v829_v56 = vld [vmem:[%s4007_s30 + $0x10c8] sm:$0xff] }
 0x115   : > { %3542 = vmatprep.subr.mxu1 %v797_v57  ;;  %3510 = vmatpush3.msra.mxu0 %v748_v58  ;;  %v862_v57 = vld [vmem:[%s4007_s30 + $0x11d0] sm:$0xff]  ;;  %v813_v58 = vld [vmem:[%s4007_s30 + $0x1048] sm:$0xff] }
 0x116   : > { %3543 = vmatpush3.msra.mxu1 %v781_v59  ;;  %3511 = vmatprep.subr.mxu0 %v763_v60  ;;  %v846_v59 = vld [vmem:[%s4007_s30 + $0x1150] sm:$0xff]  ;;  %v828_v60 = vld [vmem:[%s4007_s30 + $0x10c0] sm:$0xff] }
 0x117   : > { %3544 = vmatprep.subr.mxu1 %v796_v61  ;;  %3512 = vmatpush3.msra.mxu0 %v747_v62  ;;  %v861_v61 = vld [vmem:[%s4007_s30 + $0x11c8] sm:$0xff]  ;;  %v812_v62 = vld [vmem:[%s4007_s30 + $0x1040] sm:$0xff] }
 0x118   : > { %3545 = vmatpush3.msra.mxu1 %v780_v63  ;;  %3513 = vmatprep.subr.mxu0 %v762_v0  ;;  %v845_v63 = vld [vmem:[%s4007_s30 + $0x1148] sm:$0xff]  ;;  %v827_v0 = vld [vmem:[%s4007_s30 + $0x10b8] sm:$0xff] }
 0x119   : > { %3546 = vmatprep.subr.mxu1 %v795_v1  ;;  %3514 = vmatpush3.msra.mxu0 %v746_v2  ;;  %v860_v1 = vld [vmem:[%s4007_s30 + $0x11c0] sm:$0xff]  ;;  %v811_v2 = vld [vmem:[%s4007_s30 + $0x1038] sm:$0xff] }
 0x11a   : > { %3547 = vmatpush3.msra.mxu1 %v779_v3  ;;  %3515 = vmatprep.subr.mxu0 %v761_v4  ;;  %v844_v3 = vld [vmem:[%s4007_s30 + $0x1140] sm:$0xff]  ;;  %v826_v4 = vld [vmem:[%s4007_s30 + $0x10b0] sm:$0xff] }
 0x11b   : > { %3548 = vmatprep.subr.mxu1 %v794_v5  ;;  %3516 = vmatpush3.msra.mxu0 %v745_v6  ;;  %v859_v5 = vld [vmem:[%s4007_s30 + $0x11b8] sm:$0xff]  ;;  %v810_v6 = vld [vmem:[%s4007_s30 + $0x1030] sm:$0xff] }
 0x11c   : > { %3549 = vmatpush3.msra.mxu1 %v778_v7  ;;  %3517 = vmatprep.subr.mxu0 %v760_v8  ;;  %v843_v7 = vld [vmem:[%s4007_s30 + $0x1138] sm:$0xff]  ;;  %v825_v8 = vld [vmem:[%s4007_s30 + $0x10a8] sm:$0xff] }
 0x11d   : > { %3550 = vmatprep.subr.mxu1 %v793_v9  ;;  %3518 = vmatpush3.msra.mxu0 %v744_v10  ;;  %v858_v9 = vld [vmem:[%s4007_s30 + $0x11b0] sm:$0xff]  ;;  %v809_v10 = vld [vmem:[%s4007_s30 + $0x1028] sm:$0xff] }
 0x11e   : > { %3551 = vmatpush3.msra.mxu1 %v777_v11  ;;  %3519 = vmatprep.subr.mxu0 %v759_v12  ;;  %v842_v11 = vld [vmem:[%s4007_s30 + $0x1130] sm:$0xff]  ;;  %v824_v12 = vld [vmem:[%s4007_s30 + $0x10a0] sm:$0xff] }
 0x11f   : > { %3552 = vmatprep.subr.mxu1 %v792_v13  ;;  %3520 = vmatpush3.msra.mxu0 %v743_v14  ;;  %v857_v13 = vld [vmem:[%s4007_s30 + $0x11a8] sm:$0xff]  ;;  %v808_v14 = vld [vmem:[%s4007_s30 + $0x1020] sm:$0xff] }
 0x120   : > { %3553 = vmatpush3.msra.mxu1 %v776_v15  ;;  %3521 = vmatprep.subr.mxu0 %v758_v16  ;;  %v841_v15 = vld [vmem:[%s4007_s30 + $0x1128] sm:$0xff]  ;;  %v823_v16 = vld [vmem:[%s4007_s30 + $0x1098] sm:$0xff] }
 0x121   : > { %3554 = vmatprep.subr.mxu1 %v791_v17  ;;  %3522 = vmatpush3.msra.mxu0 %v742_v18  ;;  %v856_v17 = vld [vmem:[%s4007_s30 + $0x11a0] sm:$0xff]  ;;  %v807_v18 = vld [vmem:[%s4007_s30 + $0x1018] sm:$0xff] }
 0x122   : > { %3555 = vmatpush3.msra.mxu1 %v775_v19  ;;  %3523 = vmatprep.subr.mxu0 %v757_v20  ;;  %v840_v19 = vld [vmem:[%s4007_s30 + $0x1120] sm:$0xff]  ;;  %v822_v20 = vld [vmem:[%s4007_s30 + $0x1090] sm:$0xff] }
 0x123   : > { %3556 = vmatprep.subr.mxu1 %v790_v21  ;;  %3524 = vmatpush3.msra.mxu0 %v741_v22  ;;  %v855_v21 = vld [vmem:[%s4007_s30 + $0x1198] sm:$0xff]  ;;  %v806_v22 = vld [vmem:[%s4007_s30 + $0x1010] sm:$0xff] }
 0x124   : > { %3557 = vmatpush3.msra.mxu1 %v774_v23  ;;  %3525 = vmatprep.subr.mxu0 %v756_v24  ;;  %v839_v23 = vld [vmem:[%s4007_s30 + $0x1118] sm:$0xff]  ;;  %v821_v24 = vld [vmem:[%s4007_s30 + $0x1088] sm:$0xff] }
 0x125   : > { %3558 = vmatprep.subr.mxu1 %v789_v25  ;;  %3526 = vmatpush3.msra.mxu0 %v740_v26  ;;  %v854_v25 = vld [vmem:[%s4007_s30 + $0x1190] sm:$0xff]  ;;  %v805_v26 = vld [vmem:[%s4007_s30 + $0x1008] sm:$0xff] }
 0x126   : > { %2136 = vmatprep.mubr.f32.mxu0 %v271_v27  ;;  %3559 = vmatpush3.msra.mxu1 %v773_v28  ;;  %v838_v27 = vld [vmem:[%s4007_s30 + $0x1110] sm:$0xff]  ;;  %v820_v28 = vld [vmem:[%s4007_s30 + $0x1080] sm:$0xff] }
 0x127   : > { %2137 = vmatmul.mubr.f32.vlgmr.msra.gmra.mxu0 %v270_v29  ;;  %3560 = vmatprep.subr.mxu1 %v788_v30  ;;  %v853_v29 = vld [vmem:[%s4007_s30 + $0x1188] sm:$0xff]  ;;  %v804_v30 = vld [vmem:[%s4007_s30 + $0x1000] sm:$0xff] }
 0x128   : > { %3565 = vmatprep.subr.mxu0 %v835_v31  ;;  %3561 = vmatpush3.msra.mxu1 %v772_v32  ;;  %v275_v31 = vld [vmem:[%s4002_s26 + $0x108] sm:$0xff] }
 0x129   : > { %2206 = vmatprep.mubr.f32.mxu1 %v273_v33  ;;  %3566 = vmatpush3.msra.mxu0 %v819_v34  ;;  %v837_v32 = vld [vmem:[%s4007_s30 + $0x1108] sm:$0xff]  ;;  %v274_v33 = vld [vmem:[%s4002_s26 + $0x100] sm:$0xff] }
 0x12a   : > { %2207 = vmatmul.mubr.f32.vlgmr.msra.gmra.mxu1 %v272_v35  ;;  %3567 = vmatprep.subr.mxu0 %v834_v36  ;;  %v852_v34 = vld [vmem:[%s4007_s30 + $0x1180] sm:$0xff]  ;;  %v899_v35 = vld [vmem:[%s4007_s30 + $0x12f8] sm:$0xff] }
 0x12b   : > { %3600 = vmatprep.subr.mxu1 %v867_v37  ;;  %3568 = vmatpush3.msra.mxu0 %v818_v38  ;;  %v836_v36 = vld [vmem:[%s4007_s30 + $0x1100] sm:$0xff]  ;;  %v277_v37 = vld [vmem:[%s4002_s26 + $0x118] sm:$0xff] }
 0x12c   : > { %3601 = vmatpush3.msra.mxu1 %v851_v39  ;;  %3569 = vmatprep.subr.mxu0 %v833_v40  ;;  %v883_v38 = vld [vmem:[%s4007_s30 + $0x1278] sm:$0xff]  ;;  %v276_v39 = vld [vmem:[%s4002_s26 + $0x110] sm:$0xff] }
 0x12d   : > { %3602 = vmatprep.subr.mxu1 %v866_v41  ;;  %3570 = vmatpush3.msra.mxu0 %v817_v42  ;;  %v898_v40 = vld [vmem:[%s4007_s30 + $0x12f0] sm:$0xff]  ;;  %v931_v41 = vld [vmem:[%s4007_s30 + $0x13f8] sm:$0xff] }
 0x12e   : > { %3603 = vmatpush3.msra.mxu1 %v850_v43  ;;  %3571 = vmatprep.subr.mxu0 %v832_v44  ;;  %v882_v42 = vld [vmem:[%s4007_s30 + $0x1270] sm:$0xff]  ;;  %v915_v43 = vld [vmem:[%s4007_s30 + $0x1378] sm:$0xff]  ;;  %v897_v44 = vld [vmem:[%s4007_s30 + $0x12e8] sm:$0xff] }
 0x12f   : > { %3604 = vmatprep.subr.mxu1 %v865_v45  ;;  %3572 = vmatpush3.msra.mxu0 %v816_v46  ;;  %v930_v45 = vld [vmem:[%s4007_s30 + $0x13f0] sm:$0xff]  ;;  %v881_v46 = vld [vmem:[%s4007_s30 + $0x1268] sm:$0xff] }
 0x130   : > { %3605 = vmatpush3.msra.mxu1 %v849_v47  ;;  %3573 = vmatprep.subr.mxu0 %v831_v48  ;;  %v914_v47 = vld [vmem:[%s4007_s30 + $0x1370] sm:$0xff]  ;;  %v896_v48 = vld [vmem:[%s4007_s30 + $0x12e0] sm:$0xff] }
 0x131   : > { %3606 = vmatprep.subr.mxu1 %v864_v49  ;;  %3574 = vmatpush3.msra.mxu0 %v815_v50  ;;  %v929_v49 = vld [vmem:[%s4007_s30 + $0x13e8] sm:$0xff]  ;;  %v880_v50 = vld [vmem:[%s4007_s30 + $0x1260] sm:$0xff] }
 0x132   : > { %3607 = vmatpush3.msra.mxu1 %v848_v51  ;;  %3575 = vmatprep.subr.mxu0 %v830_v52  ;;  %v913_v51 = vld [vmem:[%s4007_s30 + $0x1368] sm:$0xff]  ;;  %v895_v52 = vld [vmem:[%s4007_s30 + $0x12d8] sm:$0xff] }
 0x133   : > { %3608 = vmatprep.subr.mxu1 %v863_v53  ;;  %3576 = vmatpush3.msra.mxu0 %v814_v54  ;;  %v928_v53 = vld [vmem:[%s4007_s30 + $0x13e0] sm:$0xff]  ;;  %v879_v54 = vld [vmem:[%s4007_s30 + $0x1258] sm:$0xff] }
 0x134   : > { %3609 = vmatpush3.msra.mxu1 %v847_v55  ;;  %3577 = vmatprep.subr.mxu0 %v829_v56  ;;  %v912_v55 = vld [vmem:[%s4007_s30 + $0x1360] sm:$0xff]  ;;  %v894_v56 = vld [vmem:[%s4007_s30 + $0x12d0] sm:$0xff] }
 0x135   : > { %3610 = vmatprep.subr.mxu1 %v862_v57  ;;  %3578 = vmatpush3.msra.mxu0 %v813_v58  ;;  %v927_v57 = vld [vmem:[%s4007_s30 + $0x13d8] sm:$0xff]  ;;  %v878_v58 = vld [vmem:[%s4007_s30 + $0x1250] sm:$0xff] }
 0x136   : > { %3611 = vmatpush3.msra.mxu1 %v846_v59  ;;  %3579 = vmatprep.subr.mxu0 %v828_v60  ;;  %v911_v59 = vld [vmem:[%s4007_s30 + $0x1358] sm:$0xff]  ;;  %v893_v60 = vld [vmem:[%s4007_s30 + $0x12c8] sm:$0xff] }
 0x137   : > { %3612 = vmatprep.subr.mxu1 %v861_v61  ;;  %3580 = vmatpush3.msra.mxu0 %v812_v62  ;;  %v926_v61 = vld [vmem:[%s4007_s30 + $0x13d0] sm:$0xff]  ;;  %v877_v62 = vld [vmem:[%s4007_s30 + $0x1248] sm:$0xff] }
 0x138   : > { %3613 = vmatpush3.msra.mxu1 %v845_v63  ;;  %3581 = vmatprep.subr.mxu0 %v827_v0  ;;  %v910_v63 = vld [vmem:[%s4007_s30 + $0x1350] sm:$0xff]  ;;  %v892_v0 = vld [vmem:[%s4007_s30 + $0x12c0] sm:$0xff] }
 0x139   : > { %3614 = vmatprep.subr.mxu1 %v860_v1  ;;  %3582 = vmatpush3.msra.mxu0 %v811_v2  ;;  %v925_v1 = vld [vmem:[%s4007_s30 + $0x13c8] sm:$0xff]  ;;  %v876_v2 = vld [vmem:[%s4007_s30 + $0x1240] sm:$0xff] }
 0x13a   : > { %3615 = vmatpush3.msra.mxu1 %v844_v3  ;;  %3583 = vmatprep.subr.mxu0 %v826_v4  ;;  %v909_v3 = vld [vmem:[%s4007_s30 + $0x1348] sm:$0xff]  ;;  %v891_v4 = vld [vmem:[%s4007_s30 + $0x12b8] sm:$0xff] }
 0x13b   : > { %3616 = vmatprep.subr.mxu1 %v859_v5  ;;  %3584 = vmatpush3.msra.mxu0 %v810_v6  ;;  %v924_v5 = vld [vmem:[%s4007_s30 + $0x13c0] sm:$0xff]  ;;  %v875_v6 = vld [vmem:[%s4007_s30 + $0x1238] sm:$0xff] }
 0x13c   : > { %3617 = vmatpush3.msra.mxu1 %v843_v7  ;;  %3585 = vmatprep.subr.mxu0 %v825_v8  ;;  %v908_v7 = vld [vmem:[%s4007_s30 + $0x1340] sm:$0xff]  ;;  %v890_v8 = vld [vmem:[%s4007_s30 + $0x12b0] sm:$0xff] }
 0x13d   : > { %3618 = vmatprep.subr.mxu1 %v858_v9  ;;  %3586 = vmatpush3.msra.mxu0 %v809_v10  ;;  %v923_v9 = vld [vmem:[%s4007_s30 + $0x13b8] sm:$0xff]  ;;  %v874_v10 = vld [vmem:[%s4007_s30 + $0x1230] sm:$0xff] }
 0x13e   : > { %3619 = vmatpush3.msra.mxu1 %v842_v11  ;;  %3587 = vmatprep.subr.mxu0 %v824_v12  ;;  %v907_v11 = vld [vmem:[%s4007_s30 + $0x1338] sm:$0xff]  ;;  %v889_v12 = vld [vmem:[%s4007_s30 + $0x12a8] sm:$0xff] }
 0x13f   : > { %3620 = vmatprep.subr.mxu1 %v857_v13  ;;  %3588 = vmatpush3.msra.mxu0 %v808_v14  ;;  %v922_v13 = vld [vmem:[%s4007_s30 + $0x13b0] sm:$0xff]  ;;  %v873_v14 = vld [vmem:[%s4007_s30 + $0x1228] sm:$0xff] }
 0x140   : > { %3621 = vmatpush3.msra.mxu1 %v841_v15  ;;  %3589 = vmatprep.subr.mxu0 %v823_v16  ;;  %v906_v15 = vld [vmem:[%s4007_s30 + $0x1330] sm:$0xff]  ;;  %v888_v16 = vld [vmem:[%s4007_s30 + $0x12a0] sm:$0xff] }
 0x141   : > { %3622 = vmatprep.subr.mxu1 %v856_v17  ;;  %3590 = vmatpush3.msra.mxu0 %v807_v18  ;;  %v921_v17 = vld [vmem:[%s4007_s30 + $0x13a8] sm:$0xff]  ;;  %v872_v18 = vld [vmem:[%s4007_s30 + $0x1220] sm:$0xff] }
 0x142   : > { %3623 = vmatpush3.msra.mxu1 %v840_v19  ;;  %3591 = vmatprep.subr.mxu0 %v822_v20  ;;  %v905_v19 = vld [vmem:[%s4007_s30 + $0x1328] sm:$0xff]  ;;  %v887_v20 = vld [vmem:[%s4007_s30 + $0x1298] sm:$0xff] }
 0x143   : > { %3624 = vmatprep.subr.mxu1 %v855_v21  ;;  %3592 = vmatpush3.msra.mxu0 %v806_v22  ;;  %v920_v21 = vld [vmem:[%s4007_s30 + $0x13a0] sm:$0xff]  ;;  %v871_v22 = vld [vmem:[%s4007_s30 + $0x1218] sm:$0xff] }
 0x144   : > { %3625 = vmatpush3.msra.mxu1 %v839_v23  ;;  %3593 = vmatprep.subr.mxu0 %v821_v24  ;;  %v904_v23 = vld [vmem:[%s4007_s30 + $0x1320] sm:$0xff]  ;;  %v886_v24 = vld [vmem:[%s4007_s30 + $0x1290] sm:$0xff] }
 0x145   : > { %3626 = vmatprep.subr.mxu1 %v854_v25  ;;  %3594 = vmatpush3.msra.mxu0 %v805_v26  ;;  %v919_v25 = vld [vmem:[%s4007_s30 + $0x1398] sm:$0xff]  ;;  %v870_v26 = vld [vmem:[%s4007_s30 + $0x1210] sm:$0xff] }
 0x146   : > { %3627 = vmatpush3.msra.mxu1 %v838_v27  ;;  %3595 = vmatprep.subr.mxu0 %v820_v28  ;;  %v903_v27 = vld [vmem:[%s4007_s30 + $0x1318] sm:$0xff]  ;;  %v885_v28 = vld [vmem:[%s4007_s30 + $0x1288] sm:$0xff] }
 0x147   : > { %3628 = vmatprep.subr.mxu1 %v853_v29  ;;  %3596 = vmatpush3.msra.mxu0 %v804_v30  ;;  %v918_v29 = vld [vmem:[%s4007_s30 + $0x1390] sm:$0xff]  ;;  %v869_v30 = vld [vmem:[%s4007_s30 + $0x1208] sm:$0xff] }
 0x148   : > { %2276 = vmatprep.mubr.f32.mxu0 %v275_v31  ;;  %3629 = vmatpush3.msra.mxu1 %v837_v32  ;;  %v902_v31 = vld [vmem:[%s4007_s30 + $0x1310] sm:$0xff]  ;;  %v884_v32 = vld [vmem:[%s4007_s30 + $0x1280] sm:$0xff] }
 0x149   : > { %2277 = vmatmul.mubr.f32.vlgmr.msra.gmra.mxu0 %v274_v33  ;;  %3630 = vmatprep.subr.mxu1 %v852_v34  ;;  %v917_v33 = vld [vmem:[%s4007_s30 + $0x1388] sm:$0xff]  ;;  %v868_v34 = vld [vmem:[%s4007_s30 + $0x1200] sm:$0xff] }
 0x14a   : > { %3635 = vmatprep.subr.mxu0 %v899_v35  ;;  %3631 = vmatpush3.msra.mxu1 %v836_v36  ;;  %v279_v35 = vld [vmem:[%s4002_s26 + $0x128] sm:$0xff] }
 0x14b   : > { %2346 = vmatprep.mubr.f32.mxu1 %v277_v37  ;;  %3636 = vmatpush3.msra.mxu0 %v883_v38  ;;  %v901_v36 = vld [vmem:[%s4007_s30 + $0x1308] sm:$0xff]  ;;  %v278_v37 = vld [vmem:[%s4002_s26 + $0x120] sm:$0xff] }
 0x14c   : > { %2347 = vmatmul.mubr.f32.vlgmr.msra.gmra.mxu1 %v276_v39  ;;  %3637 = vmatprep.subr.mxu0 %v898_v40  ;;  %v916_v38 = vld [vmem:[%s4007_s30 + $0x1380] sm:$0xff]  ;;  %v963_v39 = vld [vmem:[%s4007_s30 + $0x14f8] sm:$0xff] }
 0x14d   : > { %3670 = vmatprep.subr.mxu1 %v931_v41  ;;  %3638 = vmatpush3.msra.mxu0 %v882_v42  ;;  %v900_v40 = vld [vmem:[%s4007_s30 + $0x1300] sm:$0xff]  ;;  %v281_v41 = vld [vmem:[%s4002_s26 + $0x138] sm:$0xff] }
 0x14e   : > { %3671 = vmatpush3.msra.mxu1 %v915_v43  ;;  %3639 = vmatprep.subr.mxu0 %v897_v44  ;;  %v947_v42 = vld [vmem:[%s4007_s30 + $0x1478] sm:$0xff]  ;;  %v280_v43 = vld [vmem:[%s4002_s26 + $0x130] sm:$0xff] }
 0x14f   : > { %3672 = vmatprep.subr.mxu1 %v930_v45  ;;  %3640 = vmatpush3.msra.mxu0 %v881_v46  ;;  %v962_v44 = vld [vmem:[%s4007_s30 + $0x14f0] sm:$0xff]  ;;  %v995_v45 = vld [vmem:[%s4007_s30 + $0x15f8] sm:$0xff] }
 0x150   : > { %3673 = vmatpush3.msra.mxu1 %v914_v47  ;;  %3641 = vmatprep.subr.mxu0 %v896_v48  ;;  %v946_v46 = vld [vmem:[%s4007_s30 + $0x1470] sm:$0xff]  ;;  %v979_v47 = vld [vmem:[%s4007_s30 + $0x1578] sm:$0xff]  ;;  %v961_v48 = vld [vmem:[%s4007_s30 + $0x14e8] sm:$0xff] }
 0x151   : > { %3674 = vmatprep.subr.mxu1 %v929_v49  ;;  %3642 = vmatpush3.msra.mxu0 %v880_v50  ;;  %v994_v49 = vld [vmem:[%s4007_s30 + $0x15f0] sm:$0xff]  ;;  %v945_v50 = vld [vmem:[%s4007_s30 + $0x1468] sm:$0xff] }
 0x152   : > { %3675 = vmatpush3.msra.mxu1 %v913_v51  ;;  %3643 = vmatprep.subr.mxu0 %v895_v52  ;;  %v978_v51 = vld [vmem:[%s4007_s30 + $0x1570] sm:$0xff]  ;;  %v960_v52 = vld [vmem:[%s4007_s30 + $0x14e0] sm:$0xff] }
 0x153   : > { %3676 = vmatprep.subr.mxu1 %v928_v53  ;;  %3644 = vmatpush3.msra.mxu0 %v879_v54  ;;  %v993_v53 = vld [vmem:[%s4007_s30 + $0x15e8] sm:$0xff]  ;;  %v944_v54 = vld [vmem:[%s4007_s30 + $0x1460] sm:$0xff] }
 0x154   : > { %3677 = vmatpush3.msra.mxu1 %v912_v55  ;;  %3645 = vmatprep.subr.mxu0 %v894_v56  ;;  %v977_v55 = vld [vmem:[%s4007_s30 + $0x1568] sm:$0xff]  ;;  %v959_v56 = vld [vmem:[%s4007_s30 + $0x14d8] sm:$0xff] }
 0x155   : > { %3678 = vmatprep.subr.mxu1 %v927_v57  ;;  %3646 = vmatpush3.msra.mxu0 %v878_v58  ;;  %v992_v57 = vld [vmem:[%s4007_s30 + $0x15e0] sm:$0xff]  ;;  %v943_v58 = vld [vmem:[%s4007_s30 + $0x1458] sm:$0xff] }
 0x156   : > { %3679 = vmatpush3.msra.mxu1 %v911_v59  ;;  %3647 = vmatprep.subr.mxu0 %v893_v60  ;;  %v976_v59 = vld [vmem:[%s4007_s30 + $0x1560] sm:$0xff]  ;;  %v958_v60 = vld [vmem:[%s4007_s30 + $0x14d0] sm:$0xff] }
 0x157   : > { %3680 = vmatprep.subr.mxu1 %v926_v61  ;;  %3648 = vmatpush3.msra.mxu0 %v877_v62  ;;  %v991_v61 = vld [vmem:[%s4007_s30 + $0x15d8] sm:$0xff]  ;;  %v942_v62 = vld [vmem:[%s4007_s30 + $0x1450] sm:$0xff] }
 0x158   : > { %3681 = vmatpush3.msra.mxu1 %v910_v63  ;;  %3649 = vmatprep.subr.mxu0 %v892_v0  ;;  %v975_v63 = vld [vmem:[%s4007_s30 + $0x1558] sm:$0xff]  ;;  %v957_v0 = vld [vmem:[%s4007_s30 + $0x14c8] sm:$0xff] }
 0x159   : > { %3682 = vmatprep.subr.mxu1 %v925_v1  ;;  %3650 = vmatpush3.msra.mxu0 %v876_v2  ;;  %v990_v1 = vld [vmem:[%s4007_s30 + $0x15d0] sm:$0xff]  ;;  %v941_v2 = vld [vmem:[%s4007_s30 + $0x1448] sm:$0xff] }
 0x15a   : > { %3683 = vmatpush3.msra.mxu1 %v909_v3  ;;  %3651 = vmatprep.subr.mxu0 %v891_v4  ;;  %v974_v3 = vld [vmem:[%s4007_s30 + $0x1550] sm:$0xff]  ;;  %v956_v4 = vld [vmem:[%s4007_s30 + $0x14c0] sm:$0xff] }
 0x15b   : > { %3684 = vmatprep.subr.mxu1 %v924_v5  ;;  %3652 = vmatpush3.msra.mxu0 %v875_v6  ;;  %v989_v5 = vld [vmem:[%s4007_s30 + $0x15c8] sm:$0xff]  ;;  %v940_v6 = vld [vmem:[%s4007_s30 + $0x1440] sm:$0xff] }
 0x15c   : > { %3685 = vmatpush3.msra.mxu1 %v908_v7  ;;  %3653 = vmatprep.subr.mxu0 %v890_v8  ;;  %v973_v7 = vld [vmem:[%s4007_s30 + $0x1548] sm:$0xff]  ;;  %v955_v8 = vld [vmem:[%s4007_s30 + $0x14b8] sm:$0xff] }
 0x15d   : > { %3686 = vmatprep.subr.mxu1 %v923_v9  ;;  %3654 = vmatpush3.msra.mxu0 %v874_v10  ;;  %v988_v9 = vld [vmem:[%s4007_s30 + $0x15c0] sm:$0xff]  ;;  %v939_v10 = vld [vmem:[%s4007_s30 + $0x1438] sm:$0xff] }
 0x15e   : > { %3687 = vmatpush3.msra.mxu1 %v907_v11  ;;  %3655 = vmatprep.subr.mxu0 %v889_v12  ;;  %v972_v11 = vld [vmem:[%s4007_s30 + $0x1540] sm:$0xff]  ;;  %v954_v12 = vld [vmem:[%s4007_s30 + $0x14b0] sm:$0xff] }
 0x15f   : > { %3688 = vmatprep.subr.mxu1 %v922_v13  ;;  %3656 = vmatpush3.msra.mxu0 %v873_v14  ;;  %v987_v13 = vld [vmem:[%s4007_s30 + $0x15b8] sm:$0xff]  ;;  %v938_v14 = vld [vmem:[%s4007_s30 + $0x1430] sm:$0xff] }
 0x160   : > { %3689 = vmatpush3.msra.mxu1 %v906_v15  ;;  %3657 = vmatprep.subr.mxu0 %v888_v16  ;;  %v971_v15 = vld [vmem:[%s4007_s30 + $0x1538] sm:$0xff]  ;;  %v953_v16 = vld [vmem:[%s4007_s30 + $0x14a8] sm:$0xff] }
 0x161   : > { %3690 = vmatprep.subr.mxu1 %v921_v17  ;;  %3658 = vmatpush3.msra.mxu0 %v872_v18  ;;  %v986_v17 = vld [vmem:[%s4007_s30 + $0x15b0] sm:$0xff]  ;;  %v937_v18 = vld [vmem:[%s4007_s30 + $0x1428] sm:$0xff] }
 0x162   : > { %3691 = vmatpush3.msra.mxu1 %v905_v19  ;;  %3659 = vmatprep.subr.mxu0 %v887_v20  ;;  %v970_v19 = vld [vmem:[%s4007_s30 + $0x1530] sm:$0xff]  ;;  %v952_v20 = vld [vmem:[%s4007_s30 + $0x14a0] sm:$0xff] }
 0x163   : > { %3692 = vmatprep.subr.mxu1 %v920_v21  ;;  %3660 = vmatpush3.msra.mxu0 %v871_v22  ;;  %v985_v21 = vld [vmem:[%s4007_s30 + $0x15a8] sm:$0xff]  ;;  %v936_v22 = vld [vmem:[%s4007_s30 + $0x1420] sm:$0xff] }
 0x164   : > { %3693 = vmatpush3.msra.mxu1 %v904_v23  ;;  %3661 = vmatprep.subr.mxu0 %v886_v24  ;;  %v969_v23 = vld [vmem:[%s4007_s30 + $0x1528] sm:$0xff]  ;;  %v951_v24 = vld [vmem:[%s4007_s30 + $0x1498] sm:$0xff] }
 0x165   : > { %3694 = vmatprep.subr.mxu1 %v919_v25  ;;  %3662 = vmatpush3.msra.mxu0 %v870_v26  ;;  %v984_v25 = vld [vmem:[%s4007_s30 + $0x15a0] sm:$0xff]  ;;  %v935_v26 = vld [vmem:[%s4007_s30 + $0x1418] sm:$0xff] }
 0x166   : > { %3695 = vmatpush3.msra.mxu1 %v903_v27  ;;  %3663 = vmatprep.subr.mxu0 %v885_v28  ;;  %v968_v27 = vld [vmem:[%s4007_s30 + $0x1520] sm:$0xff]  ;;  %v950_v28 = vld [vmem:[%s4007_s30 + $0x1490] sm:$0xff] }
 0x167   : > { %3696 = vmatprep.subr.mxu1 %v918_v29  ;;  %3664 = vmatpush3.msra.mxu0 %v869_v30  ;;  %v983_v29 = vld [vmem:[%s4007_s30 + $0x1598] sm:$0xff]  ;;  %v934_v30 = vld [vmem:[%s4007_s30 + $0x1410] sm:$0xff] }
 0x168   : > { %3697 = vmatpush3.msra.mxu1 %v902_v31  ;;  %3665 = vmatprep.subr.mxu0 %v884_v32  ;;  %v967_v31 = vld [vmem:[%s4007_s30 + $0x1518] sm:$0xff]  ;;  %v949_v32 = vld [vmem:[%s4007_s30 + $0x1488] sm:$0xff] }
 0x169   : > { %3698 = vmatprep.subr.mxu1 %v917_v33  ;;  %3666 = vmatpush3.msra.mxu0 %v868_v34  ;;  %v982_v33 = vld [vmem:[%s4007_s30 + $0x1590] sm:$0xff]  ;;  %v933_v34 = vld [vmem:[%s4007_s30 + $0x1408] sm:$0xff] }
 0x16a   : > { %2416 = vmatprep.mubr.f32.mxu0 %v279_v35  ;;  %3699 = vmatpush3.msra.mxu1 %v901_v36  ;;  %v966_v35 = vld [vmem:[%s4007_s30 + $0x1510] sm:$0xff]  ;;  %v948_v36 = vld [vmem:[%s4007_s30 + $0x1480] sm:$0xff] }
 0x16b   : > { %2417 = vmatmul.mubr.f32.vlgmr.msra.gmra.mxu0 %v278_v37  ;;  %3700 = vmatprep.subr.mxu1 %v916_v38  ;;  %v981_v37 = vld [vmem:[%s4007_s30 + $0x1588] sm:$0xff]  ;;  %v932_v38 = vld [vmem:[%s4007_s30 + $0x1400] sm:$0xff] }
 0x16c   : > { %3705 = vmatprep.subr.mxu0 %v963_v39  ;;  %3701 = vmatpush3.msra.mxu1 %v900_v40  ;;  %v283_v39 = vld [vmem:[%s4002_s26 + $0x148] sm:$0xff] }
 0x16d   : > { %2486 = vmatprep.mubr.f32.mxu1 %v281_v41  ;;  %3706 = vmatpush3.msra.mxu0 %v947_v42  ;;  %v965_v40 = vld [vmem:[%s4007_s30 + $0x1508] sm:$0xff]  ;;  %v282_v41 = vld [vmem:[%s4002_s26 + $0x140] sm:$0xff] }
 0x16e   : > { %2487 = vmatmul.mubr.f32.vlgmr.msra.gmra.mxu1 %v280_v43  ;;  %3707 = vmatprep.subr.mxu0 %v962_v44  ;;  %v980_v42 = vld [vmem:[%s4007_s30 + $0x1580] sm:$0xff]  ;;  %v1027_v43 = vld [vmem:[%s4007_s30 + $0x16f8] sm:$0xff] }
 0x16f   : > { %3740 = vmatprep.subr.mxu1 %v995_v45  ;;  %3708 = vmatpush3.msra.mxu0 %v946_v46  ;;  %v964_v44 = vld [vmem:[%s4007_s30 + $0x1500] sm:$0xff]  ;;  %v285_v45 = vld [vmem:[%s4002_s26 + $0x158] sm:$0xff] }
 0x170   : > { %3741 = vmatpush3.msra.mxu1 %v979_v47  ;;  %3709 = vmatprep.subr.mxu0 %v961_v48  ;;  %v1011_v46 = vld [vmem:[%s4007_s30 + $0x1678] sm:$0xff]  ;;  %v284_v47 = vld [vmem:[%s4002_s26 + $0x150] sm:$0xff] }
 0x171   : > { %3742 = vmatprep.subr.mxu1 %v994_v49  ;;  %3710 = vmatpush3.msra.mxu0 %v945_v50  ;;  %v1026_v48 = vld [vmem:[%s4007_s30 + $0x16f0] sm:$0xff]  ;;  %v1059_v49 = vld [vmem:[%s4007_s30 + $0x17f8] sm:$0xff] }
 0x172   : > { %3743 = vmatpush3.msra.mxu1 %v978_v51  ;;  %3711 = vmatprep.subr.mxu0 %v960_v52  ;;  %v1010_v50 = vld [vmem:[%s4007_s30 + $0x1670] sm:$0xff]  ;;  %v1043_v51 = vld [vmem:[%s4007_s30 + $0x1778] sm:$0xff]  ;;  %v1025_v52 = vld [vmem:[%s4007_s30 + $0x16e8] sm:$0xff] }
 0x173   : > { %3744 = vmatprep.subr.mxu1 %v993_v53  ;;  %3712 = vmatpush3.msra.mxu0 %v944_v54  ;;  %v1058_v53 = vld [vmem:[%s4007_s30 + $0x17f0] sm:$0xff]  ;;  %v1009_v54 = vld [vmem:[%s4007_s30 + $0x1668] sm:$0xff] }
 0x174   : > { %3745 = vmatpush3.msra.mxu1 %v977_v55  ;;  %3713 = vmatprep.subr.mxu0 %v959_v56  ;;  %v1042_v55 = vld [vmem:[%s4007_s30 + $0x1770] sm:$0xff]  ;;  %v1024_v56 = vld [vmem:[%s4007_s30 + $0x16e0] sm:$0xff] }
 0x175   : > { %3746 = vmatprep.subr.mxu1 %v992_v57  ;;  %3714 = vmatpush3.msra.mxu0 %v943_v58  ;;  %v1057_v57 = vld [vmem:[%s4007_s30 + $0x17e8] sm:$0xff]  ;;  %v1008_v58 = vld [vmem:[%s4007_s30 + $0x1660] sm:$0xff] }
 0x176   : > { %3747 = vmatpush3.msra.mxu1 %v976_v59  ;;  %3715 = vmatprep.subr.mxu0 %v958_v60  ;;  %v1041_v59 = vld [vmem:[%s4007_s30 + $0x1768] sm:$0xff]  ;;  %v1023_v60 = vld [vmem:[%s4007_s30 + $0x16d8] sm:$0xff] }
 0x177   : > { %3748 = vmatprep.subr.mxu1 %v991_v61  ;;  %3716 = vmatpush3.msra.mxu0 %v942_v62  ;;  %v1056_v61 = vld [vmem:[%s4007_s30 + $0x17e0] sm:$0xff]  ;;  %v1007_v62 = vld [vmem:[%s4007_s30 + $0x1658] sm:$0xff] }
 0x178   : > { %3749 = vmatpush3.msra.mxu1 %v975_v63  ;;  %3717 = vmatprep.subr.mxu0 %v957_v0  ;;  %v1040_v63 = vld [vmem:[%s4007_s30 + $0x1760] sm:$0xff]  ;;  %v1022_v0 = vld [vmem:[%s4007_s30 + $0x16d0] sm:$0xff] }
 0x179   : > { %3750 = vmatprep.subr.mxu1 %v990_v1  ;;  %3718 = vmatpush3.msra.mxu0 %v941_v2  ;;  %v1055_v1 = vld [vmem:[%s4007_s30 + $0x17d8] sm:$0xff]  ;;  %v1006_v2 = vld [vmem:[%s4007_s30 + $0x1650] sm:$0xff] }
 0x17a   : > { %3751 = vmatpush3.msra.mxu1 %v974_v3  ;;  %3719 = vmatprep.subr.mxu0 %v956_v4  ;;  %v1039_v3 = vld [vmem:[%s4007_s30 + $0x1758] sm:$0xff]  ;;  %v1021_v4 = vld [vmem:[%s4007_s30 + $0x16c8] sm:$0xff] }
 0x17b   : > { %3752 = vmatprep.subr.mxu1 %v989_v5  ;;  %3720 = vmatpush3.msra.mxu0 %v940_v6  ;;  %v1054_v5 = vld [vmem:[%s4007_s30 + $0x17d0] sm:$0xff]  ;;  %v1005_v6 = vld [vmem:[%s4007_s30 + $0x1648] sm:$0xff] }
 0x17c   : > { %3753 = vmatpush3.msra.mxu1 %v973_v7  ;;  %3721 = vmatprep.subr.mxu0 %v955_v8  ;;  %v1038_v7 = vld [vmem:[%s4007_s30 + $0x1750] sm:$0xff]  ;;  %v1020_v8 = vld [vmem:[%s4007_s30 + $0x16c0] sm:$0xff] }
 0x17d   : > { %3754 = vmatprep.subr.mxu1 %v988_v9  ;;  %3722 = vmatpush3.msra.mxu0 %v939_v10  ;;  %v1053_v9 = vld [vmem:[%s4007_s30 + $0x17c8] sm:$0xff]  ;;  %v1004_v10 = vld [vmem:[%s4007_s30 + $0x1640] sm:$0xff] }
 0x17e   : > { %3755 = vmatpush3.msra.mxu1 %v972_v11  ;;  %3723 = vmatprep.subr.mxu0 %v954_v12  ;;  %v1037_v11 = vld [vmem:[%s4007_s30 + $0x1748] sm:$0xff]  ;;  %v1019_v12 = vld [vmem:[%s4007_s30 + $0x16b8] sm:$0xff] }
 0x17f   : > { %3756 = vmatprep.subr.mxu1 %v987_v13  ;;  %3724 = vmatpush3.msra.mxu0 %v938_v14  ;;  %v1052_v13 = vld [vmem:[%s4007_s30 + $0x17c0] sm:$0xff]  ;;  %v1003_v14 = vld [vmem:[%s4007_s30 + $0x1638] sm:$0xff] }
 0x180   : > { %3757 = vmatpush3.msra.mxu1 %v971_v15  ;;  %3725 = vmatprep.subr.mxu0 %v953_v16  ;;  %v1036_v15 = vld [vmem:[%s4007_s30 + $0x1740] sm:$0xff]  ;;  %v1018_v16 = vld [vmem:[%s4007_s30 + $0x16b0] sm:$0xff] }
 0x181   : > { %3758 = vmatprep.subr.mxu1 %v986_v17  ;;  %3726 = vmatpush3.msra.mxu0 %v937_v18  ;;  %v1051_v17 = vld [vmem:[%s4007_s30 + $0x17b8] sm:$0xff]  ;;  %v1002_v18 = vld [vmem:[%s4007_s30 + $0x1630] sm:$0xff] }
 0x182   : > { %3759 = vmatpush3.msra.mxu1 %v970_v19  ;;  %3727 = vmatprep.subr.mxu0 %v952_v20  ;;  %v1035_v19 = vld [vmem:[%s4007_s30 + $0x1738] sm:$0xff]  ;;  %v1017_v20 = vld [vmem:[%s4007_s30 + $0x16a8] sm:$0xff] }
 0x183   : > { %3760 = vmatprep.subr.mxu1 %v985_v21  ;;  %3728 = vmatpush3.msra.mxu0 %v936_v22  ;;  %v1050_v21 = vld [vmem:[%s4007_s30 + $0x17b0] sm:$0xff]  ;;  %v1001_v22 = vld [vmem:[%s4007_s30 + $0x1628] sm:$0xff] }
 0x184   : > { %3761 = vmatpush3.msra.mxu1 %v969_v23  ;;  %3729 = vmatprep.subr.mxu0 %v951_v24  ;;  %v1034_v23 = vld [vmem:[%s4007_s30 + $0x1730] sm:$0xff]  ;;  %v1016_v24 = vld [vmem:[%s4007_s30 + $0x16a0] sm:$0xff] }
 0x185   : > { %3762 = vmatprep.subr.mxu1 %v984_v25  ;;  %3730 = vmatpush3.msra.mxu0 %v935_v26  ;;  %v1049_v25 = vld [vmem:[%s4007_s30 + $0x17a8] sm:$0xff]  ;;  %v1000_v26 = vld [vmem:[%s4007_s30 + $0x1620] sm:$0xff] }
 0x186   : > { %3763 = vmatpush3.msra.mxu1 %v968_v27  ;;  %3731 = vmatprep.subr.mxu0 %v950_v28  ;;  %v1033_v27 = vld [vmem:[%s4007_s30 + $0x1728] sm:$0xff]  ;;  %v1015_v28 = vld [vmem:[%s4007_s30 + $0x1698] sm:$0xff] }
 0x187   : > { %3764 = vmatprep.subr.mxu1 %v983_v29  ;;  %3732 = vmatpush3.msra.mxu0 %v934_v30  ;;  %v1048_v29 = vld [vmem:[%s4007_s30 + $0x17a0] sm:$0xff]  ;;  %v999_v30 = vld [vmem:[%s4007_s30 + $0x1618] sm:$0xff] }
 0x188   : > { %3765 = vmatpush3.msra.mxu1 %v967_v31  ;;  %3733 = vmatprep.subr.mxu0 %v949_v32  ;;  %v1032_v31 = vld [vmem:[%s4007_s30 + $0x1720] sm:$0xff]  ;;  %v1014_v32 = vld [vmem:[%s4007_s30 + $0x1690] sm:$0xff] }
 0x189   : > { %3766 = vmatprep.subr.mxu1 %v982_v33  ;;  %3734 = vmatpush3.msra.mxu0 %v933_v34  ;;  %v1047_v33 = vld [vmem:[%s4007_s30 + $0x1798] sm:$0xff]  ;;  %v998_v34 = vld [vmem:[%s4007_s30 + $0x1610] sm:$0xff] }
 0x18a   : > { %3767 = vmatpush3.msra.mxu1 %v966_v35  ;;  %3735 = vmatprep.subr.mxu0 %v948_v36  ;;  %v1031_v35 = vld [vmem:[%s4007_s30 + $0x1718] sm:$0xff]  ;;  %v1013_v36 = vld [vmem:[%s4007_s30 + $0x1688] sm:$0xff] }
 0x18b   : > { %3768 = vmatprep.subr.mxu1 %v981_v37  ;;  %3736 = vmatpush3.msra.mxu0 %v932_v38  ;;  %v1046_v37 = vld [vmem:[%s4007_s30 + $0x1790] sm:$0xff]  ;;  %v997_v38 = vld [vmem:[%s4007_s30 + $0x1608] sm:$0xff] }
 0x18c   : > { %2556 = vmatprep.mubr.f32.mxu0 %v283_v39  ;;  %3769 = vmatpush3.msra.mxu1 %v965_v40  ;;  %v1030_v39 = vld [vmem:[%s4007_s30 + $0x1710] sm:$0xff]  ;;  %v1012_v40 = vld [vmem:[%s4007_s30 + $0x1680] sm:$0xff] }
 0x18d   : > { %2557 = vmatmul.mubr.f32.vlgmr.msra.gmra.mxu0 %v282_v41  ;;  %3770 = vmatprep.subr.mxu1 %v980_v42  ;;  %v1045_v41 = vld [vmem:[%s4007_s30 + $0x1788] sm:$0xff]  ;;  %v996_v42 = vld [vmem:[%s4007_s30 + $0x1600] sm:$0xff] }
 0x18e   : > { %3775 = vmatprep.subr.mxu0 %v1027_v43  ;;  %3771 = vmatpush3.msra.mxu1 %v964_v44  ;;  %v287_v43 = vld [vmem:[%s4002_s26 + $0x168] sm:$0xff] }
 0x18f   : > { %2626 = vmatprep.mubr.f32.mxu1 %v285_v45  ;;  %3776 = vmatpush3.msra.mxu0 %v1011_v46  ;;  %v1029_v44 = vld [vmem:[%s4007_s30 + $0x1708] sm:$0xff]  ;;  %v286_v45 = vld [vmem:[%s4002_s26 + $0x160] sm:$0xff] }
 0x190   : > { %2627 = vmatmul.mubr.f32.vlgmr.msra.gmra.mxu1 %v284_v47  ;;  %3777 = vmatprep.subr.mxu0 %v1026_v48  ;;  %v1044_v46 = vld [vmem:[%s4007_s30 + $0x1780] sm:$0xff]  ;;  %v1091_v47 = vld [vmem:[%s4007_s30 + $0x18f8] sm:$0xff] }
 0x191   : > { %3810 = vmatprep.subr.mxu1 %v1059_v49  ;;  %3778 = vmatpush3.msra.mxu0 %v1010_v50  ;;  %v1028_v48 = vld [vmem:[%s4007_s30 + $0x1700] sm:$0xff]  ;;  %v289_v49 = vld [vmem:[%s4002_s26 + $0x178] sm:$0xff] }
 0x192   : > { %3811 = vmatpush3.msra.mxu1 %v1043_v51  ;;  %3779 = vmatprep.subr.mxu0 %v1025_v52  ;;  %v1075_v50 = vld [vmem:[%s4007_s30 + $0x1878] sm:$0xff]  ;;  %v288_v51 = vld [vmem:[%s4002_s26 + $0x170] sm:$0xff] }
 0x193   : > { %3812 = vmatprep.subr.mxu1 %v1058_v53  ;;  %3780 = vmatpush3.msra.mxu0 %v1009_v54  ;;  %v1090_v52 = vld [vmem:[%s4007_s30 + $0x18f0] sm:$0xff]  ;;  %v291_v53 = vld [vmem:[%s4002_s26 + $0x188] sm:$0xff] }
 0x194   : > { %3813 = vmatpush3.msra.mxu1 %v1042_v55  ;;  %3781 = vmatprep.subr.mxu0 %v1024_v56  ;;  %v1074_v54 = vld [vmem:[%s4007_s30 + $0x1870] sm:$0xff]  ;;  %v1089_v55 = vld [vmem:[%s4007_s30 + $0x18e8] sm:$0xff] }
 0x195   : > { %3814 = vmatprep.subr.mxu1 %v1057_v57  ;;  %3782 = vmatpush3.msra.mxu0 %v1008_v58  ;;  %v1073_v56 = vld [vmem:[%s4007_s30 + $0x1868] sm:$0xff]  ;;  %v1088_v57 = vld [vmem:[%s4007_s30 + $0x18e0] sm:$0xff] }
 0x196   : > { %3815 = vmatpush3.msra.mxu1 %v1041_v59  ;;  %3783 = vmatprep.subr.mxu0 %v1023_v60  ;;  %v1072_v58 = vld [vmem:[%s4007_s30 + $0x1860] sm:$0xff]  ;;  %v1087_v59 = vld [vmem:[%s4007_s30 + $0x18d8] sm:$0xff] }
 0x197   : > { %3816 = vmatprep.subr.mxu1 %v1056_v61  ;;  %3784 = vmatpush3.msra.mxu0 %v1007_v62  ;;  %v1071_v60 = vld [vmem:[%s4007_s30 + $0x1858] sm:$0xff]  ;;  %v1086_v61 = vld [vmem:[%s4007_s30 + $0x18d0] sm:$0xff] }
 0x198   : > { %3817 = vmatpush3.msra.mxu1 %v1040_v63  ;;  %3785 = vmatprep.subr.mxu0 %v1022_v0  ;;  %v1070_v62 = vld [vmem:[%s4007_s30 + $0x1850] sm:$0xff]  ;;  %v1085_v63 = vld [vmem:[%s4007_s30 + $0x18c8] sm:$0xff] }
 0x199   : > { %3818 = vmatprep.subr.mxu1 %v1055_v1  ;;  %3786 = vmatpush3.msra.mxu0 %v1006_v2  ;;  %v1069_v0 = vld [vmem:[%s4007_s30 + $0x1848] sm:$0xff]  ;;  %v1084_v1 = vld [vmem:[%s4007_s30 + $0x18c0] sm:$0xff] }
 0x19a   : > { %3819 = vmatpush3.msra.mxu1 %v1039_v3  ;;  %3787 = vmatprep.subr.mxu0 %v1021_v4  ;;  %v1068_v2 = vld [vmem:[%s4007_s30 + $0x1840] sm:$0xff]  ;;  %v1083_v3 = vld [vmem:[%s4007_s30 + $0x18b8] sm:$0xff] }
 0x19b   : > { %3820 = vmatprep.subr.mxu1 %v1054_v5  ;;  %3788 = vmatpush3.msra.mxu0 %v1005_v6  ;;  %v1067_v4 = vld [vmem:[%s4007_s30 + $0x1838] sm:$0xff]  ;;  %v1082_v5 = vld [vmem:[%s4007_s30 + $0x18b0] sm:$0xff] }
 0x19c   : > { %3821 = vmatpush3.msra.mxu1 %v1038_v7  ;;  %3789 = vmatprep.subr.mxu0 %v1020_v8  ;;  %v1066_v6 = vld [vmem:[%s4007_s30 + $0x1830] sm:$0xff]  ;;  %v1081_v7 = vld [vmem:[%s4007_s30 + $0x18a8] sm:$0xff] }
 0x19d   : > { %3822 = vmatprep.subr.mxu1 %v1053_v9  ;;  %3790 = vmatpush3.msra.mxu0 %v1004_v10  ;;  %v1065_v8 = vld [vmem:[%s4007_s30 + $0x1828] sm:$0xff]  ;;  %v1080_v9 = vld [vmem:[%s4007_s30 + $0x18a0] sm:$0xff] }
 0x19e   : > { %3823 = vmatpush3.msra.mxu1 %v1037_v11  ;;  %3791 = vmatprep.subr.mxu0 %v1019_v12  ;;  %v1064_v10 = vld [vmem:[%s4007_s30 + $0x1820] sm:$0xff]  ;;  %v1079_v11 = vld [vmem:[%s4007_s30 + $0x1898] sm:$0xff] }
 0x19f   : > { %3824 = vmatprep.subr.mxu1 %v1052_v13  ;;  %3792 = vmatpush3.msra.mxu0 %v1003_v14  ;;  %v1063_v12 = vld [vmem:[%s4007_s30 + $0x1818] sm:$0xff]  ;;  %v1078_v13 = vld [vmem:[%s4007_s30 + $0x1890] sm:$0xff] }
 0x1a0   : > { %3825 = vmatpush3.msra.mxu1 %v1036_v15  ;;  %3793 = vmatprep.subr.mxu0 %v1018_v16  ;;  %v1062_v14 = vld [vmem:[%s4007_s30 + $0x1810] sm:$0xff]  ;;  %v1077_v15 = vld [vmem:[%s4007_s30 + $0x1888] sm:$0xff] }
 0x1a1   : > { %3826 = vmatprep.subr.mxu1 %v1051_v17  ;;  %3794 = vmatpush3.msra.mxu0 %v1002_v18  ;;  %v1061_v16 = vld [vmem:[%s4007_s30 + $0x1808] sm:$0xff]  ;;  %v1076_v17 = vld [vmem:[%s4007_s30 + $0x1880] sm:$0xff] }
 0x1a2   : > { %3827 = vmatpush3.msra.mxu1 %v1035_v19  ;;  %3795 = vmatprep.subr.mxu0 %v1017_v20  ;;  %v1060_v18 = vld [vmem:[%s4007_s30 + $0x1800] sm:$0xff]  ;;  %v3037_v20 = vpop.f32.mrf.mxu0 }
 0x1a3   : > { %3828 = vmatprep.subr.mxu1 %v1050_v21  ;;  %3796 = vmatpush3.msra.mxu0 %v1001_v22  ;;  %v290_v19 = vld [vmem:[%s4002_s26 + $0x180] sm:$0xff]  ;;  %v3072_v21 = vpop.f32.mrf.mxu1 }
 0x1a4   : > { %3829 = vmatpush3.msra.mxu1 %v1034_v23  ;;  %3797 = vmatprep.subr.mxu0 %v1016_v24  ;;  %v3038_v22 = vpop.f32.mrf.mxu0 }
 0x1a5   : > { %3830 = vmatprep.subr.mxu1 %v1049_v25  ;;  %3798 = vmatpush3.msra.mxu0 %v1000_v26  ;;  %v3073_v24 = vpop.f32.mrf.mxu1 }
 0x1a6   : > { %3831 = vmatpush3.msra.mxu1 %v1033_v27  ;;  %3799 = vmatprep.subr.mxu0 %v1015_v28  ;;  %v3107_v23 = vpop.f32.mrf.mxu0  ;;  %v3039_v27 = vadd.f32 %v3038_v22, %v3037_v20  ;;  %v3074_v28 = vadd.f32 %v3073_v24, %v3072_v21 }
 0x1a7   : > { %3832 = vmatprep.subr.mxu1 %v1048_v29  ;;  %3800 = vmatpush3.msra.mxu0 %v999_v30  ;;  %v3142_v26 = vpop.f32.mrf.mxu1 }
 0x1a8   : > { %3833 = vmatpush3.msra.mxu1 %v1032_v31  ;;  %3801 = vmatprep.subr.mxu0 %v1014_v32  ;;  %v3108_v25 = vpop.f32.mrf.mxu0  ;;  %v1229_v32 = vadd.f32 %v3074_v28, %v3039_v27 }
 0x1a9   : > { %3834 = vmatprep.subr.mxu1 %v1047_v33  ;;  %3802 = vmatpush3.msra.mxu0 %v998_v34  ;;  %v3109_v30 = vadd.f32 %v3108_v25, %v3107_v23  ;;  %v3143_v31 = vpop.f32.mrf.mxu1 }
 0x1aa   : > { %3835 = vmatpush3.msra.mxu1 %v1031_v35  ;;  %3803 = vmatprep.subr.mxu0 %v1013_v36  ;;  %v3177_v29 = vpop.f32.mrf.mxu0  ;;  %v3144_v36 = vadd.f32 %v3143_v31, %v3142_v26 }
 0x1ab   : > { %3836 = vmatprep.subr.mxu1 %v1046_v37  ;;  %3804 = vmatpush3.msra.mxu0 %v997_v38  ;;  %v3212_v34 = vpop.f32.mrf.mxu1  ;;  %v1299_v35 = vadd.f32 %v3109_v30, %v1229_v32 }
 0x1ac   : > { %3837 = vmatpush3.msra.mxu1 %v1030_v39  ;;  %3805 = vmatprep.subr.mxu0 %v1012_v40  ;;  %v3178_v33 = vpop.f32.mrf.mxu0 }
 0x1ad   : > { %3838 = vmatprep.subr.mxu1 %v1045_v41  ;;  %3806 = vmatpush3.msra.mxu0 %v996_v42  ;;  %v3179_v38 = vadd.f32 %v3178_v33, %v3177_v29  ;;  %v3213_v39 = vpop.f32.mrf.mxu1  ;;  %v1369_v40 = vadd.f32 %v3144_v36, %v1299_v35 }
 0x1ae   : > { %2696 = vmatprep.mubr.f32.mxu0 %v287_v43  ;;  %3839 = vmatpush3.msra.mxu1 %v1029_v44  ;;  %v3247_v37 = vpop.f32.mrf.mxu0  ;;  %v3214_v44 = vadd.f32 %v3213_v39, %v3212_v34 }
 0x1af   : > { %2697 = vmatmul.mubr.f32.vlgmr.msra.gmra.mxu0 %v286_v45  ;;  %3840 = vmatprep.subr.mxu1 %v1044_v46  ;;  %v3282_v42 = vpop.f32.mrf.mxu1  ;;  %v1439_v43 = vadd.f32 %v3179_v38, %v1369_v40 }
 0x1b0   : > { %3845 = vmatprep.subr.mxu0 %v1091_v47  ;;  %3841 = vmatpush3.msra.mxu1 %v1028_v48  ;;  %v3248_v41 = vpop.f32.mrf.mxu0 }
 0x1b1   : > { %2766 = vmatprep.mubr.f32.mxu1 %v289_v49  ;;  %3846 = vmatpush3.msra.mxu0 %v1075_v50  ;;  %v3249_v46 = vadd.f32 %v3248_v41, %v3247_v37  ;;  %v3283_v47 = vpop.f32.mrf.mxu1  ;;  %v1509_v48 = vadd.f32 %v3214_v44, %v1439_v43 }
 0x1b2   : > { %2767 = vmatmul.mubr.f32.vlgmr.msra.gmra.mxu1 %v288_v51  ;;  %3847 = vmatprep.subr.mxu0 %v1090_v52  ;;  %v3317_v45 = vpop.f32.mrf.mxu0  ;;  %v3284_v52 = vadd.f32 %v3283_v47, %v3282_v42 }
 0x1b3   : > { %2836 = vmatprep.mubr.f32.mxu0 %v291_v53  ;;  %3848 = vmatpush3.msra.mxu0 %v1074_v54  ;;  %v3352_v50 = vpop.f32.mrf.mxu1  ;;  %v1579_v51 = vadd.f32 %v3249_v46, %v1509_v48 }
 0x1b4   : > { %3849 = vmatprep.subr.mxu0 %v1089_v55  ;;  %v3318_v49 = vpop.f32.mrf.mxu0 }
 0x1b5   : > { %3850 = vmatpush3.msra.mxu0 %v1073_v56  ;;  %v3319_v54 = vadd.f32 %v3318_v49, %v3317_v45  ;;  %v3353_v55 = vpop.f32.mrf.mxu1  ;;  %v1649_v56 = vadd.f32 %v3284_v52, %v1579_v51 }
 0x1b6   : > { %3851 = vmatprep.subr.mxu0 %v1088_v57  ;;  %v3387_v53 = vpop.f32.mrf.mxu0 }
 0x1b7   : > { %3852 = vmatpush3.msra.mxu0 %v1072_v58  ;;  %v3422_v58 = vpop.f32.mrf.mxu1 }
 0x1b8   : > { %3853 = vmatprep.subr.mxu0 %v1087_v59  ;;  %v3388_v57 = vpop.f32.mrf.mxu0  ;;  %v1719_v59 = vadd.f32 %v3319_v54, %v1649_v56  ;;  %v241_v54 = vld [vmem:[#allocation2] sm:$0xff] }
 0x1b9   : > { %3854 = vmatpush3.msra.mxu0 %v1071_v60  ;;  %v3354_v60 = vadd.f32 %v3353_v55, %v3352_v50 }
 0x1ba   : > { %3855 = vmatprep.subr.mxu0 %v1086_v61 }
 0x1bb   : > { %3856 = vmatpush3.msra.mxu0 %v1070_v62  ;;  %v3389_v62 = vadd.f32 %v3388_v57, %v3387_v53 }
 0x1bc   : > { %3857 = vmatprep.subr.mxu0 %v1085_v63  ;;  %v3423_v63 = vpop.f32.mrf.mxu1 }
 0x1bd   : > { %3858 = vmatpush3.msra.mxu0 %v1069_v0  ;;  %v1789_v0 = vadd.f32 %v3354_v60, %v1719_v59 }
 0x1be   : > { %3859 = vmatprep.subr.mxu0 %v1084_v1 }
 0x1bf   : > { %3860 = vmatpush3.msra.mxu0 %v1068_v2 }
 0x1c0   : > { %3861 = vmatprep.subr.mxu0 %v1083_v3  ;;  %v1859_v3 = vadd.f32 %v3389_v62, %v1789_v0 }
 0x1c1   : > { %3862 = vmatpush3.msra.mxu0 %v1067_v4  ;;  %v3424_v4 = vadd.f32 %v3423_v63, %v3422_v58 }
 0x1c2   : > { %3863 = vmatprep.subr.mxu0 %v1082_v5 }
 0x1c3   : > { %3864 = vmatpush3.msra.mxu0 %v1066_v6 }
 0x1c4   : > { %3865 = vmatprep.subr.mxu0 %v1081_v7 }
 0x1c5   : > { %3866 = vmatpush3.msra.mxu0 %v1065_v8  ;;  %v3457_v61 = vpop.f32.mrf.mxu0  ;;  %v1929_v8 = vadd.f32 %v3424_v4, %v1859_v3 }
 0x1c6   : > { %3867 = vmatprep.subr.mxu0 %v1080_v9 }
 0x1c7   : > { %3868 = vmatpush3.msra.mxu0 %v1064_v10  ;;  %v3458_v1 = vpop.f32.mrf.mxu0 }
 0x1c8   : > { %3869 = vmatprep.subr.mxu0 %v1079_v11  ;;  %v3492_v2 = vpop.f32.mrf.mxu1  ;;  %v3459_v6 = vadd.f32 %v3458_v1, %v3457_v61 }
 0x1c9   : > { %3870 = vmatpush3.msra.mxu0 %v1063_v12 }
 0x1ca   : > { %3871 = vmatprep.subr.mxu0 %v1078_v13  ;;  %v3493_v7 = vpop.f32.mrf.mxu1  ;;  %v1999_v11 = vadd.f32 %v3459_v6, %v1929_v8 }
 0x1cb   : > { %3872 = vmatpush3.msra.mxu0 %v1062_v14  ;;  %v3494_v12 = vadd.f32 %v3493_v7, %v3492_v2 }
 0x1cc   : > { %3873 = vmatprep.subr.mxu0 %v1077_v15 }
 0x1cd   : > { %3874 = vmatpush3.msra.mxu0 %v1061_v16  ;;  %v2069_v16 = vadd.f32 %v3494_v12, %v1999_v11 }
 0x1ce   : > { %3875 = vmatprep.subr.mxu0 %v1076_v17 }
 0x1cf   : > { %3876 = vmatpush3.msra.mxu0 %v1060_v18 }
 0x1d0   : > { %2837 = vmatmul.mubr.f32.vlgmr.msra.gmra.mxu0 %v290_v19 }
 0x1e7   : > { %v3527_v5 = vpop.f32.mrf.mxu0 }
 0x1e9   : > { %v3528_v9 = vpop.f32.mrf.mxu0 }
 0x1ea   : > { %v3562_v10 = vpop.f32.mrf.mxu1  ;;  %v3529_v14 = vadd.f32 %v3528_v9, %v3527_v5 }
 0x1ec   : > { %v3563_v15 = vpop.f32.mrf.mxu1  ;;  %v2139_v19 = vadd.f32 %v3529_v14, %v2069_v16 }
 0x1ed   : > { %v3564_v20 = vadd.f32 %v3563_v15, %v3562_v10 }
 0x1ef   : > { %v2209_v24 = vadd.f32 %v3564_v20, %v2139_v19 }
 0x209   : > { %v3597_v13 = vpop.f32.mrf.mxu0 }
 0x20b   : > { %v3598_v17 = vpop.f32.mrf.mxu0 }
 0x20c   : > { %v3632_v18 = vpop.f32.mrf.mxu1  ;;  %v3599_v22 = vadd.f32 %v3598_v17, %v3597_v13 }
 0x20e   : > { %v3633_v23 = vpop.f32.mrf.mxu1  ;;  %v2279_v27 = vadd.f32 %v3599_v22, %v2209_v24 }
 0x20f   : > { %v3634_v28 = vadd.f32 %v3633_v23, %v3632_v18 }
 0x211   : > { %v2349_v32 = vadd.f32 %v3634_v28, %v2279_v27 }
 0x22b   : > { %v3667_v21 = vpop.f32.mrf.mxu0 }
 0x22d   : > { %v3668_v25 = vpop.f32.mrf.mxu0 }
 0x22e   : > { %v3702_v26 = vpop.f32.mrf.mxu1  ;;  %v3669_v30 = vadd.f32 %v3668_v25, %v3667_v21 }
 0x230   : > { %v3703_v31 = vpop.f32.mrf.mxu1  ;;  %v2419_v35 = vadd.f32 %v3669_v30, %v2349_v32 }
 0x231   : > { %v3704_v36 = vadd.f32 %v3703_v31, %v3702_v26 }
 0x233   : > { %v2489_v40 = vadd.f32 %v3704_v36, %v2419_v35 }
 0x24d   : > { %v3737_v29 = vpop.f32.mrf.mxu0 }
 0x24f   : > { %v3738_v33 = vpop.f32.mrf.mxu0 }
 0x250   : > { %v3772_v34 = vpop.f32.mrf.mxu1  ;;  %v3739_v38 = vadd.f32 %v3738_v33, %v3737_v29 }
 0x252   : > { %v3773_v39 = vpop.f32.mrf.mxu1  ;;  %v2559_v43 = vadd.f32 %v3739_v38, %v2489_v40 }
 0x253   : > { %v3774_v44 = vadd.f32 %v3773_v39, %v3772_v34 }
 0x255   : > { %v2629_v47 = vadd.f32 %v3774_v44, %v2559_v43 }
 0x26f   : > { %v3807_v37 = vpop.f32.mrf.mxu0 }
 0x271   : > { %v3808_v41 = vpop.f32.mrf.mxu0 }
 0x272   : > { %v3842_v42 = vpop.f32.mrf.mxu1  ;;  %v3809_v45 = vadd.f32 %v3808_v41, %v3807_v37 }
 0x274   : > { %v3843_v46 = vpop.f32.mrf.mxu1  ;;  %v2699_v48 = vadd.f32 %v3809_v45, %v2629_v47 }
 0x275   : > { %v3844_v49 = vadd.f32 %v3843_v46, %v3842_v42 }
 0x277   : > { %v2769_v52 = vadd.f32 %v3844_v49, %v2699_v48 }
 0x290   : > { %v3877_v50 = vpop.f32.mrf.mxu0 }
 0x292   : > { %v3878_v51 = vpop.f32.mrf.mxu0 }
 0x293   : > { %v3879_v53 = vadd.f32 %v3878_v51, %v3877_v50 }
 0x295   : > { %v2839_v55 = vadd.f32 %v3879_v53, %v2769_v52  ;;  %2847 = sbr.rel (%p3000_p6) target bundleno = 895 (0x37f), region = 48 }
 0x297   : > { %v2842_v56 = vadd.f32 %v2839_v55, %v241_v54 }
 0x299   : > { %2843 = vst [vmem:[#allocation2] sm:$0xff] %v2842_v56 }
 0x29a   : > { %v2873_v57 = vld [vmem:[%s4921_s3 + $0x78] sm:$0xff]  ;;  %v3952_v58 = vmov 0.0   ;;  %v2872_v59 = vld [vmem:[%s4921_s3 + $0x70] sm:$0xff]  ;;  %vm3953_vm0 = vmmov 0   ;;  %v2871_v60 = vld [vmem:[%s4921_s3 + $0x68] sm:$0xff]  ;;  %vm2951_vm1 = vcmask 7168  }
 0x29b   : > { %3897 = vmatprep.subr.mxu0 %v3952_v58  ;;  %3929 = vmatprep.mubr.msk.f32.mxu0 %vm3953_vm0, %v3952_v58  ;;  %v2870_v61 = vld [vmem:[%s4921_s3 + $0x60] sm:$0xff]  ;;  %v2869_v62 = vld [vmem:[%s4921_s3 + $0x58] sm:$0xff]  ;;  %v2868_v63 = vld [vmem:[%s4921_s3 + $0x50] sm:$0xff] }
 0x29c   : > { %3898 = vmatpush3.msra.mxu0 %v2873_v57  ;;  %v2867_v0 = vld [vmem:[%s4921_s3 + $0x48] sm:$0xff]  ;;  %v2866_v1 = vld [vmem:[%s4921_s3 + $0x40] sm:$0xff]  ;;  %v2865_v2 = vld [vmem:[%s4921_s3 + $0x38] sm:$0xff] }
 0x29d   : > { %3899 = vmatprep.subr.mxu0 %v3952_v58  ;;  %v2864_v3 = vld [vmem:[%s4921_s3 + $0x30] sm:$0xff]  ;;  %v2863_v4 = vld [vmem:[%s4921_s3 + $0x28] sm:$0xff]  ;;  %v2862_v5 = vld [vmem:[%s4921_s3 + $0x20] sm:$0xff] }
 0x29e   : > { %3900 = vmatpush3.msra.mxu0 %v2872_v59  ;;  %v3001_v7 = vld [vmem:[%s4920_s2] ss:$0 sm:$0xff]  ;;  %v2861_v8 = vld [vmem:[%s4921_s3 + $0x18] sm:$0xff]  ;;  %v2860_v9 = vld [vmem:[%s4921_s3 + $0x10] sm:$0xff] }
 0x29f   : > { %3901 = vmatprep.subr.mxu0 %v3952_v58  ;;  %v2859_v11 = vld [vmem:[%s4921_s3 + $0x8] sm:$0xff]  ;;  %v2858_v12 = vld [vmem:[%s4921_s3] sm:$0xff] }
 0x2a0   : > { %3902 = vmatpush3.msra.mxu0 %v2871_v60  ;;  %v2848_v6 = vld [vmem:[#allocation2] sm:$0xff]  ;;  %v3002_v14 = vld [vmem:[#allocation3] ss:$0 sm:$0xff] }
 0x2a1   : > { %3903 = vmatprep.subr.mxu0 %v3952_v58  ;;  %v2856_v10 = vadd.f32 %v3001_v7, %v2848_v6 }
 0x2a2   : > { %3904 = vmatpush3.msra.mxu0 %v2870_v61 }
 0x2a3   : > { %3905 = vmatprep.subr.mxu0 %v3952_v58  ;;  %v2857_v13 = vmax.f32 %v2856_v10, 0.0 }
 0x2a4   : > { %3906 = vmatpush3.msra.mxu0 %v2869_v62 }
 0x2a5   : > { %3907 = vmatprep.subr.mxu0 %v3952_v58 }
 0x2a6   : > { %3908 = vmatpush3.msra.mxu0 %v2868_v63 }
 0x2a7   : > { %3909 = vmatprep.subr.mxu0 %v3952_v58 }
 0x2a8   : > { %3910 = vmatpush3.msra.mxu0 %v2867_v0 }
 0x2a9   : > { %3911 = vmatprep.subr.mxu0 %v3952_v58 }
 0x2aa   : > { %3912 = vmatpush3.msra.mxu0 %v2866_v1 }
 0x2ab   : > { %3913 = vmatprep.subr.mxu0 %v3952_v58 }
 0x2ac   : > { %3914 = vmatpush3.msra.mxu0 %v2865_v2 }
 0x2ad   : > { %3915 = vmatprep.subr.mxu0 %v3952_v58 }
 0x2ae   : > { %3916 = vmatpush3.msra.mxu0 %v2864_v3 }
 0x2af   : > { %3917 = vmatprep.subr.mxu0 %v3952_v58 }
 0x2b0   : > { %3918 = vmatpush3.msra.mxu0 %v2863_v4 }
 0x2b1   : > { %3919 = vmatprep.subr.mxu0 %v3952_v58 }
 0x2b2   : > { %3920 = vmatpush3.msra.mxu0 %v2862_v5 }
 0x2b3   : > { %3921 = vmatprep.subr.mxu0 %v3952_v58 }
 0x2b4   : > { %3922 = vmatpush3.msra.mxu0 %v2861_v8 }
 0x2b5   : > { %3923 = vmatprep.subr.mxu0 %v3952_v58 }
 0x2b6   : > { %3924 = vmatpush3.msra.mxu0 %v2860_v9 }
 0x2b7   : > { %3925 = vmatprep.subr.mxu0 %v3952_v58 }
 0x2b8   : > { %3926 = vmatpush3.msra.mxu0 %v2859_v11 }
 0x2b9   : > { %3927 = vmatprep.subr.mxu0 %v3952_v58 }
 0x2ba   : > { %3928 = vmatpush3.msra.mxu0 %v2858_v12 }
 0x2bb   : > { %3930 = vmatmul.mubr.f32.vlgmr.msra.gmra.mxu0 %v2857_v13 }
 0x37b   : > { %v2947_v15 = vpop.f32.mrf.mxu0 }
 0x37c   : > { %v2948_v16 = vadd.f32 %v3002_v14, %v2947_v15 }
 0x37d   : > { %v3931_v17 = vpop.f32.mrf.mxu0 }
 0x37e   : > { %2952 = vst.msk [vmem:[%s4923_s5] sm:$0xff] %vm2951_vm1, %v2948_v16 }
 0x37f PF: > { %s17_s20 = sadd.s32 1, %s3949_s20  }
 0x380   : > { %p14_p7 = scmp.ge.s32.totalorder %s17_s20, 11  }
 0x382   :  { %16 = sbr.rel (!%p14_p7) target bundleno = 3 (0x3), region = 77 }

</bundles_post_ra>
